<compile_context>
chip_gen: v7x
topology: tpu7x:2x2x1
jax: 0.10.0
libtpu: 0.0.40
codegen_flags: <defaults>
</compile_context>

<pallas_src>
import functools

import jax
import jax.numpy as jnp
from jax.experimental import pallas as pl
from jax.experimental.pallas import tpu as pltpu

EPS = 1e-5


def _round_up(x, m):
    return ((x + m - 1) // m) * m


# --------------------------------------------------------------------------
# In-kernel helpers
# --------------------------------------------------------------------------

def _col_mask(M, Ws, Wo):
    """(M, 1) bool mask: (row_index mod Ws) < Wo, built from an in-kernel iota.

    Uses exact f32 floor-division (M < 2**24 and the gap to the next integer is
    >= 1/Ws >> ulp), avoiding vector integer div/mod.
    """
    m = jax.lax.broadcasted_iota(jnp.int32, (M, 1), 0).astype(jnp.float32)
    col = m - jnp.floor(m / Ws) * Ws
    return col < Wo


def _stats_masked(acc, Ws, Wo):
    """Single-pass BN partials (sum, sum of squares); junk columns zeroed (select)."""
    accm = jnp.where(_col_mask(acc.shape[0], Ws, Wo), acc, 0.0)
    s0 = jnp.sum(accm, axis=0, keepdims=True)
    s1 = jnp.sum(accm * accm, axis=0, keepdims=True)
    return jnp.concatenate([s0, s1], axis=0)                 # (2, Cpad) f32


def _conv_accumulate(load, w_ref, groups, Ws, M):
    """Shifted-GEMM conv: one bf16 MXU matmul per tap group, f32 accumulation.

    Taps inside a group are stacked along the contraction dim (K-fusion): a
    group of 3 taps runs as a single (M, 3*C) x (3*C, Cpad) matmul.
    """
    acc = None
    for g, taps in enumerate(groups):
        parts = [load(p, oi * Ws + oj, M) for (p, oi, oj) in taps]
        lhs = parts[0] if len(parts) == 1 else jnp.concatenate(parts, axis=-1)
        part = jnp.dot(lhs, w_ref[g], preferred_element_type=jnp.float32)
        acc = part if acc is None else acc + part
    return acc                                               # (M, Cpad) f32


# --------------------------------------------------------------------------
# Pallas kernels
# --------------------------------------------------------------------------

def conv1_kernel(xs_ref, w1_ref, y1_ref, st1_ref, *, groups, Ho, Wo, Ws):
    """conv1 for one image: shifted bf16 GEMMs -> raw bf16 output (single aligned
    full-block store) plus BN1 partial statistics."""
    M = Ho * Ws

    def load(p, start, m):
        return xs_ref[0, p, pl.ds(start, m), :]              # already bf16

    acc = _conv_accumulate(load, w1_ref, groups, Ws, M)
    st1_ref[0] = _stats_masked(acc, Ws, Wo)
    y1_ref[0] = acc.astype(y1_ref.dtype)


def conv1_proj_kernel(xs_ref, w1_ref, wsc_ref, y1_ref, st1_ref, sc_ref, stsc_ref,
                      *, groups, sc_tap, Ho, Wo, Ws):
    """conv1 + fused 1x1 projection shortcut (shares the single HBM read of x)."""
    M = Ho * Ws

    def load(p, start, m):
        return xs_ref[0, p, pl.ds(start, m), :]

    acc = _conv_accumulate(load, w1_ref, groups, Ws, M)
    st1_ref[0] = _stats_masked(acc, Ws, Wo)
    y1_ref[0] = acc.astype(y1_ref.dtype)

    p, oi, oj = sc_tap
    sc = jnp.dot(load(p, oi * Ws + oj, M), wsc_ref[...],
                 preferred_element_type=jnp.float32)
    stsc_ref[0] = _stats_masked(sc, Ws, Wo)
    sc_ref[0] = sc.astype(sc_ref.dtype)


def conv2_kernel(y1_ref, s1_ref, b1_ref, w2_ref, y2_ref, st2_ref, ybn_ref,
                 *, groups, Ho, Wo, Ws, store_off):
    """Applies BN1 (global affine) + ReLU + zero padding on the fly into a bf16
    VMEM slab, then conv2 as K-fused shifted bf16 GEMMs; emits the raw bf16
    conv2 output plus BN2 partial statistics."""
    S2, Cpad = ybn_ref.shape
    M = Ho * Ws
    lead = store_off - (Ws + 1)

    # Zero only the small halo head/tail of the padded slab (not the whole slab).
    ybn_ref[pl.ds(0, store_off), :] = jnp.zeros((store_off, Cpad), ybn_ref.dtype)
    tail = S2 - store_off - M
    ybn_ref[pl.ds(store_off + M, tail), :] = jnp.zeros((tail, Cpad), ybn_ref.dtype)

    # BN1 affine + ReLU; junk columns -> 0 via select (this also supplies the
    # left/right zero-padding columns of the slab).  Stored bf16, aligned offset.
    y1 = y1_ref[0].astype(jnp.float32)
    ybn = jnp.maximum(y1 * s1_ref[...] + b1_ref[...], 0.0)
    ybn = jnp.where(_col_mask(M, Ws, Wo), ybn, 0.0)
    ybn_ref[pl.ds(store_off, M), :] = ybn.astype(ybn_ref.dtype)

    def load(p, start, m):
        del p
        return ybn_ref[pl.ds(lead + start, m), :]            # bf16

    acc = _conv_accumulate(load, w2_ref, groups, Ws, M)
    st2_ref[0] = _stats_masked(acc, Ws, Wo)
    y2_ref[0] = acc.astype(y2_ref.dtype)


def finalize_id_kernel(y2_ref, s2_ref, b2_ref, x_ref, o_ref):
    # BN2 affine + identity shortcut + ReLU
    y = y2_ref[0].astype(jnp.float32) * s2_ref[...] + b2_ref[...]
    o_ref[0] = jnp.maximum(y + x_ref[0].astype(jnp.float32), 0.0)


def finalize_proj_kernel(y2_ref, s2_ref, b2_ref, sc_ref, ssc_ref, bsc_ref, o_ref):
    # BN2 affine + (1x1-conv shortcut -> BN_sc affine) + ReLU
    y = y2_ref[0].astype(jnp.float32) * s2_ref[...] + b2_ref[...]
    sc = sc_ref[0].astype(jnp.float32) * ssc_ref[...] + bsc_ref[...]
    o_ref[0] = jnp.maximum(y + sc, 0.0)


# --------------------------------------------------------------------------
# Wrapper-side layout helpers (cheap, ~1x the activation bytes)
# --------------------------------------------------------------------------

def _tap_groups(s, group):
    """3x3 taps (parity, row-off, col-off) in row-major order, grouped for K-fusion."""
    taps = [((di % s) * s + (dj % s), di // s, dj // s)
            for di in range(3) for dj in range(3)]
    return tuple(tuple(taps[g * group:(g + 1) * group]) for g in range(9 // group))


def _sc_tap(s):
    # 1x1 shortcut conv (stride s, no padding) as a single tap.
    return ((1 % s) * s + (1 % s), 1 // s, 1 // s)


def _parity_slabs(x_nhwc, s, Hs, Ws):
    """Zero-pad x and split it into s*s strided 'parity' slabs, flattened so every
    conv tap becomes a contiguous unit-stride row slice inside the kernel."""
    N, H, W, C = x_nhwc.shape
    xp = jnp.pad(x_nhwc, ((0, 0), (1, s * Hs - H - 1), (1, s * Ws - W - 1), (0, 0)))
    xp = xp.reshape(N, Hs, s, Ws, s, C)
    xp = jnp.transpose(xp, (0, 2, 4, 1, 3, 5))               # (N, s, s, Hs, Ws, C)
    return xp.reshape(N, s * s, Hs * Ws, C)


def _prep_w3x3(w_oihw, cin_pad, cout_pad, group):
    """(Cout,Cin,3,3) -> (9/group, group*cin_pad, cout_pad) bf16, tap-row-major."""
    co, ci, kh, kw = w_oihw.shape
    w = jnp.transpose(w_oihw, (2, 3, 1, 0))                  # (3,3,ci,co)
    w = jnp.pad(w, ((0, 0), (0, 0), (0, cin_pad - ci), (0, cout_pad - co)))
    w = w.reshape(kh * kw, cin_pad, cout_pad)
    w = w.reshape((kh * kw) // group, group * cin_pad, cout_pad)
    return w.astype(jnp.bfloat16)


def _prep_w1x1(w_oihw, cout_pad):
    co, ci = w_oihw.shape[:2]
    w = jnp.transpose(w_oihw.reshape(co, ci), (1, 0))
    w = jnp.pad(w, ((0, 0), (0, cout_pad - co)))
    return w.astype(jnp.bfloat16)


def _bn_affine(stats, gamma, beta, count, cpad):
    """Reduce per-image partials -> global (mean, var) -> per-channel scale/shift."""
    tot = jnp.sum(stats, axis=0)                              # (2, Cpad)
    mean = tot[0] / count
    var = tot[1] / count - mean * mean                        # single-pass E[x^2]-E[x]^2
    g = jnp.pad(gamma.astype(jnp.float32), (0, cpad - gamma.shape[0]))
    b = jnp.pad(beta.astype(jnp.float32), (0, cpad - beta.shape[0]))
    scale = g * jax.lax.rsqrt(var + EPS)
    shift = b - mean * scale
    return scale.reshape(1, cpad), shift.reshape(1, cpad)


# --------------------------------------------------------------------------
# Forward pass
# --------------------------------------------------------------------------

@functools.partial(jax.jit, static_argnames=("stride",))
def basic_block_forward(x_nchw, params, stride=1):
    N, Cin, H, W = x_nchw.shape
    Cout = params["w1"].shape[0]
    Cpad = _round_up(Cout, 128)            # lane-dense output channel axis
    s = stride
    proj = "wsc" in params

    Ho = (H + 2 - 3) // s + 1
    Wo = (W + 2 - 3) // s + 1
    Ws = Wo + 2                            # unified row period for all slabs/outputs
    M = Ho * Ws
    Hs1 = Ho + 2 // s + 1                  # parity-slab rows (covers all tap shifts)
    lead = (-(Ws + 1)) % 16                # sublane-align conv2's interior scratch store
    store_off = lead + Ws + 1
    S2 = _round_up(store_off + M + Ws + 1, 16)   # conv2 zero-padded slab length
    count = N * Ho * Wo

    x = jnp.transpose(x_nchw, (0, 2, 3, 1)).astype(jnp.bfloat16)   # NCHW -> NHWC bf16
    xs = _parity_slabs(x, s, Hs1, Ws)      # (N, s*s, Hs1*Ws, Cin) bf16

    g1 = 3 if Cin % 128 == 0 else 1        # K-fuse conv1 taps only when lane-aligned
    w1 = _prep_w3x3(params["w1"], Cin, Cpad, g1)      # resident bf16
    w2 = _prep_w3x3(params["w2"], Cpad, Cpad, 3)      # resident bf16, K = 3*Cpad

    cparams = pltpu.CompilerParams(
        dimension_semantics=("parallel",),
        vmem_limit_bytes=48 * 1024 * 1024,
    )

    xs_spec = pl.BlockSpec((1, s * s, Hs1 * Ws, Cin), lambda n: (n, 0, 0, 0))
    w1_spec = pl.BlockSpec(w1.shape, lambda n: (0, 0, 0))
    w2_spec = pl.BlockSpec(w2.shape, lambda n: (0, 0, 0))
    row_spec = pl.BlockSpec((1, M, Cpad), lambda n: (n, 0, 0))
    st_spec = pl.BlockSpec((1, 2, Cpad), lambda n: (n, 0, 0))
    vec_spec = pl.BlockSpec((1, Cpad), lambda n: (0, 0))

    row_bf16 = jax.ShapeDtypeStruct((N, M, Cpad), jnp.bfloat16)
    st_f32 = jax.ShapeDtypeStruct((N, 2, Cpad), jnp.float32)

    # ---- conv1 (+ fused 1x1 projection): raw bf16 outputs + BN partial stats ----
    if proj:
        wsc = _prep_w1x1(params["wsc"], Cpad)
        y1_raw, st1, sc_raw, stsc = pl.pallas_call(
            functools.partial(conv1_proj_kernel, groups=_tap_groups(s, g1),
                              sc_tap=_sc_tap(s), Ho=Ho, Wo=Wo, Ws=Ws),
            grid=(N,),
            in_specs=[xs_spec, w1_spec, pl.BlockSpec(wsc.shape, lambda n: (0, 0))],
            out_specs=(row_spec, st_spec, row_spec, st_spec),
            out_shape=(row_bf16, st_f32, row_bf16, st_f32),
            compiler_params=cparams,
        )(xs, w1, wsc)
    else:
        y1_raw, st1 = pl.pallas_call(
            functools.partial(conv1_kernel, groups=_tap_groups(s, g1),
                              Ho=Ho, Wo=Wo, Ws=Ws),
            grid=(N,),
            in_specs=[xs_spec, w1_spec],
            out_specs=(row_spec, st_spec),
            out_shape=(row_bf16, st_f32),
            compiler_params=cparams,
        )(xs, w1)

    scale1, shift1 = _bn_affine(st1, params["g1"], params["b1"], count, Cpad)

    # ---- conv2 (BN1 + ReLU + zero padding applied on the fly) ----
    y2_raw, st2 = pl.pallas_call(
        functools.partial(conv2_kernel, groups=_tap_groups(1, 3),
                          Ho=Ho, Wo=Wo, Ws=Ws, store_off=store_off),
        grid=(N,),
        in_specs=[row_spec, vec_spec, vec_spec, w2_spec],
        out_specs=(row_spec, st_spec),
        out_shape=(row_bf16, st_f32),
        scratch_shapes=[pltpu.VMEM((S2, Cpad), jnp.bfloat16)],
        compiler_params=cparams,
    )(y1_raw, scale1, shift1, w2)

    scale2, shift2 = _bn_affine(st2, params["g2"], params["b2"], count, Cpad)

    # ---- finalize: BN2 + shortcut (+BN_sc) + residual add + ReLU ----
    fin_shape = jax.ShapeDtypeStruct((N, M, Cpad), jnp.float32)
    if proj:
        scale_sc, shift_sc = _bn_affine(stsc, params["gsc"], params["bsc"],
                                        count, Cpad)
        out = pl.pallas_call(
            finalize_proj_kernel,
            grid=(N,),
            in_specs=[row_spec, vec_spec, vec_spec, row_spec, vec_spec, vec_spec],
            out_specs=row_spec,
            out_shape=fin_shape,
            compiler_params=cparams,
        )(y2_raw, scale2, shift2, sc_raw, scale_sc, shift_sc)
    else:
        x_id = jnp.pad(x, ((0, 0), (0, 0), (0, Ws - Wo), (0, Cpad - Cin)))
        x_id = x_id.reshape(N, M, Cpad)
        out = pl.pallas_call(
            finalize_id_kernel,
            grid=(N,),
            in_specs=[row_spec, vec_spec, vec_spec, row_spec],
            out_specs=row_spec,
            out_shape=fin_shape,
            compiler_params=cparams,
        )(y2_raw, scale2, shift2, x_id)

    out = out.reshape(N, Ho, Ws, Cpad)[:, :, :Wo, :Cout]      # drop junk cols / pad ch
    return jnp.transpose(out, (0, 3, 1, 2))                   # NHWC -> NCHW


# --------------------------------------------------------------------------
# Pure-JAX reference (validation only)
# --------------------------------------------------------------------------

def ref_basic_block(x, params, stride):
    hi = jax.lax.Precision.HIGHEST

    def conv(x, w, s, pad):
        return jax.lax.conv_general_dilated(
            x, w, (s, s), [(pad, pad), (pad, pad)],
            dimension_numbers=("NCHW", "OIHW", "NCHW"), precision=hi)

    def bn(y, g, b):
        m = jnp.mean(y, axis=(0, 2, 3), keepdims=True)
        v = jnp.mean((y - m) ** 2, axis=(0, 2, 3), keepdims=True)
        return ((y - m) * jax.lax.rsqrt(v + EPS) * g.reshape(1, -1, 1, 1)
                + b.reshape(1, -1, 1, 1))

    r = jnp.maximum(bn(conv(x, params["w1"], stride, 1), params["g1"], params["b1"]),
                    0.0)
    r = bn(conv(r, params["w2"], 1, 1), params["g2"], params["b2"])
    if "wsc" in params:
        sc = bn(conv(x, params["wsc"], stride, 0), params["gsc"], params["bsc"])
    else:
        sc = x
    return jnp.maximum(r + sc, 0.0)


# --------------------------------------------------------------------------
# Test
# --------------------------------------------------------------------------

if __name__ == "__main__":
    def make_params(key, cin, cout, stride):
        k1, k2, k3 = jax.random.split(key, 3)
        p = {
            "w1": jax.random.normal(k1, (cout, cin, 3, 3), jnp.float32) * 0.2,
            "g1": jnp.full((cout,), 1.1, jnp.float32),
            "b1": jnp.full((cout,), 0.05, jnp.float32),
            "w2": jax.random.normal(k2, (cout, cout, 3, 3), jnp.float32) * 0.2,
            "g2": jnp.full((cout,), 0.9, jnp.float32),
            "b2": jnp.full((cout,), -0.02, jnp.float32),
        }
        if stride != 1 or cin != cout:
            p.update({
                "wsc": jax.random.normal(k3, (cout, cin, 1, 1), jnp.float32) * 0.2,
                "gsc": jnp.ones((cout,), jnp.float32),
                "bsc": jnp.zeros((cout,), jnp.float32),
            })
        return p

    key = jax.random.PRNGKey(0)
    # (in_channels, out_channels, stride): projection, identity, strided projection.
    for cin, cout, stride in [(4, 8, 1), (8, 8, 1), (4, 8, 2)]:
        key, kx, kp = jax.random.split(key, 3)
        x = jax.random.normal(kx, (2, cin, 16, 16), jnp.float32)
        params = make_params(kp, cin, cout, stride)

        out = jax.block_until_ready(basic_block_forward(x, params, stride=stride))
        ref = ref_basic_block(x, params, stride)

        assert out.shape == ref.shape, (out.shape, ref.shape)
        err = float(jnp.max(jnp.abs(out - ref)))
        assert jnp.allclose(out, ref, atol=4e-2, rtol=4e-2), (cin, cout, stride, err)

    print("KERNEL_OK")
</pallas_src>

<mosaic_0001>
module attributes {stable_mosaic.version = 11 : i64} {
  func.func @conv1_proj_kernel(%arg0: i32, %arg1: memref<1x1x342x4xbf16, #tpu.memory_space<vmem>>, %arg2: memref<9x4x128xbf16, #tpu.memory_space<vmem>>, %arg3: memref<4x128xbf16, #tpu.memory_space<vmem>>, %arg4: memref<1x288x128xbf16, #tpu.memory_space<vmem>>, %arg5: memref<1x2x128xf32, #tpu.memory_space<vmem>>, %arg6: memref<1x288x128xbf16, #tpu.memory_space<vmem>>, %arg7: memref<1x2x128xf32, #tpu.memory_space<vmem>>) attributes {dimension_semantics = [#tpu.dimension_semantics<parallel>], iteration_bounds = array<i64: 2>, scalar_prefetch = 0 : i64, scratch_operands = 0 : i64, tpu.core_type = #tpu.core_type<tc>, window_params = [{transform_indices = @transform_0, window_bounds = array<i64: 1, 1, 342, 4>}, {pipeline_mode = #tpu.pipeline_mode<synchronous>, transform_indices = @transform_1, window_bounds = array<i64: 9, 4, 128>}, {pipeline_mode = #tpu.pipeline_mode<synchronous>, transform_indices = @transform_2, window_bounds = array<i64: 4, 128>}, {transform_indices = @transform_3, window_bounds = array<i64: 1, 288, 128>}, {transform_indices = @transform_4, window_bounds = array<i64: 1, 2, 128>}, {transform_indices = @transform_5, window_bounds = array<i64: 1, 288, 128>}, {transform_indices = @transform_6, window_bounds = array<i64: 1, 2, 128>}]} {
    %c0 = arith.constant 0 : index
    %c0_0 = arith.constant 0 : index
    %c0_1 = arith.constant 0 : index
    %c0_2 = arith.constant 0 : index
    %0 = vector.load %arg1[%c0, %c0_0, %c0_1, %c0_2] : memref<1x1x342x4xbf16, #tpu.memory_space<vmem>>, vector<1x1x288x4xbf16>
    %1 = vector.shape_cast %0 : vector<1x1x288x4xbf16> to vector<288x4xbf16>
    %c0_3 = arith.constant 0 : index
    %c0_4 = arith.constant 0 : index
    %c0_5 = arith.constant 0 : index
    %2 = vector.load %arg2[%c0_3, %c0_4, %c0_5] : memref<9x4x128xbf16, #tpu.memory_space<vmem>>, vector<1x4x128xbf16>
    %3 = vector.shape_cast %2 : vector<1x4x128xbf16> to vector<4x128xbf16>
    %cst = arith.constant dense<0.000000e+00> : vector<288x128xf32>
    %4 = tpu.matmul %1, %3, %cst {dimension_numbers = #tpu.dot_dimension_numbers<[1], [0], [0], [1], [0, 0, 1, 1], [], []>} : vector<288x4xbf16>, vector<4x128xbf16>, vector<288x128xf32> -> vector<288x128xf32>
    %c0_6 = arith.constant 0 : index
    %c0_7 = arith.constant 0 : index
    %c1 = arith.constant 1 : index
    %c0_8 = arith.constant 0 : index
    %5 = vector.load %arg1[%c0_6, %c0_7, %c1, %c0_8] : memref<1x1x342x4xbf16, #tpu.memory_space<vmem>>, vector<1x1x288x4xbf16>
    %6 = vector.shape_cast %5 : vector<1x1x288x4xbf16> to vector<288x4xbf16>
    %c1_9 = arith.constant 1 : index
    %c0_10 = arith.constant 0 : index
    %c0_11 = arith.constant 0 : index
    %7 = vector.load %arg2[%c1_9, %c0_10, %c0_11] : memref<9x4x128xbf16, #tpu.memory_space<vmem>>, vector<1x4x128xbf16>
    %8 = vector.shape_cast %7 : vector<1x4x128xbf16> to vector<4x128xbf16>
    %cst_12 = arith.constant dense<0.000000e+00> : vector<288x128xf32>
    %9 = tpu.matmul %6, %8, %cst_12 {dimension_numbers = #tpu.dot_dimension_numbers<[1], [0], [0], [1], [0, 0, 1, 1], [], []>} : vector<288x4xbf16>, vector<4x128xbf16>, vector<288x128xf32> -> vector<288x128xf32>
    %10 = arith.addf %4, %9 : vector<288x128xf32>
    %c0_13 = arith.constant 0 : index
    %c0_14 = arith.constant 0 : index
    %c2 = arith.constant 2 : index
    %c0_15 = arith.constant 0 : index
    %11 = vector.load %arg1[%c0_13, %c0_14, %c2, %c0_15] : memref<1x1x342x4xbf16, #tpu.memory_space<vmem>>, vector<1x1x288x4xbf16>
    %12 = vector.shape_cast %11 : vector<1x1x288x4xbf16> to vector<288x4xbf16>
    %c2_16 = arith.constant 2 : index
    %c0_17 = arith.constant 0 : index
    %c0_18 = arith.constant 0 : index
    %13 = vector.load %arg2[%c2_16, %c0_17, %c0_18] : memref<9x4x128xbf16, #tpu.memory_space<vmem>>, vector<1x4x128xbf16>
    %14 = vector.shape_cast %13 : vector<1x4x128xbf16> to vector<4x128xbf16>
    %cst_19 = arith.constant dense<0.000000e+00> : vector<288x128xf32>
    %15 = tpu.matmul %12, %14, %cst_19 {dimension_numbers = #tpu.dot_dimension_numbers<[1], [0], [0], [1], [0, 0, 1, 1], [], []>} : vector<288x4xbf16>, vector<4x128xbf16>, vector<288x128xf32> -> vector<288x128xf32>
    %16 = arith.addf %10, %15 : vector<288x128xf32>
    %c0_20 = arith.constant 0 : index
    %c0_21 = arith.constant 0 : index
    %c18 = arith.constant 18 : index
    %c0_22 = arith.constant 0 : index
    %17 = vector.load %arg1[%c0_20, %c0_21, %c18, %c0_22] : memref<1x1x342x4xbf16, #tpu.memory_space<vmem>>, vector<1x1x288x4xbf16>
    %18 = vector.shape_cast %17 : vector<1x1x288x4xbf16> to vector<288x4xbf16>
    %c3 = arith.constant 3 : index
    %c0_23 = arith.constant 0 : index
    %c0_24 = arith.constant 0 : index
    %19 = vector.load %arg2[%c3, %c0_23, %c0_24] : memref<9x4x128xbf16, #tpu.memory_space<vmem>>, vector<1x4x128xbf16>
    %20 = vector.shape_cast %19 : vector<1x4x128xbf16> to vector<4x128xbf16>
    %cst_25 = arith.constant dense<0.000000e+00> : vector<288x128xf32>
    %21 = tpu.matmul %18, %20, %cst_25 {dimension_numbers = #tpu.dot_dimension_numbers<[1], [0], [0], [1], [0, 0, 1, 1], [], []>} : vector<288x4xbf16>, vector<4x128xbf16>, vector<288x128xf32> -> vector<288x128xf32>
    %22 = arith.addf %16, %21 : vector<288x128xf32>
    %c0_26 = arith.constant 0 : index
    %c0_27 = arith.constant 0 : index
    %c19 = arith.constant 19 : index
    %c0_28 = arith.constant 0 : index
    %23 = vector.load %arg1[%c0_26, %c0_27, %c19, %c0_28] : memref<1x1x342x4xbf16, #tpu.memory_space<vmem>>, vector<1x1x288x4xbf16>
    %24 = vector.shape_cast %23 : vector<1x1x288x4xbf16> to vector<288x4xbf16>
    %c4 = arith.constant 4 : index
    %c0_29 = arith.constant 0 : index
    %c0_30 = arith.constant 0 : index
    %25 = vector.load %arg2[%c4, %c0_29, %c0_30] : memref<9x4x128xbf16, #tpu.memory_space<vmem>>, vector<1x4x128xbf16>
    %26 = vector.shape_cast %25 : vector<1x4x128xbf16> to vector<4x128xbf16>
    %cst_31 = arith.constant dense<0.000000e+00> : vector<288x128xf32>
    %27 = tpu.matmul %24, %26, %cst_31 {dimension_numbers = #tpu.dot_dimension_numbers<[1], [0], [0], [1], [0, 0, 1, 1], [], []>} : vector<288x4xbf16>, vector<4x128xbf16>, vector<288x128xf32> -> vector<288x128xf32>
    %28 = arith.addf %22, %27 : vector<288x128xf32>
    %c0_32 = arith.constant 0 : index
    %c0_33 = arith.constant 0 : index
    %c20 = arith.constant 20 : index
    %c0_34 = arith.constant 0 : index
    %29 = vector.load %arg1[%c0_32, %c0_33, %c20, %c0_34] : memref<1x1x342x4xbf16, #tpu.memory_space<vmem>>, vector<1x1x288x4xbf16>
    %30 = vector.shape_cast %29 : vector<1x1x288x4xbf16> to vector<288x4xbf16>
    %c5 = arith.constant 5 : index
    %c0_35 = arith.constant 0 : index
    %c0_36 = arith.constant 0 : index
    %31 = vector.load %arg2[%c5, %c0_35, %c0_36] : memref<9x4x128xbf16, #tpu.memory_space<vmem>>, vector<1x4x128xbf16>
    %32 = vector.shape_cast %31 : vector<1x4x128xbf16> to vector<4x128xbf16>
    %cst_37 = arith.constant dense<0.000000e+00> : vector<288x128xf32>
    %33 = tpu.matmul %30, %32, %cst_37 {dimension_numbers = #tpu.dot_dimension_numbers<[1], [0], [0], [1], [0, 0, 1, 1], [], []>} : vector<288x4xbf16>, vector<4x128xbf16>, vector<288x128xf32> -> vector<288x128xf32>
    %34 = arith.addf %28, %33 : vector<288x128xf32>
    %c0_38 = arith.constant 0 : index
    %c0_39 = arith.constant 0 : index
    %c36 = arith.constant 36 : index
    %c0_40 = arith.constant 0 : index
    %35 = vector.load %arg1[%c0_38, %c0_39, %c36, %c0_40] : memref<1x1x342x4xbf16, #tpu.memory_space<vmem>>, vector<1x1x288x4xbf16>
    %36 = vector.shape_cast %35 : vector<1x1x288x4xbf16> to vector<288x4xbf16>
    %c6 = arith.constant 6 : index
    %c0_41 = arith.constant 0 : index
    %c0_42 = arith.constant 0 : index
    %37 = vector.load %arg2[%c6, %c0_41, %c0_42] : memref<9x4x128xbf16, #tpu.memory_space<vmem>>, vector<1x4x128xbf16>
    %38 = vector.shape_cast %37 : vector<1x4x128xbf16> to vector<4x128xbf16>
    %cst_43 = arith.constant dense<0.000000e+00> : vector<288x128xf32>
    %39 = tpu.matmul %36, %38, %cst_43 {dimension_numbers = #tpu.dot_dimension_numbers<[1], [0], [0], [1], [0, 0, 1, 1], [], []>} : vector<288x4xbf16>, vector<4x128xbf16>, vector<288x128xf32> -> vector<288x128xf32>
    %40 = arith.addf %34, %39 : vector<288x128xf32>
    %c0_44 = arith.constant 0 : index
    %c0_45 = arith.constant 0 : index
    %c37 = arith.constant 37 : index
    %c0_46 = arith.constant 0 : index
    %41 = vector.load %arg1[%c0_44, %c0_45, %c37, %c0_46] : memref<1x1x342x4xbf16, #tpu.memory_space<vmem>>, vector<1x1x288x4xbf16>
    %42 = vector.shape_cast %41 : vector<1x1x288x4xbf16> to vector<288x4xbf16>
    %c7 = arith.constant 7 : index
    %c0_47 = arith.constant 0 : index
    %c0_48 = arith.constant 0 : index
    %43 = vector.load %arg2[%c7, %c0_47, %c0_48] : memref<9x4x128xbf16, #tpu.memory_space<vmem>>, vector<1x4x128xbf16>
    %44 = vector.shape_cast %43 : vector<1x4x128xbf16> to vector<4x128xbf16>
    %cst_49 = arith.constant dense<0.000000e+00> : vector<288x128xf32>
    %45 = tpu.matmul %42, %44, %cst_49 {dimension_numbers = #tpu.dot_dimension_numbers<[1], [0], [0], [1], [0, 0, 1, 1], [], []>} : vector<288x4xbf16>, vector<4x128xbf16>, vector<288x128xf32> -> vector<288x128xf32>
    %46 = arith.addf %40, %45 : vector<288x128xf32>
    %c0_50 = arith.constant 0 : index
    %c0_51 = arith.constant 0 : index
    %c38 = arith.constant 38 : index
    %c0_52 = arith.constant 0 : index
    %47 = vector.load %arg1[%c0_50, %c0_51, %c38, %c0_52] : memref<1x1x342x4xbf16, #tpu.memory_space<vmem>>, vector<1x1x288x4xbf16>
    %48 = vector.shape_cast %47 : vector<1x1x288x4xbf16> to vector<288x4xbf16>
    %c8 = arith.constant 8 : index
    %c0_53 = arith.constant 0 : index
    %c0_54 = arith.constant 0 : index
    %49 = vector.load %arg2[%c8, %c0_53, %c0_54] : memref<9x4x128xbf16, #tpu.memory_space<vmem>>, vector<1x4x128xbf16>
    %50 = vector.shape_cast %49 : vector<1x4x128xbf16> to vector<4x128xbf16>
    %cst_55 = arith.constant dense<0.000000e+00> : vector<288x128xf32>
    %51 = tpu.matmul %48, %50, %cst_55 {dimension_numbers = #tpu.dot_dimension_numbers<[1], [0], [0], [1], [0, 0, 1, 1], [], []>} : vector<288x4xbf16>, vector<4x128xbf16>, vector<288x128xf32> -> vector<288x128xf32>
    %52 = arith.addf %46, %51 : vector<288x128xf32>
    %53 = tpu.iota {dimensions = array<i32: 0>} : vector<288x1xi32>
    %54 = arith.sitofp %53 : vector<288x1xi32> to vector<288x1xf32>
    %cst_56 = arith.constant 1.800000e+01 : f32
    %55 = vector.broadcast %cst_56 : f32 to vector<288x1xf32>
    %56 = arith.divf %54, %55 : vector<288x1xf32>
    %57 = math.floor %56 : vector<288x1xf32>
    %cst_57 = arith.constant 1.800000e+01 : f32
    %58 = vector.broadcast %cst_57 : f32 to vector<288x1xf32>
    %59 = arith.mulf %57, %58 : vector<288x1xf32>
    %60 = arith.subf %54, %59 : vector<288x1xf32>
    %cst_58 = arith.constant 1.600000e+01 : f32
    %61 = vector.broadcast %cst_58 : f32 to vector<288x1xf32>
    %62 = arith.cmpf olt, %60, %61 : vector<288x1xf32>
    %cst_59 = arith.constant 0.000000e+00 : f32
    %63 = vector.shape_cast %62 : vector<288x1xi1> to vector<288x1xi1>
    %64 = vector.broadcast %63 : vector<288x1xi1> to vector<288x128xi1>
    %65 = vector.broadcast %cst_59 : f32 to vector<288x128xf32>
    %66 = arith.select %64, %52, %65 : vector<288x128xi1>, vector<288x128xf32>
    %cst_60 = arith.constant dense<0.000000e+00> : vector<128xf32>
    %67 = vector.multi_reduction <add>, %66, %cst_60 [0] : vector<288x128xf32> to vector<128xf32>
    %68 = vector.shape_cast %67 : vector<128xf32> to vector<1x128xf32>
    %69 = arith.mulf %66, %66 : vector<288x128xf32>
    %cst_61 = arith.constant dense<0.000000e+00> : vector<128xf32>
    %70 = vector.multi_reduction <add>, %69, %cst_61 [0] : vector<288x128xf32> to vector<128xf32>
    %71 = vector.shape_cast %70 : vector<128xf32> to vector<1x128xf32>
    %72 = tpu.concatenate %68, %71 in 0 : vector<1x128xf32>, vector<1x128xf32> -> vector<2x128xf32>
    %c0_62 = arith.constant 0 : index
    %c0_63 = arith.constant 0 : index
    %c0_64 = arith.constant 0 : index
    %73 = vector.load %arg5[%c0_62, %c0_63, %c0_64] : memref<1x2x128xf32, #tpu.memory_space<vmem>>, vector<1x2x128xf32>
    %74 = vector.shape_cast %73 : vector<1x2x128xf32> to vector<2x128xf32>
    %75 = vector.shape_cast %72 : vector<2x128xf32> to vector<1x2x128xf32>
    tpu.vector_store %arg5[%c0_62, %c0_63, %c0_64], %75 {strides = array<i32>} : memref<1x2x128xf32, #tpu.memory_space<vmem>>, vector<1x2x128xf32>,
    %76 = arith.truncf %52 : vector<288x128xf32> to vector<288x128xbf16>
    %c0_65 = arith.constant 0 : index
    %c0_66 = arith.constant 0 : index
    %c0_67 = arith.constant 0 : index
    %77 = vector.load %arg4[%c0_65, %c0_66, %c0_67] : memref<1x288x128xbf16, #tpu.memory_space<vmem>>, vector<1x288x128xbf16>
    %78 = vector.shape_cast %77 : vector<1x288x128xbf16> to vector<288x128xbf16>
    %79 = vector.shape_cast %76 : vector<288x128xbf16> to vector<1x288x128xbf16>
    tpu.vector_store %arg4[%c0_65, %c0_66, %c0_67], %79 {strides = array<i32>} : memref<1x288x128xbf16, #tpu.memory_space<vmem>>, vector<1x288x128xbf16>,
    %c0_68 = arith.constant 0 : index
    %c0_69 = arith.constant 0 : index
    %c19_70 = arith.constant 19 : index
    %c0_71 = arith.constant 0 : index
    %80 = vector.load %arg1[%c0_68, %c0_69, %c19_70, %c0_71] : memref<1x1x342x4xbf16, #tpu.memory_space<vmem>>, vector<1x1x288x4xbf16>
    %81 = vector.shape_cast %80 : vector<1x1x288x4xbf16> to vector<288x4xbf16>
    %c0_72 = arith.constant 0 : index
    %c0_73 = arith.constant 0 : index
    %82 = vector.load %arg3[%c0_72, %c0_73] : memref<4x128xbf16, #tpu.memory_space<vmem>>, vector<4x128xbf16>
    %cst_74 = arith.constant dense<0.000000e+00> : vector<288x128xf32>
    %83 = tpu.matmul %81, %82, %cst_74 {dimension_numbers = #tpu.dot_dimension_numbers<[1], [0], [0], [1], [0, 0, 1, 1], [], []>} : vector<288x4xbf16>, vector<4x128xbf16>, vector<288x128xf32> -> vector<288x128xf32>
    %84 = tpu.iota {dimensions = array<i32: 0>} : vector<288x1xi32>
    %85 = arith.sitofp %84 : vector<288x1xi32> to vector<288x1xf32>
    %cst_75 = arith.constant 1.800000e+01 : f32
    %86 = vector.broadcast %cst_75 : f32 to vector<288x1xf32>
    %87 = arith.divf %85, %86 : vector<288x1xf32>
    %88 = math.floor %87 : vector<288x1xf32>
    %cst_76 = arith.constant 1.800000e+01 : f32
    %89 = vector.broadcast %cst_76 : f32 to vector<288x1xf32>
    %90 = arith.mulf %88, %89 : vector<288x1xf32>
    %91 = arith.subf %85, %90 : vector<288x1xf32>
    %cst_77 = arith.constant 1.600000e+01 : f32
    %92 = vector.broadcast %cst_77 : f32 to vector<288x1xf32>
    %93 = arith.cmpf olt, %91, %92 : vector<288x1xf32>
    %cst_78 = arith.constant 0.000000e+00 : f32
    %94 = vector.shape_cast %93 : vector<288x1xi1> to vector<288x1xi1>
    %95 = vector.broadcast %94 : vector<288x1xi1> to vector<288x128xi1>
    %96 = vector.broadcast %cst_78 : f32 to vector<288x128xf32>
    %97 = arith.select %95, %83, %96 : vector<288x128xi1>, vector<288x128xf32>
    %cst_79 = arith.constant dense<0.000000e+00> : vector<128xf32>
    %98 = vector.multi_reduction <add>, %97, %cst_79 [0] : vector<288x128xf32> to vector<128xf32>
    %99 = vector.shape_cast %98 : vector<128xf32> to vector<1x128xf32>
    %100 = arith.mulf %97, %97 : vector<288x128xf32>
    %cst_80 = arith.constant dense<0.000000e+00> : vector<128xf32>
    %101 = vector.multi_reduction <add>, %100, %cst_80 [0] : vector<288x128xf32> to vector<128xf32>
    %102 = vector.shape_cast %101 : vector<128xf32> to vector<1x128xf32>
    %103 = tpu.concatenate %99, %102 in 0 : vector<1x128xf32>, vector<1x128xf32> -> vector<2x128xf32>
    %c0_81 = arith.constant 0 : index
    %c0_82 = arith.constant 0 : index
    %c0_83 = arith.constant 0 : index
    %104 = vector.load %arg7[%c0_81, %c0_82, %c0_83] : memref<1x2x128xf32, #tpu.memory_space<vmem>>, vector<1x2x128xf32>
    %105 = vector.shape_cast %104 : vector<1x2x128xf32> to vector<2x128xf32>
    %106 = vector.shape_cast %103 : vector<2x128xf32> to vector<1x2x128xf32>
    tpu.vector_store %arg7[%c0_81, %c0_82, %c0_83], %106 {strides = array<i32>} : memref<1x2x128xf32, #tpu.memory_space<vmem>>, vector<1x2x128xf32>,
    %107 = arith.truncf %83 : vector<288x128xf32> to vector<288x128xbf16>
    %c0_84 = arith.constant 0 : index
    %c0_85 = arith.constant 0 : index
    %c0_86 = arith.constant 0 : index
    %108 = vector.load %arg6[%c0_84, %c0_85, %c0_86] : memref<1x288x128xbf16, #tpu.memory_space<vmem>>, vector<1x288x128xbf16>
    %109 = vector.shape_cast %108 : vector<1x288x128xbf16> to vector<288x128xbf16>
    %110 = vector.shape_cast %107 : vector<288x128xbf16> to vector<1x288x128xbf16>
    tpu.vector_store %arg6[%c0_84, %c0_85, %c0_86], %110 {strides = array<i32>} : memref<1x288x128xbf16, #tpu.memory_space<vmem>>, vector<1x288x128xbf16>,
    return
  }
  func.func @transform_0(%arg0: i32) -> (i32, i32, i32, i32) {
    %c0_i32 = arith.constant 0 : i32
    %c0_i32_0 = arith.constant 0 : i32
    %c0_i32_1 = arith.constant 0 : i32
    %c0_i32_2 = arith.constant 0 : i32
    return %arg0, %c0_i32, %c0_i32_0, %c0_i32_1 : i32, i32, i32, i32
  }
  func.func @transform_1(%arg0: i32) -> (i32, i32, i32) {
    %c0_i32 = arith.constant 0 : i32
    %c0_i32_0 = arith.constant 0 : i32
    %c0_i32_1 = arith.constant 0 : i32
    %c0_i32_2 = arith.constant 0 : i32
    return %c0_i32, %c0_i32_0, %c0_i32_1 : i32, i32, i32
  }
  func.func @transform_2(%arg0: i32) -> (i32, i32) {
    %c0_i32 = arith.constant 0 : i32
    %c0_i32_0 = arith.constant 0 : i32
    %c0_i32_1 = arith.constant 0 : i32
    return %c0_i32, %c0_i32_0 : i32, i32
  }
  func.func @transform_3(%arg0: i32) -> (i32, i32, i32) {
    %c0_i32 = arith.constant 0 : i32
    %c0_i32_0 = arith.constant 0 : i32
    %c0_i32_1 = arith.constant 0 : i32
    return %arg0, %c0_i32, %c0_i32_0 : i32, i32, i32
  }
  func.func @transform_4(%arg0: i32) -> (i32, i32, i32) {
    %c0_i32 = arith.constant 0 : i32
    %c0_i32_0 = arith.constant 0 : i32
    %c0_i32_1 = arith.constant 0 : i32
    return %arg0, %c0_i32, %c0_i32_0 : i32, i32, i32
  }
  func.func @transform_5(%arg0: i32) -> (i32, i32, i32) {
    %c0_i32 = arith.constant 0 : i32
    %c0_i32_0 = arith.constant 0 : i32
    %c0_i32_1 = arith.constant 0 : i32
    return %arg0, %c0_i32, %c0_i32_0 : i32, i32, i32
  }
  func.func @transform_6(%arg0: i32) -> (i32, i32, i32) {
    %c0_i32 = arith.constant 0 : i32
    %c0_i32_0 = arith.constant 0 : i32
    %c0_i32_1 = arith.constant 0 : i32
    return %arg0, %c0_i32, %c0_i32_0 : i32, i32, i32
  }
}

module attributes {stable_mosaic.version = 11 : i64} {
  func.func @conv2_kernel(%arg0: i32, %arg1: memref<1x288x128xbf16, #tpu.memory_space<vmem>>, %arg2: memref<1x128xf32, #tpu.memory_space<vmem>>, %arg3: memref<1x128xf32, #tpu.memory_space<vmem>>, %arg4: memref<3x384x128xbf16, #tpu.memory_space<vmem>>, %arg5: memref<1x288x128xbf16, #tpu.memory_space<vmem>>, %arg6: memref<1x2x128xf32, #tpu.memory_space<vmem>>, %arg7: memref<352x128xbf16, #tpu.memory_space<vmem>>) attributes {dimension_semantics = [#tpu.dimension_semantics<parallel>], iteration_bounds = array<i64: 2>, scalar_prefetch = 0 : i64, scratch_operands = 1 : i64, tpu.core_type = #tpu.core_type<tc>, window_params = [{transform_indices = @transform_0, window_bounds = array<i64: 1, 288, 128>}, {pipeline_mode = #tpu.pipeline_mode<synchronous>, transform_indices = @transform_1, window_bounds = array<i64: 1, 128>}, {pipeline_mode = #tpu.pipeline_mode<synchronous>, transform_indices = @transform_2, window_bounds = array<i64: 1, 128>}, {pipeline_mode = #tpu.pipeline_mode<synchronous>, transform_indices = @transform_3, window_bounds = array<i64: 3, 384, 128>}, {transform_indices = @transform_4, window_bounds = array<i64: 1, 288, 128>}, {transform_indices = @transform_5, window_bounds = array<i64: 1, 2, 128>}]} {
    %cst = arith.constant 0.000000e+00 : bf16
    %0 = vector.broadcast %cst : bf16 to vector<32x128xbf16>
    %c0 = arith.constant 0 : index
    %c0_0 = arith.constant 0 : index
    %1 = vector.load %arg7[%c0, %c0_0] : memref<352x128xbf16, #tpu.memory_space<vmem>>, vector<32x128xbf16>
    tpu.vector_store %arg7[%c0, %c0_0], %0 {strides = array<i32>} : memref<352x128xbf16, #tpu.memory_space<vmem>>, vector<32x128xbf16>,
    %cst_1 = arith.constant 0.000000e+00 : bf16
    %2 = vector.broadcast %cst_1 : bf16 to vector<32x128xbf16>
    %c320 = arith.constant 320 : index
    %c0_2 = arith.constant 0 : index
    %3 = vector.load %arg7[%c320, %c0_2] : memref<352x128xbf16, #tpu.memory_space<vmem>>, vector<32x128xbf16>
    tpu.vector_store %arg7[%c320, %c0_2], %2 {strides = array<i32>} : memref<352x128xbf16, #tpu.memory_space<vmem>>, vector<32x128xbf16>,
    %c0_3 = arith.constant 0 : index
    %c0_4 = arith.constant 0 : index
    %c0_5 = arith.constant 0 : index
    %4 = vector.load %arg1[%c0_3, %c0_4, %c0_5] : memref<1x288x128xbf16, #tpu.memory_space<vmem>>, vector<1x288x128xbf16>
    %5 = vector.shape_cast %4 : vector<1x288x128xbf16> to vector<288x128xbf16>
    %6 = arith.extf %5 : vector<288x128xbf16> to vector<288x128xf32>
    %c0_6 = arith.constant 0 : index
    %c0_7 = arith.constant 0 : index
    %7 = vector.load %arg2[%c0_6, %c0_7] : memref<1x128xf32, #tpu.memory_space<vmem>>, vector<1x128xf32>
    %8 = vector.broadcast %7 : vector<1x128xf32> to vector<288x128xf32>
    %9 = arith.mulf %6, %8 : vector<288x128xf32>
    %c0_8 = arith.constant 0 : index
    %c0_9 = arith.constant 0 : index
    %10 = vector.load %arg3[%c0_8, %c0_9] : memref<1x128xf32, #tpu.memory_space<vmem>>, vector<1x128xf32>
    %11 = vector.broadcast %10 : vector<1x128xf32> to vector<288x128xf32>
    %12 = arith.addf %9, %11 : vector<288x128xf32>
    %cst_10 = arith.constant 0.000000e+00 : f32
    %13 = vector.broadcast %cst_10 : f32 to vector<288x128xf32>
    %14 = arith.maximumf %12, %13 : vector<288x128xf32>
    %15 = tpu.iota {dimensions = array<i32: 0>} : vector<288x1xi32>
    %16 = arith.sitofp %15 : vector<288x1xi32> to vector<288x1xf32>
    %cst_11 = arith.constant 1.800000e+01 : f32
    %17 = vector.broadcast %cst_11 : f32 to vector<288x1xf32>
    %18 = arith.divf %16, %17 : vector<288x1xf32>
    %19 = math.floor %18 : vector<288x1xf32>
    %cst_12 = arith.constant 1.800000e+01 : f32
    %20 = vector.broadcast %cst_12 : f32 to vector<288x1xf32>
    %21 = arith.mulf %19, %20 : vector<288x1xf32>
    %22 = arith.subf %16, %21 : vector<288x1xf32>
    %cst_13 = arith.constant 1.600000e+01 : f32
    %23 = vector.broadcast %cst_13 : f32 to vector<288x1xf32>
    %24 = arith.cmpf olt, %22, %23 : vector<288x1xf32>
    %cst_14 = arith.constant 0.000000e+00 : f32
    %25 = vector.shape_cast %24 : vector<288x1xi1> to vector<288x1xi1>
    %26 = vector.broadcast %25 : vector<288x1xi1> to vector<288x128xi1>
    %27 = vector.broadcast %cst_14 : f32 to vector<288x128xf32>
    %28 = arith.select %26, %14, %27 : vector<288x128xi1>, vector<288x128xf32>
    %29 = arith.truncf %28 : vector<288x128xf32> to vector<288x128xbf16>
    %c32 = arith.constant 32 : index
    %c0_15 = arith.constant 0 : index
    %30 = vector.load %arg7[%c32, %c0_15] : memref<352x128xbf16, #tpu.memory_space<vmem>>, vector<288x128xbf16>
    tpu.vector_store %arg7[%c32, %c0_15], %29 {strides = array<i32>} : memref<352x128xbf16, #tpu.memory_space<vmem>>, vector<288x128xbf16>,
    %c13 = arith.constant 13 : index
    %c0_16 = arith.constant 0 : index
    %31 = vector.load %arg7[%c13, %c0_16] : memref<352x128xbf16, #tpu.memory_space<vmem>>, vector<288x128xbf16>
    %c14 = arith.constant 14 : index
    %c0_17 = arith.constant 0 : index
    %32 = vector.load %arg7[%c14, %c0_17] : memref<352x128xbf16, #tpu.memory_space<vmem>>, vector<288x128xbf16>
    %c15 = arith.constant 15 : index
    %c0_18 = arith.constant 0 : index
    %33 = vector.load %arg7[%c15, %c0_18] : memref<352x128xbf16, #tpu.memory_space<vmem>>, vector<288x128xbf16>
    %34 = tpu.concatenate %31, %32, %33 in 1 : vector<288x128xbf16>, vector<288x128xbf16>, vector<288x128xbf16> -> vector<288x384xbf16>
    %c0_19 = arith.constant 0 : index
    %c0_20 = arith.constant 0 : index
    %c0_21 = arith.constant 0 : index
    %35 = vector.load %arg4[%c0_19, %c0_20, %c0_21] : memref<3x384x128xbf16, #tpu.memory_space<vmem>>, vector<1x384x128xbf16>
    %36 = vector.shape_cast %35 : vector<1x384x128xbf16> to vector<384x128xbf16>
    %cst_22 = arith.constant dense<0.000000e+00> : vector<288x128xf32>
    %37 = tpu.matmul %34, %36, %cst_22 {dimension_numbers = #tpu.dot_dimension_numbers<[1], [0], [0], [1], [0, 0, 1, 1], [], []>} : vector<288x384xbf16>, vector<384x128xbf16>, vector<288x128xf32> -> vector<288x128xf32>
    %c31 = arith.constant 31 : index
    %c0_23 = arith.constant 0 : index
    %38 = vector.load %arg7[%c31, %c0_23] : memref<352x128xbf16, #tpu.memory_space<vmem>>, vector<288x128xbf16>
    %c32_24 = arith.constant 32 : index
    %c0_25 = arith.constant 0 : index
    %39 = vector.load %arg7[%c32_24, %c0_25] : memref<352x128xbf16, #tpu.memory_space<vmem>>, vector<288x128xbf16>
    %c33 = arith.constant 33 : index
    %c0_26 = arith.constant 0 : index
    %40 = vector.load %arg7[%c33, %c0_26] : memref<352x128xbf16, #tpu.memory_space<vmem>>, vector<288x128xbf16>
    %41 = tpu.concatenate %38, %39, %40 in 1 : vector<288x128xbf16>, vector<288x128xbf16>, vector<288x128xbf16> -> vector<288x384xbf16>
    %c1 = arith.constant 1 : index
    %c0_27 = arith.constant 0 : index
    %c0_28 = arith.constant 0 : index
    %42 = vector.load %arg4[%c1, %c0_27, %c0_28] : memref<3x384x128xbf16, #tpu.memory_space<vmem>>, vector<1x384x128xbf16>
    %43 = vector.shape_cast %42 : vector<1x384x128xbf16> to vector<384x128xbf16>
    %cst_29 = arith.constant dense<0.000000e+00> : vector<288x128xf32>
    %44 = tpu.matmul %41, %43, %cst_29 {dimension_numbers = #tpu.dot_dimension_numbers<[1], [0], [0], [1], [0, 0, 1, 1], [], []>} : vector<288x384xbf16>, vector<384x128xbf16>, vector<288x128xf32> -> vector<288x128xf32>
    %45 = arith.addf %37, %44 : vector<288x128xf32>
    %c49 = arith.constant 49 : index
    %c0_30 = arith.constant 0 : index
    %46 = vector.load %arg7[%c49, %c0_30] : memref<352x128xbf16, #tpu.memory_space<vmem>>, vector<288x128xbf16>
    %c50 = arith.constant 50 : index
    %c0_31 = arith.constant 0 : index
    %47 = vector.load %arg7[%c50, %c0_31] : memref<352x128xbf16, #tpu.memory_space<vmem>>, vector<288x128xbf16>
    %c51 = arith.constant 51 : index
    %c0_32 = arith.constant 0 : index
    %48 = vector.load %arg7[%c51, %c0_32] : memref<352x128xbf16, #tpu.memory_space<vmem>>, vector<288x128xbf16>
    %49 = tpu.concatenate %46, %47, %48 in 1 : vector<288x128xbf16>, vector<288x128xbf16>, vector<288x128xbf16> -> vector<288x384xbf16>
    %c2 = arith.constant 2 : index
    %c0_33 = arith.constant 0 : index
    %c0_34 = arith.constant 0 : index
    %50 = vector.load %arg4[%c2, %c0_33, %c0_34] : memref<3x384x128xbf16, #tpu.memory_space<vmem>>, vector<1x384x128xbf16>
    %51 = vector.shape_cast %50 : vector<1x384x128xbf16> to vector<384x128xbf16>
    %cst_35 = arith.constant dense<0.000000e+00> : vector<288x128xf32>
    %52 = tpu.matmul %49, %51, %cst_35 {dimension_numbers = #tpu.dot_dimension_numbers<[1], [0], [0], [1], [0, 0, 1, 1], [], []>} : vector<288x384xbf16>, vector<384x128xbf16>, vector<288x128xf32> -> vector<288x128xf32>
    %53 = arith.addf %45, %52 : vector<288x128xf32>
    %54 = tpu.iota {dimensions = array<i32: 0>} : vector<288x1xi32>
    %55 = arith.sitofp %54 : vector<288x1xi32> to vector<288x1xf32>
    %cst_36 = arith.constant 1.800000e+01 : f32
    %56 = vector.broadcast %cst_36 : f32 to vector<288x1xf32>
    %57 = arith.divf %55, %56 : vector<288x1xf32>
    %58 = math.floor %57 : vector<288x1xf32>
    %cst_37 = arith.constant 1.800000e+01 : f32
    %59 = vector.broadcast %cst_37 : f32 to vector<288x1xf32>
    %60 = arith.mulf %58, %59 : vector<288x1xf32>
    %61 = arith.subf %55, %60 : vector<288x1xf32>
    %cst_38 = arith.constant 1.600000e+01 : f32
    %62 = vector.broadcast %cst_38 : f32 to vector<288x1xf32>
    %63 = arith.cmpf olt, %61, %62 : vector<288x1xf32>
    %cst_39 = arith.constant 0.000000e+00 : f32
    %64 = vector.shape_cast %63 : vector<288x1xi1> to vector<288x1xi1>
    %65 = vector.broadcast %64 : vector<288x1xi1> to vector<288x128xi1>
    %66 = vector.broadcast %cst_39 : f32 to vector<288x128xf32>
    %67 = arith.select %65, %53, %66 : vector<288x128xi1>, vector<288x128xf32>
    %cst_40 = arith.constant dense<0.000000e+00> : vector<128xf32>
    %68 = vector.multi_reduction <add>, %67, %cst_40 [0] : vector<288x128xf32> to vector<128xf32>
    %69 = vector.shape_cast %68 : vector<128xf32> to vector<1x128xf32>
    %70 = arith.mulf %67, %67 : vector<288x128xf32>
    %cst_41 = arith.constant dense<0.000000e+00> : vector<128xf32>
    %71 = vector.multi_reduction <add>, %70, %cst_41 [0] : vector<288x128xf32> to vector<128xf32>
    %72 = vector.shape_cast %71 : vector<128xf32> to vector<1x128xf32>
    %73 = tpu.concatenate %69, %72 in 0 : vector<1x128xf32>, vector<1x128xf32> -> vector<2x128xf32>
    %c0_42 = arith.constant 0 : index
    %c0_43 = arith.constant 0 : index
    %c0_44 = arith.constant 0 : index
    %74 = vector.load %arg6[%c0_42, %c0_43, %c0_44] : memref<1x2x128xf32, #tpu.memory_space<vmem>>, vector<1x2x128xf32>
    %75 = vector.shape_cast %74 : vector<1x2x128xf32> to vector<2x128xf32>
    %76 = vector.shape_cast %73 : vector<2x128xf32> to vector<1x2x128xf32>
    tpu.vector_store %arg6[%c0_42, %c0_43, %c0_44], %76 {strides = array<i32>} : memref<1x2x128xf32, #tpu.memory_space<vmem>>, vector<1x2x128xf32>,
    %77 = arith.truncf %53 : vector<288x128xf32> to vector<288x128xbf16>
    %c0_45 = arith.constant 0 : index
    %c0_46 = arith.constant 0 : index
    %c0_47 = arith.constant 0 : index
    %78 = vector.load %arg5[%c0_45, %c0_46, %c0_47] : memref<1x288x128xbf16, #tpu.memory_space<vmem>>, vector<1x288x128xbf16>
    %79 = vector.shape_cast %78 : vector<1x288x128xbf16> to vector<288x128xbf16>
    %80 = vector.shape_cast %77 : vector<288x128xbf16> to vector<1x288x128xbf16>
    tpu.vector_store %arg5[%c0_45, %c0_46, %c0_47], %80 {strides = array<i32>} : memref<1x288x128xbf16, #tpu.memory_space<vmem>>, vector<1x288x128xbf16>,
    return
  }
  func.func @transform_0(%arg0: i32) -> (i32, i32, i32) {
    %c0_i32 = arith.constant 0 : i32
    %c0_i32_0 = arith.constant 0 : i32
    %c0_i32_1 = arith.constant 0 : i32
    return %arg0, %c0_i32, %c0_i32_0 : i32, i32, i32
  }
  func.func @transform_1(%arg0: i32) -> (i32, i32) {
    %c0_i32 = arith.constant 0 : i32
    %c0_i32_0 = arith.constant 0 : i32
    %c0_i32_1 = arith.constant 0 : i32
    return %c0_i32, %c0_i32_0 : i32, i32
  }
  func.func @transform_2(%arg0: i32) -> (i32, i32) {
    %c0_i32 = arith.constant 0 : i32
    %c0_i32_0 = arith.constant 0 : i32
    %c0_i32_1 = arith.constant 0 : i32
    return %c0_i32, %c0_i32_0 : i32, i32
  }
  func.func @transform_3(%arg0: i32) -> (i32, i32, i32) {
    %c0_i32 = arith.constant 0 : i32
    %c0_i32_0 = arith.constant 0 : i32
    %c0_i32_1 = arith.constant 0 : i32
    %c0_i32_2 = arith.constant 0 : i32
    return %c0_i32, %c0_i32_0, %c0_i32_1 : i32, i32, i32
  }
  func.func @transform_4(%arg0: i32) -> (i32, i32, i32) {
    %c0_i32 = arith.constant 0 : i32
    %c0_i32_0 = arith.constant 0 : i32
    %c0_i32_1 = arith.constant 0 : i32
    return %arg0, %c0_i32, %c0_i32_0 : i32, i32, i32
  }
  func.func @transform_5(%arg0: i32) -> (i32, i32, i32) {
    %c0_i32 = arith.constant 0 : i32
    %c0_i32_0 = arith.constant 0 : i32
    %c0_i32_1 = arith.constant 0 : i32
    return %arg0, %c0_i32, %c0_i32_0 : i32, i32, i32
  }
}

module attributes {stable_mosaic.version = 11 : i64} {
  func.func @finalize_proj_kernel(%arg0: i32, %arg1: memref<1x288x128xbf16, #tpu.memory_space<vmem>>, %arg2: memref<1x128xf32, #tpu.memory_space<vmem>>, %arg3: memref<1x128xf32, #tpu.memory_space<vmem>>, %arg4: memref<1x288x128xbf16, #tpu.memory_space<vmem>>, %arg5: memref<1x128xf32, #tpu.memory_space<vmem>>, %arg6: memref<1x128xf32, #tpu.memory_space<vmem>>, %arg7: memref<1x288x128xf32, #tpu.memory_space<vmem>>) attributes {dimension_semantics = [#tpu.dimension_semantics<parallel>], iteration_bounds = array<i64: 2>, scalar_prefetch = 0 : i64, scratch_operands = 0 : i64, tpu.core_type = #tpu.core_type<tc>, window_params = [{transform_indices = @transform_0, window_bounds = array<i64: 1, 288, 128>}, {pipeline_mode = #tpu.pipeline_mode<synchronous>, transform_indices = @transform_1, window_bounds = array<i64: 1, 128>}, {pipeline_mode = #tpu.pipeline_mode<synchronous>, transform_indices = @transform_2, window_bounds = array<i64: 1, 128>}, {transform_indices = @transform_3, window_bounds = array<i64: 1, 288, 128>}, {pipeline_mode = #tpu.pipeline_mode<synchronous>, transform_indices = @transform_4, window_bounds = array<i64: 1, 128>}, {pipeline_mode = #tpu.pipeline_mode<synchronous>, transform_indices = @transform_5, window_bounds = array<i64: 1, 128>}, {transform_indices = @transform_6, window_bounds = array<i64: 1, 288, 128>}]} {
    %c0 = arith.constant 0 : index
    %c0_0 = arith.constant 0 : index
    %c0_1 = arith.constant 0 : index
    %0 = vector.load %arg1[%c0, %c0_0, %c0_1] : memref<1x288x128xbf16, #tpu.memory_space<vmem>>, vector<1x288x128xbf16>
    %1 = vector.shape_cast %0 : vector<1x288x128xbf16> to vector<288x128xbf16>
    %2 = arith.extf %1 : vector<288x128xbf16> to vector<288x128xf32>
    %c0_2 = arith.constant 0 : index
    %c0_3 = arith.constant 0 : index
    %3 = vector.load %arg2[%c0_2, %c0_3] : memref<1x128xf32, #tpu.memory_space<vmem>>, vector<1x128xf32>
    %4 = vector.broadcast %3 : vector<1x128xf32> to vector<288x128xf32>
    %5 = arith.mulf %2, %4 : vector<288x128xf32>
    %c0_4 = arith.constant 0 : index
    %c0_5 = arith.constant 0 : index
    %6 = vector.load %arg3[%c0_4, %c0_5] : memref<1x128xf32, #tpu.memory_space<vmem>>, vector<1x128xf32>
    %7 = vector.broadcast %6 : vector<1x128xf32> to vector<288x128xf32>
    %8 = arith.addf %5, %7 : vector<288x128xf32>
    %c0_6 = arith.constant 0 : index
    %c0_7 = arith.constant 0 : index
    %c0_8 = arith.constant 0 : index
    %9 = vector.load %arg4[%c0_6, %c0_7, %c0_8] : memref<1x288x128xbf16, #tpu.memory_space<vmem>>, vector<1x288x128xbf16>
    %10 = vector.shape_cast %9 : vector<1x288x128xbf16> to vector<288x128xbf16>
    %11 = arith.extf %10 : vector<288x128xbf16> to vector<288x128xf32>
    %c0_9 = arith.constant 0 : index
    %c0_10 = arith.constant 0 : index
    %12 = vector.load %arg5[%c0_9, %c0_10] : memref<1x128xf32, #tpu.memory_space<vmem>>, vector<1x128xf32>
    %13 = vector.broadcast %12 : vector<1x128xf32> to vector<288x128xf32>
    %14 = arith.mulf %11, %13 : vector<288x128xf32>
    %c0_11 = arith.constant 0 : index
    %c0_12 = arith.constant 0 : index
    %15 = vector.load %arg6[%c0_11, %c0_12] : memref<1x128xf32, #tpu.memory_space<vmem>>, vector<1x128xf32>
    %16 = vector.broadcast %15 : vector<1x128xf32> to vector<288x128xf32>
    %17 = arith.addf %14, %16 : vector<288x128xf32>
    %18 = arith.addf %8, %17 : vector<288x128xf32>
    %cst = arith.constant 0.000000e+00 : f32
    %19 = vector.broadcast %cst : f32 to vector<288x128xf32>
    %20 = arith.maximumf %18, %19 : vector<288x128xf32>
    %c0_13 = arith.constant 0 : index
    %c0_14 = arith.constant 0 : index
    %c0_15 = arith.constant 0 : index
    %21 = vector.load %arg7[%c0_13, %c0_14, %c0_15] : memref<1x288x128xf32, #tpu.memory_space<vmem>>, vector<1x288x128xf32>
    %22 = vector.shape_cast %21 : vector<1x288x128xf32> to vector<288x128xf32>
    %23 = vector.shape_cast %20 : vector<288x128xf32> to vector<1x288x128xf32>
    tpu.vector_store %arg7[%c0_13, %c0_14, %c0_15], %23 {strides = array<i32>} : memref<1x288x128xf32, #tpu.memory_space<vmem>>, vector<1x288x128xf32>,
    return
  }
  func.func @transform_0(%arg0: i32) -> (i32, i32, i32) {
    %c0_i32 = arith.constant 0 : i32
    %c0_i32_0 = arith.constant 0 : i32
    %c0_i32_1 = arith.constant 0 : i32
    return %arg0, %c0_i32, %c0_i32_0 : i32, i32, i32
  }
  func.func @transform_1(%arg0: i32) -> (i32, i32) {
    %c0_i32 = arith.constant 0 : i32
    %c0_i32_0 = arith.constant 0 : i32
    %c0_i32_1 = arith.constant 0 : i32
    return %c0_i32, %c0_i32_0 : i32, i32
  }
  func.func @transform_2(%arg0: i32) -> (i32, i32) {
    %c0_i32 = arith.constant 0 : i32
    %c0_i32_0 = arith.constant 0 : i32
    %c0_i32_1 = arith.constant 0 : i32
    return %c0_i32, %c0_i32_0 : i32, i32
  }
  func.func @transform_3(%arg0: i32) -> (i32, i32, i32) {
    %c0_i32 = arith.constant 0 : i32
    %c0_i32_0 = arith.constant 0 : i32
    %c0_i32_1 = arith.constant 0 : i32
    return %arg0, %c0_i32, %c0_i32_0 : i32, i32, i32
  }
  func.func @transform_4(%arg0: i32) -> (i32, i32) {
    %c0_i32 = arith.constant 0 : i32
    %c0_i32_0 = arith.constant 0 : i32
    %c0_i32_1 = arith.constant 0 : i32
    return %c0_i32, %c0_i32_0 : i32, i32
  }
  func.func @transform_5(%arg0: i32) -> (i32, i32) {
    %c0_i32 = arith.constant 0 : i32
    %c0_i32_0 = arith.constant 0 : i32
    %c0_i32_1 = arith.constant 0 : i32
    return %c0_i32, %c0_i32_0 : i32, i32
  }
  func.func @transform_6(%arg0: i32) -> (i32, i32, i32) {
    %c0_i32 = arith.constant 0 : i32
    %c0_i32_0 = arith.constant 0 : i32
    %c0_i32_1 = arith.constant 0 : i32
    return %arg0, %c0_i32, %c0_i32_0 : i32, i32, i32
  }
}

</mosaic_0001>

<bundles_post_ra>
// kernel: basic_block_forward.5
= control target key start
LH: loop header
LB: loop body
LE: loop exit
PB: predicated region body
PF: predicated region fallthrough
CT: control target
= control target key end

     0   :  { %s1008_s21 = smov 0   ;;  %s1274_s0 = inlined_call_operand.vmem [shape: bf16[2,288,128], index: 0, kind: input, shape index: {}]   ;;  %s1275_s1 = inlined_call_operand.vmem [shape: f32[1,128], index: 1, kind: input, shape index: {}]   ;;  %s1276_s2 = inlined_call_operand.vmem [shape: f32[1,128], index: 2, kind: input, shape index: {}]   ;;  %s1277_s3 = inlined_call_operand.vmem [shape: bf16[2,288,128], index: 3, kind: input, shape index: {}]   ;;  %s1278_s4 = inlined_call_operand.vmem [shape: f32[1,128], index: 4, kind: input, shape index: {}]   ;;  %s1279_s5 = inlined_call_operand.vmem [shape: f32[1,128], index: 5, kind: input, shape index: {}]   ;;  %s1280_s6 = inlined_call_operand.vmem [shape: f32[2,288,128], index: 6, kind: output, shape index: {}]  }
   0x1 LB: > { %s763_s22 = sadd.s32 4294967295, %s971_s21   ;;  %p767_p0 = scmp.ge.s32.totalorder %s971_s21, 1  ;;  %s971_s21 = sphi %s1008_s21, %s16_s21  }
   0x2   : > { %p222_p1 = scmp.lt.s32.totalorder %s971_s21, 3 }
   0x4   : > { %p223_p2 = pnand %p767_p0, %p222_p1 }
   0x5   : > { %p257_p3 = scmp.lt.s32.totalorder (!%p223_p2), %s763_s22, 1  ;;  %v1032_v0 = vld [vmem:[%s1275_s1] ss:$0 sm:$0xff] (!%p223_p2) }
   0x6   : > { %226 = sbr.rel (%p223_p2) target bundleno = 96 (0x60), region = 44  ;;  %v1037_v1 = vld [vmem:[%s1278_s4] ss:$0 sm:$0xff] (!%p223_p2) }
   0x7   : > { %v1046_v10 = vld [vmem:[%s1276_s2] ss:$0 sm:$0xff] (!%p223_p2) }
   0x8   : > { %v1051_v11 = vld [vmem:[%s1279_s5] ss:$0 sm:$0xff] (!%p223_p2) }
   0xd   : > { %s1282_s22 = smov (!%p257_p3, %s763_s22), 1 }
   0xe   : > { %s955_s23 = smul.u32 144, %s1282_s22 }
   0xf   : > { %s956_s14 = smul.u32 288, %s1282_s22 }
  0x10   : > { %s1022_s26 = scalar_lea.vmem %s1274_s0, %s955_s23  ;;  %s1027_s29 = scalar_lea.vmem %s1277_s3, %s955_s23 }
  0x11   : > { %v778_v2 = vld [vmem:[%s1022_s26] sm:$0xff]   ;;  %v921_v4 = vld [vmem:[%s1022_s26 + $0x8] sm:$0xff]   ;;  %v922_v24 = vld [vmem:[%s1022_s26 + $0x10] sm:$0xff]   ;;  %s1075_s17 = scalar_lea.vmem %s1280_s6, %s956_s14 }
  0x12   : > { %v850_v3 = vld [vmem:[%s1027_s29] sm:$0xff]   ;;  %v779_v5 = vunpack.c.l.bf16 %v778_v2  ;;  %v780_v7 = vunpack.c.h.bf16 %v778_v2  ;;  %v938_v9 = vld [vmem:[%s1027_s29 + $0x8] sm:$0xff]   ;;  %v783_v12 = vunpack.c.l.bf16 %v921_v4  ;;  %v784_v14 = vunpack.c.h.bf16 %v921_v4  ;;  %v939_v25 = vld [vmem:[%s1027_s29 + $0x10] sm:$0xff]  }
  0x13   : > { %v851_v6 = vunpack.c.l.bf16 %v850_v3  ;;  %v852_v8 = vunpack.c.h.bf16 %v850_v3  ;;  %v855_v13 = vunpack.c.l.bf16 %v938_v9  ;;  %v856_v15 = vunpack.c.h.bf16 %v938_v9  ;;  %v923_v42 = vld [vmem:[%s1022_s26 + $0x18] sm:$0xff]   ;;  %v924_v52 = vld [vmem:[%s1022_s26 + $0x20] sm:$0xff]  }
  0x14   : > { %v351_v16 = vmul.f32 %v779_v5, %v1032_v0  ;;  %v352_v18 = vmul.f32 %v780_v7, %v1032_v0  ;;  %v353_v20 = vmul.f32 %v783_v12, %v1032_v0  ;;  %v354_v22 = vmul.f32 %v784_v14, %v1032_v0  ;;  %v940_v43 = vld [vmem:[%s1027_s29 + $0x18] sm:$0xff]   ;;  %v941_v57 = vld [vmem:[%s1027_s29 + $0x20] sm:$0xff]   ;;  %v925_v14 = vld [vmem:[%s1022_s26 + $0x28] sm:$0xff]  }
  0x15   : > { %v509_v17 = vmul.f32 %v851_v6, %v1037_v1  ;;  %v510_v19 = vmul.f32 %v852_v8, %v1037_v1  ;;  %v511_v21 = vmul.f32 %v855_v13, %v1037_v1  ;;  %v512_v23 = vmul.f32 %v856_v15, %v1037_v1  ;;  %v942_v15 = vld [vmem:[%s1027_s29 + $0x28] sm:$0xff]  }
  0x16   : > { %v394_v26 = vadd.f32 %v1046_v10, %v351_v16  ;;  %v395_v28 = vadd.f32 %v1046_v10, %v352_v18  ;;  %v396_v30 = vadd.f32 %v1046_v10, %v353_v20  ;;  %v397_v32 = vadd.f32 %v1046_v10, %v354_v22 }
  0x17   : > { %v552_v27 = vadd.f32 %v1051_v11, %v509_v17  ;;  %v553_v29 = vadd.f32 %v1051_v11, %v510_v19  ;;  %v554_v31 = vadd.f32 %v1051_v11, %v511_v21  ;;  %v555_v33 = vadd.f32 %v1051_v11, %v512_v23 }
  0x18   : > { %v787_v36 = vunpack.c.l.bf16 %v922_v24  ;;  %v859_v37 = vunpack.c.l.bf16 %v939_v25  ;;  %v788_v40 = vunpack.c.h.bf16 %v922_v24  ;;  %v860_v41 = vunpack.c.h.bf16 %v939_v25 }
  0x19   : > { %v588_v34 = vadd.f32 %v552_v27, %v394_v26  ;;  %v589_v35 = vadd.f32 %v553_v29, %v395_v28  ;;  %v590_v38 = vadd.f32 %v554_v31, %v396_v30  ;;  %v591_v39 = vadd.f32 %v555_v33, %v397_v32  ;;  %v926_v32 = vld [vmem:[%s1022_s26 + $0x30] sm:$0xff]  }
  0x1a   : > { %v355_v46 = vmul.f32 %v787_v36, %v1032_v0  ;;  %v513_v47 = vmul.f32 %v859_v37, %v1037_v1  ;;  %v356_v50 = vmul.f32 %v788_v40, %v1032_v0  ;;  %v514_v51 = vmul.f32 %v860_v41, %v1037_v1  ;;  %v943_v37 = vld [vmem:[%s1027_s29 + $0x30] sm:$0xff]  }
  0x1b   : > { %v624_v44 = vmax.f32 %v588_v34, 0.0  ;;  %v625_v45 = vmax.f32 %v589_v35, 0.0  ;;  %v626_v48 = vmax.f32 %v590_v38, 0.0  ;;  %v627_v49 = vmax.f32 %v591_v39, 0.0 }
  0x1c   : > { %v398_v53 = vadd.f32 %v1046_v10, %v355_v46  ;;  %v556_v54 = vadd.f32 %v1051_v11, %v513_v47  ;;  %v791_v55 = vunpack.c.l.bf16 %v923_v42  ;;  %v863_v56 = vunpack.c.l.bf16 %v940_v43  ;;  %v927_v46 = vld [vmem:[%s1022_s26 + $0x38] sm:$0xff]  }
  0x1d   : > { %660 = vst [vmem:[%s1075_s17] sm:$0xff] %v624_v44  ;;  %661 = vst [vmem:[%s1075_s17 + $0x8] sm:$0xff] %v625_v45  ;;  %v399_v58 = vadd.f32 %v1046_v10, %v356_v50  ;;  %v557_v59 = vadd.f32 %v1051_v11, %v514_v51  ;;  %v792_v60 = vunpack.c.h.bf16 %v923_v42  ;;  %v864_v61 = vunpack.c.h.bf16 %v940_v43 }
  0x1e   : > { %662 = vst [vmem:[%s1075_s17 + $0x10] sm:$0xff] %v626_v48  ;;  %663 = vst [vmem:[%s1075_s17 + $0x18] sm:$0xff] %v627_v49  ;;  %v592_v62 = vadd.f32 %v556_v54, %v398_v53  ;;  %v357_v63 = vmul.f32 %v791_v55, %v1032_v0  ;;  %v515_v2 = vmul.f32 %v863_v56, %v1037_v1  ;;  %v795_v3 = vunpack.c.l.bf16 %v924_v52  ;;  %v944_v55 = vld [vmem:[%s1027_s29 + $0x38] sm:$0xff]  }
  0x1f   : > { %v593_v4 = vadd.f32 %v557_v59, %v399_v58  ;;  %v358_v5 = vmul.f32 %v792_v60, %v1032_v0  ;;  %v516_v6 = vmul.f32 %v864_v61, %v1037_v1  ;;  %v867_v7 = vunpack.c.l.bf16 %v941_v57 }
  0x20   : > { %v628_v8 = vmax.f32 %v592_v62, 0.0  ;;  %v400_v9 = vadd.f32 %v1046_v10, %v357_v63  ;;  %v558_v12 = vadd.f32 %v1051_v11, %v515_v2  ;;  %v359_v13 = vmul.f32 %v795_v3, %v1032_v0 }
  0x21   : > { %v629_v16 = vmax.f32 %v593_v4, 0.0  ;;  %v401_v17 = vadd.f32 %v1046_v10, %v358_v5  ;;  %v559_v18 = vadd.f32 %v1051_v11, %v516_v6  ;;  %v517_v19 = vmul.f32 %v867_v7, %v1037_v1  ;;  %v928_v6 = vld [vmem:[%s1022_s26 + $0x40] sm:$0xff]  }
  0x22   : > { %664 = vst [vmem:[%s1075_s17 + $0x20] sm:$0xff] %v628_v8  ;;  %v594_v20 = vadd.f32 %v558_v12, %v400_v9  ;;  %v402_v21 = vadd.f32 %v1046_v10, %v359_v13  ;;  %v796_v22 = vunpack.c.h.bf16 %v924_v52  ;;  %v868_v23 = vunpack.c.h.bf16 %v941_v57  ;;  %v945_v13 = vld [vmem:[%s1027_s29 + $0x40] sm:$0xff]  }
  0x23   : > { %665 = vst [vmem:[%s1075_s17 + $0x28] sm:$0xff] %v629_v16  ;;  %v595_v24 = vadd.f32 %v559_v18, %v401_v17  ;;  %v560_v25 = vadd.f32 %v1051_v11, %v517_v19  ;;  %v799_v26 = vunpack.c.l.bf16 %v925_v14  ;;  %v871_v27 = vunpack.c.l.bf16 %v942_v15 }
  0x24   : > { %v630_v28 = vmax.f32 %v594_v20, 0.0  ;;  %v360_v29 = vmul.f32 %v796_v22, %v1032_v0  ;;  %v518_v30 = vmul.f32 %v868_v23, %v1037_v1  ;;  %v800_v31 = vunpack.c.h.bf16 %v925_v14 }
  0x25   : > { %v631_v33 = vmax.f32 %v595_v24, 0.0  ;;  %v596_v34 = vadd.f32 %v560_v25, %v402_v21  ;;  %v361_v35 = vmul.f32 %v799_v26, %v1032_v0  ;;  %v519_v36 = vmul.f32 %v871_v27, %v1037_v1  ;;  %v929_v26 = vld [vmem:[%s1022_s26 + $0x48] sm:$0xff]  }
  0x26   : > { %666 = vst [vmem:[%s1075_s17 + $0x30] sm:$0xff] %v630_v28  ;;  %v403_v38 = vadd.f32 %v1046_v10, %v360_v29  ;;  %v561_v39 = vadd.f32 %v1051_v11, %v518_v30  ;;  %v362_v40 = vmul.f32 %v800_v31, %v1032_v0  ;;  %v872_v41 = vunpack.c.h.bf16 %v942_v15  ;;  %v946_v27 = vld [vmem:[%s1027_s29 + $0x48] sm:$0xff]  }
  0x27   : > { %667 = vst [vmem:[%s1075_s17 + $0x38] sm:$0xff] %v631_v33  ;;  %v632_v42 = vmax.f32 %v596_v34, 0.0  ;;  %v404_v43 = vadd.f32 %v1046_v10, %v361_v35  ;;  %v562_v44 = vadd.f32 %v1051_v11, %v519_v36  ;;  %v803_v45 = vunpack.c.l.bf16 %v926_v32 }
  0x28   : > { %v597_v47 = vadd.f32 %v561_v39, %v403_v38  ;;  %v405_v48 = vadd.f32 %v1046_v10, %v362_v40  ;;  %v520_v49 = vmul.f32 %v872_v41, %v1037_v1  ;;  %v875_v50 = vunpack.c.l.bf16 %v943_v37  ;;  %v930_v40 = vld [vmem:[%s1022_s26 + $0x50] sm:$0xff]  }
  0x29   : > { %668 = vst [vmem:[%s1075_s17 + $0x40] sm:$0xff] %v632_v42  ;;  %v598_v51 = vadd.f32 %v562_v44, %v404_v43  ;;  %v363_v52 = vmul.f32 %v803_v45, %v1032_v0  ;;  %v804_v53 = vunpack.c.h.bf16 %v926_v32  ;;  %v876_v54 = vunpack.c.h.bf16 %v943_v37  ;;  %v947_v45 = vld [vmem:[%s1027_s29 + $0x50] sm:$0xff]  }
  0x2a   : > { %v633_v56 = vmax.f32 %v597_v47, 0.0  ;;  %v563_v57 = vadd.f32 %v1051_v11, %v520_v49  ;;  %v521_v58 = vmul.f32 %v875_v50, %v1037_v1  ;;  %v807_v59 = vunpack.c.l.bf16 %v927_v46 }
  0x2b   : > { %v634_v60 = vmax.f32 %v598_v51, 0.0  ;;  %v406_v61 = vadd.f32 %v1046_v10, %v363_v52  ;;  %v364_v62 = vmul.f32 %v804_v53, %v1032_v0  ;;  %v522_v63 = vmul.f32 %v876_v54, %v1037_v1 }
  0x2c   : > { %669 = vst [vmem:[%s1075_s17 + $0x48] sm:$0xff] %v633_v56  ;;  %v599_v2 = vadd.f32 %v563_v57, %v405_v48  ;;  %v564_v3 = vadd.f32 %v1051_v11, %v521_v58  ;;  %v365_v4 = vmul.f32 %v807_v59, %v1032_v0  ;;  %v879_v5 = vunpack.c.l.bf16 %v944_v55 }
  0x2d   : > { %670 = vst [vmem:[%s1075_s17 + $0x50] sm:$0xff] %v634_v60  ;;  %v407_v7 = vadd.f32 %v1046_v10, %v364_v62  ;;  %v565_v8 = vadd.f32 %v1051_v11, %v522_v63  ;;  %v808_v9 = vunpack.c.h.bf16 %v927_v46  ;;  %v880_v12 = vunpack.c.h.bf16 %v944_v55  ;;  %v931_v62 = vld [vmem:[%s1022_s26 + $0x58] sm:$0xff]  }
  0x2e   : > { %v635_v14 = vmax.f32 %v599_v2, 0.0  ;;  %v600_v15 = vadd.f32 %v564_v3, %v406_v61  ;;  %v408_v16 = vadd.f32 %v1046_v10, %v365_v4  ;;  %v523_v17 = vmul.f32 %v879_v5, %v1037_v1  ;;  %v948_v5 = vld [vmem:[%s1027_s29 + $0x58] sm:$0xff]  }
  0x2f   : > { %v601_v18 = vadd.f32 %v565_v8, %v407_v7  ;;  %v366_v19 = vmul.f32 %v808_v9, %v1032_v0  ;;  %v524_v20 = vmul.f32 %v880_v12, %v1037_v1  ;;  %v811_v21 = vunpack.c.l.bf16 %v928_v6 }
  0x30   : > { %671 = vst [vmem:[%s1075_s17 + $0x58] sm:$0xff] %v635_v14  ;;  %v636_v22 = vmax.f32 %v600_v15, 0.0  ;;  %v566_v23 = vadd.f32 %v1051_v11, %v523_v17  ;;  %v883_v24 = vunpack.c.l.bf16 %v945_v13  ;;  %v812_v25 = vunpack.c.h.bf16 %v928_v6 }
  0x31   : > { %v637_v28 = vmax.f32 %v601_v18, 0.0  ;;  %v409_v29 = vadd.f32 %v1046_v10, %v366_v19  ;;  %v567_v30 = vadd.f32 %v1051_v11, %v524_v20  ;;  %v367_v31 = vmul.f32 %v811_v21, %v1032_v0  ;;  %v932_v20 = vld [vmem:[%s1022_s26 + $0x60] sm:$0xff]  }
  0x32   : > { %672 = vst [vmem:[%s1075_s17 + $0x60] sm:$0xff] %v636_v22  ;;  %v602_v32 = vadd.f32 %v566_v23, %v408_v16  ;;  %v525_v33 = vmul.f32 %v883_v24, %v1037_v1  ;;  %v368_v34 = vmul.f32 %v812_v25, %v1032_v0  ;;  %v884_v35 = vunpack.c.h.bf16 %v945_v13  ;;  %v949_v25 = vld [vmem:[%s1027_s29 + $0x60] sm:$0xff]  }
  0x33   : > { %673 = vst [vmem:[%s1075_s17 + $0x68] sm:$0xff] %v637_v28  ;;  %v603_v36 = vadd.f32 %v567_v30, %v409_v29  ;;  %v410_v37 = vadd.f32 %v1046_v10, %v367_v31  ;;  %v815_v38 = vunpack.c.l.bf16 %v929_v26  ;;  %v887_v39 = vunpack.c.l.bf16 %v946_v27 }
  0x34   : > { %v638_v41 = vmax.f32 %v602_v32, 0.0  ;;  %v568_v42 = vadd.f32 %v1051_v11, %v525_v33  ;;  %v411_v43 = vadd.f32 %v1046_v10, %v368_v34  ;;  %v526_v44 = vmul.f32 %v884_v35, %v1037_v1  ;;  %v933_v34 = vld [vmem:[%s1022_s26 + $0x68] sm:$0xff]  }
  0x35   : > { %v639_v46 = vmax.f32 %v603_v36, 0.0  ;;  %v369_v47 = vmul.f32 %v815_v38, %v1032_v0  ;;  %v527_v48 = vmul.f32 %v887_v39, %v1037_v1  ;;  %v816_v49 = vunpack.c.h.bf16 %v929_v26 }
  0x36   : > { %674 = vst [vmem:[%s1075_s17 + $0x70] sm:$0xff] %v638_v41  ;;  %v604_v50 = vadd.f32 %v568_v42, %v410_v37  ;;  %v569_v51 = vadd.f32 %v1051_v11, %v526_v44  ;;  %v888_v52 = vunpack.c.h.bf16 %v946_v27  ;;  %v819_v53 = vunpack.c.l.bf16 %v930_v40 }
  0x37   : > { %675 = vst [vmem:[%s1075_s17 + $0x78] sm:$0xff] %v639_v46  ;;  %v412_v54 = vadd.f32 %v1046_v10, %v369_v47  ;;  %v570_v55 = vadd.f32 %v1051_v11, %v527_v48  ;;  %v370_v56 = vmul.f32 %v816_v49, %v1032_v0  ;;  %v891_v57 = vunpack.c.l.bf16 %v947_v45 }
  0x38   : > { %v640_v58 = vmax.f32 %v604_v50, 0.0  ;;  %v605_v59 = vadd.f32 %v569_v51, %v411_v43  ;;  %v528_v60 = vmul.f32 %v888_v52, %v1037_v1  ;;  %v371_v61 = vmul.f32 %v819_v53, %v1032_v0  ;;  %v950_v43 = vld [vmem:[%s1027_s29 + $0x68] sm:$0xff]  }
  0x39   : > { %v606_v63 = vadd.f32 %v570_v55, %v412_v54  ;;  %v413_v2 = vadd.f32 %v1046_v10, %v370_v56  ;;  %v529_v3 = vmul.f32 %v891_v57, %v1037_v1  ;;  %v820_v4 = vunpack.c.h.bf16 %v930_v40  ;;  %v934_v56 = vld [vmem:[%s1022_s26 + $0x70] sm:$0xff]  }
  0x3a   : > { %676 = vst [vmem:[%s1075_s17 + $0x80] sm:$0xff] %v640_v58  ;;  %v641_v6 = vmax.f32 %v605_v59, 0.0  ;;  %v571_v7 = vadd.f32 %v1051_v11, %v528_v60  ;;  %v414_v8 = vadd.f32 %v1046_v10, %v371_v61  ;;  %v892_v9 = vunpack.c.h.bf16 %v947_v45  ;;  %v951_v57 = vld [vmem:[%s1027_s29 + $0x70] sm:$0xff]  }
  0x3b   : > { %v642_v12 = vmax.f32 %v606_v63, 0.0  ;;  %v572_v13 = vadd.f32 %v1051_v11, %v529_v3  ;;  %v372_v14 = vmul.f32 %v820_v4, %v1032_v0  ;;  %v823_v15 = vunpack.c.l.bf16 %v931_v62 }
  0x3c   : > { %677 = vst [vmem:[%s1075_s17 + $0x88] sm:$0xff] %v641_v6  ;;  %v607_v16 = vadd.f32 %v571_v7, %v413_v2  ;;  %v530_v17 = vmul.f32 %v892_v9, %v1037_v1  ;;  %v895_v18 = vunpack.c.l.bf16 %v948_v5  ;;  %v824_v19 = vunpack.c.h.bf16 %v931_v62 }
  0x3d   : > { %678 = vst [vmem:[%s1075_s17 + $0x90] sm:$0xff] %v642_v12  ;;  %v608_v21 = vadd.f32 %v572_v13, %v414_v8  ;;  %v415_v22 = vadd.f32 %v1046_v10, %v372_v14  ;;  %v373_v23 = vmul.f32 %v823_v15, %v1032_v0  ;;  %v896_v24 = vunpack.c.h.bf16 %v948_v5  ;;  %v935_v14 = vld [vmem:[%s1022_s26 + $0x78] sm:$0xff]  }
  0x3e   : > { %v643_v26 = vmax.f32 %v607_v16, 0.0  ;;  %v573_v27 = vadd.f32 %v1051_v11, %v530_v17  ;;  %v531_v28 = vmul.f32 %v895_v18, %v1037_v1  ;;  %v374_v29 = vmul.f32 %v824_v19, %v1032_v0  ;;  %v952_v15 = vld [vmem:[%s1027_s29 + $0x78] sm:$0xff]  }
  0x3f   : > { %v644_v30 = vmax.f32 %v608_v21, 0.0  ;;  %v416_v31 = vadd.f32 %v1046_v10, %v373_v23  ;;  %v532_v32 = vmul.f32 %v896_v24, %v1037_v1  ;;  %v827_v33 = vunpack.c.l.bf16 %v932_v20 }
  0x40   : > { %679 = vst [vmem:[%s1075_s17 + $0x98] sm:$0xff] %v643_v26  ;;  %v609_v35 = vadd.f32 %v573_v27, %v415_v22  ;;  %v574_v36 = vadd.f32 %v1051_v11, %v531_v28  ;;  %v417_v37 = vadd.f32 %v1046_v10, %v374_v29  ;;  %v899_v38 = vunpack.c.l.bf16 %v949_v25  ;;  %v936_v28 = vld [vmem:[%s1022_s26 + $0x80] sm:$0xff]  }
  0x41   : > { %680 = vst [vmem:[%s1075_s17 + $0xa0] sm:$0xff] %v644_v30  ;;  %v575_v39 = vadd.f32 %v1051_v11, %v532_v32  ;;  %v375_v40 = vmul.f32 %v827_v33, %v1032_v0  ;;  %v828_v41 = vunpack.c.h.bf16 %v932_v20  ;;  %v900_v42 = vunpack.c.h.bf16 %v949_v25 }
  0x42   : > { %v645_v44 = vmax.f32 %v609_v35, 0.0  ;;  %v610_v45 = vadd.f32 %v574_v36, %v416_v31  ;;  %v533_v46 = vmul.f32 %v899_v38, %v1037_v1  ;;  %v831_v47 = vunpack.c.l.bf16 %v933_v34 }
  0x43   : > { %v611_v48 = vadd.f32 %v575_v39, %v417_v37  ;;  %v418_v49 = vadd.f32 %v1046_v10, %v375_v40  ;;  %v376_v50 = vmul.f32 %v828_v41, %v1032_v0  ;;  %v534_v51 = vmul.f32 %v900_v42, %v1037_v1  ;;  %v953_v37 = vld [vmem:[%s1027_s29 + $0x80] sm:$0xff]  }
  0x44   : > { %681 = vst [vmem:[%s1075_s17 + $0xa8] sm:$0xff] %v645_v44  ;;  %v646_v52 = vmax.f32 %v610_v45, 0.0  ;;  %v576_v53 = vadd.f32 %v1051_v11, %v533_v46  ;;  %v377_v54 = vmul.f32 %v831_v47, %v1032_v0  ;;  %v903_v55 = vunpack.c.l.bf16 %v950_v43 }
  0x45   : > { %v647_v58 = vmax.f32 %v611_v48, 0.0  ;;  %v419_v59 = vadd.f32 %v1046_v10, %v376_v50  ;;  %v577_v60 = vadd.f32 %v1051_v11, %v534_v51  ;;  %v832_v61 = vunpack.c.h.bf16 %v933_v34  ;;  %v937_v50 = vld [vmem:[%s1022_s26 + $0x88] sm:$0xff]  }
  0x46   : > { %682 = vst [vmem:[%s1075_s17 + $0xb0] sm:$0xff] %v646_v52  ;;  %v612_v62 = vadd.f32 %v576_v53, %v418_v49  ;;  %v420_v63 = vadd.f32 %v1046_v10, %v377_v54  ;;  %v535_v2 = vmul.f32 %v903_v55, %v1037_v1  ;;  %v904_v3 = vunpack.c.h.bf16 %v950_v43  ;;  %v954_v55 = vld [vmem:[%s1027_s29 + $0x88] sm:$0xff]  }
  0x47   : > { %683 = vst [vmem:[%s1075_s17 + $0xb8] sm:$0xff] %v647_v58  ;;  %v613_v4 = vadd.f32 %v577_v60, %v419_v59  ;;  %v378_v5 = vmul.f32 %v832_v61, %v1032_v0  ;;  %v835_v6 = vunpack.c.l.bf16 %v934_v56  ;;  %v907_v7 = vunpack.c.l.bf16 %v951_v57 }
  0x48   : > { %v648_v8 = vmax.f32 %v612_v62, 0.0  ;;  %v578_v9 = vadd.f32 %v1051_v11, %v535_v2  ;;  %v536_v12 = vmul.f32 %v904_v3, %v1037_v1  ;;  %v836_v13 = vunpack.c.h.bf16 %v934_v56 }
  0x49   : > { %v649_v16 = vmax.f32 %v613_v4, 0.0  ;;  %v421_v17 = vadd.f32 %v1046_v10, %v378_v5  ;;  %v379_v18 = vmul.f32 %v835_v6, %v1032_v0  ;;  %v537_v19 = vmul.f32 %v907_v7, %v1037_v1 }
  0x4a   : > { %684 = vst [vmem:[%s1075_s17 + $0xc0] sm:$0xff] %v648_v8  ;;  %v614_v20 = vadd.f32 %v578_v9, %v420_v63  ;;  %v579_v21 = vadd.f32 %v1051_v11, %v536_v12  ;;  %v380_v22 = vmul.f32 %v836_v13, %v1032_v0  ;;  %v908_v23 = vunpack.c.h.bf16 %v951_v57 }
  0x4b   : > { %685 = vst [vmem:[%s1075_s17 + $0xc8] sm:$0xff] %v649_v16  ;;  %v422_v24 = vadd.f32 %v1046_v10, %v379_v18  ;;  %v580_v25 = vadd.f32 %v1051_v11, %v537_v19  ;;  %v839_v26 = vunpack.c.l.bf16 %v935_v14  ;;  %v911_v27 = vunpack.c.l.bf16 %v952_v15 }
  0x4c   : > { %v650_v29 = vmax.f32 %v614_v20, 0.0  ;;  %v615_v30 = vadd.f32 %v579_v21, %v421_v17  ;;  %v423_v31 = vadd.f32 %v1046_v10, %v380_v22  ;;  %v538_v32 = vmul.f32 %v908_v23, %v1037_v1 }
  0x4d   : > { %v616_v33 = vadd.f32 %v580_v25, %v422_v24  ;;  %v381_v34 = vmul.f32 %v839_v26, %v1032_v0  ;;  %v539_v35 = vmul.f32 %v911_v27, %v1037_v1  ;;  %v840_v36 = vunpack.c.h.bf16 %v935_v14 }
  0x4e   : > { %686 = vst [vmem:[%s1075_s17 + $0xd0] sm:$0xff] %v650_v29  ;;  %v651_v38 = vmax.f32 %v615_v30, 0.0  ;;  %v581_v39 = vadd.f32 %v1051_v11, %v538_v32  ;;  %v912_v40 = vunpack.c.h.bf16 %v952_v15  ;;  %v843_v41 = vunpack.c.l.bf16 %v936_v28 }
  0x4f   : > { %v652_v42 = vmax.f32 %v616_v33, 0.0  ;;  %v424_v43 = vadd.f32 %v1046_v10, %v381_v34  ;;  %v582_v44 = vadd.f32 %v1051_v11, %v539_v35  ;;  %v382_v45 = vmul.f32 %v840_v36, %v1032_v0 }
  0x50   : > { %687 = vst [vmem:[%s1075_s17 + $0xd8] sm:$0xff] %v651_v38  ;;  %v617_v46 = vadd.f32 %v581_v39, %v423_v31  ;;  %v540_v47 = vmul.f32 %v912_v40, %v1037_v1  ;;  %v383_v48 = vmul.f32 %v843_v41, %v1032_v0  ;;  %v915_v49 = vunpack.c.l.bf16 %v953_v37 }
  0x51   : > { %688 = vst [vmem:[%s1075_s17 + $0xe0] sm:$0xff] %v652_v42  ;;  %v618_v51 = vadd.f32 %v582_v44, %v424_v43  ;;  %v425_v52 = vadd.f32 %v1046_v10, %v382_v45  ;;  %v844_v53 = vunpack.c.h.bf16 %v936_v28  ;;  %v916_v54 = vunpack.c.h.bf16 %v953_v37 }
  0x52   : > { %v653_v56 = vmax.f32 %v617_v46, 0.0  ;;  %v583_v57 = vadd.f32 %v1051_v11, %v540_v47  ;;  %v426_v58 = vadd.f32 %v1046_v10, %v383_v48  ;;  %v541_v59 = vmul.f32 %v915_v49, %v1037_v1 }
  0x53   : > { %v654_v60 = vmax.f32 %v618_v51, 0.0  ;;  %v384_v61 = vmul.f32 %v844_v53, %v1032_v0  ;;  %v542_v62 = vmul.f32 %v916_v54, %v1037_v1  ;;  %v847_v63 = vunpack.c.l.bf16 %v937_v50 }
  0x54   : > { %689 = vst [vmem:[%s1075_s17 + $0xe8] sm:$0xff] %v653_v56  ;;  %v619_v2 = vadd.f32 %v583_v57, %v425_v52  ;;  %v584_v3 = vadd.f32 %v1051_v11, %v541_v59  ;;  %v919_v4 = vunpack.c.l.bf16 %v954_v55  ;;  %v848_v5 = vunpack.c.h.bf16 %v937_v50 }
  0x55   : > { %690 = vst [vmem:[%s1075_s17 + $0xf0] sm:$0xff] %v654_v60  ;;  %v427_v6 = vadd.f32 %v1046_v10, %v384_v61  ;;  %v585_v7 = vadd.f32 %v1051_v11, %v542_v62  ;;  %v385_v8 = vmul.f32 %v847_v63, %v1032_v0  ;;  %v920_v9 = vunpack.c.h.bf16 %v954_v55 }
  0x56   : > { %v655_v12 = vmax.f32 %v619_v2, 0.0  ;;  %v620_v13 = vadd.f32 %v584_v3, %v426_v58  ;;  %v543_v14 = vmul.f32 %v919_v4, %v1037_v1  ;;  %v386_v15 = vmul.f32 %v848_v5, %v1032_v0 }
  0x57   : > { %v621_v16 = vadd.f32 %v585_v7, %v427_v6  ;;  %v428_v17 = vadd.f32 %v1046_v10, %v385_v8  ;;  %v544_v18 = vmul.f32 %v920_v9, %v1037_v1 }
  0x58   : > { %691 = vst [vmem:[%s1075_s17 + $0xf8] sm:$0xff] %v655_v12  ;;  %v656_v19 = vmax.f32 %v620_v13, 0.0  ;;  %v586_v20 = vadd.f32 %v1051_v11, %v543_v14  ;;  %v429_v21 = vadd.f32 %v1046_v10, %v386_v15 }
  0x59   : > { %v657_v22 = vmax.f32 %v621_v16, 0.0  ;;  %v587_v23 = vadd.f32 %v1051_v11, %v544_v18 }
  0x5a   : > { %692 = vst [vmem:[%s1075_s17 + $0x100] sm:$0xff] %v656_v19  ;;  %v622_v24 = vadd.f32 %v586_v20, %v428_v17 }
  0x5b   : > { %693 = vst [vmem:[%s1075_s17 + $0x108] sm:$0xff] %v657_v22  ;;  %v623_v0 = vadd.f32 %v587_v23, %v429_v21 }
  0x5c   : > { %v658_v25 = vmax.f32 %v622_v24, 0.0 }
  0x5d   : > { %v659_v26 = vmax.f32 %v623_v0, 0.0 }
  0x5e   : > { %694 = vst [vmem:[%s1075_s17 + $0x110] sm:$0xff] %v658_v25 }
  0x5f   : > { %695 = vst [vmem:[%s1075_s17 + $0x118] sm:$0xff] %v659_v26 }
  0x60 PF: > { %s16_s21 = sadd.s32 1, %s971_s21  }
  0x61   : > { %p13_p4 = scmp.ge.s32.totalorder %s16_s21, 4  }
  0x63   :  { %15 = sbr.rel (!%p13_p4) target bundleno = 1 (0x1), region = 77 }

// kernel: basic_block_forward.4
= control target key start
LH: loop header
LB: loop body
LE: loop exit
PB: predicated region body
PF: predicated region fallthrough
CT: control target
= control target key end

     0   :  { %s5341_s18 = smov 0   ;;  %s8003_s0 = inlined_call_operand.vmem [shape: bf16[2,288,128], index: 0, kind: input, shape index: {}]   ;;  %s8004_s1 = inlined_call_operand.vmem [shape: f32[1,128], index: 1, kind: input, shape index: {}]   ;;  %s8005_s2 = inlined_call_operand.vmem [shape: f32[1,128], index: 2, kind: input, shape index: {}]   ;;  %s8006_s3 = inlined_call_operand.vmem [shape: bf16[3,384,128], index: 3, kind: input, shape index: {}]   ;;  %s8007_s4 = inlined_call_operand.vmem [shape: bf16[2,288,128], index: 4, kind: output, shape index: {0}]   ;;  %s8008_s5 = inlined_call_operand.vmem [shape: f32[2,2,128], index: 5, kind: output, shape index: {1}]  }
   0x1 LB: > { %s4501_s19 = sadd.s32 4294967295, %s5308_s18   ;;  %p4505_p0 = scmp.ge.s32.totalorder %s5308_s18, 1  ;;  %s5308_s18 = sphi %s5341_s18, %s16_s18  }
   0x2   : > { %p190_p1 = scmp.lt.s32.totalorder %s5308_s18, 3 }
   0x4   : > { %p191_p2 = pnand %p4505_p0, %p190_p1 }
   0x6   : > { %194 = sbr.rel (%p191_p2) target bundleno = 720 (0x2d0), region = 36 }
   0xd   : > { %v5209_v0 = vld [vmem:[%s8006_s3 + $0xc0] sm:$0xff]   ;;  %v5310_v1 = vmov 0   ;;  %p222_p3 = scmp.lt.s32.totalorder %s4501_s19, 1  ;;  %v5211_v3 = vld [vmem:[%s8006_s3 + $0xc8] sm:$0xff]   ;;  %v435_v4 = vlaneseq  ;;  %v5214_v6 = vld [vmem:[%s8006_s3 + $0x150] sm:$0xff]   ;;  %vm1025_vm0 = vcmask 1046528  }
   0xe   : > { %1738 = vmatprep.subr.bf16.mxu0 %v5310_v1  ;;  %237 = vst [vmem:[#allocation2] sm:$0xff] %v5310_v1  ;;  %238 = vst [vmem:[#allocation2 + $0x8] sm:$0xff] %v5310_v1  ;;  %v5360_v2 = vld [vmem:[%s8006_s3 + $0x140] sm:$0xff]   ;;  %v5212_v5 = vld [vmem:[%s8006_s3 + $0x148] sm:$0xff]   ;;  %vm1185_vm7 = vsmask.f32 256 }
   0xf   : > { %239 = vst [vmem:[#allocation2 + $0xa0] sm:$0xff] %v5310_v1  ;;  %240 = vst [vmem:[#allocation2 + $0xa8] sm:$0xff] %v5310_v1  ;;  %1739 = vmatpush1.bf16.msra.mxu0 %v5209_v0  ;;  %5183 = vmatprep.subr.bf16.mxu1 %v5360_v2  ;;  %s8392_s19 = smov (!%p222_p3, %s4501_s19), 1  ;;  %v5213_v7 = vld [vmem:[%s8006_s3 + $0xd0] sm:$0xff]   ;;  %v5379_v8 = vshrl.u32 %v435_v4, 7  ;;  %v5215_v9 = vld [vmem:[%s8006_s3 + $0xd8] sm:$0xff]  }
  0x10   : > { %1740 = vmatprep.subr.bf16.mxu0 %v5310_v1  ;;  %5191 = vmatpush3.bf16.msra.mxu1 %v5360_v2  ;;  %v5216_v11 = vld [vmem:[%s8006_s3 + $0x158] sm:$0xff]   ;;  %s5199_s11 = smul.u32 144, %s8392_s19  ;;  %v5218_v18 = vld [vmem:[%s8006_s3 + $0x160] sm:$0xff]   ;;  %v5220_v24 = vld [vmem:[%s8006_s3 + $0x168] sm:$0xff]  }
  0x11   : > { %5184 = vmatprep.subr.bf16.mxu1 %v5212_v5  ;;  %v5386_v10 = vadd.s32 16, %v5379_v8  ;;  %v5393_v12 = vadd.s32 24, %v5379_v8  ;;  %v5396_v13 = vadd.s32 32, %v5379_v8  ;;  %v5400_v14 = vadd.s32 40, %v5379_v8  ;;  %v5217_v21 = vld [vmem:[%s8006_s3 + $0xe0] sm:$0xff]   ;;  %v5219_v29 = vld [vmem:[%s8006_s3 + $0xe8] sm:$0xff]  }
  0x12   : > { %v5403_v15 = vadd.s32 48, %v5379_v8  ;;  %v5406_v16 = vadd.s32 56, %v5379_v8  ;;  %v5409_v17 = vadd.s32 64, %v5379_v8  ;;  %v5416_v20 = vadd.s32 72, %v5379_v8  ;;  %s5426_s20 = scalar_lea.vmem %s8003_s0, %s5199_s11  ;;  %v5464_v45 = vld [vmem:[%s8004_s1] ss:$0 sm:$0xff] }
  0x13   : > { %1741 = vmatpush1.bf16.msra.mxu0 %v5211_v3  ;;  %v474_v19 = vcvt.s32.f32 %v5386_v10  ;;  %v5429_v22 = vadd.s32 80, %v5379_v8  ;;  %v472_v23 = vcvt.s32.f32 %v5379_v8  ;;  %v475_v25 = vcvt.s32.f32 %v5393_v12  ;;  %v4915_v34 = vld [vmem:[%s5426_s20 + $0x8] sm:$0xff]   ;;  %v4916_v35 = vld [vmem:[%s5426_s20 + $0x10] sm:$0xff]   ;;  %v4917_v36 = vld [vmem:[%s5426_s20 + $0x18] sm:$0xff]  }
  0x14   : > { %1742 = vmatprep.subr.bf16.mxu0 %v5310_v1  ;;  %5192 = vmatpush3.bf16.msra.mxu1 %v5212_v5  ;;  %v476_v26 = vcvt.s32.f32 %v5396_v13  ;;  %v477_v27 = vcvt.s32.f32 %v5400_v14  ;;  %v478_v28 = vcvt.s32.f32 %v5403_v15  ;;  %v479_v30 = vcvt.s32.f32 %v5406_v16  ;;  %v5469_v46 = vld [vmem:[%s8005_s2] ss:$0 sm:$0xff]  ;;  %v5222_v51 = vld [vmem:[%s8006_s3 + $0x170] sm:$0xff]   ;;  %v4919_v15 = vld [vmem:[%s5426_s20 + $0x28] sm:$0xff]  }
  0x15   : > { %5185 = vmatprep.subr.bf16.mxu1 %v5214_v6  ;;  %v480_v31 = vcvt.s32.f32 %v5409_v17  ;;  %v5446_v32 = vadd.s32 88, %v5379_v8  ;;  %v5449_v33 = vadd.s32 96, %v5379_v8  ;;  %v511_v37 = vmul.f32 0.055555556, %v474_v19  ;;  %v5221_v60 = vld [vmem:[%s8006_s3 + $0xf0] sm:$0xff]   ;;  %v5225_v10 = vld [vmem:[%s8006_s3 + $0x100] sm:$0xff]  }
  0x16   : > { %v481_v38 = vcvt.s32.f32 %v5416_v20  ;;  %v482_v39 = vcvt.s32.f32 %v5429_v22  ;;  %v5459_v40 = vadd.s32 104, %v5379_v8  ;;  %v4759_v41 = vunpack.c.l.bf16 %v4915_v34 }
  0x17   : > { %1743 = vmatpush1.bf16.msra.mxu0 %v5213_v7  ;;  %v4760_v42 = vunpack.c.h.bf16 %v4915_v34  ;;  %v4763_v43 = vunpack.c.l.bf16 %v4916_v35  ;;  %v4764_v44 = vunpack.c.h.bf16 %v4916_v35  ;;  %v4767_v47 = vunpack.c.l.bf16 %v4917_v36 }
  0x18   : > { %1744 = vmatprep.subr.bf16.mxu0 %v5310_v1  ;;  %5193 = vmatpush3.bf16.msra.mxu1 %v5214_v6  ;;  %v4768_v48 = vunpack.c.h.bf16 %v4917_v36  ;;  %v512_v49 = vmul.f32 0.055555556, %v475_v25  ;;  %v513_v50 = vmul.f32 0.055555556, %v476_v26  ;;  %v322_v52 = vmul.f32 %v4759_v41, %v5464_v45 }
  0x19   : > { %5186 = vmatprep.subr.bf16.mxu1 %v5216_v11  ;;  %v323_v53 = vmul.f32 %v4760_v42, %v5464_v45  ;;  %v324_v54 = vmul.f32 %v4763_v43, %v5464_v45  ;;  %v325_v55 = vmul.f32 %v4764_v44, %v5464_v45  ;;  %v326_v56 = vmul.f32 %v4767_v47, %v5464_v45 }
  0x1a   : > { %v327_v57 = vmul.f32 %v4768_v48, %v5464_v45  ;;  %v514_v58 = vmul.f32 0.055555556, %v477_v27  ;;  %v515_v59 = vmul.f32 0.055555556, %v478_v28  ;;  %v365_v61 = vadd.f32 %v5469_v46, %v322_v52 }
  0x1b   : > { %1745 = vmatpush1.bf16.msra.mxu0 %v5215_v9  ;;  %v366_v62 = vadd.f32 %v5469_v46, %v323_v53  ;;  %v367_v63 = vadd.f32 %v5469_v46, %v324_v54  ;;  %v368_v0 = vadd.f32 %v5469_v46, %v325_v55  ;;  %v369_v3 = vadd.f32 %v5469_v46, %v326_v56 }
  0x1c   : > { %1746 = vmatprep.subr.bf16.mxu0 %v5310_v1  ;;  %5194 = vmatpush3.bf16.msra.mxu1 %v5216_v11  ;;  %v370_v4 = vadd.f32 %v5469_v46, %v327_v57  ;;  %v516_v5 = vmul.f32 0.055555556, %v479_v30  ;;  %v547_v6 = vfloor.f32 %v511_v37  ;;  %v401_v7 = vmax.f32 %v365_v61, 0.0 }
  0x1d   : > { %5187 = vmatprep.subr.bf16.mxu1 %v5218_v18  ;;  %v402_v9 = vmax.f32 %v366_v62, 0.0  ;;  %v403_v11 = vmax.f32 %v367_v63, 0.0  ;;  %v404_v34 = vmax.f32 %v368_v0, 0.0  ;;  %v405_v35 = vmax.f32 %v369_v3, 0.0 }
  0x1e   : > { %v548_v36 = vfloor.f32 %v512_v49  ;;  %v549_v41 = vfloor.f32 %v513_v50  ;;  %v550_v37 = vfloor.f32 %v514_v58  ;;  %v551_v42 = vfloor.f32 %v515_v59  ;;  %v5226_v59 = vld [vmem:[%s8006_s3 + $0x108] sm:$0xff]  }
  0x1f   : > { %1747 = vmatpush1.bf16.msra.mxu0 %v5217_v21  ;;  %v483_v21 = vcvt.s32.f32 %v5446_v32  ;;  %v552_v43 = vfloor.f32 %v516_v5  ;;  %v583_v44 = vmul.f32 18.0, %v547_v6  ;;  %v406_v47 = vmax.f32 %v370_v4, 0.0 }
  0x20   : > { %1748 = vmatprep.subr.bf16.mxu0 %v5310_v1  ;;  %5195 = vmatpush3.bf16.msra.mxu1 %v5218_v18  ;;  %v4918_v18 = vld [vmem:[%s5426_s20 + $0x20] sm:$0xff]   ;;  %v584_v48 = vmul.f32 18.0, %v548_v36  ;;  %v585_v52 = vmul.f32 18.0, %v549_v41  ;;  %v586_v54 = vmul.f32 18.0, %v550_v37  ;;  %v587_v55 = vmul.f32 18.0, %v551_v42  ;;  %v5228_v42 = vld [vmem:[%s8006_s3 + $0x110] sm:$0xff]  }
  0x21   : > { %5188 = vmatprep.subr.bf16.mxu1 %v5220_v24  ;;  %v4771_v53 = vunpack.c.l.bf16 %v4918_v18  ;;  %v588_v49 = vmul.f32 18.0, %v552_v43  ;;  %v5512_v50 = vsub.f32 %v474_v19, %v583_v44  ;;  %v4772_v58 = vunpack.c.h.bf16 %v4918_v18 }
  0x22   : > { %v5516_v56 = vsub.f32 %v475_v25, %v584_v48  ;;  %v5520_v57 = vsub.f32 %v476_v26, %v585_v52  ;;  %v5528_v19 = vsub.f32 %v477_v27, %v586_v54  ;;  %v5532_v12 = vsub.f32 %v478_v28, %v587_v55 }
  0x23   : > { %1749 = vmatpush1.bf16.msra.mxu0 %v5219_v29  ;;  %v5224_v29 = vld [vmem:[%s8006_s3 + $0x178] sm:$0xff]   ;;  %8150 = vst [vmem:[#allocation3_spill] sm:$0xff] %v5512_v50  ;;  %v5536_v13 = vsub.f32 %v479_v30, %v588_v49  ;;  %vm655_vm1 = vcmp.lt.f32.partialorder %v5512_v50, 16.0  ;;  %v329_v25 = vmul.f32 %v4772_v58, %v5464_v45  ;;  %v517_v3 = vmul.f32 0.055555556, %v480_v31 }
  0x24   : > { %1750 = vmatprep.subr.bf16.mxu0 %v5310_v1  ;;  %5196 = vmatpush3.bf16.msra.mxu1 %v5220_v24  ;;  %v5223_v24 = vld [vmem:[%s8006_s3 + $0xf8] sm:$0xff]   ;;  %8151 = vst [vmem:[#allocation4_spill] sm:$0xff] %v5516_v56  ;;  %8152 = vst [vmem:[#allocation5_spill] sm:$0xff] %v5520_v57  ;;  %vm656_vm2 = vcmp.lt.f32.partialorder %v5516_v56, 16.0  ;;  %vm657_vm3 = vcmp.lt.f32.partialorder %v5520_v57, 16.0  ;;  %v763_v14 = vsel %vm655_vm1, %v401_v7, 0.0  ;;  %v4775_v5 = vunpack.c.l.bf16 %v4919_v15 }
  0x25   : > { %5189 = vmatprep.subr.bf16.mxu1 %v5222_v51  ;;  %8153 = vst [vmem:[#allocation6_spill] sm:$0xff] %v5528_v19  ;;  %8154 = vst [vmem:[#allocation7_spill] sm:$0xff] %v5532_v12  ;;  %vm658_vm4 = vcmp.lt.f32.partialorder %v5528_v19, 16.0  ;;  %vm659_vm5 = vcmp.lt.f32.partialorder %v5532_v12, 16.0  ;;  %vm660_vm6 = vcmp.lt.f32.partialorder %v5536_v13, 16.0  ;;  %v764_v16 = vsel %vm656_vm2, %v402_v9, 0.0 }
  0x26   : > { %8155 = vst [vmem:[#allocation8_spill] sm:$0xff] %v5536_v13  ;;  %v765_v26 = vsel %vm657_vm3, %v403_v11, 0.0  ;;  %v766_v27 = vsel %vm658_vm4, %v404_v34, 0.0  ;;  %v767_v28 = vsel %vm659_vm5, %v405_v35, 0.0  ;;  %v768_v30 = vsel %vm660_vm6, %v406_v47, 0.0  ;;  %v4929_v12 = vld [vmem:[%s5426_s20 + $0x78] sm:$0xff]  }
  0x27   : > { %1751 = vmatpush1.bf16.msra.mxu0 %v5221_v60  ;;  %v5563_v60 = vpack.c.bf16 %v764_v16, %v763_v14  ;;  %v799_v61 = vpack.c.bf16 %v766_v27, %v765_v26  ;;  %v5565_v62 = vpack.c.bf16 %v768_v30, %v767_v28  ;;  %v372_v0 = vadd.f32 %v5469_v46, %v329_v25  ;;  %v5230_v14 = vld [vmem:[%s8006_s3 + $0x118] sm:$0xff]   ;;  %v4920_v25 = vld [vmem:[%s5426_s20 + $0x30] sm:$0xff]  }
  0x28   : > { %1752 = vmatprep.subr.bf16.mxu0 %v5310_v1  ;;  %5197 = vmatpush3.bf16.msra.mxu1 %v5222_v51  ;;  %v328_v51 = vmul.f32 %v4771_v53, %v5464_v45  ;;  %v518_v4 = vmul.f32 0.055555556, %v481_v38  ;;  %v4776_v47 = vunpack.c.h.bf16 %v4919_v15  ;;  %v330_v48 = vmul.f32 %v4775_v5, %v5464_v45 }
  0x29   : > { %5190 = vmatprep.subr.bf16.mxu1 %v5224_v29  ;;  %816 = vst [vmem:[#allocation2 + $0x18] sm:$0xff] %v5563_v60  ;;  %817 = vst [vmem:[#allocation2 + $0x20] sm:$0xff] %v799_v61  ;;  %v5577_v6 = vshrl.u32 %v5563_v60, 16  ;;  %v5579_v7 = vshll.u32 %v799_v61, 16  ;;  %v5581_v9 = vshrl.u32 %v799_v61, 16  ;;  %v5584_v11 = vshll.u32 %v5565_v62, 16 }
  0x2a   : > { %v371_v63 = vadd.f32 %v5469_v46, %v328_v51  ;;  %818 = vst [vmem:[#allocation2 + $0x28] sm:$0xff] %v5565_v62  ;;  %v5587_v18 = vshrl.u32 %v5565_v62, 16  ;;  %v1033_v34 = vrot.slane %v799_v61, 1  ;;  %v1035_v35 = vrot.slane %v5565_v62, 1 }
  0x2b   : > { %1753 = vmatpush1.bf16.msra.mxu0 %v5223_v24  ;;  %v408_v41 = vmax.f32 %v372_v0, 0.0  ;;  %v553_v24 = vfloor.f32 %v517_v3  ;;  %v554_v37 = vfloor.f32 %v518_v4  ;;  %v331_v51 = vmul.f32 %v4776_v47, %v5464_v45  ;;  %v4921_v3 = vld [vmem:[%s5426_s20 + $0x38] sm:$0xff]  }
  0x2c   : > { %1754 = vmatprep.subr.bf16.mxu0 %v5310_v1  ;;  %5198 = vmatpush3.bf16.msra.mxu1 %v5224_v29  ;;  %v8034_v29 = vrot.slane %v5563_v60, 1  ;;  %v407_v36 = vmax.f32 %v371_v63, 0.0  ;;  %v5602_v44 = vsel %vm1025_vm0, %v1033_v34, %v1035_v35  ;;  %v519_v26 = vmul.f32 0.055555556, %v482_v39 }
  0x2d   : > { %2556 = vmatprep.subr.bf16.mxu1 %v5310_v1  ;;  %v8019_v54 = vshrl.u32 %v5602_v44, 16  ;;  %v8018_v55 = vshll.u32 %v5602_v44, 16  ;;  %v589_v49 = vmul.f32 18.0, %v553_v24  ;;  %v590_v58 = vmul.f32 18.0, %v554_v37  ;;  %v5232_v37 = vld [vmem:[%s8006_s3 + $0x120] sm:$0xff]  }
  0x2e   : > { %v5597_v43 = vsel %vm1025_vm0, %v8034_v29, %v1033_v34  ;;  %v520_v27 = vmul.f32 0.055555556, %v483_v21  ;;  %v555_v17 = vfloor.f32 %v519_v26  ;;  %v4784_v26 = vunpack.c.h.bf16 %v4921_v3 }
  0x2f   : > { %1755 = vmatpush1.bf16.msra.mxu0 %v5225_v10  ;;  %v8025_v52 = vshrl.u32 %v5597_v43, 16  ;;  %v8021_v53 = vshll.u32 %v5597_v43, 16  ;;  %v373_v10 = vadd.f32 %v5469_v46, %v330_v48  ;;  %v5620_v16 = vrot.slane %v8019_v54, 7 }
  0x30   : > { %1756 = vmatprep.subr.bf16.mxu0 %v5310_v1  ;;  %v5628_v28 = vsub.f32 %v480_v31, %v589_v49  ;;  %v5632_v30 = vsub.f32 %v481_v38, %v590_v58  ;;  %v556_v31 = vfloor.f32 %v520_v27  ;;  %v4779_v38 = vunpack.c.l.bf16 %v4920_v25 }
  0x31   : > { %v1231_v15 = vrot.slane %v8025_v52, 7  ;;  %v409_v61 = vmax.f32 %v373_v10, 0.0  ;;  %v1253_v0 = vor.u32 %v8018_v55, %v5620_v16  ;;  %v591_v24 = vmul.f32 18.0, %v555_v17 }
  0x32   : > { %8156 = vst [vmem:[#allocation9_spill] sm:$0xff] %v5628_v28  ;;  %8157 = vst [vmem:[#allocation10_spill] sm:$0xff] %v5632_v30  ;;  %vm661_vm8 = vcmp.lt.f32.partialorder %v5628_v28, 16.0  ;;  %vm662_vm9 = vcmp.lt.f32.partialorder %v5632_v30, 16.0  ;;  %v592_v47 = vmul.f32 18.0, %v556_v31  ;;  %v4780_v48 = vunpack.c.h.bf16 %v4920_v25 }
  0x33   : > { %1757 = vmatpush1.bf16.msra.mxu0 %v5226_v59  ;;  %v374_v59 = vadd.f32 %v5469_v46, %v331_v51  ;;  %v5638_v63 = vor.u32 %v8021_v53, %v1231_v15  ;;  %v1254_v4 = vsel %vm1185_vm7, %v1231_v15, %v1253_v0  ;;  %v769_v5 = vsel %vm661_vm8, %v407_v36, 0.0  ;;  %v5847_v53 = vld [vmem:[#allocation2] sm:$0xff] }
  0x34   : > { %1758 = vmatprep.subr.bf16.mxu0 %v5310_v1  ;;  %v770_v34 = vsel %vm662_vm9, %v408_v41, 0.0  ;;  %5047 = vmatprep.mubr.bf16.mxu1 %v1254_v4  ;;  %v332_v49 = vmul.f32 %v4779_v38, %v5464_v45  ;;  %v5658_v36 = vsub.f32 %v482_v39, %v591_v24  ;;  %v484_v41 = vcvt.s32.f32 %v5449_v33  ;;  %v5234_v33 = vld [vmem:[%s8006_s3 + $0x128] sm:$0xff]  }
  0x35   : > { %v410_v20 = vmax.f32 %v374_v59, 0.0  ;;  %v485_v58 = vcvt.s32.f32 %v5459_v40  ;;  %v4783_v51 = vunpack.c.l.bf16 %v4921_v3  ;;  %v333_v25 = vmul.f32 %v4780_v48, %v5464_v45  ;;  %v5227_v48 = vld [vmem:[%s8006_s3] sm:$0xff]  }
  0x36   : > { %8158 = vst [vmem:[#allocation11_spill] sm:$0xff] %v5658_v36  ;;  %v375_v15 = vadd.f32 %v5469_v46, %v332_v49  ;;  %vm663_vm10 = vcmp.lt.f32.partialorder %v5658_v36, 16.0  ;;  %v521_v22 = vmul.f32 0.055555556, %v484_v41  ;;  %v335_v4 = vmul.f32 %v4784_v26, %v5464_v45 }
  0x37   : > { %1759 = vmatpush1.bf16.msra.mxu0 %v5228_v42  ;;  %v801_v42 = vpack.c.bf16 %v770_v34, %v769_v5  ;;  %v522_v39 = vmul.f32 0.055555556, %v485_v58  ;;  %v771_v40 = vsel %vm663_vm10, %v409_v61, 0.0  ;;  %v334_v3 = vmul.f32 %v4783_v51, %v5464_v45 }
  0x38   : > { %1760 = vmatprep.subr.bf16.mxu0 %v5310_v1  ;;  %v411_v62 = vmax.f32 %v375_v15, 0.0  ;;  %v557_v31 = vfloor.f32 %v521_v22  ;;  %v5693_v5 = vadd.s32 112, %v5379_v8  ;;  %v5713_v51 = vadd.f32 %v5469_v46, %v335_v4 }
  0x39   : > { %819 = vst [vmem:[#allocation2 + $0x30] sm:$0xff] %v801_v42  ;;  %v1037_v10 = vrot.slane %v801_v42, 1  ;;  %v558_v38 = vfloor.f32 %v522_v39  ;;  %v5701_v42 = vadd.s32 120, %v5379_v8  ;;  %v5710_v49 = vadd.f32 %v5469_v46, %v334_v3 }
  0x3a   : > { %v593_v24 = vmul.f32 18.0, %v557_v31 }
  0x3b   : > { %1761 = vmatpush1.bf16.msra.mxu0 %v5230_v14  ;;  %v5664_v14 = vsub.f32 %v483_v21, %v592_v47  ;;  %v5675_v32 = vsel %vm1025_vm0, %v1035_v35, %v1037_v10  ;;  %v376_v21 = vadd.f32 %v5469_v46, %v333_v25  ;;  %v486_v25 = vcvt.s32.f32 %v5693_v5  ;;  %v4923_v5 = vld [vmem:[%s5426_s20 + $0x48] sm:$0xff]  }
  0x3c   : > { %1762 = vmatprep.subr.bf16.mxu0 %v5310_v1  ;;  %v8013_v27 = vshrl.u32 %v5675_v32, 16  ;;  %v8012_v59 = vshll.u32 %v5675_v32, 16  ;;  %v5719_v22 = vsub.f32 %v484_v41, %v593_v24  ;;  %v487_v26 = vcvt.s32.f32 %v5701_v42  ;;  %v5238_v41 = vld [vmem:[%s8006_s3 + $0x138] sm:$0xff]  }
  0x3d   : > { %8159 = vst [vmem:[#allocation12_spill] sm:$0xff] %v5664_v14  ;;  %vm8048_vm11 = vcmp.lt.f32.partialorder %v5664_v14, 16.0  ;;  %v412_v35 = vmax.f32 %v376_v21, 0.0 }
  0x3e   : > { %v772_v0 = vsel %vm8048_vm11, %v410_v20, 0.0  ;;  %v1269_v61 = vrot.slane %v8013_v27, 7  ;;  %v5236_v20 = vld [vmem:[%s8006_s3 + $0x130] sm:$0xff]   ;;  %8160 = vst [vmem:[#allocation13_spill] sm:$0xff] %v5719_v22  ;;  %vm8047_vm12 = vcmp.lt.f32.partialorder %v5719_v22, 16.0 }
  0x3f   : > { %1763 = vmatpush1.bf16.msra.mxu0 %v5232_v37  ;;  %v5686_v17 = vpack.c.bf16 %v772_v0, %v771_v40  ;;  %v594_v37 = vmul.f32 18.0, %v558_v38  ;;  %v413_v0 = vmax.f32 %v5710_v49, 0.0  ;;  %v773_v38 = vsel %vm8047_vm12, %v411_v62, 0.0  ;;  %v4924_v27 = vld [vmem:[%s5426_s20 + $0x50] sm:$0xff]  }
  0x40   : > { %1764 = vmatprep.subr.bf16.mxu0 %v5310_v1  ;;  %v1272_v47 = vor.u32 %v8012_v59, %v1269_v61  ;;  %v524_v4 = vmul.f32 0.055555556, %v487_v26  ;;  %v452_v49 = vadd.s32 128, %v5379_v8  ;;  %v453_v62 = vadd.s32 136, %v5379_v8 }
  0x41   : > { %820 = vst [vmem:[#allocation2 + $0x38] sm:$0xff] %v5686_v17  ;;  %v1039_v34 = vrot.slane %v5686_v17, 1  ;;  %v5721_v39 = vsub.f32 %v485_v58, %v594_v37  ;;  %v4922_v17 = vld [vmem:[%s5426_s20 + $0x40] sm:$0xff]   ;;  %v5229_v58 = vld [vmem:[%s8006_s3 + $0x8] sm:$0xff]   ;;  %v455_v59 = vadd.s32 152, %v5379_v8 }
  0x42   : > { %v4787_v37 = vunpack.c.l.bf16 %v4922_v17  ;;  %v4788_v42 = vunpack.c.h.bf16 %v4922_v17 }
  0x43   : > { %1765 = vmatpush1.bf16.msra.mxu0 %v5234_v33  ;;  %v5717_v15 = vsel %vm1025_vm0, %v1037_v10, %v1039_v34  ;;  %8161 = vst [vmem:[#allocation14_spill] sm:$0xff] %v5721_v39  ;;  %v1273_v33 = vsel %vm1185_vm7, %v5620_v16, %v1272_v47  ;;  %vm8015_vm13 = vcmp.lt.f32.partialorder %v5721_v39, 16.0  ;;  %v414_v16 = vmax.f32 %v5713_v51, 0.0 }
  0x44   : > { %1766 = vmatprep.subr.bf16.mxu0 %v5310_v1  ;;  %v8011_v40 = vshrl.u32 %v5717_v15, 16  ;;  %v8010_v21 = vshll.u32 %v5717_v15, 16  ;;  %5048 = vmatmul.mubr.bf16.vlgmr.msra.gmra.mrb[0].mxu1 %v1273_v33  ;;  %v523_v10 = vmul.f32 0.055555556, %v486_v25  ;;  %v774_v3 = vsel %vm8015_vm13, %v412_v35, 0.0 }
  0x45   : > { %2557 = vmatpush1.bf16.msra.mxu1 %v5227_v48  ;;  %v560_v48 = vfloor.f32 %v524_v4  ;;  %v336_v33 = vmul.f32 %v4787_v37, %v5464_v45  ;;  %v489_v4 = vcvt.s32.f32 %v453_v62 }
  0x46   : > { %v1288_v31 = vrot.slane %v8011_v40, 7  ;;  %2558 = vmatprep.subr.bf16.mxu1 %v5310_v1  ;;  %v559_v24 = vfloor.f32 %v523_v10  ;;  %v337_v10 = vmul.f32 %v4788_v42, %v5464_v45  ;;  %v5233_v42 = vld [vmem:[%s8006_s3 + $0x18] sm:$0xff]  }
  0x47   : > { %1767 = vmatpush1.bf16.msra.mxu0 %v5236_v20  ;;  %v5748_v20 = vpack.c.bf16 %v774_v3, %v773_v38  ;;  %v5231_v38 = vld [vmem:[%s8006_s3 + $0x10] sm:$0xff]   ;;  %v596_v3 = vmul.f32 18.0, %v560_v48 }
  0x48   : > { %1768 = vmatprep.subr.bf16.mxu0 %v5310_v1  ;;  %v1291_v47 = vor.u32 %v8010_v21, %v1288_v31  ;;  %v595_v51 = vmul.f32 18.0, %v559_v24  ;;  %v380_v48 = vadd.f32 %v5469_v46, %v337_v10  ;;  %v454_v21 = vadd.s32 144, %v5379_v8 }
  0x49   : > { %821 = vst [vmem:[#allocation2 + $0x40] sm:$0xff] %v5748_v20  ;;  %v1041_v35 = vrot.slane %v5748_v20, 1  ;;  %2559 = vmatpush1.bf16.msra.mxu1 %v5229_v58  ;;  %v4791_v58 = vunpack.c.l.bf16 %v4923_v5 }
  0x4a   : > { %v1292_v17 = vsel %vm1185_vm7, %v1269_v61, %v1291_v47  ;;  %2560 = vmatprep.subr.bf16.mxu1 %v5310_v1  ;;  %v5767_v24 = vsub.f32 %v486_v25, %v595_v51  ;;  %v5775_v47 = vsub.f32 %v487_v26, %v596_v3  ;;  %v416_v26 = vmax.f32 %v380_v48, 0.0 }
  0x4b   : > { %1769 = vmatpush1.bf16.msra.mxu0 %v5238_v41  ;;  %v488_v41 = vcvt.s32.f32 %v452_v49  ;;  %5051 = vmatprep.mubr.bf16.mxu1 %v1292_v17  ;;  %v5765_v20 = vsel %vm1025_vm0, %v1039_v34, %v1041_v35  ;;  %v526_v49 = vmul.f32 0.055555556, %v489_v4  ;;  %v4792_v3 = vunpack.c.h.bf16 %v4923_v5 }
  0x4c   : > { %5027 = vmatprep.subr.bf16.mxu0 %v5360_v2  ;;  %8162 = vst [vmem:[#allocation15_spill] sm:$0xff] %v5767_v24  ;;  %v379_v2 = vadd.f32 %v5469_v46, %v336_v33  ;;  %v8009_v61 = vshrl.u32 %v5765_v20, 16  ;;  %v8017_v37 = vshll.u32 %v5765_v20, 16  ;;  %8163 = vst [vmem:[#allocation16_spill] sm:$0xff] %v5775_v47  ;;  %vm8032_vm14 = vcmp.lt.f32.partialorder %v5767_v24, 16.0 }
  0x4d   : > { %v525_v25 = vmul.f32 0.055555556, %v488_v41  ;;  %2561 = vmatpush1.bf16.msra.mxu1 %v5231_v38  ;;  %vm8014_vm15 = vcmp.lt.f32.partialorder %v5775_v47, 16.0  ;;  %v775_v51 = vsel %vm8032_vm14, %v413_v0, 0.0  ;;  %v562_v17 = vfloor.f32 %v526_v49 }
  0x4e   : > { %v415_v34 = vmax.f32 %v379_v2, 0.0  ;;  %v5781_v62 = vrot.slane %v8009_v61, 7  ;;  %2562 = vmatprep.subr.bf16.mxu1 %v5310_v1  ;;  %v776_v33 = vsel %vm8014_vm15, %v414_v16, 0.0  ;;  %v338_v61 = vmul.f32 %v4791_v58, %v5464_v45 }
  0x4f   : > { %v561_v10 = vfloor.f32 %v525_v25  ;;  %v804_v38 = vpack.c.bf16 %v776_v33, %v775_v51  ;;  %v598_v0 = vmul.f32 18.0, %v562_v17  ;;  %v339_v48 = vmul.f32 %v4792_v3, %v5464_v45  ;;  %v5235_v25 = vld [vmem:[%s8006_s3 + $0x20] sm:$0xff]  }
  0x50   : > { %v1310_v2 = vor.u32 %v8017_v37, %v5781_v62  ;;  %v381_v58 = vadd.f32 %v5469_v46, %v338_v61  ;;  %v490_v49 = vcvt.s32.f32 %v454_v21  ;;  %v4754_v37 = vld [vmem:[%s5426_s20] sm:$0xff]  }
  0x51   : > { %v597_v40 = vmul.f32 18.0, %v561_v10  ;;  %2563 = vmatpush1.bf16.msra.mxu1 %v5233_v42  ;;  %822 = vst [vmem:[#allocation2 + $0x48] sm:$0xff] %v804_v38  ;;  %v1043_v5 = vrot.slane %v804_v38, 1  ;;  %v5805_v33 = vsub.f32 %v489_v4, %v598_v0  ;;  %v382_v10 = vadd.f32 %v5469_v46, %v339_v48 }
  0x52   : > { %v1311_v16 = vsel %vm1185_vm7, %v1288_v31, %v1310_v2  ;;  %2564 = vmatprep.subr.bf16.mxu1 %v5310_v1  ;;  %v491_v31 = vcvt.s32.f32 %v455_v59  ;;  %v417_v17 = vmax.f32 %v381_v58, 0.0  ;;  %v527_v3 = vmul.f32 0.055555556, %v490_v49 }
  0x53   : > { %5052 = vmatmul.mubr.bf16.gmra.mrb[4].mxu1 %v1311_v16  ;;  %v5803_v51 = vsub.f32 %v488_v41, %v597_v40  ;;  %8165 = vst [vmem:[#allocation18_spill] sm:$0xff] %v5805_v33  ;;  %v5809_v42 = vsel %vm1025_vm0, %v1041_v35, %v1043_v5  ;;  %v4795_v2 = vunpack.c.l.bf16 %v4924_v27  ;;  %vm8022_vm13 = vcmp.lt.f32.partialorder %v5805_v33, 16.0  ;;  %v5237_v35 = vld [vmem:[%s8006_s3 + $0x28] sm:$0xff]  }
  0x54   : > { %8166 = vst [vmem:[#allocation19_spill] sm:$0xff] %v5809_v42  ;;  %v8016_v38 = vshrl.u32 %v5809_v42, 16  ;;  %v8020_v21 = vshll.u32 %v5809_v42, 16  ;;  %v778_v59 = vsel %vm8022_vm13, %v416_v26, 0.0  ;;  %v418_v41 = vmax.f32 %v382_v10, 0.0  ;;  %v5239_v10 = vld [vmem:[%s8006_s3 + $0x30] sm:$0xff]  }
  0x55   : > { %8164 = vst [vmem:[#allocation17_spill] sm:$0xff] %v5803_v51  ;;  %vm8023_vm15 = vcmp.lt.f32.partialorder %v5803_v51, 16.0  ;;  %2565 = vmatpush1.bf16.msra.mxu1 %v5235_v25  ;;  %v528_v4 = vmul.f32 0.055555556, %v491_v31  ;;  %v563_v48 = vfloor.f32 %v527_v3  ;;  %v4796_v16 = vunpack.c.h.bf16 %v4924_v27 }
  0x56   : > { %v777_v40 = vsel %vm8023_vm15, %v415_v34, 0.0  ;;  %v1326_v61 = vrot.slane %v8016_v38, 7  ;;  %2566 = vmatprep.subr.bf16.mxu1 %v5310_v1  ;;  %v340_v26 = vmul.f32 %v4795_v2, %v5464_v45  ;;  %v456_v25 = vadd.s32 160, %v5379_v8 }
  0x57   : > { %v5824_v0 = vpack.c.bf16 %v778_v59, %v777_v40  ;;  %v564_v34 = vfloor.f32 %v528_v4  ;;  %v457_v58 = vadd.s32 168, %v5379_v8  ;;  %v599_v27 = vmul.f32 18.0, %v563_v48 }
  0x58   : > { %v1329_v40 = vor.u32 %v8020_v21, %v1326_v61  ;;  %v341_v3 = vmul.f32 %v4796_v16, %v5464_v45  ;;  %v383_v59 = vadd.f32 %v5469_v46, %v340_v26  ;;  %v492_v4 = vcvt.s32.f32 %v456_v25 }
  0x59   : > { %823 = vst [vmem:[#allocation2 + $0x50] sm:$0xff] %v5824_v0  ;;  %v1045_v1 = vrot.slane %v5824_v0, 1  ;;  %2567 = vmatpush1.bf16.msra.mxu1 %v5237_v35  ;;  %v600_v2 = vmul.f32 18.0, %v564_v34  ;;  %v493_v38 = vcvt.s32.f32 %v457_v58  ;;  %v5845_v21 = vsub.f32 %v490_v49, %v599_v27 }
  0x5a   : > { %v1330_v55 = vsel %vm1185_vm7, %v5781_v62, %v1329_v40  ;;  %2568 = vmatprep.subr.bf16.mxu1 %v5847_v53  ;;  %v384_v35 = vadd.f32 %v5469_v46, %v341_v3  ;;  %v419_v34 = vmax.f32 %v383_v59, 0.0  ;;  %v4755_v25 = vunpack.c.l.bf16 %v4754_v37 }
  0x5b   : > { %v5843_v54 = vsel %vm1025_vm0, %v1043_v5, %v1045_v1  ;;  %8168 = vst [vmem:[#allocation21_spill] sm:$0xff] %v5845_v21  ;;  %5055 = vmatprep.mubr.bf16.mxu1 %v1330_v55  ;;  %v5853_v16 = vsub.f32 %v491_v31, %v600_v2  ;;  %vm8028_vm13 = vcmp.lt.f32.partialorder %v5845_v21, 16.0  ;;  %v529_v5 = vmul.f32 0.055555556, %v492_v4  ;;  %v5240_v31 = vld [vmem:[%s8006_s3 + $0x38] sm:$0xff]  }
  0x5c   : > { %8167 = vst [vmem:[#allocation20_spill] sm:$0xff] %v5843_v54  ;;  %v8024_v0 = vshrl.u32 %v5843_v54, 16  ;;  %v8026_v48 = vshll.u32 %v5843_v54, 16  ;;  %v420_v62 = vmax.f32 %v384_v35, 0.0  ;;  %v530_v49 = vmul.f32 0.055555556, %v493_v38 }
  0x5d   : > { %8169 = vst [vmem:[#allocation22_spill] sm:$0xff] %v5853_v16  ;;  %vm8027_vm15 = vcmp.lt.f32.partialorder %v5853_v16, 16.0  ;;  %v779_v55 = vsel %vm8028_vm13, %v417_v17, 0.0  ;;  %2569 = vmatpush1.bf16.msra.mxu1 %v5239_v10  ;;  %v565_v40 = vfloor.f32 %v529_v5  ;;  %v4756_v3 = vunpack.c.h.bf16 %v4754_v37 }
  0x5e   : > { %v5858_v26 = vrot.slane %v8024_v0, 7  ;;  %v780_v58 = vsel %vm8027_vm15, %v418_v41, 0.0  ;;  %v566_v27 = vfloor.f32 %v530_v49  ;;  %2570 = vmatprep.subr.bf16.mxu1 %v5847_v53  ;;  %v320_v17 = vmul.f32 %v4755_v25, %v5464_v45 }
  0x5f   : > { %v806_v59 = vpack.c.bf16 %v780_v58, %v779_v55  ;;  %v437_v10 = vadd.s32 8, %v5379_v8  ;;  %v601_v35 = vmul.f32 18.0, %v565_v40  ;;  %v321_v52 = vmul.f32 %v4756_v3, %v5464_v45  ;;  %v5241_v55 = vld [vmem:[%s8006_s3 + $0x40] sm:$0xff]  }
  0x60   : > { %v1348_v2 = vor.u32 %v8026_v48, %v5858_v26  ;;  %v602_v0 = vmul.f32 18.0, %v566_v27  ;;  %v509_v41 = vmul.f32 0.055555556, %v472_v23  ;;  %v363_v49 = vadd.f32 %v5469_v46, %v320_v17 }
  0x61   : > { %824 = vst [vmem:[#allocation2 + $0x58] sm:$0xff] %v806_v59  ;;  %v1047_v5 = vrot.slane %v806_v59, 1  ;;  %v473_v48 = vcvt.s32.f32 %v437_v10  ;;  %2571 = vmatpush1.bf16.msra.mxu1 %v5240_v31  ;;  %v5882_v25 = vsub.f32 %v492_v4, %v601_v35  ;;  %v364_v58 = vadd.f32 %v5469_v46, %v321_v52  ;;  %v1111_v31 = vld [vmem:[#allocation2 + $0x8] sm:$0x80] }
  0x62   : > { %v1349_v37 = vsel %vm1185_vm7, %v1326_v61, %v1348_v2  ;;  %v5884_v45 = vsub.f32 %v493_v38, %v602_v0  ;;  %v545_v40 = vfloor.f32 %v509_v41  ;;  %2572 = vmatprep.subr.bf16.mxu1 %v5847_v53  ;;  %v399_v27 = vmax.f32 %v363_v49, 0.0  ;;  %v4925_v2 = vld [vmem:[%s5426_s20 + $0x58] sm:$0xff]   ;;  %v5242_v4 = vld [vmem:[%s8006_s3 + $0x48] sm:$0xff]  }
  0x63   : > { %5056 = vmatmul.mubr.bf16.gmra.mrb[8].mxu1 %v1349_v37  ;;  %8170 = vst [vmem:[#allocation23_spill] sm:$0xff] %v5882_v25  ;;  %v5889_v61 = vsel %vm1025_vm0, %v1045_v1, %v1047_v5  ;;  %v510_v3 = vmul.f32 0.055555556, %v473_v48  ;;  %vm8031_vm15 = vcmp.lt.f32.partialorder %v5882_v25, 16.0  ;;  %v400_v38 = vmax.f32 %v364_v58, 0.0 }
  0x64   : > { %8171 = vst [vmem:[#allocation24_spill] sm:$0xff] %v5884_v45  ;;  %8172 = vst [vmem:[#allocation25_spill] sm:$0xff] %v5889_v61  ;;  %v8033_v59 = vshrl.u32 %v5889_v61, 16  ;;  %v8029_v17 = vshll.u32 %v5889_v61, 16  ;;  %vm8030_vm13 = vcmp.lt.f32.partialorder %v5884_v45, 16.0  ;;  %v781_v46 = vsel %vm8031_vm15, %v419_v34, 0.0 }
  0x65   : > { %v782_v52 = vsel %vm8030_vm13, %v420_v62, 0.0  ;;  %v546_v1 = vfloor.f32 %v510_v3  ;;  %2573 = vmatpush1.bf16.msra.mxu1 %v5241_v55  ;;  %v581_v35 = vmul.f32 18.0, %v545_v40  ;;  %v5908_v41 = vshll.u32 %v5563_v60, 16 }
  0x66   : > { %v1364_v0 = vrot.slane %v8033_v59, 7  ;;  %v5905_v10 = vpack.c.bf16 %v782_v52, %v781_v46  ;;  %2574 = vmatprep.subr.bf16.mxu1 %v5847_v53  ;;  %v1187_v62 = vshrl.u32 %v1111_v31, 16  ;;  %v4799_v37 = vunpack.c.l.bf16 %v4925_v2  ;;  %v4926_v46 = vld [vmem:[%s5426_s20 + $0x60] sm:$0xff]  }
  0x67   : > { %v582_v34 = vmul.f32 18.0, %v546_v1  ;;  %v4800_v49 = vunpack.c.h.bf16 %v4925_v2  ;;  %v5917_v3 = vsub.f32 %v472_v23, %v581_v35  ;;  %v5928_v31 = vld [vmem:[%s8004_s1] ss:$0 sm:$0xff]  ;;  %v5243_v23 = vld [vmem:[%s8006_s3 + $0x50] sm:$0xff]   ;;  %vm854_vm15 = vsmask.f32 7424 }
  0x68   : > { %v1367_v55 = vor.u32 %v8029_v17, %v1364_v0  ;;  %825 = vst [vmem:[#allocation2 + $0x60] sm:$0xff] %v5905_v10  ;;  %v8035_v58 = vrot.slane %v5905_v10, 1  ;;  %v5923_v1 = vrot.slane %v1187_v62, 7  ;;  %v342_v2 = vmul.f32 %v5928_v31, %v4799_v37  ;;  %v5955_v37 = vld [vmem:[%s8005_s2] ss:$0 sm:$0xff] }
  0x69   : > { %8173 = vst [vmem:[#allocation26_spill] sm:$0xff] %v5917_v3  ;;  %v5921_v52 = vsub.f32 %v473_v48, %v582_v34  ;;  %v343_v17 = vmul.f32 %v5928_v31, %v4800_v49  ;;  %2575 = vmatpush1.bf16.msra.mxu1 %v5242_v4  ;;  %vm653_vm13 = vcmp.lt.f32.partialorder %v5917_v3, 16.0  ;;  %v458_v34 = vadd.s32 176, %v5379_v8 }
  0x6a   : > { %v1368_v48 = vsel %vm1185_vm7, %v5858_v26, %v1367_v55  ;;  %v5940_v35 = vsel %vm1025_vm0, %v1047_v5, %v8035_v58  ;;  %2576 = vmatprep.subr.bf16.mxu1 %v5847_v53  ;;  %v761_v26 = vsel %vm653_vm13, %v399_v27, 0.0  ;;  %v385_v49 = vadd.f32 %v5955_v37, %v342_v2 }
  0x6b   : > { %8174 = vst [vmem:[#allocation27_spill] sm:$0xff] %v5921_v52  ;;  %8175 = vst [vmem:[#allocation28_spill] sm:$0xff] %v5940_v35  ;;  %5059 = vmatprep.mubr.bf16.mxu1 %v1368_v48  ;;  %v8037_v4 = vshrl.u32 %v5940_v35, 16  ;;  %vm654_vm14 = vcmp.lt.f32.partialorder %v5921_v52, 16.0  ;;  %v5959_v55 = vadd.f32 %v5955_v37, %v343_v17  ;;  %v459_v48 = vadd.s32 184, %v5379_v8 }
  0x6c   : > { %v762_v5 = vsel %vm654_vm14, %v400_v38, 0.0  ;;  %v494_v29 = vcvt.s32.f32 %v458_v34  ;;  %v4803_v58 = vunpack.c.l.bf16 %v4926_v46  ;;  %v5244_v38 = vld [vmem:[%s8006_s3 + $0x58] sm:$0xff]   ;;  %v421_v40 = vmax.f32 %v385_v49, 0.0 }
  0x6d   : > { %v5964_v59 = vrot.slane %v8037_v4, 7  ;;  %v797_v27 = vpack.c.bf16 %v762_v5, %v761_v26  ;;  %2577 = vmatpush1.bf16.msra.mxu1 %v5243_v23  ;;  %v422_v2 = vmax.f32 %v5959_v55, 0.0  ;;  %v495_v62 = vcvt.s32.f32 %v459_v48 }
  0x6e   : > { %v4804_v17 = vunpack.c.h.bf16 %v4926_v46  ;;  %2578 = vmatprep.subr.bf16.mxu1 %v5847_v53  ;;  %v8176_v45 = vshll.u32 %v5940_v35, 16  ;;  %v531_v23 = vmul.f32 0.055555556, %v494_v29  ;;  %v344_v25 = vmul.f32 %v5928_v31, %v4803_v58 }
  0x6f   : > { %815 = vst [vmem:[#allocation2 + $0x10] sm:$0xff] %v797_v27  ;;  %v5974_v26 = vshll.u32 %v797_v27, 16  ;;  %v5976_v34 = vshrl.u32 %v797_v27, 16  ;;  %v532_v5 = vmul.f32 0.055555556, %v495_v62  ;;  %v5981_v55 = vadd.s32 192, %v5379_v8 }
  0x70   : > { %v1386_v4 = vor.u32 %v8176_v45, %v5964_v59  ;;  %v345_v49 = vmul.f32 %v5928_v31, %v4804_v17  ;;  %v567_v16 = vfloor.f32 %v531_v23  ;;  %v5245_v27 = vld [vmem:[%s8006_s3 + $0x60] sm:$0xff]   ;;  %v5992_v17 = vadd.f32 %v5955_v37, %v344_v25 }
  0x71   : > { %v5985_v48 = vrot.slane %v5974_v26, 1  ;;  %v1190_v45 = vrot.slane %v5976_v34, 7  ;;  %2579 = vmatpush1.bf16.msra.mxu1 %v5244_v38  ;;  %v568_v58 = vfloor.f32 %v532_v5  ;;  %v8177_v51 = vrot.slane %v5908_v41, 1 }
  0x72   : > { %v1387_v46 = vsel %vm1185_vm7, %v1364_v0, %v1386_v4  ;;  %v5995_v33 = vadd.f32 %v5955_v37, %v345_v49  ;;  %v461_v0 = vadd.s32 200, %v5379_v8  ;;  %2580 = vmatprep.subr.bf16.mxu1 %v5847_v53  ;;  %v603_v21 = vmul.f32 18.0, %v567_v16  ;;  %v5246_v16 = vld [vmem:[%s8006_s3 + $0x68] sm:$0xff]  }
  0x73   : > { %5060 = vmatmul.mubr.bf16.gmra.mrb[12].mxu1 %v1387_v46  ;;  %v877_v4 = vor.u32 %v5976_v34, %v5985_v48  ;;  %v1194_v38 = vshrl.u32 %v5985_v48, 16  ;;  %v1191_v23 = vor.u32 %v1190_v45, %v5974_v26  ;;  %v604_v46 = vmul.f32 18.0, %v568_v58 }
  0x74   : > { %v496_v49 = vcvt.s32.f32 %v5981_v55  ;;  %v6013_v22 = vsub.f32 %v494_v29, %v603_v21  ;;  %v8180_v29 = vrot.slane %v5908_v41, 1  ;;  %v8055_v5 = vrot.slane %v5577_v6, 7 }
  0x75   : > { %v6009_v47 = vsel %vm854_vm15, %v877_v4, %v8177_v51  ;;  %v1196_v39 = vrot.slane %v1194_v38, 7  ;;  %v1192_v24 = vsel %vm1185_vm7, %v5923_v1, %v1191_v23  ;;  %2581 = vmatpush1.bf16.msra.mxu1 %v5245_v27  ;;  %v6020_v25 = vsub.f32 %v495_v62, %v604_v46  ;;  %v4927_v38 = vld [vmem:[%s5426_s20 + $0x68] sm:$0xff]  }
  0x76   : > { %8178 = vst [vmem:[#allocation29_spill] sm:$0xff] %v6013_v22  ;;  %v8049_v58 = vshrl.u32 %v6009_v47, 16  ;;  %v8054_v55 = vshll.u32 %v6009_v47, 16  ;;  %v497_v51 = vcvt.s32.f32 %v461_v0  ;;  %2582 = vmatprep.subr.bf16.mxu1 %v5847_v53  ;;  %vm8057_vm12 = vcmp.lt.f32.partialorder %v6013_v22, 16.0 }
  0x77   : > { %8179 = vst [vmem:[#allocation30_spill] sm:$0xff] %v6020_v25  ;;  %v533_v1 = vmul.f32 0.055555556, %v496_v49  ;;  %v885_v21 = vor.u32 %v5577_v6, %v8180_v29  ;;  %v8052_v27 = vrot.slane %v5579_v7, 1  ;;  %vm8056_vm11 = vcmp.lt.f32.partialorder %v6020_v25, 16.0 }
  0x78   : > { %v1200_v4 = vrot.slane %v8049_v58, 7  ;;  %v783_v62 = vsel %vm8057_vm12, %v421_v40, 0.0  ;;  %v534_v0 = vmul.f32 0.055555556, %v497_v51  ;;  %v784_v23 = vsel %vm8056_vm11, %v422_v2, 0.0  ;;  %v5247_v58 = vld [vmem:[%s8006_s3 + $0x70] sm:$0xff]  }
  0x79   : > { %v569_v46 = vfloor.f32 %v533_v1  ;;  %v6039_v29 = vsel %vm854_vm15, %v885_v21, %v8052_v27  ;;  %2583 = vmatpush1.bf16.msra.mxu1 %v5246_v16  ;;  %v6047_v22 = vpack.c.bf16 %v784_v23, %v783_v62  ;;  %v1218_v16 = vor.u32 %v8055_v5, %v5908_v41 }
  0x7a   : > { %v1203_v40 = vor.u32 %v8054_v55, %v1200_v4  ;;  %v570_v25 = vfloor.f32 %v534_v0  ;;  %v8058_v2 = vshrl.u32 %v6039_v29, 16  ;;  %2584 = vmatprep.subr.bf16.mxu1 %v5847_v53  ;;  %v4807_v27 = vunpack.c.l.bf16 %v4927_v38 }
  0x7b   : > { %v605_v1 = vmul.f32 18.0, %v569_v46  ;;  %826 = vst [vmem:[#allocation2 + $0x68] sm:$0xff] %v6047_v22  ;;  %v1051_v62 = vrot.slane %v6047_v22, 1  ;;  %v1219_v55 = vsel %vm1185_vm7, %v1190_v45, %v1218_v16  ;;  %v4808_v21 = vunpack.c.h.bf16 %v4927_v38 }
  0x7c   : > { %v1204_v14 = vsel %vm1185_vm7, %v1196_v39, %v1203_v40  ;;  %v606_v23 = vmul.f32 18.0, %v570_v25  ;;  %v6060_v0 = vrot.slane %v8058_v2, 7  ;;  %v346_v5 = vmul.f32 %v5928_v31, %v4807_v27  ;;  %v5248_v39 = vld [vmem:[%s8006_s3 + $0x78] sm:$0xff]  }
  0x7d   : > { %1770 = vmatprep.mubr.bf16.mxu0 %v1204_v14  ;;  %v6062_v46 = vsub.f32 %v496_v49, %v605_v1  ;;  %2585 = vmatpush1.bf16.msra.mxu1 %v5247_v58  ;;  %v8182_v25 = vrot.slane %v5905_v10, 1  ;;  %v8185_v45 = vshll.u32 %v6039_v29, 16  ;;  %v6080_v38 = vadd.s32 208, %v5379_v8  ;;  %v4928_v1 = vld [vmem:[%s5426_s20 + $0x70] sm:$0xff]  }
  0x7e   : > { %1771 = vmatmul.mubr.bf16.vlgmr.msra.gmra.mrb[0].mxu0 %v1192_v24  ;;  %v6074_v14 = vsub.f32 %v497_v51, %v606_v23  ;;  %2586 = vmatprep.subr.bf16.mxu1 %v5847_v53  ;;  %v5284_v24 = vld [vmem:[%s8006_s3 + $0x140] sm:$0xff]   ;;  %v347_v51 = vmul.f32 %v5928_v31, %v4808_v21  ;;  %v8186_v16 = vmax.f32 %v5992_v17, 0.0  ;;  %v8187_v2 = vmax.f32 %v5995_v33, 0.0 }
  0x7f   : > { %8181 = vst [vmem:[#allocation31_spill] sm:$0xff] %v6062_v46  ;;  %v6072_v40 = vsel %vm1025_vm0, %v8182_v25, %v1051_v62  ;;  %v1226_v49 = vor.u32 %v8185_v45, %v6060_v0  ;;  %5028 = vmatpush3.bf16.msra.mxu0 %v5284_v24  ;;  %vm8071_vm11 = vcmp.lt.f32.partialorder %v6062_v46, 16.0  ;;  %v6098_v45 = vadd.f32 %v5955_v37, %v346_v5  ;;  %v5285_v24 = vld [vmem:[%s8006_s3 + $0x148] sm:$0xff]  }
  0x80   : > { %8183 = vst [vmem:[#allocation32_spill] sm:$0xff] %v6072_v40  ;;  %8184 = vst [vmem:[#allocation33_spill] sm:$0xff] %v6074_v14  ;;  %v8059_v58 = vshrl.u32 %v6072_v40, 16  ;;  %vm8070_vm12 = vcmp.lt.f32.partialorder %v6074_v14, 16.0  ;;  %v785_v23 = vsel %vm8071_vm11, %v8186_v16, 0.0  ;;  %5029 = vmatprep.subr.bf16.mxu0 %v5285_v24  ;;  %v463_v5 = vadd.s32 216, %v5379_v8 }
  0x81   : > { %v1227_v25 = vsel %vm1185_vm7, %v1200_v4, %v1226_v49  ;;  %v786_v17 = vsel %vm8070_vm12, %v8187_v2, 0.0  ;;  %v6112_v4 = vadd.f32 %v5955_v37, %v347_v51  ;;  %2587 = vmatpush1.bf16.msra.mxu1 %v5248_v39  ;;  %v425_v16 = vmax.f32 %v6098_v45, 0.0 }
  0x82   : > { %v6105_v21 = vrot.slane %v8059_v58, 7  ;;  %1778 = vmatprep.mubr.bf16.mxu0 %v1227_v25  ;;  %v6115_v49 = vpack.c.bf16 %v786_v17, %v785_v23  ;;  %v498_v27 = vcvt.s32.f32 %v6080_v38  ;;  %v4811_v58 = vunpack.c.l.bf16 %v4928_v1  ;;  %3688 = vmatprep.subr.bf16.mxu1 %v5847_v53  ;;  %v5286_v17 = vld [vmem:[%s8006_s3 + $0x150] sm:$0xff]  }
  0x83   : > { %v8188_v33 = vshll.u32 %v6072_v40, 16  ;;  %v426_v25 = vmax.f32 %v6112_v4, 0.0  ;;  %v499_v51 = vcvt.s32.f32 %v463_v5  ;;  %v4812_v14 = vunpack.c.h.bf16 %v4928_v1  ;;  %5030 = vmatpush3.bf16.msra.mxu0 %v5285_v24 }
  0x84   : > { %827 = vst [vmem:[#allocation2 + $0x70] sm:$0xff] %v6115_v49  ;;  %v8068_v39 = vrot.slane %v6115_v49, 1  ;;  %v535_v23 = vmul.f32 0.055555556, %v498_v27  ;;  %v348_v45 = vmul.f32 %v5928_v31, %v4811_v58  ;;  %v464_v38 = vadd.s32 224, %v5379_v8  ;;  %5031 = vmatprep.subr.bf16.mxu0 %v5286_v17 }
  0x85   : > { %v1405_v2 = vor.u32 %v8188_v33, %v6105_v21  ;;  %v536_v5 = vmul.f32 0.055555556, %v499_v51  ;;  %v349_v1 = vmul.f32 %v5928_v31, %v4812_v14  ;;  %v465_v24 = vadd.s32 232, %v5379_v8 }
  0x86   : > { %v6138_v58 = vsel %vm1025_vm0, %v1051_v62, %v8068_v39  ;;  %1779 = vmatmul.mubr.bf16.gmra.mrb[4].mxu0 %v1219_v55  ;;  %v571_v33 = vfloor.f32 %v535_v23  ;;  %v391_v46 = vadd.f32 %v5955_v37, %v348_v45  ;;  %v500_v30 = vcvt.s32.f32 %v464_v38  ;;  %v5287_v55 = vld [vmem:[%s8006_s3 + $0x158] sm:$0xff]  }
  0x87   : > { %v1406_v4 = vsel %vm1185_vm7, %v5964_v59, %v1405_v2  ;;  %8189 = vst [vmem:[#allocation34_spill] sm:$0xff] %v6138_v58  ;;  %v8069_v36 = vshrl.u32 %v6138_v58, 16  ;;  %v8072_v59 = vshll.u32 %v6138_v58, 16  ;;  %v572_v2 = vfloor.f32 %v536_v5  ;;  %5032 = vmatpush3.bf16.msra.mxu0 %v5286_v17 }
  0x88   : > { %5063 = vmatprep.mubr.bf16.mxu1 %v1406_v4  ;;  %v392_v14 = vadd.f32 %v5955_v37, %v349_v1  ;;  %v607_v28 = vmul.f32 18.0, %v571_v33  ;;  %v427_v4 = vmax.f32 %v391_v46, 0.0  ;;  %v501_v13 = vcvt.s32.f32 %v465_v24  ;;  %5033 = vmatprep.subr.bf16.mxu0 %v5287_v55 }
  0x89   : > { %v537_v19 = vmul.f32 0.055555556, %v500_v30  ;;  %v6150_v62 = vrot.slane %v8069_v36, 7  ;;  %v608_v23 = vmul.f32 18.0, %v572_v2  ;;  %v8190_v38 = vrot.slane %v5579_v7, 1 }
  0x8a   : > { %v428_v45 = vmax.f32 %v392_v14, 0.0  ;;  %v6155_v5 = vsub.f32 %v498_v27, %v607_v28  ;;  %v538_v46 = vmul.f32 0.055555556, %v501_v13  ;;  %v8078_v24 = vrot.slane %v5584_v11, 1  ;;  %v5288_v28 = vld [vmem:[%s8006_s3 + $0x160] sm:$0xff]  }
  0x8b   : > { %v893_v17 = vor.u32 %v5581_v9, %v8190_v38  ;;  %v573_v1 = vfloor.f32 %v537_v19  ;;  %v1424_v33 = vor.u32 %v8072_v59, %v6150_v62  ;;  %v6161_v39 = vsub.f32 %v499_v51, %v608_v23  ;;  %5034 = vmatpush3.bf16.msra.mxu0 %v5287_v55 }
  0x8c   : > { %8191 = vst [vmem:[#allocation35_spill] sm:$0xff] %v6155_v5  ;;  %v8076_v36 = vrot.slane %v5581_v9, 7  ;;  %v4815_v2 = vunpack.c.l.bf16 %v4929_v12  ;;  %vm8074_vm12 = vcmp.lt.f32.partialorder %v6155_v5, 16.0  ;;  %v574_v14 = vfloor.f32 %v538_v46  ;;  %5035 = vmatprep.subr.bf16.mxu0 %v5288_v28 }
  0x8d   : > { %8192 = vst [vmem:[#allocation36_spill] sm:$0xff] %v6161_v39  ;;  %v609_v38 = vmul.f32 18.0, %v573_v1  ;;  %v6168_v19 = vsel %vm854_vm15, %v893_v17, %v8078_v24  ;;  %v1425_v27 = vsel %vm1185_vm7, %v6105_v21, %v1424_v33  ;;  %vm8073_vm11 = vcmp.lt.f32.partialorder %v6161_v39, 16.0 }
  0x8e   : > { %v787_v51 = vsel %vm8074_vm12, %v425_v16, 0.0  ;;  %v8075_v55 = vshrl.u32 %v6168_v19, 16  ;;  %5064 = vmatmul.mubr.bf16.gmra.mrb[16].mxu1 %v1425_v27  ;;  %v788_v23 = vsel %vm8073_vm11, %v426_v25, 0.0  ;;  %v610_v17 = vmul.f32 18.0, %v574_v14  ;;  %v5289_v14 = vld [vmem:[%s8006_s3 + $0x168] sm:$0xff]  }
  0x8f   : > { %v6181_v46 = vsub.f32 %v500_v30, %v609_v38  ;;  %v8077_v1 = vshll.u32 %v6168_v19, 16  ;;  %v6184_v59 = vpack.c.bf16 %v788_v23, %v787_v51  ;;  %v1237_v16 = vor.u32 %v8076_v36, %v5579_v7  ;;  %5036 = vmatpush3.bf16.msra.mxu0 %v5288_v28 }
  0x90   : > { %v6188_v21 = vrot.slane %v8075_v55, 7  ;;  %v4816_v33 = vunpack.c.h.bf16 %v4929_v12  ;;  %v6193_v27 = vsub.f32 %v501_v13, %v610_v17  ;;  %v350_v30 = vmul.f32 %v5928_v31, %v4815_v2  ;;  %5037 = vmatprep.subr.bf16.mxu0 %v5289_v14  ;;  %v4930_v55 = vld [vmem:[%s5426_s20 + $0x80] sm:$0xff]  }
  0x91   : > { %8193 = vst [vmem:[#allocation37_spill] sm:$0xff] %v6181_v46  ;;  %vm8090_vm11 = vcmp.lt.f32.partialorder %v6181_v46, 16.0  ;;  %v466_v25 = vadd.s32 240, %v5379_v8  ;;  %828 = vst [vmem:[#allocation2 + $0x78] sm:$0xff] %v6184_v59  ;;  %v1055_v38 = vrot.slane %v6184_v59, 1  ;;  %v8195_v2 = vrot.slane %v5577_v6, 7 }
  0x92   : > { %8194 = vst [vmem:[#allocation38_spill] sm:$0xff] %v6193_v27  ;;  %v789_v12 = vsel %vm8090_vm11, %v427_v4, 0.0  ;;  %v1245_v13 = vor.u32 %v8077_v1, %v6188_v21  ;;  %vm8089_vm12 = vcmp.lt.f32.partialorder %v6193_v27, 16.0  ;;  %v351_v51 = vmul.f32 %v5928_v31, %v4816_v33 }
  0x93   : > { %v1238_v28 = vsel %vm1185_vm7, %v8195_v2, %v1237_v16  ;;  %v393_v23 = vadd.f32 %v5955_v37, %v350_v30  ;;  %v467_v17 = vadd.s32 248, %v5379_v8  ;;  %v8196_v36 = vrot.slane %v6115_v49, 1  ;;  %5038 = vmatpush3.bf16.msra.mxu0 %v5289_v14 }
  0x94   : > { %v790_v1 = vsel %vm8089_vm12, %v428_v45, 0.0  ;;  %v1246_v16 = vsel %vm1185_vm7, %v6060_v0, %v1245_v13  ;;  %v502_v2 = vcvt.s32.f32 %v466_v25  ;;  %v394_v46 = vadd.f32 %v5955_v37, %v351_v51 }
  0x95   : > { %v6219_v4 = vsel %vm1025_vm0, %v8196_v36, %v1055_v38  ;;  %v6227_v24 = vpack.c.bf16 %v790_v1, %v789_v12  ;;  %1786 = vmatprep.mubr.bf16.mxu0 %v1246_v16  ;;  %v5290_v36 = vld [vmem:[%s8006_s3 + $0x170] sm:$0xff]   ;;  %v429_v45 = vmax.f32 %v393_v23, 0.0  ;;  %v503_v27 = vcvt.s32.f32 %v467_v17 }
  0x96   : > { %8197 = vst [vmem:[#allocation39_spill] sm:$0xff] %v6219_v4  ;;  %v8082_v33 = vshrl.u32 %v6219_v4, 16  ;;  %5039 = vmatprep.subr.bf16.mxu0 %v5290_v36  ;;  %1787 = vmatmul.mubr.bf16.gmra.mrb[8].mxu0 %v1238_v28  ;;  %v539_v0 = vmul.f32 0.055555556, %v502_v2  ;;  %v4819_v25 = vunpack.c.l.bf16 %v4930_v55  ;;  %v430_v12 = vmax.f32 %v394_v46, 0.0 }
  0x97   : > { %829 = vst [vmem:[#allocation2 + $0x80] sm:$0xff] %v6227_v24  ;;  %v8083_v1 = vrot.slane %v6227_v24, 1  ;;  %v4820_v13 = vunpack.c.h.bf16 %v4930_v55  ;;  %v540_v51 = vmul.f32 0.055555556, %v503_v27  ;;  %v468_v39 = vadd.s32 256, %v5379_v8  ;;  %5040 = vmatpush3.bf16.msra.mxu0 %v5290_v36  ;;  %v5291_v55 = vld [vmem:[%s8006_s3 + $0x178] sm:$0xff]  }
  0x98   : > { %v1440_v14 = vrot.slane %v8082_v33, 7  ;;  %v575_v16 = vfloor.f32 %v539_v0  ;;  %v352_v30 = vmul.f32 %v5928_v31, %v4819_v25  ;;  %v8198_v28 = vshll.u32 %v6219_v4, 16  ;;  %5041 = vmatprep.subr.bf16.mxu0 %v5291_v55 }
  0x99   : > { %v6244_v17 = vsel %vm1025_vm0, %v1055_v38, %v8083_v1  ;;  %v353_v33 = vmul.f32 %v5928_v31, %v4820_v13  ;;  %v469_v46 = vadd.s32 264, %v5379_v8  ;;  %v576_v25 = vfloor.f32 %v540_v51 }
  0x9a   : > { %v1443_v23 = vor.u32 %v8198_v28, %v1440_v14  ;;  %8199 = vst [vmem:[#allocation40_spill] sm:$0xff] %v6244_v17  ;;  %v8091_v0 = vshrl.u32 %v6244_v17, 16  ;;  %v611_v28 = vmul.f32 18.0, %v575_v16  ;;  %v395_v1 = vadd.f32 %v5955_v37, %v352_v30 }
  0x9b   : > { %v396_v13 = vadd.f32 %v5955_v37, %v353_v33  ;;  %v504_v5 = vcvt.s32.f32 %v468_v39  ;;  %v612_v56 = vmul.f32 18.0, %v576_v25  ;;  %v505_v36 = vcvt.s32.f32 %v469_v46  ;;  %5042 = vmatpush3.bf16.msra.mxu0 %v5291_v55  ;;  %v5292_v55 = vld [vmem:[#allocation2 + $0x30] sm:$0xff] }
  0x9c   : > { %v1444_v38 = vsel %vm1185_vm7, %v6150_v62, %v1443_v23  ;;  %v6259_v57 = vrot.slane %v8091_v0, 7  ;;  %v6261_v52 = vsub.f32 %v502_v2, %v611_v28  ;;  %v431_v51 = vmax.f32 %v395_v1, 0.0  ;;  %v4931_v23 = vld [vmem:[%s5426_s20 + $0x88] sm:$0xff]   ;;  %s7835_s20 = scalar_lea.vmem %s8007_s4, %s5199_s11  ;;  %s4508_s11 = sshll.u32 %s8392_s19, 1 }
  0x9d   : > { %5067 = vmatprep.mubr.bf16.mxu1 %v1444_v38  ;;  %v432_v16 = vmax.f32 %v396_v13, 0.0  ;;  %v541_v50 = vmul.f32 0.055555556, %v504_v5  ;;  %v8201_v62 = vrot.slane %v5584_v11, 1  ;;  %v8202_v39 = vshll.u32 %v6244_v17, 16  ;;  %s235_s23 = scalar_lea.vmem %s8008_s5, %s4508_s11 }
  0x9e   : > { %8200 = vst [vmem:[#allocation41_spill] sm:$0xff] %v6261_v52  ;;  %v6270_v38 = vsub.f32 %v503_v27, %v612_v56  ;;  %vm8095_vm12 = vcmp.lt.f32.partialorder %v6261_v52, 16.0  ;;  %v542_v2 = vmul.f32 0.055555556, %v505_v36  ;;  %v6275_v25 = vshll.u32 %v5292_v55, 16 }
  0x9f   : > { %v901_v30 = vor.u32 %v5587_v18, %v8201_v62  ;;  %v1462_v33 = vor.u32 %v8202_v39, %v6259_v57  ;;  %v791_v46 = vsel %vm8095_vm12, %v429_v45, 0.0  ;;  %v577_v1 = vfloor.f32 %v541_v50 }
  0xa0   : > { %8203 = vst [vmem:[#allocation42_spill] sm:$0xff] %v6270_v38  ;;  %v8097_v28 = vrot.slane %v5587_v18, 7  ;;  %vm8094_vm11 = vcmp.lt.f32.partialorder %v6270_v38, 16.0  ;;  %v578_v62 = vfloor.f32 %v542_v2  ;;  %v4823_v39 = vunpack.c.l.bf16 %v4931_v23 }
  0xa1   : > { %v1463_v13 = vsel %vm1185_vm7, %v1440_v14, %v1462_v33  ;;  %v792_v56 = vsel %vm8094_vm11, %v430_v12, 0.0  ;;  %v613_v27 = vmul.f32 18.0, %v577_v1  ;;  %v905_v0 = vrot.slane %v6275_v25, 1 }
  0xa2   : > { %5068 = vmatmul.mubr.bf16.gmra.mrb[20].mxu1 %v1463_v13  ;;  %v1256_v50 = vor.u32 %v8097_v28, %v5584_v11  ;;  %v6286_v45 = vpack.c.bf16 %v792_v56, %v791_v46  ;;  %v614_v52 = vmul.f32 18.0, %v578_v62  ;;  %v4824_v3 = vunpack.c.h.bf16 %v4931_v23 }
  0xa3   : > { %v354_v14 = vmul.f32 %v5928_v31, %v4823_v39  ;;  %v6289_v33 = vsub.f32 %v504_v5, %v613_v27  ;;  %v6292_v2 = vsel %vm854_vm15, %v901_v30, %v905_v0  ;;  %v8205_v12 = vrot.slane %v5581_v9, 7 }
  0xa4   : > { %v470_v13 = vadd.s32 272, %v5379_v8  ;;  %830 = vst [vmem:[#allocation2 + $0x88] sm:$0xff] %v6286_v45  ;;  %v1059_v46 = vrot.slane %v6286_v45, 1  ;;  %v6300_v56 = vsub.f32 %v505_v36, %v614_v52  ;;  %v8096_v23 = vshrl.u32 %v6292_v2, 16 }
  0xa5   : > { %8204 = vst [vmem:[#allocation43_spill] sm:$0xff] %v6289_v33  ;;  %v1257_v1 = vsel %vm1185_vm7, %v8205_v12, %v1256_v50  ;;  %v8100_v5 = vshll.u32 %v6292_v2, 16  ;;  %vm8114_vm11 = vcmp.lt.f32.partialorder %v6289_v33, 16.0  ;;  %v355_v30 = vmul.f32 %v5928_v31, %v4824_v3 }
  0xa6   : > { %8206 = vst [vmem:[#allocation44_spill] sm:$0xff] %v6300_v56  ;;  %v6307_v62 = vadd.f32 %v5955_v37, %v354_v14  ;;  %v471_v39 = vadd.s32 280, %v5379_v8  ;;  %v8207_v27 = vrot.slane %v6227_v24, 1  ;;  %vm8112_vm12 = vcmp.lt.f32.partialorder %v6300_v56, 16.0 }
  0xa7   : > { %v793_v52 = vsel %vm8114_vm11, %v431_v51, 0.0  ;;  %v6320_v36 = vrot.slane %v8096_v23, 7  ;;  %v794_v8 = vsel %vm8112_vm12, %v432_v16, 0.0  ;;  %v398_v14 = vadd.f32 %v5955_v37, %v355_v30 }
  0xa8   : > { %v6313_v50 = vsel %vm1025_vm0, %v8207_v27, %v1059_v46  ;;  %v6327_v12 = vpack.c.bf16 %v794_v8, %v793_v52  ;;  %v506_v51 = vcvt.s32.f32 %v470_v13  ;;  %v433_v28 = vmax.f32 %v6307_v62, 0.0 }
  0xa9   : > { %8208 = vst [vmem:[#allocation45_spill] sm:$0xff] %v6313_v50  ;;  %v8099_v3 = vshrl.u32 %v6313_v50, 16  ;;  %v1264_v27 = vor.u32 %v8100_v5, %v6320_v36  ;;  %v507_v33 = vcvt.s32.f32 %v471_v39  ;;  %v6341_v30 = vshrl.u32 %v5292_v55, 16  ;;  %v6345_v5 = vld [vmem:[#allocation2 + $0x38] sm:$0xff]  ;;  %v6350_v39 = vld [vmem:[#allocation2] sm:$0x80] }
  0xaa   : > { %831 = vst [vmem:[#allocation2 + $0x90] sm:$0xff] %v6327_v12  ;;  %v6337_v31 = vrot.slane %v6327_v12, 1  ;;  %v543_v16 = vmul.f32 0.055555556, %v506_v51  ;;  %v8210_v52 = vshll.u32 %v6313_v50, 16  ;;  %v434_v8 = vmax.f32 %v398_v14, 0.0 }
  0xab   : > { %v1478_v23 = vrot.slane %v8099_v3, 7  ;;  %v1265_v37 = vsel %vm1185_vm7, %v6188_v21, %v1264_v27  ;;  %v544_v3 = vmul.f32 0.055555556, %v507_v33  ;;  %v6348_v62 = vshll.u32 %v6345_v5, 16  ;;  %v1113_v55 = vld [vmem:[#allocation2 + $0xa0] sm:$0x1] }
  0xac   : > { %8209 = vst [vmem:[#allocation46_spill] sm:$0xff] %v6337_v31  ;;  %1794 = vmatprep.mubr.bf16.mxu0 %v1265_v37  ;;  %v6354_v56 = vsel %vm1025_vm0, %v1059_v46, %v6337_v31  ;;  %v579_v21 = vfloor.f32 %v543_v16  ;;  %v909_v27 = vor.u32 %v6341_v30, %v905_v0  ;;  %v856_v37 = vshrl.u32 %v6350_v39, 16 }
  0xad   : > { %v1481_v13 = vor.u32 %v8210_v52, %v1478_v23  ;;  %8211 = vst [vmem:[#allocation47_spill] sm:$0xff] %v6354_v56  ;;  %1795 = vmatmul.mubr.bf16.gmra.mrb[12].mxu0 %v1257_v1  ;;  %v8111_v52 = vshrl.u32 %v6354_v56, 16  ;;  %v8115_v38 = vshll.u32 %v6354_v56, 16  ;;  %v580_v50 = vfloor.f32 %v544_v3 }
  0xae   : > { %v615_v17 = vmul.f32 18.0, %v579_v21  ;;  %v8113_v46 = vrot.slane %v6348_v62, 1  ;;  %v858_v16 = vshll.u32 %v6350_v39, 16  ;;  %v1134_v58 = vrot.slane %v1113_v55, 1 }
  0xaf   : > { %v1482_v14 = vsel %vm1185_vm7, %v6259_v57, %v1481_v13  ;;  %v6367_v0 = vrot.slane %v8111_v52, 7  ;;  %v616_v4 = vmul.f32 18.0, %v580_v50  ;;  %v863_v57 = vshll.u32 %v5847_v53, 16 }
  0xb0   : > { %5071 = vmatprep.mubr.bf16.mxu1 %v1482_v14  ;;  %v6370_v13 = vsub.f32 %v506_v51, %v615_v17  ;;  %v6375_v3 = vsel %vm854_vm15, %v909_v27, %v8113_v46  ;;  %v860_v21 = vrot.slane %v858_v16, 1  ;;  %v867_v14 = vshrl.u32 %v5847_v53, 16  ;;  %v833_v17 = vld [vmem:[#allocation2] sm:$0xc0] }
  0xb1   : > { %v1500_v1 = vor.u32 %v8115_v38, %v6367_v0  ;;  %v6381_v52 = vsub.f32 %v507_v33, %v616_v4  ;;  %v8119_v50 = vshrl.u32 %v6375_v3, 16  ;;  %v8214_v51 = vrot.slane %v6341_v30, 7  ;;  %v6392_v53 = vld [vmem:[%s8006_s3 + $0x80] sm:$0xff]  }
  0xb2   : > { %8212 = vst [vmem:[#allocation48_spill] sm:$0xff] %v6370_v13  ;;  %vm687_vm12 = vcmp.lt.f32.partialorder %v6370_v13, 16.0  ;;  %v861_v16 = vor.u32 %v860_v21, %v856_v37  ;;  %v865_v46 = vrot.slane %v863_v57, 1  ;;  %v2094_v55 = vshrl.u32 %v833_v17, 16  ;;  %5079 = vmatprep.subr.bf16.mxu0 %v6392_v53 }
  0xb3   : > { %8213 = vst [vmem:[#allocation49_spill] sm:$0xff] %v6381_v52  ;;  %v1275_v27 = vor.u32 %v8214_v51, %v6275_v25  ;;  %v1501_v4 = vsel %vm1185_vm7, %v1478_v23, %v1500_v1  ;;  %vm8120_vm11 = vcmp.lt.f32.partialorder %v6381_v52, 16.0  ;;  %v795_v33 = vsel %vm687_vm12, %v433_v28, 0.0 }
  0xb4   : > { %v6400_v38 = vrot.slane %v8119_v50, 7  ;;  %5072 = vmatmul.mubr.bf16.gmra.mrb[24].mxu1 %v1501_v4  ;;  %v796_v37 = vsel %vm8120_vm11, %v434_v8, 0.0  ;;  %v866_v21 = vsel %vm854_vm15, %v861_v16, %v865_v46  ;;  %v869_v51 = vor.u32 %v867_v14, %v865_v46 }
  0xb5   : > { %v6406_v23 = vpack.c.bf16 %v796_v37, %v795_v33  ;;  %v8215_v1 = vshll.u32 %v6375_v3, 16  ;;  %v2106_v13 = vshrl.u32 %v866_v21, 16  ;;  %v2109_v56 = vshll.u32 %v866_v21, 16 }
  0xb6   : > { %v8216_v50 = vrot.slane %v5587_v18, 7  ;;  %v874_v8 = vsel %vm854_vm15, %v869_v51, %v5985_v48  ;;  %vm2092_vm11 = vsmask.f32 1280  ;;  %v2097_v46 = vshll.u32 %v833_v17, 16 }
  0xb7   : > { %v1283_v28 = vor.u32 %v8215_v1, %v6400_v38  ;;  %832 = vst [vmem:[#allocation2 + $0x98] sm:$0xff] %v6406_v23  ;;  %v1132_v16 = vrot.slane %v6406_v23, 1  ;;  %v2108_v37 = vrot.slane %v2106_v13, 6  ;;  %v2111_v1 = vrot.slane %v2109_v56, 7 }
  0xb8   : > { %v1276_v4 = vsel %vm1185_vm7, %v8216_v50, %v1275_v27  ;;  %v2114_v21 = vshrl.u32 %v874_v8, 16  ;;  %v2117_v52 = vshll.u32 %v874_v8, 16  ;;  %v2096_v40 = vrot.slane %v2094_v55, 6 }
  0xb9   : > { %v1284_v33 = vsel %vm1185_vm7, %v6320_v36, %v1283_v28  ;;  %v2101_v35 = vrot.slane %v867_v14, 6  ;;  %v1133_v50 = vsel %vm1025_vm0, %v6337_v31, %v1132_v16  ;;  %v1135_v48 = vsel %vm1025_vm0, %v1132_v16, %v1134_v58  ;;  %v5294_v58 = vld [vmem:[#allocation2 + $0x40] sm:$0xff] }
  0xba   : > { %1802 = vmatprep.mubr.bf16.mxu0 %v1284_v33  ;;  %v2099_v17 = vrot.slane %v2097_v46, 7  ;;  %v6424_v27 = vshrl.u32 %v6345_v5, 16  ;;  %v1514_v51 = vshrl.u32 %v1133_v50, 16  ;;  %v1517_v61 = vshll.u32 %v1133_v50, 16 }
  0xbb   : > { %1803 = vmatmul.mubr.bf16.gmra.mrb[16].mxu0 %v1276_v4  ;;  %v1533_v36 = vshrl.u32 %v1135_v48, 16  ;;  %v1536_v13 = vshll.u32 %v1135_v48, 16  ;;  %v2112_v56 = vor.u32 %v2111_v1, %v2108_v37  ;;  %v2116_v28 = vrot.slane %v2114_v21, 6 }
  0xbc   : > { %v2119_v33 = vrot.slane %v2117_v52, 7  ;;  %v2102_v8 = vrot.slane %v863_v57, 7  ;;  %v1516_v55 = vrot.slane %v1514_v51, 7  ;;  %v8217_v54 = vrot.slane %v6348_v62, 1 }
  0xbd   : > { %v1535_v14 = vrot.slane %v1533_v36, 7  ;;  %v6429_v4 = vshll.u32 %v5294_v58, 16  ;;  %v1293_v5 = vrot.slane %v6424_v27, 7  ;;  %v8218_v16 = vshrl.u32 %v6009_v47, 16 }
  0xbe   : > { %v917_v31 = vor.u32 %v6424_v27, %v8217_v54  ;;  %v2120_v46 = vor.u32 %v2119_v33, %v2116_v28  ;;  %v1519_v48 = vor.u32 %v1517_v61, %v1516_v55  ;;  %v8219_v57 = vshll.u32 %v6009_v47, 16 }
  0xbf   : > { %v2143_v50 = vrot.slane %v8218_v16, 6  ;;  %v1538_v37 = vor.u32 %v1536_v13, %v1535_v14  ;;  %v921_v52 = vrot.slane %v6429_v4, 1  ;;  %v2100_v51 = vor.u32 %v2099_v17, %v2096_v40 }
  0xc0   : > { %v2144_v1 = vrot.slane %v8219_v57, 7  ;;  %v2121_v21 = vsel %vm2092_vm11, %v2112_v56, %v2120_v46  ;;  %v2103_v54 = vor.u32 %v2102_v8, %v2101_v35  ;;  %v2139_v36 = vrot.slane %v5976_v34, 6 }
  0xc1   : > { %v1520_v28 = vsel %vm1185_vm7, %v6367_v0, %v1519_v48  ;;  %v1539_v33 = vsel %vm1185_vm7, %v1516_v55, %v1538_v37  ;;  %v6443_v16 = vsel %vm854_vm15, %v917_v31, %v921_v52  ;;  %v2140_v61 = vrot.slane %v5974_v26, 7  ;;  %v5295_v0 = vld [vmem:[#allocation2 + $0x48] sm:$0xff] }
  0xc2   : > { %5075 = vmatprep.mubr.bf16.mxu1 %v1520_v28  ;;  %v8133_v47 = vshrl.u32 %v6443_v16, 16  ;;  %v8132_v13 = vshll.u32 %v6443_v16, 16  ;;  %v1294_v35 = vor.u32 %v1293_v5, %v6348_v62  ;;  %v2145_v34 = vor.u32 %v2144_v1, %v2143_v50  ;;  %v5296_v1 = vld [vmem:[#allocation2 + $0x50] sm:$0xff] }
  0xc3   : > { %5076 = vmatmul.mubr.bf16.gmra.mrb[28].mxu1 %v1539_v33  ;;  %v6451_v40 = vshrl.u32 %v5294_v58, 16  ;;  %v6453_v17 = vshll.u32 %v5295_v0, 16  ;;  %v2104_v31 = vsel %vm2092_vm11, %v2100_v51, %v2103_v54  ;;  %v6458_v56 = vor.u32 %v2140_v61, %v2139_v36 }
  0xc4   : > { %2588 = vmatprep.mubr.bf16.mxu1 %v2121_v21  ;;  %v1299_v26 = vrot.slane %v8133_v47, 7  ;;  %v8220_v14 = vshrl.u32 %v6039_v29, 16  ;;  %v8221_v48 = vshll.u32 %v6039_v29, 16  ;;  %v6468_v57 = vshrl.u32 %v5295_v0, 16  ;;  %v5249_v29 = vld [vmem:[%s8006_s3 + $0x180] sm:$0xff]  }
  0xc5   : > { %v925_v8 = vor.u32 %v6451_v40, %v921_v52  ;;  %v929_v55 = vrot.slane %v6453_v17, 1  ;;  %v6470_v21 = vshll.u32 %v5296_v1, 16  ;;  %v8222_v51 = vrot.slane %v6341_v30, 7 }
  0xc6   : > { %v2155_v50 = vrot.slane %v8220_v14, 6  ;;  %v1302_v58 = vor.u32 %v8132_v13, %v1299_v26  ;;  %v2156_v37 = vrot.slane %v8221_v48, 7  ;;  %v2146_v36 = vsel %vm2092_vm11, %v2120_v46, %v2145_v34 }
  0xc7   : > { %v1295_v52 = vsel %vm1185_vm7, %v8222_v51, %v1294_v35  ;;  %v6477_v28 = vsel %vm854_vm15, %v925_v8, %v929_v55  ;;  %v8135_v33 = vrot.slane %v6451_v40, 7  ;;  %v2151_v35 = vrot.slane %v5577_v6, 6 }
  0xc8   : > { %v1303_v61 = vsel %vm1185_vm7, %v6400_v38, %v1302_v58  ;;  %v8134_v0 = vshrl.u32 %v6477_v28, 16  ;;  %v8136_v14 = vshll.u32 %v6477_v28, 16  ;;  %v2152_v46 = vrot.slane %v5908_v41, 7 }
  0xc9   : > { %1810 = vmatprep.mubr.bf16.mxu0 %v1303_v61  ;;  %v933_v8 = vor.u32 %v6468_v57, %v929_v55  ;;  %v937_v48 = vrot.slane %v6470_v21, 1  ;;  %v8223_v51 = vshrl.u32 %v6168_v19, 16  ;;  %v2142_v38 = vsel %vm2092_vm11, %v2103_v54, %v6458_v56 }
  0xca   : > { %1811 = vmatmul.mubr.bf16.gmra.mrb[20].mxu0 %v1295_v52  ;;  %v1318_v58 = vrot.slane %v8134_v0, 7  ;;  %v6497_v47 = vor.u32 %v2156_v37, %v2155_v50  ;;  %v8224_v6 = vshll.u32 %v6168_v19, 16  ;;  %v1313_v41 = vor.u32 %v8135_v33, %v6429_v4  ;;  %v5250_v19 = vld [vmem:[%s8006_s3 + $0x188] sm:$0xff]  }
  0xcb   : > { %v2167_v13 = vrot.slane %v8223_v51, 6  ;;  %2589 = vmatmul.mubr.bf16.vlgmr.msra.gmra.mrb[32].mxu1 %v2104_v31  ;;  %v6505_v55 = vsel %vm854_vm15, %v933_v8, %v937_v48  ;;  %v6507_v52 = vshrl.u32 %v5296_v1, 16  ;;  %v5297_v51 = vld [vmem:[#allocation2 + $0x58] sm:$0xff]  ;;  %v6519_v1 = vld [vmem:[#allocation2] sm:$0xff]  ;;  %v2163_v37 = vrot.slane %v5581_v9, 6 }
  0xcc   : > { %v2168_v61 = vrot.slane %v8224_v6, 7  ;;  %v6509_v54 = vshll.u32 %v5297_v51, 16  ;;  %3689 = vmatpush1.bf16.msra.mxu1 %v5249_v29  ;;  %2596 = vmatprep.mubr.bf16.mxu1 %v2146_v36  ;;  %v1321_v31 = vor.u32 %v8136_v14, %v1318_v58  ;;  %v8137_v50 = vshrl.u32 %v6505_v55, 16 }
  0xcd   : > { %3690 = vmatprep.subr.bf16.mxu1 %v6519_v1  ;;  %v6522_v6 = vor.u32 %v2152_v46, %v2151_v35  ;;  %v941_v29 = vor.u32 %v6507_v52, %v937_v48  ;;  %v2164_v8 = vrot.slane %v5579_v7, 7  ;;  %v1314_v35 = vsel %vm1185_vm7, %v1293_v5, %v1313_v41  ;;  %v5251_v7 = vld [vmem:[%s8006_s3 + $0x190] sm:$0xff]  }
  0xce   : > { %v2169_v36 = vor.u32 %v2168_v61, %v2167_v13  ;;  %v945_v0 = vrot.slane %v6509_v54, 1  ;;  %v1322_v33 = vsel %vm1185_vm7, %v1299_v26, %v1321_v31  ;;  %v1337_v14 = vrot.slane %v8137_v50, 7 }
  0xcf   : > { %1818 = vmatprep.mubr.bf16.mxu0 %v1322_v33  ;;  %v2158_v13 = vsel %vm2092_vm11, %v2145_v34, %v6497_v47  ;;  %v8225_v26 = vshrl.u32 %v6292_v2, 16  ;;  %v8226_v61 = vshll.u32 %v6505_v55, 16  ;;  %v8227_v5 = vrot.slane %v6468_v57, 7 }
  0xd0   : > { %v6537_v46 = vsel %vm854_vm15, %v941_v29, %v945_v0  ;;  %3691 = vmatpush1.bf16.msra.mxu1 %v5250_v19  ;;  %v8228_v31 = vshll.u32 %v6292_v2, 16  ;;  %v2175_v29 = vrot.slane %v5587_v18, 6  ;;  %v2165_v42 = vor.u32 %v2164_v8, %v2163_v37 }
  0xd1   : > { %v2179_v48 = vrot.slane %v8225_v26, 6  ;;  %v1340_v9 = vor.u32 %v8226_v61, %v1337_v14  ;;  %v1332_v33 = vor.u32 %v8227_v5, %v6453_v17  ;;  %v1354_v34 = vshrl.u32 %v6537_v46, 16  ;;  %3692 = vmatprep.subr.bf16.mxu1 %v6519_v1 }
  0xd2   : > { %v2180_v19 = vrot.slane %v8228_v31, 7  ;;  %v2176_v26 = vrot.slane %v5584_v11, 7  ;;  %v6556_v61 = vshrl.u32 %v5297_v51, 16  ;;  %1819 = vmatmul.mubr.bf16.gmra.mrb[24].mxu0 %v1314_v35  ;;  %v6562_v41 = vshll.u32 %v5905_v10, 16 }
  0xd3   : > { %v1341_v50 = vsel %vm1185_vm7, %v1318_v58, %v1340_v9  ;;  %v1356_v5 = vrot.slane %v1354_v34, 7  ;;  %2597 = vmatmul.mubr.bf16.gmra.mrb[36].mxu1 %v2142_v38  ;;  %v8229_v11 = vshll.u32 %v6537_v46, 16  ;;  %v5252_v58 = vld [vmem:[%s8006_s3 + $0x198] sm:$0xff]   ;;  %v2188_v35 = vrot.slane %v6275_v25, 7  ;;  %v5253_v25 = vld [vmem:[%s8006_s3 + $0x1a0] sm:$0xff]  }
  0xd4   : > { %1826 = vmatprep.mubr.bf16.mxu0 %v1341_v50  ;;  %v6564_v2 = vor.u32 %v2180_v19, %v2179_v48  ;;  %v2177_v31 = vor.u32 %v2176_v26, %v2175_v29  ;;  %v949_v18 = vor.u32 %v6556_v61, %v945_v0  ;;  %2604 = vmatprep.mubr.bf16.mxu1 %v2158_v13  ;;  %v953_v37 = vrot.slane %v6562_v41, 1  ;;  %v5299_v19 = vld [vmem:[#allocation2 + $0x60] sm:$0xff] }
  0xd5   : > { %3693 = vmatpush1.bf16.msra.mxu1 %v5251_v7  ;;  %v1359_v51 = vor.u32 %v8229_v11, %v1356_v5  ;;  %v2187_v0 = vrot.slane %v6341_v30, 6  ;;  %v2154_v50 = vsel %vm2092_vm11, %v6458_v56, %v6522_v6  ;;  %v8230_v13 = vrot.slane %v6451_v40, 7 }
  0xd6   : > { %3694 = vmatprep.subr.bf16.mxu1 %v6519_v1  ;;  %v6576_v10 = vsel %vm2092_vm11, %v2169_v36, %v6564_v2  ;;  %v6579_v38 = vsel %vm2092_vm11, %v2165_v42, %v2177_v31  ;;  %v6586_v8 = vsel %vm854_vm15, %v949_v18, %v953_v37  ;;  %v1350_v9 = vrot.slane %v6507_v52, 7 }
  0xd7   : > { %v1333_v48 = vsel %vm1185_vm7, %v8230_v13, %v1332_v33  ;;  %v1373_v7 = vshrl.u32 %v6586_v8, 16  ;;  %v6594_v29 = vshrl.u32 %v5299_v19, 16  ;;  %v1360_v30 = vsel %vm1185_vm7, %v1337_v14, %v1359_v51 }
  0xd8   : > { %v8140_v56 = vshll.u32 %v6586_v8, 16  ;;  %v2189_v26 = vor.u32 %v2188_v35, %v2187_v0  ;;  %v6602_v18 = vshll.u32 %v6047_v22, 16  ;;  %v2170_v33 = vsel %vm2092_vm11, %v6497_v47, %v2169_v36 }
  0xd9   : > { %3695 = vmatpush1.bf16.msra.mxu1 %v5252_v58  ;;  %v1375_v11 = vrot.slane %v1373_v7, 7  ;;  %v957_v14 = vor.u32 %v6594_v29, %v953_v37  ;;  %v2199_v0 = vrot.slane %v6424_v27, 6  ;;  %v2200_v35 = vrot.slane %v6348_v62, 7  ;;  %v5254_v62 = vld [vmem:[%s8006_s3 + $0x1a8] sm:$0xff]  }
  0xda   : > { %3696 = vmatprep.subr.bf16.mxu1 %v6519_v1  ;;  %1827 = vmatmul.mubr.bf16.gmra.mrb[28].mxu0 %v1333_v48  ;;  %v6611_v51 = vsel %vm2092_vm11, %v2177_v31, %v2189_v26  ;;  %v961_v58 = vrot.slane %v6602_v18, 1  ;;  %v1351_v47 = vor.u32 %v1350_v9, %v6470_v21  ;;  %v6620_v36 = vshrl.u32 %v6047_v22, 16 }
  0xdb   : > { %2605 = vmatmul.mubr.bf16.gmra.mrb[40].mxu1 %v2154_v50  ;;  %1834 = vmatprep.mubr.bf16.mxu0 %v1360_v30  ;;  %v1378_v31 = vor.u32 %v8140_v56, %v1375_v11  ;;  %v2201_v27 = vor.u32 %v2200_v35, %v2199_v0  ;;  %v6631_v50 = vshll.u32 %v6115_v49, 16  ;;  %v2166_v22 = vsel %vm2092_vm11, %v6522_v6, %v2165_v42 }
  0xdc   : > { %2612 = vmatprep.mubr.bf16.mxu1 %v2170_v33  ;;  %v6625_v37 = vsel %vm854_vm15, %v957_v14, %v961_v58  ;;  %v965_v19 = vor.u32 %v6620_v36, %v961_v58  ;;  %v1369_v14 = vrot.slane %v6556_v61, 7  ;;  %v8232_v0 = vshrl.u32 %v6375_v3, 16  ;;  %v5255_v58 = vld [vmem:[%s8006_s3 + $0x1b0] sm:$0xff]  }
  0xdd   : > { %3697 = vmatpush1.bf16.msra.mxu1 %v5253_v25  ;;  %v8142_v13 = vshrl.u32 %v6625_v37, 16  ;;  %v6638_v48 = vsel %vm2092_vm11, %v2189_v26, %v2201_v27  ;;  %v969_v30 = vrot.slane %v6631_v50, 1  ;;  %v8231_v25 = vrot.slane %v6468_v57, 7 }
  0xde   : > { %3698 = vmatprep.subr.bf16.mxu1 %v6519_v1  ;;  %v2191_v35 = vrot.slane %v8232_v0, 6  ;;  %v2211_v56 = vrot.slane %v6451_v40, 6  ;;  %v1379_v42 = vsel %vm1185_vm7, %v1356_v5, %v1378_v31  ;;  %v8141_v26 = vshll.u32 %v6625_v37, 16 }
  0xdf   : > { %v1352_v33 = vsel %vm1185_vm7, %v8231_v25, %v1351_v47  ;;  %v6652_v6 = vrot.slane %v8142_v13, 7  ;;  %v2212_v47 = vrot.slane %v6429_v4, 7  ;;  %v8233_v25 = vshll.u32 %v6375_v3, 16 }
  0xe0   : > { %v6662_v40 = vsel %vm854_vm15, %v965_v19, %v969_v30  ;;  %v6666_v5 = vshrl.u32 %v6115_v49, 16  ;;  %v6669_v31 = vshll.u32 %v6184_v59, 16  ;;  %v1370_v3 = vor.u32 %v1369_v14, %v6509_v54 }
  0xe1   : > { %3699 = vmatpush1.bf16.msra.mxu1 %v5254_v62  ;;  %v2192_v0 = vrot.slane %v8233_v25, 7  ;;  %v2213_v62 = vor.u32 %v2212_v47, %v2211_v56  ;;  %v1397_v4 = vor.u32 %v8141_v26, %v6652_v6  ;;  %v1411_v49 = vshrl.u32 %v6662_v40, 16  ;;  %v5256_v56 = vld [vmem:[%s8006_s3 + $0x1b8] sm:$0xff]  }
  0xe2   : > { %3700 = vmatprep.subr.bf16.mxu1 %v6519_v1  ;;  %1835 = vmatmul.mubr.bf16.gmra.mrb[32].mxu0 %v1352_v33  ;;  %v973_v33 = vor.u32 %v6666_v5, %v969_v30  ;;  %v2223_v47 = vrot.slane %v6468_v57, 6  ;;  %v8234_v25 = vshrl.u32 %v6443_v16, 16  ;;  %v1414_v57 = vshll.u32 %v6662_v40, 16 }
  0xe3   : > { %2613 = vmatmul.mubr.bf16.gmra.mrb[44].mxu1 %v2166_v22  ;;  %1842 = vmatprep.mubr.bf16.mxu0 %v1379_v42  ;;  %v6680_v19 = vsel %vm2092_vm11, %v2201_v27, %v2213_v62  ;;  %v2193_v22 = vor.u32 %v2192_v0, %v2191_v35  ;;  %v977_v42 = vrot.slane %v6669_v31, 1  ;;  %v1371_v27 = vsel %vm1185_vm7, %v1350_v9, %v1370_v3  ;;  %v5257_v9 = vld [vmem:[%s8006_s3 + $0x1c0] sm:$0xff]  }
  0xe4   : > { %2620 = vmatprep.mubr.bf16.mxu1 %v6576_v10  ;;  %v1388_v10 = vrot.slane %v6594_v29, 7  ;;  %v2203_v26 = vrot.slane %v8234_v25, 6  ;;  %v8235_v35 = vshll.u32 %v6443_v16, 16  ;;  %v1398_v0 = vsel %vm1185_vm7, %v1375_v11, %v1397_v4 }
  0xe5   : > { %3701 = vmatpush1.bf16.msra.mxu1 %v5255_v58  ;;  %v2224_v58 = vrot.slane %v6453_v17, 7  ;;  %v6701_v13 = vrot.slane %v1411_v49, 7  ;;  %v2194_v3 = vsel %vm2092_vm11, %v6564_v2, %v2193_v22  ;;  %v6710_v16 = vsel %vm854_vm15, %v973_v33, %v977_v42 }
  0xe6   : > { %3702 = vmatprep.subr.bf16.mxu1 %v6519_v1  ;;  %v2204_v30 = vrot.slane %v8235_v35, 7  ;;  %v6713_v11 = vshrl.u32 %v6184_v59, 16  ;;  %v6716_v4 = vshll.u32 %v6227_v24, 16  ;;  %v2235_v2 = vrot.slane %v6507_v52, 6 }
  0xe7   : > { %v2225_v17 = vor.u32 %v2224_v58, %v2223_v47  ;;  %v2236_v33 = vrot.slane %v6470_v21, 7  ;;  %v1416_v58 = vor.u32 %v1414_v57, %v6701_v13  ;;  %v8236_v35 = vshrl.u32 %v6477_v28, 16 }
  0xe8   : > { %v2205_v59 = vor.u32 %v2204_v30, %v2203_v26  ;;  %v981_v52 = vor.u32 %v6713_v11, %v977_v42  ;;  %v1407_v26 = vrot.slane %v6620_v36, 7  ;;  %v2247_v42 = vrot.slane %v6556_v61, 6 }
  0xe9   : > { %3703 = vmatpush1.bf16.msra.mxu1 %v5256_v56  ;;  %v1389_v56 = vor.u32 %v1388_v10, %v6562_v41  ;;  %v6723_v47 = vsel %vm2092_vm11, %v2213_v62, %v2225_v17  ;;  %v5258_v62 = vld [vmem:[%s8006_s3 + $0x1c8] sm:$0xff]   ;;  %v2237_v25 = vor.u32 %v2236_v33, %v2235_v2  ;;  %v2215_v30 = vrot.slane %v8236_v35, 6 }
  0xea   : > { %3704 = vmatprep.subr.bf16.mxu1 %v6519_v1  ;;  %1843 = vmatmul.mubr.bf16.gmra.mrb[36].mxu0 %v1371_v27  ;;  %v8144_v27 = vshrl.u32 %v6710_v16, 16  ;;  %v1417_v2 = vsel %vm1185_vm7, %v6652_v6, %v1416_v58  ;;  %v8237_v33 = vshll.u32 %v6477_v28, 16  ;;  %v8143_v35 = vshll.u32 %v6710_v16, 16 }
  0xeb   : > { %2621 = vmatmul.mubr.bf16.gmra.mrb[48].mxu1 %v6579_v38  ;;  %1850 = vmatprep.mubr.bf16.mxu0 %v1398_v0  ;;  %v985_v38 = vrot.slane %v6716_v4, 1  ;;  %v1390_v21 = vsel %vm1185_vm7, %v1369_v14, %v1389_v56  ;;  %v2206_v0 = vsel %vm2092_vm11, %v2193_v22, %v2205_v59  ;;  %v5259_v22 = vld [vmem:[%s8006_s3 + $0x1d0] sm:$0xff]   ;;  %v6769_v28 = vshll.u32 %v6286_v45, 16 }
  0xec   : > { %2628 = vmatprep.mubr.bf16.mxu1 %v2194_v3  ;;  %v2248_v3 = vrot.slane %v6509_v54, 7  ;;  %v2216_v14 = vrot.slane %v8237_v33, 7  ;;  %v6756_v56 = vrot.slane %v8144_v27, 7  ;;  %v6766_v54 = vshrl.u32 %v6227_v24, 16 }
  0xed   : > { %3705 = vmatpush1.bf16.msra.mxu1 %v5257_v9  ;;  %v6746_v9 = vsel %vm2092_vm11, %v2225_v17, %v2237_v25  ;;  %v6763_v61 = vsel %vm854_vm15, %v981_v52, %v985_v38  ;;  %v1408_v17 = vor.u32 %v1407_v26, %v6602_v18 }
  0xee   : > { %3706 = vmatprep.subr.bf16.mxu1 %v6519_v1  ;;  %v2249_v6 = vor.u32 %v2248_v3, %v2247_v42  ;;  %v2217_v24 = vor.u32 %v2216_v14, %v2215_v30  ;;  %v8148_v52 = vshrl.u32 %v6763_v61, 16  ;;  %v5260_v42 = vld [vmem:[%s8006_s3 + $0x1d8] sm:$0xff]   ;;  %v1426_v3 = vrot.slane %v6666_v5, 7 }
  0xef   : > { %v1409_v30 = vsel %vm1185_vm7, %v1388_v10, %v1408_v17  ;;  %v8239_v14 = vshll.u32 %v6505_v55, 16  ;;  %v5262_v10 = vld [vmem:[%s8006_s3 + $0x1e0] sm:$0xff]   ;;  %v6814_v17 = vshrl.u32 %v6286_v45, 16  ;;  %v2272_v45 = vrot.slane %v6602_v18, 7 }
  0xf0   : > { %v6777_v58 = vsel %vm2092_vm11, %v2237_v25, %v2249_v6  ;;  %v993_v25 = vrot.slane %v6769_v28, 1  ;;  %v6804_v27 = vrot.slane %v8148_v52, 7 }
  0xf1   : > { %3707 = vmatpush1.bf16.msra.mxu1 %v5258_v62  ;;  %v1435_v62 = vor.u32 %v8143_v35, %v6756_v56 }
  0xf2   : > { %3708 = vmatprep.subr.bf16.mxu1 %v6519_v1  ;;  %1851 = vmatmul.mubr.bf16.gmra.mrb[40].mxu0 %v1390_v21  ;;  %v2259_v21 = vrot.slane %v6594_v29, 6  ;;  %v8147_v29 = vshll.u32 %v6763_v61, 16 }
  0xf3   : > { %2629 = vmatmul.mubr.bf16.gmra.mrb[52].mxu1 %v6611_v51  ;;  %1858 = vmatprep.mubr.bf16.mxu0 %v1417_v2  ;;  %v989_v51 = vor.u32 %v6766_v54, %v985_v38  ;;  %v8238_v2 = vshrl.u32 %v6505_v55, 16  ;;  %v2218_v38 = vsel %vm2092_vm11, %v2205_v59, %v2217_v24  ;;  %v1115_v59 = vshll.u32 %v6327_v12, 16 }
  0xf4   : > { %2636 = vmatprep.mubr.bf16.mxu1 %v2206_v0  ;;  %v2260_v0 = vrot.slane %v6562_v41, 7  ;;  %v1436_v41 = vsel %vm1185_vm7, %v6701_v13, %v1435_v62  ;;  %v1427_v62 = vor.u32 %v1426_v3, %v6631_v50 }
  0xf5   : > { %3709 = vmatpush1.bf16.msra.mxu1 %v5259_v22  ;;  %v2227_v33 = vrot.slane %v8238_v2, 6  ;;  %v2228_v22 = vrot.slane %v8239_v14, 7  ;;  %v6811_v55 = vsel %vm854_vm15, %v989_v51, %v993_v25  ;;  %v1117_v18 = vrot.slane %v1115_v59, 1 }
  0xf6   : > { %3710 = vmatprep.subr.bf16.mxu1 %v6519_v1  ;;  %v2261_v35 = vor.u32 %v2260_v0, %v2259_v21  ;;  %v8146_v51 = vshrl.u32 %v6811_v55, 16  ;;  %v1445_v0 = vrot.slane %v6713_v11, 7  ;;  %v8240_v14 = vshll.u32 %v6537_v46, 16 }
  0xf7   : > { %v2229_v21 = vor.u32 %v2228_v22, %v2227_v33  ;;  %v2239_v33 = vrot.slane %v1354_v34, 6  ;;  %v8145_v34 = vshll.u32 %v6811_v55, 16 }
  0xf8   : > { %v6818_v13 = vsel %vm2092_vm11, %v2249_v6, %v2261_v35  ;;  %v1454_v6 = vor.u32 %v8147_v29, %v6804_v27  ;;  %v2240_v22 = vrot.slane %v8240_v14, 7  ;;  %v1470_v46 = vrot.slane %v8146_v51, 7 }
  0xf9   : > { %3711 = vmatpush1.bf16.msra.mxu1 %v5260_v42  ;;  %v2271_v42 = vrot.slane %v6620_v36, 6  ;;  %v5269_v36 = vld [vmem:[%s8006_s3 + $0x1f0] sm:$0xff]  }
  0xfa   : > { %3712 = vmatprep.subr.bf16.mxu1 %v6519_v1  ;;  %1859 = vmatmul.mubr.bf16.gmra.mrb[44].mxu0 %v1409_v30  ;;  %v6836_v30 = vor.u32 %v6814_v17, %v993_v25  ;;  %v1428_v25 = vsel %vm1185_vm7, %v1407_v26, %v1427_v62 }
  0xfb   : > { %2637 = vmatmul.mubr.bf16.gmra.mrb[56].mxu1 %v6638_v48  ;;  %1866 = vmatprep.mubr.bf16.mxu0 %v1436_v41  ;;  %v5265_v48 = vld [vmem:[%s8006_s3 + $0x1e8] sm:$0xff]   ;;  %v2273_v2 = vor.u32 %v2272_v45, %v2271_v42  ;;  %v2284_v41 = vrot.slane %v6631_v50, 7  ;;  %v1455_v45 = vsel %vm1185_vm7, %v6756_v56, %v1454_v6  ;;  %v1446_v50 = vor.u32 %v1445_v0, %v6669_v31 }
  0xfc   : > { %2644 = vmatprep.mubr.bf16.mxu1 %v2218_v38  ;;  %v2283_v38 = vrot.slane %v6666_v5, 6  ;;  %v1118_v26 = vsel %vm854_vm15, %v6836_v30, %v1117_v18  ;;  %v1119_v56 = vshrl.u32 %v6327_v12, 16  ;;  %v2295_v6 = vrot.slane %v6713_v11, 6 }
  0xfd   : > { %3713 = vmatpush1.bf16.msra.mxu1 %v5262_v10  ;;  %v2230_v10 = vsel %vm2092_vm11, %v2217_v24, %v2229_v21  ;;  %v6852_v42 = vsel %vm2092_vm11, %v2261_v35, %v2273_v2  ;;  %v1123_v35 = vshll.u32 %v6406_v23, 16  ;;  %v2241_v24 = vor.u32 %v2240_v22, %v2239_v33  ;;  %v5272_v33 = vld [vmem:[%s8006_s3 + $0x1f8] sm:$0xff]  }
  0xfe   : > { %3714 = vmatprep.subr.bf16.mxu1 %v6519_v1  ;;  %v2285_v14 = vor.u32 %v2284_v41, %v2283_v38  ;;  %v1487_v38 = vshrl.u32 %v1118_v26, 16  ;;  %v2296_v41 = vrot.slane %v6669_v31, 7  ;;  %v1490_v5 = vshll.u32 %v1118_v26, 16 }
  0xff   : > { %v1125_v22 = vrot.slane %v1123_v35, 1 }
 0x100   : > { %v6871_v62 = vsel %vm2092_vm11, %v2273_v2, %v2285_v14  ;;  %v1447_v2 = vsel %vm1185_vm7, %v1426_v3, %v1446_v50  ;;  %v2297_v31 = vor.u32 %v2296_v41, %v2295_v6  ;;  %v2319_v3 = vrot.slane %v6814_v17, 6 }
 0x101   : > { %3715 = vmatpush1.bf16.msra.mxu1 %v5265_v48  ;;  %v1473_v48 = vor.u32 %v8145_v34, %v1470_v46  ;;  %v2320_v50 = vrot.slane %v6769_v28, 7  ;;  %v1489_v34 = vrot.slane %v1487_v38, 7  ;;  %v2251_v6 = vrot.slane %v1373_v7, 6 }
 0x102   : > { %3716 = vmatprep.subr.bf16.mxu1 %v6519_v1  ;;  %1867 = vmatmul.mubr.bf16.gmra.mrb[48].mxu0 %v1428_v25  ;;  %v2242_v25 = vsel %vm2092_vm11, %v2229_v21, %v2241_v24  ;;  %v6898_v51 = vsel %vm2092_vm11, %v2285_v14, %v2297_v31  ;;  %v8241_v41 = vshll.u32 %v6586_v8, 16 }
 0x103   : > { %2645 = vmatmul.mubr.bf16.gmra.mrb[60].mxu1 %v6680_v19  ;;  %1874 = vmatprep.mubr.bf16.mxu0 %v1455_v45  ;;  %v1121_v19 = vor.u32 %v1119_v56, %v1117_v18  ;;  %v2308_v45 = vrot.slane %v6716_v4, 7  ;;  %v1474_v18 = vsel %vm1185_vm7, %v6804_v27, %v1473_v48  ;;  %v6905_v29 = vor.u32 %v2320_v50, %v2319_v3  ;;  %v5300_v50 = vld [vmem:[#allocation2 + $0x10] sm:$0xff] }
 0x104   : > { %2652 = vmatprep.mubr.bf16.mxu1 %v2230_v10  ;;  %v2307_v10 = vrot.slane %v6766_v54, 6  ;;  %v1492_v8 = vor.u32 %v1490_v5, %v1489_v34  ;;  %v1127_v48 = vshrl.u32 %v6406_v23, 16  ;;  %v8243_v5 = vshll.u32 %v6625_v37, 16 }
 0x105   : > { %3717 = vmatpush1.bf16.msra.mxu1 %v5269_v36  ;;  %v1464_v36 = vrot.slane %v6766_v54, 7  ;;  %v2252_v54 = vrot.slane %v8241_v41, 7  ;;  %v1126_v26 = vsel %vm854_vm15, %v1121_v19, %v1125_v22  ;;  %v2276_v41 = vrot.slane %v1414_v57, 7 }
 0x106   : > { %3718 = vmatprep.subr.bf16.mxu1 %v6519_v1  ;;  %v2309_v21 = vor.u32 %v2308_v45, %v2307_v10  ;;  %v1506_v7 = vshrl.u32 %v1126_v26, 16  ;;  %v2264_v3 = vrot.slane %v8243_v5, 7 }
 0x107   : > { %v1465_v27 = vor.u32 %v1464_v36, %v6716_v4  ;;  %v2253_v38 = vor.u32 %v2252_v54, %v2251_v6  ;;  %v1509_v4 = vshll.u32 %v1126_v26, 16  ;;  %v8244_v54 = vrot.slane %v5563_v60, 1 }
 0x108   : > { %v6908_v52 = vsel %vm2092_vm11, %v2297_v31, %v2309_v21  ;;  %v6914_v14 = vsel %vm2092_vm11, %v2309_v21, %v6905_v29  ;;  %v1508_v19 = vrot.slane %v1506_v7, 7  ;;  %v1129_v31 = vor.u32 %v1127_v48, %v1125_v22 }
 0x109   : > { %3719 = vmatpush1.bf16.msra.mxu1 %v5272_v33  ;;  %v1466_v33 = vsel %vm1185_vm7, %v1445_v0, %v1465_v27  ;;  %v2254_v10 = vsel %vm2092_vm11, %v2241_v24, %v2253_v38  ;;  %v1029_v22 = vrot.slane %v5300_v50, 1  ;;  %v1521_v7 = vrot.slane %v1127_v48, 7 }
 0x10a   : > { %1875 = vmatmul.mubr.bf16.gmra.mrb[52].mxu0 %v1447_v2  ;;  %v1483_v2 = vrot.slane %v6814_v17, 7  ;;  %v1511_v17 = vor.u32 %v1509_v4, %v1508_v19  ;;  %v1525_v0 = vshrl.u32 %v1129_v31, 16  ;;  %v1528_v6 = vshll.u32 %v1129_v31, 16 }
 0x10b   : > { %2653 = vmatmul.mubr.bf16.gmra.mrb[64].mxu1 %v6723_v47  ;;  %1882 = vmatprep.mubr.bf16.mxu0 %v1474_v18  ;;  %v1493_v47 = vsel %vm1185_vm7, %v1470_v46, %v1492_v8  ;;  %v1502_v18 = vrot.slane %v1119_v56, 7  ;;  %v6941_v26 = vsel %vm1025_vm0, %v1029_v22, %v8244_v54  ;;  %v1206_v12 = vshrl.u32 %v1029_v22, 16 }
 0x10c   : > { %2660 = vmatprep.mubr.bf16.mxu1 %v2242_v25  ;;  %v8242_v25 = vshrl.u32 %v6625_v37, 16  ;;  %v1484_v11 = vor.u32 %v1483_v2, %v6769_v28  ;;  %v1512_v37 = vsel %vm1185_vm7, %v1489_v34, %v1511_v17  ;;  %v1527_v21 = vrot.slane %v1525_v0, 7 }
 0x10d   : > { %v2275_v28 = vrot.slane %v1411_v49, 6  ;;  %v1503_v34 = vor.u32 %v1502_v18, %v1115_v59  ;;  %v1210_v60 = vshrl.u32 %v6941_v26, 16  ;;  %v8245_v31 = vshrl.u32 %v6710_v16, 16 }
 0x10e   : > { %v2263_v45 = vrot.slane %v8242_v25, 6  ;;  %v1485_v24 = vsel %vm1185_vm7, %v1464_v36, %v1484_v11  ;;  %v1530_v40 = vor.u32 %v1528_v6, %v1527_v21  ;;  %v1208_v25 = vrot.slane %v1206_v12, 7 }
 0x10f   : > { %v2277_v27 = vor.u32 %v2276_v41, %v2275_v28  ;;  %v1504_v8 = vsel %vm1185_vm7, %v1483_v2, %v1503_v34  ;;  %v1212_v59 = vrot.slane %v1210_v60, 7  ;;  %v8246_v2 = vshll.u32 %v6710_v16, 16 }
 0x110   : > { %v2265_v46 = vor.u32 %v2264_v3, %v2263_v45  ;;  %v6974_v3 = vld [vmem:[#allocation2 + $0x90] sm:$0x7f]  ;;  %v8250_v12 = vshll.u32 %v6811_v55, 16 }
 0x111   : > { %v2288_v48 = vrot.slane %v8246_v2, 7  ;;  %v999_v6 = vshll.u32 %v6974_v3, 16 }
 0x112   : > { %1883 = vmatmul.mubr.bf16.gmra.mrb[56].mxu0 %v1466_v33  ;;  %v1531_v33 = vsel %vm1185_vm7, %v1508_v19, %v1530_v40  ;;  %v2278_v4 = vsel %vm2092_vm11, %v2265_v46, %v2277_v27 }
 0x113   : > { %2661 = vmatmul.mubr.bf16.gmra.mrb[68].mxu1 %v6746_v9  ;;  %1890 = vmatprep.mubr.bf16.mxu0 %v1493_v47  ;;  %v2266_v9 = vsel %vm2092_vm11, %v2253_v38, %v2265_v46  ;;  %v1026_v38 = vrot.slane %v6350_v39, 1  ;;  %v1213_v47 = vshll.u32 %v6941_v26, 16  ;;  %v1522_v39 = vor.u32 %v1521_v7, %v1123_v35  ;;  %v2910_v26 = vld [vmem:[#allocation2 + $0x18] sm:$0xff] }
 0x114   : > { %2668 = vmatprep.mubr.bf16.mxu1 %v2254_v10  ;;  %v2287_v10 = vrot.slane %v8245_v31, 6  ;;  %v1235_v7 = vsel %vm1185_vm7, %v1212_v59, %v5638_v63  ;;  %v1003_v63 = vshrl.u32 %v6974_v3, 16 }
 0x115   : > { %v1215_v45 = vor.u32 %v1213_v47, %v1212_v59  ;;  %v1523_v0 = vsel %vm1185_vm7, %v1502_v18, %v1522_v39  ;;  %v2929_v59 = vld [vmem:[#allocation2 + $0x18] sm:$0xfe] }
 0x116   : > { %v2289_v5 = vor.u32 %v2288_v48, %v2287_v10 }
 0x117   : > { %v6943_v36 = vpop.f32.mrb[0].mxu1  ;;  %v1216_v35 = vsel %vm1185_vm7, %v1208_v25, %v1215_v45 }
 0x118   : > { %v6945_v56 = vpop.f32.mrb[1].mxu1  ;;  %v2290_v50 = vsel %vm2092_vm11, %v2277_v27, %v2289_v5 }
 0x119   : > { %v6950_v49 = vpop.f32.mrb[2].mxu1 }
 0x11a   : > { %1891 = vmatmul.mubr.bf16.gmra.mrb[60].mxu0 %v1485_v24  ;;  %v6953_v57 = vpop.f32.mrb[3].mxu1 }
 0x11b   : > { %2669 = vmatmul.mubr.bf16.gmra.mrb[72].mxu1 %v6777_v58  ;;  %1898 = vmatprep.mubr.bf16.mxu0 %v1512_v37  ;;  %v1027_v58 = vrot.slane %v6519_v1, 1  ;;  %v8248_v37 = vshll.u32 %v6763_v61, 16 }
 0x11c   : > { %2676 = vmatprep.mubr.bf16.mxu1 %v2266_v9 }
 0x11d   : > { %v1028_v1 = vsel %vm1025_vm0, %v1026_v38, %v1027_v58  ;;  %v1030_v19 = vsel %vm1025_vm0, %v1027_v58, %v1029_v22  ;;  %v8247_v22 = vshrl.u32 %v6763_v61, 16  ;;  %v2300_v21 = vrot.slane %v8248_v37, 7  ;;  %v5263_v38 = vld [vmem:[%s8006_s3 + $0x88] sm:$0xff]  }
 0x11e   : > { %v2123_v16 = vshrl.u32 %v1028_v1, 16  ;;  %v2126_v11 = vshll.u32 %v1028_v1, 16  ;;  %v2131_v17 = vshrl.u32 %v1030_v19, 16  ;;  %v1001_v61 = vrot.slane %v999_v6, 1  ;;  %v2911_v1 = vld [vmem:[#allocation2 + $0x20] sm:$0xff] }
 0x11f   : > { %v2299_v24 = vrot.slane %v8247_v22, 6  ;;  %v7032_v22 = vld [vmem:[#allocation2 + $0x28] sm:$0xff] }
 0x120   : > { %v2125_v18 = vrot.slane %v2123_v16, 6  ;;  %v2128_v28 = vrot.slane %v2126_v11, 7  ;;  %v2133_v41 = vrot.slane %v2131_v17, 6  ;;  %v1002_v31 = vsel %vm854_vm15, %v6836_v30, %v1001_v61 }
 0x121   : > { %v2301_v40 = vor.u32 %v2300_v21, %v2299_v24  ;;  %v2324_v48 = vshrl.u32 %v1002_v31, 16  ;;  %v2327_v39 = vshll.u32 %v1002_v31, 16  ;;  %v2934_v30 = vshll.u32 %v2929_v59, 16  ;;  %v5267_v24 = vld [vmem:[%s8006_s3 + $0xa0] sm:$0xff]   ;;  %v7037_v21 = vld [vmem:[#allocation2 + $0x30] sm:$0xff] }
 0x122   : > { %1899 = vmatmul.mubr.bf16.gmra.mrb[64].mxu0 %v1504_v8  ;;  %v2129_v27 = vor.u32 %v2128_v28, %v2125_v18  ;;  %v2932_v17 = vshrl.u32 %v2929_v59, 16  ;;  %v3100_v18 = vrot.slane %v2929_v59, 1  ;;  %v3101_v28 = vrot.slane %v2911_v1, 1 }
 0x123   : > { %2677 = vmatmul.mubr.bf16.gmra.mrb[76].mxu1 %v6818_v13  ;;  %1906 = vmatprep.mubr.bf16.mxu0 %v1531_v33  ;;  %v2134_v13 = vshll.u32 %v1030_v19, 16  ;;  %v2302_v58 = vsel %vm2092_vm11, %v2289_v5, %v2301_v40  ;;  %v5266_v19 = vld [vmem:[%s8006_s3 + $0x98] sm:$0xff]   ;;  %v2326_v5 = vrot.slane %v2324_v48, 6  ;;  %v2329_v16 = vrot.slane %v2327_v39, 7 }
 0x124   : > { %2684 = vmatprep.mubr.bf16.mxu1 %v2278_v4  ;;  %v2312_v4 = vrot.slane %v8250_v12, 7 }
 0x125   : > { %v2136_v54 = vrot.slane %v2134_v13, 7  ;;  %v2936_v13 = vrot.slane %v2934_v30, 1 }
 0x126   : > { %v6977_v23 = vpop.f32.mrb[4].mxu1 }
 0x127   : > { %v6980_v46 = vpop.f32.mrb[5].mxu1  ;;  %v6995_v8 = vor.u32 %v2136_v54, %v2133_v41  ;;  %v2330_v41 = vor.u32 %v2329_v16, %v2326_v5  ;;  %v2943_v54 = vshrl.u32 %v2911_v1, 16 }
 0x128   : > { %v6988_v9 = vpop.f32.mrb[6].mxu1 }
 0x129   : > { %v6990_v34 = vpop.f32.mrb[7].mxu1  ;;  %v2138_v10 = vsel %vm2092_vm11, %v2129_v27, %v6995_v8 }
 0x12a   : > { %1907 = vmatmul.mubr.bf16.gmra.mrb[68].mxu0 %v1523_v0  ;;  %v2939_v0 = vshll.u32 %v2911_v1, 16 }
 0x12b   : > { %2685 = vmatmul.mubr.bf16.gmra.mrb[80].mxu1 %v6852_v42  ;;  %5043 = vmatprep.mubr.bf16.mxu0 %v1216_v35  ;;  %v8249_v42 = vshrl.u32 %v6811_v55, 16  ;;  %v5264_v55 = vld [vmem:[%s8006_s3 + $0x90] sm:$0xff]  }
 0x12c   : > { %2692 = vmatprep.mubr.bf16.mxu1 %v2290_v50  ;;  %v7041_v27 = vrot.slane %v2939_v0, 1 }
 0x12d   : > { %v2311_v33 = vrot.slane %v8249_v42, 6 }
 0x12e   : > { %v2945_v1 = vor.u32 %v2943_v54, %v7041_v27  ;;  %v2337_v54 = vrot.slane %v999_v6, 7 }
 0x12f   : > { %v2313_v2 = vor.u32 %v2312_v4, %v2311_v33  ;;  %v5268_v4 = vld [vmem:[%s8006_s3 + $0xa8] sm:$0xff]  }
 0x131   : > { %v2314_v45 = vsel %vm2092_vm11, %v2301_v40, %v2313_v2  ;;  %v3103_v40 = vrot.slane %v7032_v22, 1  ;;  %v2331_v48 = vsel %vm2092_vm11, %v2313_v2, %v2330_v41  ;;  %v5270_v2 = vld [vmem:[%s8006_s3 + $0xb0] sm:$0xff]  }
 0x132   : > { %5044 = vmatmul.mubr.bf16.vlgmr.msra.gmra.mrb[72].mxu0 %v1235_v7  ;;  %v2947_v7 = vshll.u32 %v7032_v22, 16 }
 0x133   : > { %2693 = vmatmul.mubr.bf16.gmra.mrb[84].mxu1 %v6871_v62  ;;  %5080 = vmatpush3.bf16.msra.mxu0 %v6392_v53  ;;  %v1005_v62 = vor.u32 %v1003_v63, %v1001_v61  ;;  %v2937_v61 = vor.u32 %v2936_v13, %v2932_v17  ;;  %v3104_v42 = vsel %vm1025_vm0, %v3101_v28, %v3103_v40 }
 0x134   : > { %5081 = vmatprep.subr.bf16.mxu0 %v5263_v38  ;;  %2700 = vmatprep.mubr.bf16.mxu1 %v2302_v58  ;;  %v3226_v59 = vshrl.u32 %v3104_v42, 16 }
 0x135   : > { %5095 = vmatprep.mubr.bf16.mxu0 %v2138_v10  ;;  %v2341_v50 = vshrl.u32 %v1005_v62, 16  ;;  %v2344_v37 = vshll.u32 %v1005_v62, 16  ;;  %v3214_v10 = vshll.u32 %v3104_v42, 16  ;;  %v2942_v62 = vsel %vm854_vm15, %v2937_v61, %v7041_v27 }
 0x136   : > { %v7019_v53 = vpop.f32.mrb[8].mxu1  ;;  %v3197_v0 = vshll.u32 %v2942_v62, 16  ;;  %v2148_v61 = vrot.slane %v1213_v47, 7  ;;  %v3195_v6 = vshrl.u32 %v2942_v62, 16  ;;  %v8252_v47 = vshll.u32 %v5597_v43, 16 }
 0x137   : > { %5082 = vmatpush3.bf16.msra.mxu0 %v5263_v38  ;;  %v7024_v25 = vpop.f32.mrb[9].mxu1  ;;  %v3102_v38 = vsel %vm1025_vm0, %v3100_v18, %v3101_v28  ;;  %v2343_v58 = vrot.slane %v2341_v50, 6  ;;  %v2346_v31 = vrot.slane %v2344_v37, 7  ;;  %v2336_v28 = vrot.slane %v1003_v63, 6 }
 0x138   : > { %5083 = vmatprep.subr.bf16.mxu0 %v5264_v55  ;;  %v7027_v11 = vpop.f32.mrb[10].mxu1  ;;  %v3207_v33 = vshrl.u32 %v3102_v38, 16  ;;  %v3209_v12 = vshll.u32 %v3102_v38, 16  ;;  %v8251_v63 = vshrl.u32 %v5597_v43, 16  ;;  %v3199_v42 = vrot.slane %v3197_v0, 1  ;;  %v5273_v43 = vld [vmem:[%s8006_s3 + $0x200] sm:$0xff]  }
 0x139   : > { %v7029_v35 = vpop.f32.mrb[11].mxu1  ;;  %v2347_v17 = vor.u32 %v2346_v31, %v2343_v58  ;;  %v8254_v0 = vshll.u32 %v5602_v44, 16 }
 0x13a   : > { %v3211_v39 = vrot.slane %v3209_v12, 1  ;;  %v2159_v58 = vrot.slane %v8251_v63, 6 }
 0x13b   : > { %2701 = vmatmul.mubr.bf16.gmra.mrb[88].mxu1 %v6898_v51  ;;  %5084 = vmatpush3.bf16.msra.mxu0 %v5264_v55  ;;  %v8149_v51 = vrot.slane %v7037_v21, 1  ;;  %v2348_v38 = vsel %vm2092_vm11, %v2330_v41, %v2347_v17  ;;  %v2338_v41 = vor.u32 %v2337_v54, %v2336_v28  ;;  %v8253_v17 = vshrl.u32 %v5602_v44, 16 }
 0x13c   : > { %5085 = vmatprep.subr.bf16.mxu0 %v5266_v19  ;;  %2708 = vmatprep.mubr.bf16.mxu1 %v2314_v45  ;;  %v3216_v45 = vrot.slane %v3214_v10, 1  ;;  %v3212_v5 = vor.u32 %v3211_v39, %v3207_v33  ;;  %v2160_v33 = vrot.slane %v8252_v47, 7  ;;  %v3189_v39 = vshll.u32 %v2910_v26, 16 }
 0x13d   : > { %v7052_v55 = vsel %vm1025_vm0, %v3103_v40, %v8149_v51  ;;  %v2147_v40 = vrot.slane %v1210_v60, 6  ;;  %v8255_v54 = vshrl.u32 %v5675_v32, 16 }
 0x13e   : > { %v3230_v30 = vshll.u32 %v7052_v55, 16  ;;  %v3228_v13 = vor.u32 %v3226_v59, %v3216_v45  ;;  %v7066_v50 = vsel %vm854_vm15, %v3212_v5, %v3216_v45  ;;  %v2339_v5 = vsel %vm2092_vm11, %v6905_v29, %v2338_v41 }
 0x13f   : > { %5086 = vmatpush3.bf16.msra.mxu0 %v5266_v19  ;;  %v2949_v19 = vrot.slane %v2947_v7, 1  ;;  %v5271_v7 = vld [vmem:[%s8006_s3 + $0xb8] sm:$0xff]   ;;  %v2149_v59 = vor.u32 %v2148_v61, %v2147_v40  ;;  %v3191_v28 = vrot.slane %v3189_v39, 1  ;;  %v2183_v40 = vrot.slane %v8255_v54, 6 }
 0x140   : > { %5087 = vmatprep.subr.bf16.mxu0 %v5267_v24  ;;  %v7060_v16 = vrot.slane %v3230_v30, 1  ;;  %v3200_v30 = vor.u32 %v3199_v42, %v3195_v6  ;;  %v8256_v61 = vshll.u32 %v5675_v32, 16  ;;  %v7132_v32 = vld [vmem:[#allocation2 + $0x40] sm:$0xff] }
 0x141   : > { %v7069_v37 = vsel %vm854_vm15, %v2945_v1, %v2949_v19  ;;  %v2161_v1 = vor.u32 %v2160_v33, %v2159_v58  ;;  %v5275_v33 = vld [vmem:[%s8006_s3 + $0x210] sm:$0xff]  }
 0x142   : > { %v7075_v18 = vsel %vm854_vm15, %v3228_v13, %v7060_v16  ;;  %v3202_v60 = vshll.u32 %v7069_v37, 16  ;;  %v2171_v13 = vrot.slane %v8253_v17, 6  ;;  %v3218_v44 = vshrl.u32 %v7069_v37, 16 }
 0x143   : > { %2709 = vmatmul.mubr.bf16.gmra.mrb[92].mxu1 %v6908_v52  ;;  %5088 = vmatpush3.bf16.msra.mxu0 %v5267_v24  ;;  %v2951_v52 = vshrl.u32 %v7032_v22, 16  ;;  %v2955_v24 = vshll.u32 %v7037_v21, 16  ;;  %v8260_v17 = vshll.u32 %v5717_v15, 16 }
 0x144   : > { %5089 = vmatprep.subr.bf16.mxu0 %v5268_v4  ;;  %2716 = vmatprep.mubr.bf16.mxu1 %v2331_v48  ;;  %v7103_v48 = vld [vmem:[#allocation2 + $0x38] sm:$0xff]  ;;  %v3204_v62 = vrot.slane %v3202_v60, 1 }
 0x145   : > { %v2957_v31 = vrot.slane %v2955_v24, 1  ;;  %v2963_v45 = vshll.u32 %v7103_v48, 16  ;;  %v3187_v24 = vshrl.u32 %v2910_v26, 16  ;;  %v2967_v39 = vshrl.u32 %v7103_v48, 16 }
 0x146   : > { %v7085_v22 = vpop.f32.mrb[12].mxu1  ;;  %v3205_v29 = vsel %vm854_vm15, %v3200_v30, %v3204_v62  ;;  %v3220_v41 = vor.u32 %v3218_v44, %v3204_v62  ;;  %v2971_v30 = vshll.u32 %v7132_v32, 16  ;;  %v2196_v62 = vrot.slane %v8260_v17, 7  ;;  %v8268_v17 = vld [vmem:[#allocation20_spill] sm:$0xff] }
 0x147   : > { %5090 = vmatpush3.bf16.msra.mxu0 %v5268_v4  ;;  %v7093_v3 = vpop.f32.mrb[13].mxu1  ;;  %v2953_v4 = vor.u32 %v2951_v52, %v2949_v19  ;;  %v2172_v52 = vrot.slane %v8254_v0, 7  ;;  %v2965_v6 = vrot.slane %v2963_v45, 1  ;;  %v3192_v26 = vor.u32 %v3191_v28, %v3187_v24 }
 0x148   : > { %5091 = vmatprep.subr.bf16.mxu0 %v5270_v2  ;;  %v7098_v12 = vpop.f32.mrb[14].mxu1  ;;  %v8262_v28 = vshll.u32 %v5765_v20, 16 }
 0x149   : > { %v7100_v10 = vpop.f32.mrb[15].mxu1  ;;  %v7109_v19 = vsel %vm854_vm15, %v2953_v4, %v2957_v31  ;;  %v2173_v42 = vor.u32 %v2172_v52, %v2171_v13  ;;  %v3193_v13 = vsel %vm854_vm15, %v3192_v26, %v7041_v27  ;;  %v8261_v52 = vshrl.u32 %v5765_v20, 16 }
 0x14a   : > { %v3222_v63 = vshll.u32 %v7109_v19, 16  ;;  %v2208_v54 = vrot.slane %v8262_v28, 7  ;;  %v2969_v27 = vor.u32 %v2967_v39, %v2965_v6 }
 0x14b   : > { %2717 = vmatmul.mubr.bf16.gmra.mrb[96].mxu1 %v6914_v14  ;;  %5092 = vmatpush3.bf16.msra.mxu0 %v5270_v2  ;;  %v2959_v14 = vshrl.u32 %v7037_v21, 16  ;;  %v2150_v2 = vsel %vm2092_vm11, %v6995_v8, %v2149_v59  ;;  %v5274_v8 = vld [vmem:[%s8006_s3 + $0x208] sm:$0xff]   ;;  %v2174_v45 = vsel %vm2092_vm11, %v2161_v1, %v2173_v42  ;;  %v2207_v24 = vrot.slane %v8261_v52, 6 }
 0x14c   : > { %5093 = vmatprep.subr.bf16.mxu0 %v5271_v7  ;;  %2724 = vmatprep.mubr.bf16.mxu1 %v2348_v38  ;;  %v2162_v38 = vsel %vm2092_vm11, %v2149_v59, %v2161_v1 }
 0x14d   : > { %v2961_v58 = vor.u32 %v2959_v14, %v2957_v31  ;;  %v3224_v31 = vrot.slane %v3222_v63, 1 }
 0x14f   : > { %5094 = vmatpush3.bf16.msra.mxu0 %v5271_v7  ;;  %v2184_v7 = vrot.slane %v8256_v61, 7  ;;  %v3225_v1 = vsel %vm854_vm15, %v3220_v41, %v3224_v31 }
 0x150   : > { %5131 = vmatprep.subr.bf16.mxu0 %v5273_v43 }
 0x151   : > { %v7134_v60 = vpop.f32.mrb[0].mxu0  ;;  %v2185_v47 = vor.u32 %v2184_v7, %v2183_v40  ;;  %v3234_v40 = vshrl.u32 %v7109_v19, 16  ;;  %v2973_v7 = vrot.slane %v2971_v30, 1  ;;  %v8265_v30 = vld [vmem:[#allocation19_spill] sm:$0xff] }
 0x152   : > { %5096 = vmatmul.mubr.bf16.vlgmr.msra.gmra.mrb[76].mxu0 %v2150_v2  ;;  %8257 = vst [vmem:[#allocation50_spill] sm:$0xff] %v7134_v60  ;;  %v1774_v4 = vpop.f32.mrb[1].mxu0 }
 0x153   : > { %2725 = vmatmul.mubr.bf16.gmra.mrb[100].mxu1 %v2339_v5  ;;  %5132 = vmatpush3.bf16.msra.mxu0 %v5273_v43  ;;  %v7139_v59 = vpop.f32.mrb[2].mxu0  ;;  %v7142_v43 = vsel %vm854_vm15, %v2961_v58, %v2965_v6  ;;  %v8259_v5 = vshrl.u32 %v5717_v15, 16  ;;  %v2186_v0 = vsel %vm2092_vm11, %v2173_v42, %v2185_v47  ;;  %v5276_v15 = vld [vmem:[%s8006_s3 + $0x218] sm:$0xff]   ;;  %v3236_v63 = vor.u32 %v3234_v40, %v3224_v31  ;;  %v5277_v42 = vld [vmem:[%s8006_s3 + $0x220] sm:$0xff]  }
 0x154   : > { %3720 = vmatprep.mubr.bf16.mxu1 %v3205_v29  ;;  %5099 = vmatprep.mubr.bf16.mxu0 %v2162_v38  ;;  %8258 = vst [vmem:[#allocation51_spill] sm:$0xff] %v7139_v59  ;;  %v1777_v14 = vpop.f32.mrb[3].mxu0  ;;  %v3238_v61 = vshll.u32 %v7142_v43, 16  ;;  %v7164_v38 = vld [vmem:[#allocation2 + $0x48] sm:$0xff]  ;;  %v7174_v26 = vsel %vm854_vm15, %v2969_v27, %v2973_v7  ;;  %v2975_v4 = vshrl.u32 %v7132_v32, 16  ;;  %v8266_v31 = vshrl.u32 %v8265_v30, 16 }
 0x155   : > { %5133 = vmatprep.subr.bf16.mxu0 %v5274_v8  ;;  %v2195_v2 = vrot.slane %v8259_v5, 6  ;;  %v2979_v41 = vshll.u32 %v7164_v38, 16  ;;  %v3250_v28 = vshrl.u32 %v7142_v43, 16  ;;  %v7197_v27 = vld [vmem:[#allocation2 + $0x50] sm:$0xff]  ;;  %v7286_v59 = vld [vmem:[#allocation2 + $0x68] sm:$0xff] }
 0x156   : > { %v3240_v58 = vrot.slane %v3238_v61, 1  ;;  %v2219_v14 = vrot.slane %v8266_v31, 6 }
 0x157   : > { %5134 = vmatpush3.bf16.msra.mxu0 %v5274_v8  ;;  %v2197_v29 = vor.u32 %v2196_v62, %v2195_v2  ;;  %v2209_v8 = vor.u32 %v2208_v54, %v2207_v24  ;;  %v8269_v62 = vshrl.u32 %v8268_v17, 16  ;;  %v5278_v54 = vld [vmem:[%s8006_s3 + $0x228] sm:$0xff]   ;;  %v2981_v40 = vrot.slane %v2979_v41, 1 }
 0x158   : > { %5135 = vmatprep.subr.bf16.mxu0 %v5275_v33  ;;  %v3241_v24 = vsel %vm854_vm15, %v3236_v63, %v3240_v58  ;;  %v3252_v63 = vor.u32 %v3250_v28, %v3240_v58  ;;  %v2983_v41 = vshrl.u32 %v7164_v38, 16  ;;  %v8271_v58 = vld [vmem:[#allocation25_spill] sm:$0xff]  ;;  %v3266_v28 = vshrl.u32 %v7174_v26, 16 }
 0x159   : > { %v7166_v20 = vpop.f32.mrb[4].mxu0  ;;  %v2210_v2 = vsel %vm2092_vm11, %v2197_v29, %v2209_v8  ;;  %v8272_v31 = vshrl.u32 %v8271_v58, 16 }
 0x15a   : > { %5100 = vmatmul.mubr.bf16.gmra.mrb[80].mxu0 %v2174_v45  ;;  %8263 = vst [vmem:[#allocation52_spill] sm:$0xff] %v7166_v20  ;;  %v1782_v44 = vpop.f32.mrb[5].mxu0  ;;  %v8267_v45 = vshll.u32 %v8265_v30, 16 }
 0x15b   : > { %3721 = vmatmul.mubr.bf16.vlgmr.msra.gmra.mrb[104].mxu1 %v3193_v13  ;;  %5103 = vmatprep.mubr.bf16.mxu0 %v2186_v0  ;;  %v7171_v6 = vpop.f32.mrb[6].mxu0  ;;  %v2231_v13 = vrot.slane %v8269_v62, 6  ;;  %v8270_v0 = vshll.u32 %v8268_v17, 16  ;;  %v8274_v17 = vld [vmem:[#allocation28_spill] sm:$0xff] }
 0x15c   : > { %3728 = vmatprep.mubr.bf16.mxu1 %v3225_v1  ;;  %5136 = vmatpush3.bf16.msra.mxu0 %v5275_v33  ;;  %8264 = vst [vmem:[#allocation53_spill] sm:$0xff] %v7171_v6  ;;  %v1785_v39 = vpop.f32.mrb[7].mxu0  ;;  %v2198_v33 = vsel %vm2092_vm11, %v2185_v47, %v2197_v29  ;;  %v2220_v5 = vrot.slane %v8267_v45, 7  ;;  %v3254_v47 = vshll.u32 %v7174_v26, 16  ;;  %v2977_v1 = vor.u32 %v2975_v4, %v2973_v7 }
 0x15d   : > { %5137 = vmatprep.subr.bf16.mxu0 %v5276_v15  ;;  %v2232_v52 = vrot.slane %v8270_v0, 7  ;;  %v8273_v45 = vshll.u32 %v8271_v58, 16  ;;  %v8275_v62 = vshrl.u32 %v8274_v17, 16  ;;  %v8276_v0 = vshll.u32 %v8274_v17, 16 }
 0x15e   : > { %v2221_v61 = vor.u32 %v2220_v5, %v2219_v14  ;;  %v3256_v39 = vrot.slane %v3254_v47, 1  ;;  %v7207_v7 = vsel %vm854_vm15, %v2977_v1, %v2981_v40  ;;  %v2243_v14 = vrot.slane %v8272_v31, 6  ;;  %v5280_v47 = vld [vmem:[%s8006_s3 + $0x238] sm:$0xff]  }
 0x15f   : > { %v2233_v29 = vor.u32 %v2232_v52, %v2231_v13  ;;  %v2244_v5 = vrot.slane %v8273_v45, 7  ;;  %v2255_v13 = vrot.slane %v8275_v62, 6  ;;  %v2256_v52 = vrot.slane %v8276_v0, 7  ;;  %v7233_v45 = vld [vmem:[#allocation2 + $0x58] sm:$0xff] }
 0x160   : > { %5138 = vmatpush3.bf16.msra.mxu0 %v5276_v15  ;;  %v2985_v1 = vor.u32 %v2983_v41, %v2981_v40  ;;  %v3268_v0 = vor.u32 %v3266_v28, %v3256_v39 }
 0x161   : > { %5139 = vmatprep.subr.bf16.mxu0 %v5277_v42  ;;  %v7195_v15 = vpop.f32.mrb[16].mxu1  ;;  %v2245_v31 = vor.u32 %v2244_v5, %v2243_v14  ;;  %v2257_v17 = vor.u32 %v2256_v52, %v2255_v13  ;;  %v8277_v14 = vld [vmem:[#allocation32_spill] sm:$0xff]  ;;  %v8280_v13 = vld [vmem:[#allocation34_spill] sm:$0xff] }
 0x162   : > { %5104 = vmatmul.mubr.bf16.gmra.mrb[84].mxu0 %v2198_v33  ;;  %v7199_v44 = vpop.f32.mrb[17].mxu1  ;;  %v2222_v33 = vsel %vm2092_vm11, %v2209_v8, %v2221_v61  ;;  %v3270_v8 = vshll.u32 %v7207_v7, 16  ;;  %v8278_v5 = vshrl.u32 %v8277_v14, 16  ;;  %v8281_v52 = vshrl.u32 %v8280_v13, 16 }
 0x163   : > { %3729 = vmatmul.mubr.bf16.gmra.mrb[108].mxu1 %v7069_v37  ;;  %5107 = vmatprep.mubr.bf16.mxu0 %v2210_v2  ;;  %v7201_v30 = vpop.f32.mrb[18].mxu1  ;;  %v5279_v37 = vld [vmem:[%s8006_s3 + $0x230] sm:$0xff]   ;;  %v2234_v2 = vsel %vm2092_vm11, %v2221_v61, %v2233_v29  ;;  %v8282_v28 = vshll.u32 %v8280_v13, 16 }
 0x164   : > { %3736 = vmatprep.mubr.bf16.mxu1 %v3241_v24  ;;  %5140 = vmatpush3.bf16.msra.mxu0 %v5277_v42  ;;  %v7209_v4 = vpop.f32.mrb[19].mxu1  ;;  %v2987_v42 = vshll.u32 %v7197_v27, 16  ;;  %v3257_v24 = vsel %vm854_vm15, %v3252_v63, %v3256_v39  ;;  %v3272_v51 = vrot.slane %v3270_v8, 1  ;;  %v8279_v39 = vshll.u32 %v8277_v14, 16 }
 0x165   : > { %5141 = vmatprep.subr.bf16.mxu0 %v5278_v54  ;;  %v2280_v8 = vrot.slane %v8282_v28, 7 }
 0x166   : > { %v2989_v61 = vrot.slane %v2987_v42, 1  ;;  %v2995_v42 = vshll.u32 %v7233_v45, 16 }
 0x168   : > { %5142 = vmatpush3.bf16.msra.mxu0 %v5278_v54 }
 0x169   : > { %5143 = vmatprep.subr.bf16.mxu0 %v5279_v37  ;;  %v1788_v58 = vpop.f32.mrb[8].mxu0 }
 0x16a   : > { %5108 = vmatmul.mubr.bf16.gmra.mrb[88].mxu0 %v2222_v33  ;;  %v7231_v54 = vadd.f32 %v6945_v56, %v1788_v58  ;;  %v1790_v63 = vpop.f32.mrb[9].mxu0  ;;  %v2991_v56 = vshrl.u32 %v7197_v27, 16  ;;  %v2246_v33 = vsel %vm2092_vm11, %v2233_v29, %v2245_v31  ;;  %v3282_v58 = vshrl.u32 %v7207_v7, 16 }
 0x16b   : > { %3737 = vmatmul.mubr.bf16.gmra.mrb[112].mxu1 %v7109_v19  ;;  %5111 = vmatprep.mubr.bf16.mxu0 %v2234_v2  ;;  %v1791_v62 = vpop.f32.mrb[10].mxu0  ;;  %v7239_v19 = vsel %vm854_vm15, %v2985_v1, %v2989_v61  ;;  %v2267_v2 = vrot.slane %v8278_v5, 6  ;;  %v3273_v1 = vsel %vm854_vm15, %v3268_v0, %v3272_v51  ;;  %v2999_v0 = vshrl.u32 %v7233_v45, 16 }
 0x16c   : > { %3744 = vmatprep.mubr.bf16.mxu1 %v3257_v24  ;;  %5144 = vmatpush3.bf16.msra.mxu0 %v5279_v37  ;;  %v7236_v40 = vadd.f32 %v6953_v57, %v1791_v62  ;;  %v1793_v41 = vpop.f32.mrb[11].mxu0  ;;  %v2268_v37 = vrot.slane %v8279_v39, 7  ;;  %v2258_v57 = vsel %vm2092_vm11, %v2245_v31, %v2257_v17  ;;  %v2279_v24 = vrot.slane %v8281_v52, 6 }
 0x16d   : > { %5145 = vmatprep.subr.bf16.mxu0 %v5280_v47  ;;  %v3286_v29 = vshll.u32 %v7239_v19, 16  ;;  %v2993_v63 = vor.u32 %v2991_v56, %v2989_v61  ;;  %v2997_v62 = vrot.slane %v2995_v42, 1  ;;  %v7256_v41 = vld [vmem:[#allocation2 + $0x60] sm:$0xff]  ;;  %v3284_v5 = vor.u32 %v3282_v58, %v3272_v51 }
 0x16e   : > { %v2269_v31 = vor.u32 %v2268_v37, %v2267_v2  ;;  %v2281_v14 = vor.u32 %v2280_v8, %v2279_v24  ;;  %v3003_v13 = vshll.u32 %v7256_v41, 16  ;;  %v3298_v28 = vshrl.u32 %v7239_v19, 16  ;;  %v8288_v8 = vld [vmem:[#allocation40_spill] sm:$0xff] }
 0x16f   : > { %v3288_v39 = vrot.slane %v3286_v29, 1  ;;  %v7266_v61 = vsel %vm854_vm15, %v2993_v63, %v2997_v62  ;;  %v8290_v29 = vshll.u32 %v8288_v8, 16 }
 0x170   : > { %5146 = vmatpush3.bf16.msra.mxu0 %v5280_v47  ;;  %v2270_v56 = vsel %vm2092_vm11, %v2257_v17, %v2269_v31 }
 0x171   : > { %v2304_v17 = vrot.slane %v8290_v29, 7  ;;  %v3289_v63 = vsel %vm854_vm15, %v3284_v5, %v3288_v39  ;;  %v3300_v60 = vor.u32 %v3298_v28, %v3288_v39  ;;  %v3007_v5 = vshrl.u32 %v7256_v41, 16 }
 0x172   : > { %5112 = vmatmul.mubr.bf16.gmra.mrb[92].mxu0 %v2246_v33  ;;  %v3011_v29 = vshll.u32 %v7286_v59, 16 }
 0x173   : > { %3745 = vmatmul.mubr.bf16.gmra.mrb[116].mxu1 %v7142_v43  ;;  %5115 = vmatprep.mubr.bf16.mxu0 %v2258_v57  ;;  %v8284_v43 = vld [vmem:[#allocation39_spill] sm:$0xff]  ;;  %v2282_v57 = vsel %vm2092_vm11, %v2269_v31, %v2281_v14 }
 0x174   : > { %3752 = vmatprep.mubr.bf16.mxu1 %v3273_v1  ;;  %v8285_v42 = vshrl.u32 %v8284_v43, 16  ;;  %v8286_v2 = vshll.u32 %v8284_v43, 16  ;;  %v8289_v1 = vshrl.u32 %v8288_v8, 16  ;;  %v3001_v43 = vor.u32 %v2999_v0, %v2997_v62  ;;  %v8291_v0 = vld [vmem:[#allocation45_spill] sm:$0xff] }
 0x175   : > { %v7259_v47 = vpop.f32.mrb[20].mxu1 }
 0x176   : > { %8283 = vst [vmem:[#allocation19_spill] sm:$0xff] %v7259_v47  ;;  %v7263_v52 = vpop.f32.mrb[21].mxu1  ;;  %v2291_v33 = vrot.slane %v8285_v42, 6  ;;  %v2292_v51 = vrot.slane %v8286_v2, 7  ;;  %v2303_v58 = vrot.slane %v8289_v1, 6  ;;  %v3302_v42 = vshll.u32 %v7266_v61, 16 }
 0x177   : > { %v7273_v37 = vpop.f32.mrb[22].mxu1  ;;  %v3005_v2 = vrot.slane %v3003_v13, 1  ;;  %v8292_v13 = vshrl.u32 %v8291_v0, 16 }
 0x178   : > { %8287 = vst [vmem:[#allocation20_spill] sm:$0xff] %v7273_v37  ;;  %v7276_v24 = vpop.f32.mrb[23].mxu1  ;;  %v2293_v31 = vor.u32 %v2292_v51, %v2291_v33  ;;  %v2305_v6 = vor.u32 %v2304_v17, %v2303_v58  ;;  %v3304_v1 = vrot.slane %v3302_v42, 1  ;;  %v8294_v51 = vld [vmem:[#allocation47_spill] sm:$0xff]  ;;  %v3314_v17 = vshrl.u32 %v7266_v61, 16 }
 0x179   : > { %v7289_v8 = vsel %vm854_vm15, %v3001_v43, %v3005_v2  ;;  %v8296_v42 = vshll.u32 %v8294_v51, 16  ;;  %v3009_v20 = vor.u32 %v3007_v5, %v3005_v2  ;;  %v7309_v37 = vld [vmem:[#allocation2 + $0x70] sm:$0xff]  ;;  %v3015_v2 = vshrl.u32 %v7286_v59, 16 }
 0x17a   : > { %5116 = vmatmul.mubr.bf16.gmra.mrb[96].mxu0 %v2270_v56  ;;  %v2294_v62 = vsel %vm2092_vm11, %v2281_v14, %v2293_v31  ;;  %v8293_v56 = vshll.u32 %v8291_v0, 16  ;;  %v2306_v39 = vsel %vm2092_vm11, %v2293_v31, %v2305_v6  ;;  %v3305_v14 = vsel %vm854_vm15, %v3300_v60, %v3304_v1 }
 0x17b   : > { %3753 = vmatmul.mubr.bf16.gmra.mrb[120].mxu1 %v7174_v26  ;;  %5119 = vmatprep.mubr.bf16.mxu0 %v2282_v57  ;;  %v2315_v26 = vrot.slane %v8292_v13, 6  ;;  %v8295_v57 = vshrl.u32 %v8294_v51, 16  ;;  %v2333_v43 = vrot.slane %v8296_v42, 7  ;;  %v8297_v42 = vld [vmem:[#allocation46_spill] sm:$0xff]  ;;  %v3019_v5 = vshll.u32 %v7309_v37, 16 }
 0x17c   : > { %3760 = vmatprep.mubr.bf16.mxu1 %v3289_v63  ;;  %v2316_v33 = vrot.slane %v8293_v56, 7  ;;  %v3318_v63 = vshll.u32 %v7289_v8, 16  ;;  %v2350_v60 = vshrl.u32 %v8297_v42, 16 }
 0x17d   : > { %v2332_v58 = vrot.slane %v8295_v57, 6  ;;  %v3013_v57 = vrot.slane %v3011_v29, 1 }
 0x17e   : > { %v2317_v31 = vor.u32 %v2316_v33, %v2315_v26 }
 0x180   : > { %v1796_v28 = vpop.f32.mrb[12].mxu0  ;;  %v2318_v29 = vsel %vm2092_vm11, %v2305_v6, %v2317_v31 }
 0x181   : > { %v7307_v13 = vadd.f32 %v6943_v36, %v1796_v28  ;;  %v1798_v0 = vpop.f32.mrb[13].mxu0  ;;  %v2353_v36 = vshll.u32 %v8297_v42, 16  ;;  %v3316_v28 = vor.u32 %v3314_v17, %v3304_v1  ;;  %v3330_v1 = vshrl.u32 %v7289_v8, 16 }
 0x182   : > { %5120 = vmatmul.mubr.bf16.gmra.mrb[100].mxu0 %v2294_v62  ;;  %v1799_v56 = vpop.f32.mrb[14].mxu0  ;;  %v3320_v62 = vrot.slane %v3318_v63, 1  ;;  %v2334_v0 = vor.u32 %v2333_v43, %v2332_v58  ;;  %v3017_v63 = vor.u32 %v3015_v2, %v3013_v57  ;;  %v3021_v43 = vrot.slane %v3019_v5, 1 }
 0x183   : > { %3761 = vmatmul.mubr.bf16.gmra.mrb[124].mxu1 %v7207_v7  ;;  %5123 = vmatprep.mubr.bf16.mxu0 %v2306_v39  ;;  %v7313_v47 = vadd.f32 %v6950_v49, %v1799_v56  ;;  %v1801_v51 = vpop.f32.mrb[15].mxu0  ;;  %v7320_v7 = vsel %vm854_vm15, %v3009_v20, %v3013_v57  ;;  %v2352_v49 = vrot.slane %v2350_v60, 6  ;;  %v2355_v26 = vrot.slane %v2353_v36, 7 }
 0x184   : > { %3768 = vmatprep.mubr.bf16.mxu1 %v3305_v14  ;;  %v3321_v39 = vsel %vm854_vm15, %v3316_v28, %v3320_v62  ;;  %v2335_v14 = vsel %vm2092_vm11, %v2317_v31, %v2334_v0  ;;  %v3334_v17 = vshll.u32 %v7320_v7, 16  ;;  %v3107_v20 = vrot.slane %v7103_v48, 1  ;;  %v7337_v31 = vld [vmem:[#allocation2 + $0x78] sm:$0xff] }
 0x185   : > { %v2356_v51 = vor.u32 %v2355_v26, %v2352_v49  ;;  %v3332_v60 = vor.u32 %v3330_v1, %v3320_v62  ;;  %v7340_v57 = vsel %vm854_vm15, %v3017_v63, %v3021_v43  ;;  %v8300_v48 = vrot.slane %v7037_v21, 1 }
 0x186   : > { %v3336_v36 = vrot.slane %v3334_v17, 1  ;;  %v3109_v5 = vrot.slane %v7132_v32, 1  ;;  %v3027_v49 = vshll.u32 %v7337_v31, 16  ;;  %v3242_v21 = vshrl.u32 %v7052_v55, 16 }
 0x187   : > { %v7323_v33 = vpop.f32.mrb[24].mxu1  ;;  %v3108_v28 = vsel %vm1025_vm0, %v8300_v48, %v3107_v20  ;;  %v2357_v62 = vsel %vm2092_vm11, %v2334_v0, %v2356_v51  ;;  %v3346_v32 = vshrl.u32 %v7320_v7, 16  ;;  %v3350_v63 = vshll.u32 %v7340_v57, 16 }
 0x188   : > { %8298 = vst [vmem:[#allocation25_spill] sm:$0xff] %v7323_v33  ;;  %v7328_v58 = vpop.f32.mrb[25].mxu1  ;;  %v3246_v1 = vshll.u32 %v3108_v28, 16  ;;  %v3337_v17 = vsel %vm854_vm15, %v3332_v60, %v3336_v36  ;;  %v3029_v51 = vrot.slane %v3027_v49, 1  ;;  %v3244_v55 = vor.u32 %v3242_v21, %v7060_v16  ;;  %v7450_v33 = vld [vmem:[#allocation2 + $0x98] sm:$0xff] }
 0x189   : > { %v7332_v6 = vpop.f32.mrb[26].mxu1  ;;  %v3348_v48 = vor.u32 %v3346_v32, %v3336_v36 }
 0x18a   : > { %5124 = vmatmul.mubr.bf16.gmra.mrb[104].mxu0 %v2318_v29  ;;  %8299 = vst [vmem:[#allocation28_spill] sm:$0xff] %v7332_v6  ;;  %v7335_v56 = vpop.f32.mrb[27].mxu1  ;;  %v3023_v29 = vshrl.u32 %v7309_v37, 16  ;;  %v7422_v6 = vld [vmem:[#allocation2 + $0x90] sm:$0xff] }
 0x18b   : > { %3769 = vmatmul.mubr.bf16.gmra.mrb[128].mxu1 %v7239_v19  ;;  %5127 = vmatprep.mubr.bf16.mxu0 %v2335_v14 }
 0x18c   : > { %3776 = vmatprep.mubr.bf16.mxu1 %v3321_v39  ;;  %v3025_v0 = vor.u32 %v3023_v29, %v3021_v43 }
 0x18e   : > { %v1804_v42 = vpop.f32.mrb[16].mxu0  ;;  %v7372_v43 = vsel %vm854_vm15, %v3025_v0, %v3029_v51 }
 0x18f   : > { %v7346_v2 = vadd.f32 %v6980_v46, %v1804_v42  ;;  %v1806_v19 = vpop.f32.mrb[17].mxu0  ;;  %v3111_v46 = vrot.slane %v7164_v38, 1  ;;  %v3110_v42 = vsel %vm1025_vm0, %v3107_v20, %v3109_v5  ;;  %v3248_v38 = vrot.slane %v3246_v1, 1 }
 0x190   : > { %v1807_v26 = vpop.f32.mrb[18].mxu0  ;;  %v3352_v19 = vrot.slane %v3350_v63, 1  ;;  %v3274_v49 = vshrl.u32 %v3110_v42, 16  ;;  %v3366_v32 = vshll.u32 %v7372_v43, 16  ;;  %v7389_v63 = vld [vmem:[#allocation2 + $0x88] sm:$0xff] }
 0x191   : > { %v7353_v39 = vadd.f32 %v6990_v34, %v1807_v26  ;;  %v1809_v14 = vpop.f32.mrb[19].mxu0  ;;  %v7363_v34 = vld [vmem:[#allocation2 + $0x80] sm:$0xff]  ;;  %v7367_v60 = vsel %vm1025_vm0, %v3109_v5, %v3111_v46  ;;  %v3262_v26 = vshll.u32 %v3110_v42, 16 }
 0x192   : > { %5128 = vmatmul.mubr.bf16.gmra.mrb[108].mxu0 %v2357_v62  ;;  %v3258_v62 = vshrl.u32 %v3108_v28, 16  ;;  %v3035_v29 = vshll.u32 %v7363_v34, 16  ;;  %v3278_v5 = vshll.u32 %v7367_v60, 16  ;;  %v3249_v28 = vsel %vm854_vm15, %v3244_v55, %v3248_v38 }
 0x193   : > { %3777 = vmatmul.mubr.bf16.gmra.mrb[132].mxu1 %v7266_v61  ;;  %5147 = vmatprep.mubr.bf16.mxu0 %v7066_v50  ;;  %v3113_v50 = vrot.slane %v7197_v27, 1  ;;  %v3031_v61 = vshrl.u32 %v7337_v31, 16  ;;  %v3115_v14 = vrot.slane %v7233_v45, 1  ;;  %v3353_v1 = vsel %vm854_vm15, %v3348_v48, %v3352_v19 }
 0x194   : > { %3784 = vmatprep.mubr.bf16.mxu1 %v3337_v17  ;;  %v3264_v27 = vrot.slane %v3262_v26, 1  ;;  %v3362_v17 = vshrl.u32 %v7340_v57, 16  ;;  %v3260_v42 = vor.u32 %v3258_v62, %v3248_v38  ;;  %v3037_v55 = vrot.slane %v3035_v29, 1 }
 0x195   : > { %v3114_v0 = vsel %vm1025_vm0, %v3111_v46, %v3113_v50  ;;  %v7395_v48 = vsel %vm1025_vm0, %v3113_v50, %v3115_v14  ;;  %v3039_v26 = vshrl.u32 %v7363_v34, 16  ;;  %v3368_v38 = vrot.slane %v3366_v32, 1 }
 0x196   : > { %v7369_v20 = vpop.f32.mrb[28].mxu1  ;;  %v3276_v45 = vor.u32 %v3274_v49, %v3264_v27  ;;  %v3294_v62 = vshll.u32 %v3114_v0, 16  ;;  %v3117_v46 = vrot.slane %v7256_v41, 1  ;;  %v3265_v29 = vsel %vm854_vm15, %v3260_v42, %v3264_v27 }
 0x197   : > { %8301 = vst [vmem:[#allocation32_spill] sm:$0xff] %v7369_v20  ;;  %v7377_v16 = vpop.f32.mrb[29].mxu1  ;;  %v3280_v20 = vrot.slane %v3278_v5, 1  ;;  %v3290_v50 = vshrl.u32 %v7367_v60, 16  ;;  %v3306_v41 = vshrl.u32 %v3114_v0, 16  ;;  %v3041_v27 = vor.u32 %v3039_v26, %v3037_v55 }
 0x198   : > { %8302 = vst [vmem:[#allocation34_spill] sm:$0xff] %v7377_v16  ;;  %v7380_v36 = vpop.f32.mrb[30].mxu1  ;;  %v3118_v0 = vsel %vm1025_vm0, %v3115_v14, %v3117_v46 }
 0x199   : > { %8303 = vst [vmem:[#allocation39_spill] sm:$0xff] %v7380_v36  ;;  %v7384_v21 = vpop.f32.mrb[31].mxu1  ;;  %v3033_v36 = vor.u32 %v3031_v61, %v3029_v51  ;;  %v3326_v26 = vshll.u32 %v3118_v0, 16 }
 0x19a   : > { %8304 = vst [vmem:[#allocation40_spill] sm:$0xff] %v7384_v21  ;;  %5148 = vmatmul.mubr.bf16.vlgmr.msra.gmra.mrb[112].mxu0 %v7075_v18  ;;  %v3043_v21 = vshll.u32 %v7389_v63, 16  ;;  %v3364_v18 = vor.u32 %v3362_v17, %v3352_v19  ;;  %v3281_v19 = vsel %vm854_vm15, %v3276_v45, %v3280_v20  ;;  %v3310_v17 = vshll.u32 %v7395_v48, 16 }
 0x19b   : > { %3785 = vmatmul.mubr.bf16.gmra.mrb[136].mxu1 %v7289_v8  ;;  %5151 = vmatprep.mubr.bf16.mxu0 %v3249_v28  ;;  %v7408_v49 = vsel %vm854_vm15, %v3033_v36, %v3037_v55  ;;  %v3119_v36 = vrot.slane %v7286_v59, 1  ;;  %v3121_v59 = vrot.slane %v7309_v37, 1 }
 0x19c   : > { %3792 = vmatprep.mubr.bf16.mxu1 %v3353_v1  ;;  %v3378_v1 = vshrl.u32 %v7372_v43, 16  ;;  %v3045_v60 = vrot.slane %v3043_v21, 1  ;;  %v3382_v45 = vshll.u32 %v7408_v49, 16  ;;  %v3322_v21 = vshrl.u32 %v7395_v48, 16 }
 0x19d   : > { %v1812_v16 = vpop.f32.mrb[20].mxu0  ;;  %v3312_v55 = vrot.slane %v3310_v17, 1  ;;  %v3120_v14 = vsel %vm1025_vm0, %v3117_v46, %v3119_v36 }
 0x19e   : > { %v7400_v51 = vpop.f32.mrb[32].mxu1  ;;  %v7403_v8 = vadd.f32 %v6977_v23, %v1812_v16  ;;  %v1814_v61 = vpop.f32.mrb[21].mxu0 }
 0x19f   : > { %8305 = vst [vmem:[#allocation45_spill] sm:$0xff] %v7400_v51  ;;  %v2592_v5 = vpop.f32.mrb[33].mxu1  ;;  %v1815_v28 = vpop.f32.mrb[22].mxu0  ;;  %v3369_v61 = vsel %vm854_vm15, %v3364_v18, %v3368_v38  ;;  %v3292_v51 = vor.u32 %v3290_v50, %v3280_v20  ;;  %v7428_v18 = vsel %vm854_vm15, %v3041_v27, %v3045_v60  ;;  %v3380_v20 = vor.u32 %v3378_v1, %v3368_v38 }
 0x1a0   : > { %v7413_v32 = vpop.f32.mrb[34].mxu1  ;;  %v7416_v23 = vadd.f32 %v6988_v9, %v1815_v28  ;;  %v1817_v16 = vpop.f32.mrb[23].mxu0  ;;  %v3296_v5 = vrot.slane %v3294_v62, 1  ;;  %v3047_v50 = vshrl.u32 %v7389_v63, 16  ;;  %v3398_v46 = vshll.u32 %v7428_v18, 16 }
 0x1a1   : > { %8306 = vst [vmem:[#allocation47_spill] sm:$0xff] %v7413_v32  ;;  %v2595_v42 = vpop.f32.mrb[35].mxu1  ;;  %v3338_v38 = vshrl.u32 %v3118_v0, 16  ;;  %v3342_v1 = vshll.u32 %v3120_v14, 16  ;;  %v3122_v27 = vsel %vm1025_vm0, %v3119_v36, %v3121_v59  ;;  %v3123_v0 = vrot.slane %v7337_v31, 1 }
 0x1a2   : > { %5152 = vmatmul.mubr.bf16.gmra.mrb[116].mxu0 %v3265_v29  ;;  %v3308_v9 = vor.u32 %v3306_v41, %v3296_v5  ;;  %v3384_v29 = vrot.slane %v3382_v45, 1  ;;  %v3394_v41 = vshrl.u32 %v7408_v49, 16  ;;  %v3358_v36 = vshll.u32 %v3122_v27, 16 }
 0x1a3   : > { %3793 = vmatmul.mubr.bf16.gmra.mrb[140].mxu1 %v7320_v7  ;;  %5155 = vmatprep.mubr.bf16.mxu0 %v3281_v19  ;;  %v3051_v7 = vshll.u32 %v7422_v6, 16  ;;  %v3297_v19 = vsel %vm854_vm15, %v3292_v51, %v3296_v5  ;;  %v3328_v51 = vrot.slane %v3326_v26, 1 }
 0x1a4   : > { %3800 = vmatprep.mubr.bf16.mxu1 %v3369_v61  ;;  %v3313_v45 = vsel %vm854_vm15, %v3308_v9, %v3312_v55  ;;  %v3344_v9 = vrot.slane %v3342_v1, 1 }
 0x1a5   : > { %v1820_v62 = vpop.f32.mrb[24].mxu0  ;;  %v3053_v32 = vrot.slane %v3051_v7, 1 }
 0x1a6   : > { %v7433_v28 = vpop.f32.mrb[36].mxu1  ;;  %v7436_v48 = vadd.f32 %v7024_v25, %v1820_v62  ;;  %v1822_v37 = vpop.f32.mrb[25].mxu0  ;;  %v3324_v62 = vor.u32 %v3322_v21, %v3312_v55  ;;  %v3354_v21 = vshrl.u32 %v3120_v14, 16 }
 0x1a7   : > { %8307 = vst [vmem:[#allocation46_spill] sm:$0xff] %v7433_v28  ;;  %v2600_v17 = vpop.f32.mrb[37].mxu1  ;;  %v1823_v16 = vpop.f32.mrb[26].mxu0  ;;  %v3385_v37 = vsel %vm854_vm15, %v3380_v20, %v3384_v29  ;;  %v3396_v28 = vor.u32 %v3394_v41, %v3384_v29  ;;  %v3124_v20 = vsel %vm1025_vm0, %v3121_v59, %v3123_v0  ;;  %v3055_v29 = vshrl.u32 %v7422_v6, 16 }
 0x1a8   : > { %v7442_v42 = vpop.f32.mrb[38].mxu1  ;;  %v7445_v61 = vadd.f32 %v7029_v35, %v1823_v16  ;;  %v1825_v25 = vpop.f32.mrb[27].mxu0  ;;  %v3049_v17 = vor.u32 %v3047_v50, %v3045_v60  ;;  %v3400_v35 = vrot.slane %v3398_v46, 1  ;;  %v3340_v16 = vor.u32 %v3338_v38, %v3328_v51 }
 0x1a9   : > { %v2603_v5 = vpop.f32.mrb[39].mxu1  ;;  %v3329_v55 = vsel %vm854_vm15, %v3324_v62, %v3328_v51  ;;  %v3125_v60 = vrot.slane %v7363_v34, 1  ;;  %v3410_v41 = vshrl.u32 %v7428_v18, 16  ;;  %v3370_v46 = vshrl.u32 %v3122_v27, 16 }
 0x1aa   : > { %5156 = vmatmul.mubr.bf16.gmra.mrb[120].mxu0 %v3297_v19  ;;  %v7456_v31 = vsel %vm854_vm15, %v3049_v17, %v3053_v32  ;;  %v3360_v19 = vrot.slane %v3358_v36, 1  ;;  %v3401_v59 = vsel %vm854_vm15, %v3396_v28, %v3400_v35  ;;  %v3345_v25 = vsel %vm854_vm15, %v3340_v16, %v3344_v9 }
 0x1ab   : > { %3801 = vmatmul.mubr.bf16.gmra.mrb[144].mxu1 %v7340_v57  ;;  %5159 = vmatprep.mubr.bf16.mxu0 %v3313_v45  ;;  %v3059_v57 = vshll.u32 %v7450_v33, 16  ;;  %v3356_v45 = vor.u32 %v3354_v21, %v3344_v9  ;;  %v3414_v5 = vshll.u32 %v7456_v31, 16  ;;  %v3126_v27 = vsel %vm1025_vm0, %v3123_v0, %v3125_v60 }
 0x1ac   : > { %3808 = vmatprep.mubr.bf16.mxu1 %v3385_v37  ;;  %v3374_v37 = vshll.u32 %v3124_v20, 16  ;;  %v3057_v36 = vor.u32 %v3055_v29, %v3053_v32  ;;  %v3127_v28 = vrot.slane %v7389_v63, 1  ;;  %v3412_v16 = vor.u32 %v3410_v41, %v3400_v35 }
 0x1ad   : > { %v1828_v26 = vpop.f32.mrb[28].mxu0  ;;  %v3416_v9 = vrot.slane %v3414_v5, 1  ;;  %v3372_v21 = vor.u32 %v3370_v46, %v3360_v19  ;;  %v3361_v0 = vsel %vm854_vm15, %v3356_v45, %v3360_v19  ;;  %v3129_v35 = vrot.slane %v7422_v6, 1 }
 0x1ae   : > { %v2606_v50 = vpop.f32.mrb[40].mxu1  ;;  %v7462_v7 = vadd.f32 %v7019_v53, %v1828_v26  ;;  %v1830_v14 = vpop.f32.mrb[29].mxu0  ;;  %v3061_v26 = vrot.slane %v3059_v57, 1  ;;  %v7485_v32 = vsel %vm1025_vm0, %v3125_v60, %v3127_v28  ;;  %v3063_v29 = vshrl.u32 %v7450_v33, 16  ;;  %v7492_v57 = vld [vmem:[#allocation2] sm:$0xff] }
 0x1af   : > { %v7466_v34 = vadd.f32 %v2606_v50, %v7231_v54  ;;  %v2608_v38 = vpop.f32.mrb[41].mxu1  ;;  %v1831_v1 = vpop.f32.mrb[30].mxu0  ;;  %v3376_v50 = vrot.slane %v3374_v37, 1  ;;  %v3067_v19 = vshll.u32 %v7492_v57, 16  ;;  %v3417_v45 = vsel %vm854_vm15, %v3412_v16, %v3416_v9  ;;  %v7512_v16 = vld [vmem:[#allocation2 + $0xa8] sm:$0x1] }
 0x1b0   : > { %v2609_v62 = vpop.f32.mrb[42].mxu1  ;;  %v7471_v51 = vadd.f32 %v7027_v11, %v1831_v1  ;;  %v1833_v53 = vpop.f32.mrb[31].mxu0  ;;  %v3390_v11 = vshll.u32 %v3126_v27, 16  ;;  %v7482_v38 = vsel %vm854_vm15, %v3057_v36, %v3061_v26  ;;  %v3426_v1 = vshrl.u32 %v7456_v31, 16 }
 0x1b1   : > { %v7476_v54 = vadd.f32 %v2609_v62, %v7236_v40  ;;  %v2611_v17 = vpop.f32.mrb[43].mxu1  ;;  %v3386_v40 = vshrl.u32 %v3124_v20, 16  ;;  %v3377_v62 = vsel %vm854_vm15, %v3372_v21, %v3376_v50  ;;  %v3406_v53 = vshll.u32 %v7485_v32, 16 }
 0x1b2   : > { %5160 = vmatmul.mubr.bf16.gmra.mrb[124].mxu0 %v3329_v55  ;;  %v3392_v60 = vrot.slane %v3390_v11, 1  ;;  %v3430_v17 = vshll.u32 %v7482_v38, 16  ;;  %v3065_v36 = vor.u32 %v3063_v29, %v3061_v26  ;;  %v3069_v11 = vrot.slane %v3067_v19, 1  ;;  %v7526_v19 = vld [vmem:[#allocation2 + $0xa8] sm:$0x3] }
 0x1b3   : > { %3809 = vmatmul.mubr.bf16.gmra.mrb[148].mxu1 %v7372_v43  ;;  %5163 = vmatprep.mubr.bf16.mxu0 %v3345_v25  ;;  %v3388_v37 = vor.u32 %v3386_v40, %v3376_v50  ;;  %v3428_v21 = vor.u32 %v3426_v1, %v3416_v9  ;;  %v3071_v9 = vshrl.u32 %v7492_v57, 16  ;;  %v3075_v29 = vshll.u32 %v7512_v16, 16 }
 0x1b4   : > { %3816 = vmatprep.mubr.bf16.mxu1 %v3401_v59  ;;  %v3402_v59 = vshrl.u32 %v3126_v27, 16  ;;  %v3131_v27 = vrot.slane %v7450_v33, 1  ;;  %v3432_v40 = vrot.slane %v3430_v17, 1  ;;  %v3133_v1 = vrot.slane %v7492_v57, 1 }
 0x1b5   : > { %v1836_v14 = vpop.f32.mrb[32].mxu0  ;;  %v3393_v50 = vsel %vm854_vm15, %v3388_v37, %v3392_v60  ;;  %v3135_v57 = vrot.slane %v7526_v19, 1 }
 0x1b6   : > { %v2614_v63 = vpop.f32.mrb[44].mxu1  ;;  %v7488_v43 = vadd.f32 %v7093_v3, %v1836_v14  ;;  %v1838_v55 = vpop.f32.mrb[33].mxu0  ;;  %v3408_v14 = vrot.slane %v3406_v53, 1  ;;  %v7516_v33 = vsel %vm1025_vm0, %v3129_v35, %v3131_v27 }
 0x1b7   : > { %v7496_v20 = vadd.f32 %v2614_v63, %v7307_v13  ;;  %v2616_v41 = vpop.f32.mrb[45].mxu1  ;;  %v1839_v46 = vpop.f32.mrb[34].mxu0  ;;  %v3438_v53 = vshll.u32 %v7516_v33, 16 }
 0x1b8   : > { %v2617_v3 = vpop.f32.mrb[46].mxu1  ;;  %v7500_v25 = vadd.f32 %v7100_v10, %v1839_v46  ;;  %v1841_v6 = vpop.f32.mrb[35].mxu0  ;;  %v3130_v10 = vsel %vm1025_vm0, %v3127_v28, %v3129_v35 }
 0x1b9   : > { %v7506_v13 = vadd.f32 %v2617_v3, %v7313_v47  ;;  %v2619_v5 = vpop.f32.mrb[47].mxu1  ;;  %v3404_v47 = vor.u32 %v3402_v59, %v3392_v60  ;;  %v3422_v55 = vshll.u32 %v3130_v10, 16  ;;  %v3418_v60 = vshrl.u32 %v7485_v32, 16 }
 0x1ba   : > { %5164 = vmatmul.mubr.bf16.gmra.mrb[128].mxu0 %v3361_v0  ;;  %v7522_v0 = vsel %vm854_vm15, %v3065_v36, %v3069_v11  ;;  %v3433_v32 = vsel %vm854_vm15, %v3428_v21, %v3432_v40  ;;  %v3077_v36 = vrot.slane %v3075_v29, 1 }
 0x1bb   : > { %3817 = vmatmul.mubr.bf16.gmra.mrb[152].mxu1 %v7408_v49  ;;  %5167 = vmatprep.mubr.bf16.mxu0 %v3377_v62  ;;  %v3434_v62 = vshrl.u32 %v3130_v10, 16  ;;  %v3446_v37 = vshll.u32 %v7522_v0, 16  ;;  %v3424_v17 = vrot.slane %v3422_v55, 1  ;;  %v3420_v10 = vor.u32 %v3418_v60, %v3408_v14 }
 0x1bc   : > { %3824 = vmatprep.mubr.bf16.mxu1 %v3417_v45  ;;  %v3409_v45 = vsel %vm854_vm15, %v3404_v47, %v3408_v14  ;;  %v3134_v47 = vsel %vm1025_vm0, %v3131_v27, %v3133_v1 }
 0x1bd   : > { %v1844_v63 = vpop.f32.mrb[36].mxu0  ;;  %v3448_v21 = vrot.slane %v3446_v37, 1  ;;  %v3454_v55 = vshll.u32 %v3134_v47, 16  ;;  %v3425_v29 = vsel %vm854_vm15, %v3420_v10, %v3424_v17 }
 0x1be   : > { %v2622_v28 = vpop.f32.mrb[48].mxu1  ;;  %v7519_v26 = vadd.f32 %v7085_v22, %v1844_v63  ;;  %v1846_v49 = vpop.f32.mrb[37].mxu0  ;;  %v3442_v22 = vshrl.u32 %v7482_v38, 16  ;;  %v3440_v63 = vrot.slane %v3438_v53, 1 }
 0x1bf   : > { %v7529_v41 = vadd.f32 %v2622_v28, %v7346_v2  ;;  %v2624_v46 = vpop.f32.mrb[49].mxu1  ;;  %v1847_v35 = vpop.f32.mrb[38].mxu0 }
 0x1c0   : > { %v2625_v59 = vpop.f32.mrb[50].mxu1  ;;  %v7535_v3 = vadd.f32 %v7098_v12, %v1847_v35  ;;  %v1849_v6 = vpop.f32.mrb[39].mxu0  ;;  %v3073_v12 = vor.u32 %v3071_v9, %v3069_v11  ;;  %v3444_v49 = vor.u32 %v3442_v22, %v3432_v40  ;;  %v3136_v46 = vsel %vm1025_vm0, %v3133_v1, %v3135_v57 }
 0x1c1   : > { %v7540_v2 = vadd.f32 %v2625_v59, %v7353_v39  ;;  %v2627_v5 = vpop.f32.mrb[51].mxu1  ;;  %v3436_v39 = vor.u32 %v3434_v62, %v3424_v17  ;;  %v3450_v40 = vshrl.u32 %v7516_v33, 16  ;;  %v3466_v1 = vshrl.u32 %v3134_v47, 16 }
 0x1c2   : > { %5168 = vmatmul.mubr.bf16.gmra.mrb[132].mxu0 %v3393_v50  ;;  %v3470_v59 = vshll.u32 %v3136_v46, 16  ;;  %v3458_v62 = vshrl.u32 %v7522_v0, 16  ;;  %v3456_v33 = vrot.slane %v3454_v55, 1 }
 0x1c3   : > { %3825 = vmatmul.mubr.bf16.gmra.mrb[156].mxu1 %v7428_v18  ;;  %5171 = vmatprep.mubr.bf16.mxu0 %v3409_v45  ;;  %v7552_v18 = vsel %vm854_vm15, %v3073_v12, %v3077_v36  ;;  %v3441_v22 = vsel %vm854_vm15, %v3436_v39, %v3440_v63  ;;  %v3449_v45 = vsel %vm854_vm15, %v3444_v49, %v3448_v21  ;;  %v3079_v12 = vshrl.u32 %v7512_v16, 16 }
 0x1c4   : > { %3832 = vmatprep.mubr.bf16.mxu1 %v3433_v32  ;;  %v3462_v53 = vshll.u32 %v7552_v18, 16  ;;  %v3468_v5 = vor.u32 %v3466_v1, %v3456_v33  ;;  %v3472_v32 = vrot.slane %v3470_v59, 1  ;;  %v3460_v17 = vor.u32 %v3458_v62, %v3448_v21 }
 0x1c5   : > { %v1852_v28 = vpop.f32.mrb[40].mxu0  ;;  %v3482_v49 = vshrl.u32 %v3136_v46, 16 }
 0x1c6   : > { %v2630_v35 = vpop.f32.mrb[52].mxu1  ;;  %v7549_v50 = vadd.f32 %v7199_v44, %v1852_v28  ;;  %v1854_v11 = vpop.f32.mrb[41].mxu0  ;;  %v3473_v16 = vsel %vm854_vm15, %v3468_v5, %v3472_v32 }
 0x1c7   : > { %v7555_v14 = vadd.f32 %v2630_v35, %v7403_v8  ;;  %v2632_v27 = vpop.f32.mrb[53].mxu1  ;;  %v1855_v9 = vpop.f32.mrb[42].mxu0  ;;  %v3486_v35 = vshll.u32 %v3135_v57, 16  ;;  %v3484_v57 = vor.u32 %v3482_v49, %v3472_v32  ;;  %v8308_v32 = vld [vmem:[#allocation19_spill] sm:$0xff] }
 0x1c8   : > { %v2633_v19 = vpop.f32.mrb[54].mxu1  ;;  %v7560_v60 = vadd.f32 %v7209_v4, %v1855_v9  ;;  %v1857_v44 = vpop.f32.mrb[43].mxu0  ;;  %v3452_v4 = vor.u32 %v3450_v40, %v3440_v63  ;;  %v3474_v9 = vshrl.u32 %v7552_v18, 16 }
 0x1c9   : > { %v7564_v6 = vadd.f32 %v2633_v19, %v7416_v23  ;;  %v2635_v8 = vpop.f32.mrb[55].mxu1  ;;  %v3464_v23 = vrot.slane %v3462_v53, 1  ;;  %v3488_v46 = vrot.slane %v3486_v35, 1 }
 0x1ca   : > { %5172 = vmatmul.mubr.bf16.gmra.mrb[136].mxu0 %v3425_v29  ;;  %v3457_v63 = vsel %vm854_vm15, %v3452_v4, %v3456_v33  ;;  %v3478_v29 = vshll.u32 %v3079_v12, 16 }
 0x1cb   : > { %3833 = vmatmul.mubr.bf16.gmra.mrb[160].mxu1 %v7456_v31  ;;  %5175 = vmatprep.mubr.bf16.mxu0 %v3441_v22  ;;  %v3476_v40 = vor.u32 %v3474_v9, %v3464_v23 }
 0x1cc   : > { %3840 = vmatprep.mubr.bf16.mxu1 %v3449_v45  ;;  %v3480_v19 = vrot.slane %v3478_v29, 1  ;;  %v3489_v45 = vsel %vm854_vm15, %v3484_v57, %v3488_v46  ;;  %v8310_v46 = vld [vmem:[#allocation25_spill] sm:$0xff] }
 0x1cd   : > { %v1860_v37 = vpop.f32.mrb[44].mxu0 }
 0x1ce   : > { %v2638_v36 = vpop.f32.mrb[56].mxu1  ;;  %v7572_v10 = vadd.f32 %v7195_v15, %v1860_v37  ;;  %v1862_v47 = vpop.f32.mrb[45].mxu0 }
 0x1cf   : > { %v7575_v39 = vadd.f32 %v2638_v36, %v7436_v48  ;;  %v2640_v28 = vpop.f32.mrb[57].mxu1  ;;  %v1863_v31 = vpop.f32.mrb[46].mxu0  ;;  %v3465_v48 = vsel %vm854_vm15, %v3460_v17, %v3464_v23  ;;  %v8309_v36 = vld [vmem:[#allocation20_spill] sm:$0xff] }
 0x1d0   : > { %v2641_v11 = vpop.f32.mrb[58].mxu1  ;;  %v7579_v21 = vadd.f32 %v7201_v30, %v1863_v31  ;;  %v1865_v55 = vpop.f32.mrb[47].mxu0 }
 0x1d1   : > { %v7583_v15 = vadd.f32 %v2641_v11, %v7445_v61  ;;  %v2643_v27 = vpop.f32.mrb[59].mxu1 }
 0x1d2   : > { %5176 = vmatmul.mubr.bf16.gmra.mrb[140].mxu0 %v3457_v63 }
 0x1d3   : > { %3841 = vmatmul.mubr.bf16.gmra.mrb[164].mxu1 %v7482_v38  ;;  %5179 = vmatprep.mubr.bf16.mxu0 %v3473_v16 }
 0x1d4   : > { %3848 = vmatprep.mubr.bf16.mxu1 %v3465_v48 }
 0x1d5   : > { %v1868_v30 = vpop.f32.mrb[48].mxu0 }
 0x1d6   : > { %v2646_v44 = vpop.f32.mrb[60].mxu1  ;;  %v7589_v61 = vadd.f32 %v7263_v52, %v1868_v30  ;;  %v1870_v22 = vpop.f32.mrb[49].mxu0  ;;  %v3481_v52 = vsel %vm854_vm15, %v3476_v40, %v3480_v19 }
 0x1d7   : > { %v7592_v1 = vadd.f32 %v2646_v44, %v7462_v7  ;;  %v2648_v59 = vpop.f32.mrb[61].mxu1  ;;  %v1871_v8 = vpop.f32.mrb[50].mxu0  ;;  %v8311_v22 = vld [vmem:[#allocation28_spill] sm:$0xff] }
 0x1d8   : > { %v2649_v38 = vpop.f32.mrb[62].mxu1  ;;  %v7596_v62 = vadd.f32 %v7276_v24, %v1871_v8  ;;  %v1873_v53 = vpop.f32.mrb[51].mxu0 }
 0x1d9   : > { %v7599_v33 = vadd.f32 %v2649_v38, %v7471_v51  ;;  %v2651_v4 = vpop.f32.mrb[63].mxu1  ;;  %v8312_v53 = vld [vmem:[#allocation34_spill] sm:$0xff] }
 0x1da   : > { %5180 = vmatmul.mubr.bf16.gmra.mrb[144].mxu0 %v3489_v45 }
 0x1db   : > { %3849 = vmatmul.mubr.bf16.gmra.mrb[168].mxu1 %v7522_v0 }
 0x1dc   : > { %3856 = vmatprep.mubr.bf16.mxu1 %v3481_v52 }
 0x1dd   : > { %v1876_v7 = vpop.f32.mrb[52].mxu0 }
 0x1de   : > { %v2654_v5 = vpop.f32.mrb[64].mxu1  ;;  %v7604_v37 = vadd.f32 %v8308_v32, %v1876_v7  ;;  %v1878_v17 = vpop.f32.mrb[53].mxu0 }
 0x1df   : > { %v7607_v24 = vadd.f32 %v2654_v5, %v7488_v43  ;;  %v2656_v23 = vpop.f32.mrb[65].mxu1  ;;  %v1879_v12 = vpop.f32.mrb[54].mxu0  ;;  %v8313_v17 = vld [vmem:[#allocation40_spill] sm:$0xff] }
 0x1e0   : > { %v2657_v51 = vpop.f32.mrb[66].mxu1  ;;  %v7610_v47 = vadd.f32 %v8309_v36, %v1879_v12  ;;  %v1881_v28 = vpop.f32.mrb[55].mxu0 }
 0x1e1   : > { %v7613_v31 = vadd.f32 %v2657_v51, %v7500_v25  ;;  %v2659_v0 = vpop.f32.mrb[67].mxu1 }
 0x1e2   : > { %v8314_v0 = vld [vmem:[#allocation32_spill] sm:$0xff] }
 0x1e3   : > { %3857 = vmatmul.mubr.bf16.gmra.mrb[172].mxu1 %v7552_v18 }
 0x1e5   : > { %v1884_v63 = vpop.f32.mrb[56].mxu0 }
 0x1e6   : > { %v2662_v49 = vpop.f32.mrb[68].mxu1  ;;  %v7617_v35 = vadd.f32 %v7328_v58, %v1884_v63  ;;  %v1886_v43 = vpop.f32.mrb[57].mxu0 }
 0x1e7   : > { %v7620_v11 = vadd.f32 %v2662_v49, %v7519_v26  ;;  %v2664_v55 = vpop.f32.mrb[69].mxu1  ;;  %v1887_v16 = vpop.f32.mrb[58].mxu0 }
 0x1e8   : > { %v2665_v27 = vpop.f32.mrb[70].mxu1  ;;  %v2065_v48 = vadd.f32 %v7335_v56, %v1887_v16  ;;  %v1889_v9 = vpop.f32.mrb[59].mxu0 }
 0x1e9   : > { %v7624_v25 = vadd.f32 %v2665_v27, %v7535_v3  ;;  %v2667_v29 = vpop.f32.mrb[71].mxu1  ;;  %v8315_v27 = vld [vmem:[#allocation39_spill] sm:$0xff] }
 0x1ed   : > { %v1892_v18 = vpop.f32.mrb[60].mxu0 }
 0x1ee   : > { %v2670_v57 = vpop.f32.mrb[72].mxu1  ;;  %v2070_v30 = vadd.f32 %v8310_v46, %v1892_v18  ;;  %v1894_v58 = vpop.f32.mrb[61].mxu0 }
 0x1ef   : > { %v7628_v40 = vadd.f32 %v2670_v57, %v7549_v50  ;;  %v2672_v26 = vpop.f32.mrb[73].mxu1  ;;  %v1895_v19 = vpop.f32.mrb[62].mxu0  ;;  %v8316_v58 = vld [vmem:[#allocation52_spill] sm:$0xff] }
 0x1f0   : > { %v2673_v44 = vpop.f32.mrb[74].mxu1  ;;  %v2073_v59 = vadd.f32 %v8311_v22, %v1895_v19  ;;  %v1897_v8 = vpop.f32.mrb[63].mxu0  ;;  %v8317_v22 = vld [vmem:[#allocation50_spill] sm:$0xff] }
 0x1f1   : > { %v7632_v56 = vadd.f32 %v2673_v44, %v7560_v60  ;;  %v2675_v3 = vpop.f32.mrb[75].mxu1 }
 0x1f5   : > { %v1900_v45 = vpop.f32.mrb[64].mxu0 }
 0x1f6   : > { %v2678_v38 = vpop.f32.mrb[76].mxu1  ;;  %v2078_v4 = vadd.f32 %v8312_v53, %v1900_v45  ;;  %v1902_v52 = vpop.f32.mrb[65].mxu0 }
 0x1f7   : > { %v7636_v7 = vadd.f32 %v2678_v38, %v7572_v10  ;;  %v2680_v50 = vpop.f32.mrb[77].mxu1  ;;  %v1903_v5 = vpop.f32.mrb[66].mxu0  ;;  %v8318_v38 = vld [vmem:[#allocation53_spill] sm:$0xff] }
 0x1f8   : > { %v2681_v32 = vpop.f32.mrb[78].mxu1  ;;  %v2081_v23 = vadd.f32 %v8313_v17, %v1903_v5  ;;  %v1905_v12 = vpop.f32.mrb[67].mxu0  ;;  %v8319_v50 = vld [vmem:[#allocation46_spill] sm:$0xff]  ;;  %v8320_v17 = vld [vmem:[#allocation51_spill] sm:$0xff] }
 0x1f9   : > { %v7640_v51 = vadd.f32 %v2681_v32, %v7579_v21  ;;  %v2683_v60 = vpop.f32.mrb[79].mxu1 }
 0x1fa   : > { %v8321_v60 = vld [vmem:[#allocation45_spill] sm:$0xff] }
 0x1fd   : > { %v1908_v36 = vpop.f32.mrb[68].mxu0 }
 0x1fe   : > { %v2686_v28 = vpop.f32.mrb[80].mxu1  ;;  %v2086_v63 = vadd.f32 %v8314_v0, %v1908_v36  ;;  %v1910_v49 = vpop.f32.mrb[69].mxu0 }
 0x1ff   : > { %v7644_v43 = vadd.f32 %v2686_v28, %v7589_v61  ;;  %v2688_v10 = vpop.f32.mrb[81].mxu1  ;;  %v1911_v55 = vpop.f32.mrb[70].mxu0  ;;  %v8322_v28 = vld [vmem:[#allocation47_spill] sm:$0xff] }
 0x200   : > { %v2689_v16 = vpop.f32.mrb[82].mxu1  ;;  %v2089_v9 = vadd.f32 %v8315_v27, %v1911_v55  ;;  %v1913_v29 = vpop.f32.mrb[71].mxu0 }
 0x201   : > { %v7648_v18 = vadd.f32 %v2689_v16, %v7596_v62  ;;  %v2691_v21 = vpop.f32.mrb[83].mxu1 }
 0x205   : > { %v5045_v57 = vpop.f32.mrb[72].mxu0 }
 0x206   : > { %v2694_v46 = vpop.f32.mrb[84].mxu1  ;;  %v1958_v26 = vadd.f32 %v5045_v57, %v8316_v58  ;;  %v1949_v19 = vpop.f32.mrb[73].mxu0 }
 0x207   : > { %v7652_v44 = vadd.f32 %v2694_v46, %v7604_v37  ;;  %v2696_v61 = vpop.f32.mrb[85].mxu1  ;;  %v1950_v8 = vadd.f32 %v1949_v19, %v8317_v22  ;;  %v5046_v3 = vpop.f32.mrb[74].mxu0 }
 0x208   : > { %v2697_v45 = vpop.f32.mrb[86].mxu1  ;;  %v1961_v53 = vadd.f32 %v5046_v3, %v8318_v38  ;;  %v1952_v52 = vpop.f32.mrb[75].mxu0  ;;  %v2599_v62 = vadd.f32 %v8319_v50, %v1958_v26 }
 0x209   : > { %v7658_v5 = vadd.f32 %v2697_v45, %v7610_v47  ;;  %v2699_v32 = vpop.f32.mrb[87].mxu1  ;;  %v1953_v12 = vadd.f32 %v1952_v52, %v8320_v17  ;;  %v2591_v36 = vadd.f32 %v8321_v60, %v1950_v8 }
 0x20a   : > { %v2602_v37 = vadd.f32 %v7442_v42, %v1961_v53 }
 0x20b   : > { %v2594_v0 = vadd.f32 %v8322_v28, %v1953_v12 }
 0x20e   : > { %v2702_v49 = vpop.f32.mrb[88].mxu1 }
 0x20f   : > { %v7665_v10 = vadd.f32 %v2702_v49, %v7617_v35  ;;  %v2704_v55 = vpop.f32.mrb[89].mxu1 }
 0x210   : > { %v2705_v16 = vpop.f32.mrb[90].mxu1 }
 0x211   : > { %v7667_v27 = vadd.f32 %v2705_v16, %v2065_v48  ;;  %v2707_v29 = vpop.f32.mrb[91].mxu1 }
 0x216   : > { %v2710_v47 = vpop.f32.mrb[92].mxu1 }
 0x217   : > { %v7669_v21 = vadd.f32 %v2710_v47, %v2070_v30  ;;  %v2712_v57 = vpop.f32.mrb[93].mxu1 }
 0x218   : > { %v2713_v46 = vpop.f32.mrb[94].mxu1 }
 0x219   : > { %v7671_v58 = vadd.f32 %v2713_v46, %v2073_v59  ;;  %v2715_v26 = vpop.f32.mrb[95].mxu1 }
 0x21e   : > { %v2718_v42 = vpop.f32.mrb[96].mxu1 }
 0x21f   : > { %v7673_v19 = vadd.f32 %v2718_v42, %v2078_v4  ;;  %v2720_v61 = vpop.f32.mrb[97].mxu1 }
 0x220   : > { %v2721_v22 = vpop.f32.mrb[98].mxu1 }
 0x221   : > { %v7675_v35 = vadd.f32 %v2721_v22, %v2081_v23  ;;  %v2723_v8 = vpop.f32.mrb[99].mxu1 }
 0x225   : > { %v5097_v3 = vpop.f32.mrb[76].mxu0 }
 0x226   : > { %v2726_v48 = vpop.f32.mrb[100].mxu1  ;;  %v7677_v45 = vadd.f32 %v5097_v3, %v2599_v62  ;;  %v2767_v38 = vpop.f32.mrb[77].mxu0 }
 0x227   : > { %v7679_v30 = vadd.f32 %v2726_v48, %v2086_v63  ;;  %v2728_v53 = vpop.f32.mrb[101].mxu1  ;;  %v7681_v52 = vadd.f32 %v2767_v38, %v2591_v36  ;;  %v5098_v59 = vpop.f32.mrb[78].mxu0 }
 0x228   : > { %v2729_v50 = vpop.f32.mrb[102].mxu1  ;;  %v7683_v32 = vadd.f32 %v5098_v59, %v2602_v37  ;;  %v2770_v4 = vpop.f32.mrb[79].mxu0 }
 0x229   : > { %v7685_v17 = vadd.f32 %v2729_v50, %v2089_v9  ;;  %v2731_v23 = vpop.f32.mrb[103].mxu1  ;;  %v7687_v12 = vadd.f32 %v2770_v4, %v2594_v0 }
 0x22d   : > { %v5101_v60 = vpop.f32.mrb[80].mxu0 }
 0x22e   : > { %v7689_v28 = vpop.f32.mrb[104].mxu1  ;;  %v7692_v62 = vadd.f32 %v5101_v60, %v7496_v20  ;;  %v2783_v63 = vpop.f32.mrb[81].mxu0 }
 0x22f   : > { %v3724_v49 = vpop.f32.mrb[105].mxu1  ;;  %v7695_v36 = vadd.f32 %v2783_v63, %v7466_v34  ;;  %v5102_v55 = vpop.f32.mrb[82].mxu0 }
 0x230   : > { %v7697_v37 = vpop.f32.mrb[106].mxu1  ;;  %v7700_v9 = vadd.f32 %v5102_v55, %v7506_v13  ;;  %v2786_v16 = vpop.f32.mrb[83].mxu0 }
 0x231   : > { %v3727_v0 = vpop.f32.mrb[107].mxu1  ;;  %v7703_v29 = vadd.f32 %v2786_v16, %v7476_v54 }
 0x235   : > { %v5105_v47 = vpop.f32.mrb[84].mxu0 }
 0x236   : > { %v7705_v57 = vpop.f32.mrb[108].mxu1  ;;  %v7708_v20 = vadd.f32 %v5105_v47, %v7555_v14  ;;  %v2799_v46 = vpop.f32.mrb[85].mxu0 }
 0x237   : > { %v3732_v34 = vpop.f32.mrb[109].mxu1  ;;  %v7711_v26 = vadd.f32 %v2799_v46, %v7529_v41  ;;  %v5106_v42 = vpop.f32.mrb[86].mxu0 }
 0x238   : > { %v7713_v61 = vpop.f32.mrb[110].mxu1  ;;  %v7716_v13 = vadd.f32 %v5106_v42, %v7564_v6  ;;  %v2802_v22 = vpop.f32.mrb[87].mxu0 }
 0x239   : > { %v3735_v54 = vpop.f32.mrb[111].mxu1  ;;  %v7719_v8 = vadd.f32 %v2802_v22, %v7540_v2 }
 0x23d   : > { %v5109_v3 = vpop.f32.mrb[88].mxu0 }
 0x23e   : > { %v7721_v48 = vpop.f32.mrb[112].mxu1  ;;  %v7724_v14 = vadd.f32 %v5109_v3, %v7592_v1  ;;  %v2815_v38 = vpop.f32.mrb[89].mxu0 }
 0x23f   : > { %v3740_v41 = vpop.f32.mrb[113].mxu1  ;;  %v7727_v53 = vadd.f32 %v2815_v38, %v7575_v39  ;;  %v5110_v59 = vpop.f32.mrb[90].mxu0 }
 0x240   : > { %v7729_v50 = vpop.f32.mrb[114].mxu1  ;;  %v7732_v6 = vadd.f32 %v5110_v59, %v7599_v33  ;;  %v2818_v4 = vpop.f32.mrb[91].mxu0 }
 0x241   : > { %v3743_v2 = vpop.f32.mrb[115].mxu1  ;;  %v7735_v23 = vadd.f32 %v2818_v4, %v7583_v15 }
 0x245   : > { %v5113_v60 = vpop.f32.mrb[92].mxu0 }
 0x246   : > { %v7737_v63 = vpop.f32.mrb[116].mxu1  ;;  %v7740_v1 = vadd.f32 %v5113_v60, %v7620_v11  ;;  %v2831_v49 = vpop.f32.mrb[93].mxu0 }
 0x247   : > { %v3748_v39 = vpop.f32.mrb[117].mxu1  ;;  %v7743_v55 = vadd.f32 %v2831_v49, %v7607_v24  ;;  %v5114_v16 = vpop.f32.mrb[94].mxu0 }
 0x248   : > { %v7745_v0 = vpop.f32.mrb[118].mxu1  ;;  %v7748_v33 = vadd.f32 %v5114_v16, %v7624_v25  ;;  %v2834_v47 = vpop.f32.mrb[95].mxu0 }
 0x249   : > { %v3751_v15 = vpop.f32.mrb[119].mxu1  ;;  %v7751_v46 = vadd.f32 %v2834_v47, %v7613_v31 }
 0x24d   : > { %v5117_v34 = vpop.f32.mrb[96].mxu0 }
 0x24e   : > { %v7753_v42 = vpop.f32.mrb[120].mxu1  ;;  %v7756_v11 = vadd.f32 %v5117_v34, %v7636_v7  ;;  %v2847_v22 = vpop.f32.mrb[97].mxu0 }
 0x24f   : > { %v3756_v24 = vpop.f32.mrb[121].mxu1  ;;  %v7759_v54 = vadd.f32 %v2847_v22, %v7628_v40  ;;  %v5118_v3 = vpop.f32.mrb[98].mxu0 }
 0x250   : > { %v7761_v38 = vpop.f32.mrb[122].mxu1  ;;  %v7764_v25 = vadd.f32 %v5118_v3, %v7640_v51  ;;  %v2850_v41 = vpop.f32.mrb[99].mxu0 }
 0x251   : > { %v3759_v31 = vpop.f32.mrb[123].mxu1  ;;  %v7767_v59 = vadd.f32 %v2850_v41, %v7632_v56 }
 0x255   : > { %v5121_v4 = vpop.f32.mrb[100].mxu0 }
 0x256   : > { %v7769_v2 = vpop.f32.mrb[124].mxu1  ;;  %v7772_v7 = vadd.f32 %v5121_v4, %v7652_v44  ;;  %v2863_v60 = vpop.f32.mrb[101].mxu0 }
 0x257   : > { %v3764_v40 = vpop.f32.mrb[125].mxu1  ;;  %v7775_v49 = vadd.f32 %v2863_v60, %v7644_v43  ;;  %v5122_v39 = vpop.f32.mrb[102].mxu0 }
 0x258   : > { %v7777_v16 = vpop.f32.mrb[126].mxu1  ;;  %v7780_v51 = vadd.f32 %v5122_v39, %v7658_v5  ;;  %v2866_v47 = vpop.f32.mrb[103].mxu0 }
 0x259   : > { %v3767_v56 = vpop.f32.mrb[127].mxu1  ;;  %v7783_v15 = vadd.f32 %v2866_v47, %v7648_v18 }
 0x25d   : > { %v5125_v34 = vpop.f32.mrb[104].mxu0 }
 0x25e   : > { %v7785_v22 = vpop.f32.mrb[128].mxu1  ;;  %v7788_v44 = vadd.f32 %v5125_v34, %v7669_v21  ;;  %v2879_v24 = vpop.f32.mrb[105].mxu0 }
 0x25f   : > { %v3772_v43 = vpop.f32.mrb[129].mxu1  ;;  %v7791_v3 = vadd.f32 %v2879_v24, %v7665_v10  ;;  %v5126_v41 = vpop.f32.mrb[106].mxu0 }
 0x260   : > { %v7793_v31 = vpop.f32.mrb[130].mxu1  ;;  %v7796_v5 = vadd.f32 %v5126_v41, %v7671_v58  ;;  %v2882_v4 = vpop.f32.mrb[107].mxu0 }
 0x261   : > { %v3775_v18 = vpop.f32.mrb[131].mxu1  ;;  %v7799_v60 = vadd.f32 %v2882_v4, %v7667_v27 }
 0x265   : > { %v5129_v40 = vpop.f32.mrb[108].mxu0 }
 0x266   : > { %v7801_v39 = vpop.f32.mrb[132].mxu1  ;;  %v7804_v21 = vadd.f32 %v5129_v40, %v7679_v30  ;;  %v2895_v47 = vpop.f32.mrb[109].mxu0 }
 0x267   : > { %v3780_v10 = vpop.f32.mrb[133].mxu1  ;;  %v7807_v56 = vadd.f32 %v2895_v47, %v7673_v19  ;;  %v5130_v34 = vpop.f32.mrb[110].mxu0 }
 0x268   : > { %8323 = vst [vmem:[#allocation19_spill] sm:$0xff] %v7804_v21  ;;  %v7809_v24 = vpop.f32.mrb[134].mxu1  ;;  %v7812_v58 = vadd.f32 %v5130_v34, %v7685_v17  ;;  %v2898_v43 = vpop.f32.mrb[111].mxu0 }
 0x269   : > { %8324 = vst [vmem:[#allocation20_spill] sm:$0xff] %v7807_v56  ;;  %v3783_v27 = vpop.f32.mrb[135].mxu1  ;;  %v7815_v41 = vadd.f32 %v2898_v43, %v7675_v35 }
 0x26a   : > { %8325 = vst [vmem:[#allocation25_spill] sm:$0xff] %v7812_v58 }
 0x26b   : > { %8326 = vst [vmem:[#allocation28_spill] sm:$0xff] %v7815_v41 }
 0x26d   : > { %v5149_v4 = vpop.f32.mrb[112].mxu0 }
 0x26e   : > { %v7817_v30 = vpop.f32.mrb[136].mxu1  ;;  %v3908_v18 = vadd.f32 %v5149_v4, %v7705_v57  ;;  %v3899_v40 = vpop.f32.mrb[113].mxu0 }
 0x26f   : > { %v3788_v19 = vpop.f32.mrb[137].mxu1  ;;  %v3900_v47 = vadd.f32 %v3899_v40, %v7689_v28  ;;  %v5150_v10 = vpop.f32.mrb[114].mxu0 }
 0x270   : > { %v7821_v21 = vpop.f32.mrb[138].mxu1  ;;  %v4044_v17 = vadd.f32 %v3908_v18, %v7677_v45  ;;  %v3911_v34 = vadd.f32 %v5150_v10, %v7713_v61  ;;  %v3902_v27 = vpop.f32.mrb[115].mxu0 }
 0x271   : > { %v3791_v35 = vpop.f32.mrb[139].mxu1  ;;  %v4042_v43 = vadd.f32 %v3900_v47, %v7681_v52  ;;  %v3903_v58 = vadd.f32 %v3902_v27, %v7697_v37 }
 0x272   : > { %v4045_v41 = vadd.f32 %v3911_v34, %v7683_v32  ;;  %v4080_v52 = vsel %vm655_vm1, %v4044_v17, 0.0 }
 0x273   : > { %v4078_v4 = vsel %vm653_vm13, %v4042_v43, 0.0  ;;  %v4043_v45 = vadd.f32 %v3903_v58, %v7687_v12  ;;  %v4157_v57 = vmul.f32 %v4080_v52, %v4080_v52 }
 0x274   : > { %v4833_v61 = vpack.c.bf16 %v4045_v41, %v4044_v17  ;;  %v4155_v19 = vmul.f32 %v4078_v4, %v4078_v4  ;;  %v4081_v58 = vsel %vm656_vm2, %v4045_v41, 0.0 }
 0x275   : > { %v4079_v32 = vsel %vm654_vm14, %v4043_v45, 0.0  ;;  %v4828_v18 = vpack.c.bf16 %v4043_v45, %v4042_v43  ;;  %v5153_v40 = vpop.f32.mrb[116].mxu0  ;;  %v4158_v41 = vmul.f32 %v4081_v58, %v4081_v58 }
 0x276   : > { %4932 = vst [vmem:[%s7835_s20 + $0x8] sm:$0xff] %v4833_v61   ;;  %v4114_v47 = vadd.f32 %v4079_v32, %v4078_v4  ;;  %v4156_v10 = vmul.f32 %v4079_v32, %v4079_v32  ;;  %v7843_v34 = vpop.f32.mrb[140].mxu1  ;;  %v3924_v27 = vadd.f32 %v5153_v40, %v7737_v63  ;;  %v3915_v35 = vpop.f32.mrb[117].mxu0 }
 0x277   : > { %4829 = vst [vmem:[%s7835_s20] sm:$0xff] %v4828_v18   ;;  %v3796_v17 = vpop.f32.mrb[141].mxu1  ;;  %v3916_v28 = vadd.f32 %v3915_v35, %v7721_v48  ;;  %v5154_v37 = vpop.f32.mrb[118].mxu0 }
 0x278   : > { %v4115_v43 = vadd.f32 %v4114_v47, %v4080_v52  ;;  %v4191_v45 = vadd.f32 %v4156_v10, %v4155_v19  ;;  %v7850_v56 = vpop.f32.mrb[142].mxu1  ;;  %v4048_v4 = vadd.f32 %v3924_v27, %v7692_v62  ;;  %v3927_v61 = vadd.f32 %v5154_v37, %v7745_v0  ;;  %v3918_v32 = vpop.f32.mrb[119].mxu0 }
 0x279   : > { %v3799_v63 = vpop.f32.mrb[143].mxu1  ;;  %v4046_v40 = vadd.f32 %v3916_v28, %v7695_v36  ;;  %v3919_v12 = vadd.f32 %v3918_v32, %v7729_v50 }
 0x27a   : > { %v4192_v18 = vadd.f32 %v4191_v45, %v4157_v57  ;;  %v4116_v17 = vadd.f32 %v4115_v43, %v4081_v58  ;;  %v4049_v48 = vadd.f32 %v3927_v61, %v7700_v9  ;;  %v4084_v62 = vsel %vm659_vm5, %v4048_v4, 0.0 }
 0x27b   : > { %v4082_v52 = vsel %vm657_vm3, %v4046_v40, 0.0  ;;  %v4047_v19 = vadd.f32 %v3919_v12, %v7703_v29  ;;  %v4161_v32 = vmul.f32 %v4084_v62, %v4084_v62 }
 0x27c   : > { %v4117_v0 = vadd.f32 %v4116_v17, %v4082_v52  ;;  %v4159_v10 = vmul.f32 %v4082_v52, %v4082_v52  ;;  %v4193_v36 = vadd.f32 %v4192_v18, %v4158_v41  ;;  %v4843_v27 = vpack.c.bf16 %v4049_v48, %v4048_v4 }
 0x27d   : > { %v4083_v57 = vsel %vm658_vm4, %v4047_v19, 0.0  ;;  %v4838_v58 = vpack.c.bf16 %v4047_v19, %v4046_v40  ;;  %v5157_v28 = vpop.f32.mrb[120].mxu0  ;;  %v4085_v12 = vsel %vm660_vm6, %v4049_v48, 0.0 }
 0x27e   : > { %v4194_v9 = vadd.f32 %v4193_v36, %v4159_v10  ;;  %v4118_v37 = vadd.f32 %v4117_v0, %v4083_v57  ;;  %v4160_v43 = vmul.f32 %v4083_v57, %v4083_v57  ;;  %v7864_v45 = vpop.f32.mrb[144].mxu1  ;;  %v3940_v29 = vadd.f32 %v5157_v28, %v7769_v2  ;;  %v3931_v61 = vpop.f32.mrb[121].mxu0  ;;  %4934 = vst [vmem:[%s7835_s20 + $0x18] sm:$0xff] %v4843_v27  }
 0x27f   : > { %4933 = vst [vmem:[%s7835_s20 + $0x10] sm:$0xff] %v4838_v58   ;;  %v3804_v4 = vpop.f32.mrb[145].mxu1  ;;  %v3932_v41 = vadd.f32 %v3931_v61, %v7753_v42  ;;  %v5158_v18 = vpop.f32.mrb[122].mxu0  ;;  %v4162_v10 = vmul.f32 %v4085_v12, %v4085_v12 }
 0x280   : > { %v4119_v40 = vadd.f32 %v4118_v37, %v4084_v62  ;;  %v4195_v17 = vadd.f32 %v4194_v9, %v4160_v43  ;;  %v7872_v35 = vpop.f32.mrb[146].mxu1  ;;  %v4052_v52 = vadd.f32 %v3940_v29, %v7708_v20  ;;  %v3943_v19 = vadd.f32 %v5158_v18, %v7777_v16  ;;  %v3934_v2 = vpop.f32.mrb[123].mxu0 }
 0x281   : > { %v3807_v47 = vpop.f32.mrb[147].mxu1  ;;  %v4050_v0 = vadd.f32 %v3932_v41, %v7711_v26  ;;  %v3935_v48 = vadd.f32 %v3934_v2, %v7761_v38  ;;  %v8338_v41 = vld [vmem:[#allocation12_spill] sm:$0xff] }
 0x282   : > { %v4196_v36 = vadd.f32 %v4195_v17, %v4161_v32  ;;  %v4120_v27 = vadd.f32 %v4119_v40, %v4085_v12  ;;  %v4053_v42 = vadd.f32 %v3943_v19, %v7716_v13  ;;  %v4088_v20 = vsel %vm663_vm10, %v4052_v52, 0.0 }
 0x283   : > { %v4086_v62 = vsel %vm661_vm8, %v4050_v0, 0.0  ;;  %v4051_v57 = vadd.f32 %v3935_v48, %v7719_v8  ;;  %v4165_v4 = vmul.f32 %v4088_v20, %v4088_v20  ;;  %vm8339_vm0 = vcmp.lt.f32.partialorder %v8338_v41, 16.0 }
 0x284   : > { %v4121_v16 = vadd.f32 %v4120_v27, %v4086_v62  ;;  %v4163_v28 = vmul.f32 %v4086_v62, %v4086_v62  ;;  %v4197_v26 = vadd.f32 %v4196_v36, %v4162_v10  ;;  %v4853_v9 = vpack.c.bf16 %v4053_v42, %v4052_v52 }
 0x285   : > { %v4087_v37 = vsel %vm662_vm9, %v4051_v57, 0.0  ;;  %v4848_v43 = vpack.c.bf16 %v4051_v57, %v4050_v0  ;;  %v5161_v29 = vpop.f32.mrb[124].mxu0  ;;  %v4089_v18 = vsel %vm8339_vm0, %v4053_v42, 0.0  ;;  %v8340_v57 = vld [vmem:[#allocation13_spill] sm:$0xff] }
 0x286   : > { %v4198_v13 = vadd.f32 %v4197_v26, %v4163_v28  ;;  %v4122_v61 = vadd.f32 %v4121_v16, %v4087_v37  ;;  %v4164_v32 = vmul.f32 %v4087_v37, %v4087_v37  ;;  %v7886_v63 = vpop.f32.mrb[148].mxu1  ;;  %v3956_v8 = vadd.f32 %v5161_v29, %v7801_v39  ;;  %v3947_v12 = vpop.f32.mrb[125].mxu0  ;;  %4936 = vst [vmem:[%s7835_s20 + $0x28] sm:$0xff] %v4853_v9   ;;  %v8342_v16 = vld [vmem:[#allocation15_spill] sm:$0xff] }
 0x287   : > { %4935 = vst [vmem:[%s7835_s20 + $0x20] sm:$0xff] %v4848_v43   ;;  %v3812_v40 = vpop.f32.mrb[149].mxu1  ;;  %v3948_v17 = vadd.f32 %v3947_v12, %v7785_v22  ;;  %v5162_v52 = vpop.f32.mrb[126].mxu0  ;;  %v4166_v42 = vmul.f32 %v4089_v18, %v4089_v18  ;;  %vm8341_vm1 = vcmp.lt.f32.partialorder %v8340_v57, 16.0  ;;  %vm8343_vm2 = vcmp.lt.f32.partialorder %v8342_v16, 16.0 }
 0x288   : > { %v4123_v19 = vadd.f32 %v4122_v61, %v4088_v20  ;;  %v4199_v2 = vadd.f32 %v4198_v13, %v4164_v32  ;;  %v7894_v47 = vpop.f32.mrb[150].mxu1  ;;  %v4056_v0 = vadd.f32 %v3956_v8, %v7724_v14  ;;  %v3959_v48 = vadd.f32 %v5162_v52, %v7809_v24  ;;  %v3950_v39 = vpop.f32.mrb[127].mxu0  ;;  %v8346_v8 = vld [vmem:[#allocation16_spill] sm:$0xff] }
 0x289   : > { %v3815_v10 = vpop.f32.mrb[151].mxu1  ;;  %v4054_v36 = vadd.f32 %v3948_v17, %v7727_v53  ;;  %v3951_v27 = vadd.f32 %v3950_v39, %v7793_v31  ;;  %v8344_v31 = vld [vmem:[#allocation14_spill] sm:$0xff]  ;;  %vm8347_vm4 = vcmp.lt.f32.partialorder %v8346_v8, 16.0 }
 0x28a   : > { %v4200_v50 = vadd.f32 %v4199_v2, %v4165_v4  ;;  %v4124_v62 = vadd.f32 %v4123_v19, %v4089_v18  ;;  %v4057_v22 = vadd.f32 %v3959_v48, %v7732_v6  ;;  %v4092_v14 = vsel %vm8343_vm2, %v4056_v0, 0.0 }
 0x28b   : > { %v4090_v58 = vsel %vm8341_vm1, %v4054_v36, 0.0  ;;  %v4055_v20 = vadd.f32 %v3951_v27, %v7735_v23  ;;  %vm8345_vm3 = vcmp.lt.f32.partialorder %v8344_v31, 16.0  ;;  %v4169_v32 = vmul.f32 %v4092_v14, %v4092_v14 }
 0x28c   : > { %v4125_v24 = vadd.f32 %v4124_v62, %v4090_v58  ;;  %v4167_v28 = vmul.f32 %v4090_v58, %v4090_v58  ;;  %v4201_v53 = vadd.f32 %v4200_v50, %v4166_v42  ;;  %v4863_v26 = vpack.c.bf16 %v4057_v22, %v4056_v0  ;;  %v8348_v42 = vld [vmem:[#allocation17_spill] sm:$0xff] }
 0x28d   : > { %v4091_v9 = vsel %vm8345_vm3, %v4055_v20, 0.0  ;;  %v4858_v38 = vpack.c.bf16 %v4055_v20, %v4054_v36  ;;  %v5165_v37 = vpop.f32.mrb[128].mxu0  ;;  %v4093_v12 = vsel %vm8347_vm4, %v4057_v22, 0.0  ;;  %vm8349_vm5 = vcmp.lt.f32.partialorder %v8348_v42, 16.0  ;;  %v8350_v22 = vld [vmem:[#allocation21_spill] sm:$0xff] }
 0x28e   : > { %v4202_v6 = vadd.f32 %v4201_v53, %v4167_v28  ;;  %v4126_v43 = vadd.f32 %v4125_v24, %v4091_v9  ;;  %v4168_v29 = vmul.f32 %v4091_v9, %v4091_v9  ;;  %v7908_v13 = vpop.f32.mrb[152].mxu1  ;;  %v3972_v23 = vadd.f32 %v5165_v37, %v7843_v34  ;;  %v3963_v61 = vpop.f32.mrb[129].mxu0  ;;  %4938 = vst [vmem:[%s7835_s20 + $0x38] sm:$0xff] %v4863_v26   ;;  %v8354_v9 = vld [vmem:[#allocation22_spill] sm:$0xff] }
 0x28f   : > { %4937 = vst [vmem:[%s7835_s20 + $0x30] sm:$0xff] %v4858_v38   ;;  %v3820_v4 = vpop.f32.mrb[153].mxu1  ;;  %v3964_v41 = vadd.f32 %v3963_v61, %v7817_v30  ;;  %v5166_v18 = vpop.f32.mrb[130].mxu0  ;;  %v4170_v10 = vmul.f32 %v4093_v12, %v4093_v12  ;;  %vm8351_vm6 = vcmp.lt.f32.partialorder %v8350_v22, 16.0  ;;  %vm8355_vm8 = vcmp.lt.f32.partialorder %v8354_v9, 16.0 }
 0x290   : > { %v4127_v40 = vadd.f32 %v4126_v43, %v4092_v14  ;;  %v4203_v17 = vadd.f32 %v4202_v6, %v4168_v29  ;;  %v7916_v52 = vpop.f32.mrb[154].mxu1  ;;  %v4060_v19 = vadd.f32 %v3972_v23, %v7740_v1  ;;  %v3975_v2 = vadd.f32 %v5166_v18, %v7850_v56  ;;  %v3966_v34 = vpop.f32.mrb[131].mxu0 }
 0x291   : > { %v3823_v0 = vpop.f32.mrb[155].mxu1  ;;  %v4058_v48 = vadd.f32 %v3964_v41, %v7743_v55  ;;  %v3967_v39 = vadd.f32 %v3966_v34, %v7821_v21  ;;  %v8352_v21 = vld [vmem:[#allocation18_spill] sm:$0xff] }
 0x292   : > { %v4204_v36 = vadd.f32 %v4203_v17, %v4169_v32  ;;  %v4128_v27 = vadd.f32 %v4127_v40, %v4093_v12  ;;  %v4061_v30 = vadd.f32 %v3975_v2, %v7748_v33  ;;  %v4096_v1 = vsel %vm8351_vm6, %v4060_v19, 0.0  ;;  %v8358_v0 = vld [vmem:[#allocation29_spill] sm:$0xff] }
 0x293   : > { %v4094_v50 = vsel %vm8349_vm5, %v4058_v48, 0.0  ;;  %v4059_v62 = vadd.f32 %v3967_v39, %v7751_v46  ;;  %vm8353_vm7 = vcmp.lt.f32.partialorder %v8352_v21, 16.0  ;;  %v4173_v31 = vmul.f32 %v4096_v1, %v4096_v1 }
 0x294   : > { %v4129_v56 = vadd.f32 %v4128_v27, %v4094_v50  ;;  %v4171_v57 = vmul.f32 %v4094_v50, %v4094_v50  ;;  %v4205_v55 = vadd.f32 %v4204_v36, %v4170_v10  ;;  %v4873_v58 = vpack.c.bf16 %v4061_v30, %v4060_v19 }
 0x295   : > { %v4095_v20 = vsel %vm8353_vm7, %v4059_v62, 0.0  ;;  %v4868_v16 = vpack.c.bf16 %v4059_v62, %v4058_v48  ;;  %v5169_v14 = vpop.f32.mrb[132].mxu0  ;;  %v4097_v38 = vsel %vm8355_vm8, %v4061_v30, 0.0  ;;  %vm8359_vm10 = vcmp.lt.f32.partialorder %v8358_v0, 16.0 }
 0x296   : > { %v4206_v33 = vadd.f32 %v4205_v55, %v4171_v57  ;;  %v4130_v24 = vadd.f32 %v4129_v56, %v4095_v20  ;;  %v4172_v28 = vmul.f32 %v4095_v20, %v4095_v20  ;;  %v3826_v53 = vpop.f32.mrb[156].mxu1  ;;  %v3988_v46 = vadd.f32 %v5169_v14, %v7886_v63  ;;  %v3979_v26 = vpop.f32.mrb[133].mxu0  ;;  %4940 = vst [vmem:[%s7835_s20 + $0x48] sm:$0xff] %v4873_v58  }
 0x297   : > { %4939 = vst [vmem:[%s7835_s20 + $0x40] sm:$0xff] %v4868_v16   ;;  %v3828_v37 = vpop.f32.mrb[157].mxu1  ;;  %v3980_v6 = vadd.f32 %v3979_v26, %v7864_v45  ;;  %v5170_v43 = vpop.f32.mrb[134].mxu0  ;;  %v4174_v18 = vmul.f32 %v4097_v38, %v4097_v38  ;;  %v8356_v45 = vld [vmem:[#allocation23_spill] sm:$0xff] }
 0x298   : > { %v4131_v29 = vadd.f32 %v4130_v24, %v4096_v1  ;;  %v4207_v23 = vadd.f32 %v4206_v33, %v4172_v28  ;;  %v3829_v61 = vpop.f32.mrb[158].mxu1  ;;  %v4064_v32 = vadd.f32 %v3988_v46, %v7756_v11  ;;  %v3991_v8 = vadd.f32 %v5170_v43, %v7894_v47  ;;  %v3982_v12 = vpop.f32.mrb[135].mxu0  ;;  %v8362_v1 = vld [vmem:[#allocation30_spill] sm:$0xff]  ;;  %v8364_v37 = vld [vmem:[#allocation31_spill] sm:$0xff] }
 0x299   : > { %v3831_v63 = vpop.f32.mrb[159].mxu1  ;;  %v4062_v4 = vadd.f32 %v3980_v6, %v7759_v54  ;;  %v3983_v41 = vadd.f32 %v3982_v12, %v7872_v35  ;;  %vm8357_vm9 = vcmp.lt.f32.partialorder %v8356_v45, 16.0  ;;  %v8360_v35 = vld [vmem:[#allocation24_spill] sm:$0xff]  ;;  %vm8363_vm13 = vcmp.lt.f32.partialorder %v8362_v1, 16.0 }
 0x29a   : > { %v4208_v40 = vadd.f32 %v4207_v23, %v4173_v31  ;;  %v4132_v17 = vadd.f32 %v4131_v29, %v4097_v38  ;;  %v4065_v19 = vadd.f32 %v3991_v8, %v7764_v25  ;;  %v4100_v11 = vsel %vm8359_vm10, %v4064_v32, 0.0  ;;  %v8366_v23 = vld [vmem:[#allocation35_spill] sm:$0xff] }
 0x29b   : > { %v4098_v2 = vsel %vm8357_vm9, %v4062_v4, 0.0  ;;  %v4063_v34 = vadd.f32 %v3983_v41, %v7767_v59  ;;  %vm8361_vm11 = vcmp.lt.f32.partialorder %v8360_v35, 16.0  ;;  %v4177_v22 = vmul.f32 %v4100_v11, %v4100_v11 }
 0x29c   : > { %v4133_v47 = vadd.f32 %v4132_v17, %v4098_v2  ;;  %v4175_v48 = vmul.f32 %v4098_v2, %v4098_v2  ;;  %v4209_v54 = vadd.f32 %v4208_v40, %v4174_v18  ;;  %v4883_v39 = vpack.c.bf16 %v4065_v19, %v4064_v32  ;;  %v8370_v40 = vld [vmem:[#allocation36_spill] sm:$0xff] }
 0x29d   : > { %v4099_v10 = vsel %vm8361_vm11, %v4063_v34, 0.0  ;;  %v4878_v36 = vpack.c.bf16 %v4063_v34, %v4062_v4  ;;  %v5173_v27 = vpop.f32.mrb[136].mxu0  ;;  %v4101_v56 = vsel %vm8363_vm13, %v4065_v19, 0.0  ;;  %vm8365_vm14 = vcmp.lt.f32.partialorder %v8364_v37, 16.0 }
 0x29e   : > { %v4210_v25 = vadd.f32 %v4209_v54, %v4175_v48  ;;  %v4134_v30 = vadd.f32 %v4133_v47, %v4099_v10  ;;  %v4176_v42 = vmul.f32 %v4099_v10, %v4099_v10  ;;  %v3834_v50 = vpop.f32.mrb[160].mxu1  ;;  %v4004_v62 = vadd.f32 %v5173_v27, %v3826_v53  ;;  %v3995_v59 = vpop.f32.mrb[137].mxu0  ;;  %4942 = vst [vmem:[%s7835_s20 + $0x58] sm:$0xff] %v4883_v39  }
 0x29f   : > { %4941 = vst [vmem:[%s7835_s20 + $0x50] sm:$0xff] %v4878_v36   ;;  %v3836_v57 = vpop.f32.mrb[161].mxu1  ;;  %v3996_v55 = vadd.f32 %v3995_v59, %v7908_v13  ;;  %v5174_v58 = vpop.f32.mrb[138].mxu0  ;;  %v4178_v26 = vmul.f32 %v4101_v56, %v4101_v56  ;;  %vm8367_vm15 = vcmp.lt.f32.partialorder %v8366_v23, 16.0  ;;  %vm8371_vm1 = vcmp.lt.f32.partialorder %v8370_v40, 16.0 }
 0x2a0   : > { %v4135_v21 = vadd.f32 %v4134_v30, %v4100_v11  ;;  %v4211_v20 = vadd.f32 %v4210_v25, %v4176_v42  ;;  %v3837_v16 = vpop.f32.mrb[162].mxu1  ;;  %v4068_v14 = vadd.f32 %v4004_v62, %v7772_v7  ;;  %v4007_v33 = vadd.f32 %v5174_v58, %v3829_v61  ;;  %v3998_v24 = vpop.f32.mrb[139].mxu0  ;;  %v8372_v42 = vld [vmem:[#allocation37_spill] sm:$0xff] }
 0x2a1   : > { %v3839_v28 = vpop.f32.mrb[163].mxu1  ;;  %v4066_v53 = vadd.f32 %v3996_v55, %v7775_v49  ;;  %v3999_v46 = vadd.f32 %v3998_v24, %v7916_v52  ;;  %v8368_v52 = vld [vmem:[#allocation33_spill] sm:$0xff]  ;;  %vm8373_vm2 = vcmp.lt.f32.partialorder %v8372_v42, 16.0  ;;  %v8376_v55 = vld [vmem:[#allocation38_spill] sm:$0xff] }
 0x2a2   : > { %v4212_v31 = vadd.f32 %v4211_v20, %v4177_v22  ;;  %v4136_v9 = vadd.f32 %v4135_v21, %v4101_v56  ;;  %v4069_v38 = vadd.f32 %v4007_v33, %v7780_v51  ;;  %v4104_v49 = vsel %vm8367_vm15, %v4068_v14, 0.0  ;;  %v8374_v56 = vld [vmem:[#allocation41_spill] sm:$0xff]  ;;  %v8378_v28 = vld [vmem:[#allocation42_spill] sm:$0xff] }
 0x2a3   : > { %v4102_v13 = vsel %vm8365_vm14, %v4066_v53, 0.0  ;;  %v4067_v6 = vadd.f32 %v3999_v46, %v7783_v15  ;;  %vm8369_vm0 = vcmp.lt.f32.partialorder %v8368_v52, 16.0  ;;  %v4181_v34 = vmul.f32 %v4104_v49, %v4104_v49  ;;  %v8381_v52 = vld [vmem:[#allocation43_spill] sm:$0xff]  ;;  %v8389_v42 = vld [vmem:[#allocation49_spill] sm:$0xff] }
 0x2a4   : > { %v4137_v7 = vadd.f32 %v4136_v9, %v4102_v13  ;;  %v4179_v43 = vmul.f32 %v4102_v13, %v4102_v13  ;;  %v4213_v29 = vadd.f32 %v4212_v31, %v4178_v26  ;;  %v4893_v61 = vpack.c.bf16 %v4069_v38, %v4068_v14 }
 0x2a5   : > { %v4103_v32 = vsel %vm8369_vm0, %v4067_v6, 0.0  ;;  %v4888_v8 = vpack.c.bf16 %v4067_v6, %v4066_v53  ;;  %v5177_v12 = vpop.f32.mrb[140].mxu0  ;;  %v4105_v15 = vsel %vm8371_vm1, %v4069_v38, 0.0  ;;  %vm8375_vm3 = vcmp.lt.f32.partialorder %v8374_v56, 16.0 }
 0x2a6   : > { %v4214_v51 = vadd.f32 %v4213_v29, %v4179_v43  ;;  %v4138_v63 = vadd.f32 %v4137_v7, %v4103_v32  ;;  %v4180_v4 = vmul.f32 %v4103_v32, %v4103_v32  ;;  %v3842_v41 = vpop.f32.mrb[164].mxu1  ;;  %v4011_v18 = vpop.f32.mrb[141].mxu0  ;;  %4944 = vst [vmem:[%s7835_s20 + $0x68] sm:$0xff] %v4893_v61   ;;  %v4182_v27 = vmul.f32 %v4105_v15, %v4105_v15  ;;  %v8380_v7 = vld [vmem:[#allocation20_spill] sm:$0xff] }
 0x2a7   : > { %4943 = vst [vmem:[%s7835_s20 + $0x60] sm:$0xff] %v4888_v8   ;;  %v3844_v17 = vpop.f32.mrb[165].mxu1  ;;  %v4020_v19 = vadd.f32 %v5177_v12, %v3842_v41  ;;  %v4012_v45 = vadd.f32 %v4011_v18, %v3834_v50  ;;  %v5178_v2 = vpop.f32.mrb[142].mxu0  ;;  %vm8377_vm4 = vcmp.lt.f32.partialorder %v8376_v55, 16.0  ;;  %vm8379_vm5 = vcmp.lt.f32.partialorder %v8378_v28, 16.0  ;;  %v8383_v8 = vld [vmem:[#allocation28_spill] sm:$0xff] }
 0x2a8   : > { %v4139_v0 = vadd.f32 %v4138_v63, %v4104_v49  ;;  %v4215_v11 = vadd.f32 %v4214_v51, %v4180_v4  ;;  %v3845_v47 = vpop.f32.mrb[166].mxu1  ;;  %v4014_v48 = vpop.f32.mrb[143].mxu0  ;;  %vm8382_vm6 = vcmp.lt.f32.partialorder %v8381_v52, 16.0  ;;  %v8384_v41 = vld [vmem:[#allocation44_spill] sm:$0xff]  ;;  %vm8390_vm8 = vcmp.lt.f32.partialorder %v8389_v42, 16.0 }
 0x2a9   : > { %v4072_v54 = vadd.f32 %v4020_v19, %v7788_v44  ;;  %v3847_v39 = vpop.f32.mrb[167].mxu1  ;;  %v4070_v35 = vadd.f32 %v4012_v45, %v7791_v3  ;;  %v4023_v10 = vadd.f32 %v5178_v2, %v3845_v47  ;;  %v4015_v36 = vadd.f32 %v4014_v48, %v3837_v16  ;;  %v8386_v47 = vld [vmem:[#allocation19_spill] sm:$0xff] }
 0x2aa   : > { %v4216_v25 = vadd.f32 %v4215_v11, %v4181_v34  ;;  %v4140_v30 = vadd.f32 %v4139_v0, %v4105_v15  ;;  %vm8385_vm7 = vcmp.lt.f32.partialorder %v8384_v41, 16.0 }
 0x2ab   : > { %v4106_v62 = vsel %vm8373_vm2, %v4070_v35, 0.0  ;;  %v4073_v50 = vadd.f32 %v4023_v10, %v7796_v5  ;;  %v4071_v59 = vadd.f32 %v4015_v36, %v7799_v60  ;;  %v4108_v3 = vsel %vm8375_vm3, %v4072_v54, 0.0  ;;  %v8388_v36 = vld [vmem:[#allocation25_spill] sm:$0xff] }
 0x2ac   : > { %v4141_v22 = vadd.f32 %v4140_v30, %v4106_v62  ;;  %v4183_v1 = vmul.f32 %v4106_v62, %v4106_v62  ;;  %v4217_v44 = vadd.f32 %v4216_v25, %v4182_v27  ;;  %v4185_v31 = vmul.f32 %v4108_v3, %v4108_v3 }
 0x2ad   : > { %v4903_v57 = vpack.c.bf16 %v4073_v50, %v4072_v54  ;;  %v4107_v58 = vsel %vm8377_vm4, %v4071_v59, 0.0  ;;  %v4898_v21 = vpack.c.bf16 %v4071_v59, %v4070_v35  ;;  %v5181_v20 = vpop.f32.mrb[144].mxu0  ;;  %v4109_v60 = vsel %vm8379_vm5, %v4073_v50, 0.0 }
 0x2ae   : > { %v4218_v16 = vadd.f32 %v4217_v44, %v4183_v1  ;;  %v4142_v14 = vadd.f32 %v4141_v22, %v4107_v58  ;;  %v4184_v33 = vmul.f32 %v4107_v58, %v4107_v58  ;;  %v3850_v5 = vpop.f32.mrb[168].mxu1  ;;  %v4027_v24 = vpop.f32.mrb[145].mxu0  ;;  %v4186_v23 = vmul.f32 %v4109_v60, %v4109_v60 }
 0x2af   : > { %4946 = vst [vmem:[%s7835_s20 + $0x78] sm:$0xff] %v4903_v57   ;;  %4945 = vst [vmem:[%s7835_s20 + $0x70] sm:$0xff] %v4898_v21   ;;  %v3852_v53 = vpop.f32.mrb[169].mxu1  ;;  %v4028_v46 = vadd.f32 %v4027_v24, %v3850_v5  ;;  %v5182_v26 = vpop.f32.mrb[146].mxu0 }
 0x2b0   : > { %v4143_v9 = vadd.f32 %v4142_v14, %v4108_v3  ;;  %v4219_v38 = vadd.f32 %v4218_v16, %v4184_v33  ;;  %v3853_v37 = vpop.f32.mrb[170].mxu1  ;;  %v4030_v13 = vpop.f32.mrb[147].mxu0 }
 0x2b1   : > { %v3855_v6 = vpop.f32.mrb[171].mxu1  ;;  %v4074_v43 = vadd.f32 %v4028_v46, %v8380_v7  ;;  %v4031_v29 = vadd.f32 %v4030_v13, %v3853_v37 }
 0x2b2   : > { %v4220_v49 = vadd.f32 %v4219_v38, %v4185_v31  ;;  %v4144_v61 = vadd.f32 %v4143_v9, %v4109_v60 }
 0x2b3   : > { %v4110_v32 = vsel %vm8382_vm6, %v4074_v43, 0.0  ;;  %v4075_v12 = vadd.f32 %v4031_v29, %v8383_v8 }
 0x2b4   : > { %v4145_v51 = vadd.f32 %v4144_v61, %v4110_v32  ;;  %v4187_v63 = vmul.f32 %v4110_v32, %v4110_v32  ;;  %v4221_v4 = vadd.f32 %v4220_v49, %v4186_v23 }
 0x2b5   : > { %v4111_v18 = vsel %vm8385_vm7, %v4075_v12, 0.0  ;;  %v4908_v40 = vpack.c.bf16 %v4075_v12, %v4074_v43 }
 0x2b6   : > { %v4222_v15 = vadd.f32 %v4221_v4, %v4187_v63  ;;  %v4146_v17 = vadd.f32 %v4145_v51, %v4111_v18  ;;  %v4188_v19 = vmul.f32 %v4111_v18, %v4111_v18  ;;  %v3858_v45 = vpop.f32.mrb[172].mxu1 }
 0x2b7   : > { %4947 = vst [vmem:[%s7835_s20 + $0x80] sm:$0xff] %v4908_v40   ;;  %v4036_v2 = vadd.f32 %v5181_v20, %v3858_v45  ;;  %v3860_v34 = vpop.f32.mrb[173].mxu1 }
 0x2b8   : > { %v4223_v0 = vadd.f32 %v4222_v15, %v4188_v19  ;;  %v3861_v11 = vpop.f32.mrb[174].mxu1 }
 0x2b9   : > { %v4076_v48 = vadd.f32 %v4036_v2, %v8386_v47  ;;  %v4039_v54 = vadd.f32 %v5182_v26, %v3861_v11  ;;  %v3863_v39 = vpop.f32.mrb[175].mxu1 }
 0x2bb   : > { %v4112_v10 = vsel %vm687_vm12, %v4076_v48, 0.0  ;;  %v4077_v27 = vadd.f32 %v4039_v54, %v8388_v36  ;;  %vm4232_vm12 = vcmask 1040384  }
 0x2bc   : > { %v4147_v25 = vadd.f32 %v4146_v17, %v4112_v10  ;;  %v4189_v30 = vmul.f32 %v4112_v10, %v4112_v10 }
 0x2bd   : > { %v4113_v62 = vsel %vm8390_vm8, %v4077_v27, 0.0  ;;  %v4913_v50 = vpack.c.bf16 %v4077_v27, %v4076_v48 }
 0x2be   : > { %v4224_v59 = vadd.f32 %v4223_v0, %v4189_v30  ;;  %v4148_v22 = vadd.f32 %v4147_v25, %v4113_v62  ;;  %v4190_v1 = vmul.f32 %v4113_v62, %v4113_v62 }
 0x2bf   : > { %4948 = vst [vmem:[%s7835_s20 + $0x88] sm:$0xff] %v4913_v50  }
 0x2c0   : > { %v4149_v44 = vrot.slane %v4148_v22, 4  ;;  %v4225_v56 = vadd.f32 %v4224_v59, %v4190_v1 }
 0x2c2   : > { %v4150_v3 = vadd.f32 %v4149_v44, %v4148_v22  ;;  %v4226_v57 = vrot.slane %v4225_v56, 4 }
 0x2c4   : > { %v4151_v55 = vrot.slane %v4150_v3, 2  ;;  %v4227_v58 = vadd.f32 %v4226_v57, %v4225_v56 }
 0x2c6   : > { %v4152_v21 = vadd.f32 %v4151_v55, %v4150_v3  ;;  %v4228_v20 = vrot.slane %v4227_v58, 2 }
 0x2c8   : > { %v4153_v16 = vrot.slane %v4152_v21, 1  ;;  %v4229_v14 = vadd.f32 %v4228_v20, %v4227_v58 }
 0x2ca   : > { %v4230_v33 = vrot.slane %v4229_v14, 1  ;;  %v4154_v5 = vadd.f32 %v4153_v16, %v4152_v21 }
 0x2cc   : > { %v4231_v24 = vadd.f32 %v4230_v33, %v4229_v14 }
 0x2ce   : > { %v4233_v28 = vsel %vm4232_vm12, %v4154_v5, %v4231_v24 }
 0x2cf   : > { %4234 = vst [vmem:[%s235_s23] sm:$0x3] %v4233_v28 }
 0x2d0 PF: > { %s16_s18 = sadd.s32 1, %s5308_s18  }
 0x2d1   : > { %p13_p4 = scmp.ge.s32.totalorder %s16_s18, 4  }
 0x2d3   :  { %15 = sbr.rel (!%p13_p4) target bundleno = 1 (0x1), region = 80 }

// kernel: basic_block_forward.3
= control target key start
LH: loop header
LB: loop body
LE: loop exit
PB: predicated region body
PF: predicated region fallthrough
CT: control target
= control target key end

     0   :  { %s7078_s21 = smov 0   ;;  %s8770_s0 = inlined_call_operand.vmem [shape: bf16[2,1,342,4], index: 0, kind: input, shape index: {}]   ;;  %s8771_s1 = inlined_call_operand.vmem [shape: bf16[9,4,128], index: 1, kind: input, shape index: {}]   ;;  %s8772_s2 = inlined_call_operand.vmem [shape: bf16[4,128], index: 2, kind: input, shape index: {}]   ;;  %s8773_s3 = inlined_call_operand.vmem [shape: bf16[2,288,128], index: 3, kind: output, shape index: {0}]   ;;  %s8774_s4 = inlined_call_operand.vmem [shape: f32[2,2,128], index: 4, kind: output, shape index: {1}]   ;;  %s8775_s5 = inlined_call_operand.vmem [shape: bf16[2,288,128], index: 5, kind: output, shape index: {2}]   ;;  %s8776_s6 = inlined_call_operand.vmem [shape: f32[2,2,128], index: 6, kind: output, shape index: {3}]  }
   0x1 LB: > { %s5418_s22 = sadd.s32 4294967295, %s7041_s21   ;;  %p5422_p0 = scmp.ge.s32.totalorder %s7041_s21, 1  ;;  %s7041_s21 = sphi %s7078_s21, %s17_s21  }
   0x2   : > { %p219_p1 = scmp.lt.s32.totalorder %s7041_s21, 3 }
   0x4   : > { %p220_p2 = pnand %p5422_p0, %p219_p1 }
   0x6   : > { %223 = sbr.rel (%p220_p2) target bundleno = 649 (0x289), region = 32 }
   0xd   : > { %vm623_vm0 = vcmask 1041408   ;;  %v5542_v0 = vld [vmem:[%s8771_s1 + $0x8] sm:$0x3]  ;;  %v5428_v1 = vld [vmem:[%s8771_s1 + $0x2] sm:$0x3]  ;;  %p262_p3 = scmp.lt.s32.totalorder %s5418_s22, 1 }
   0xe   : > { %6919 = vmatprep.subr.msk.bf16.mxu0 %vm623_vm0, %v5542_v0  ;;  %6915 = vmatprep.subr.msk.bf16.mxu1 %vm623_vm0, %v5428_v1  ;;  %v2005_v2 = vsel %vm623_vm0, %v5542_v0, 0  ;;  %v625_v3 = vsel %vm623_vm0, %v5428_v1, 0  ;;  %v5562_v4 = vld [vmem:[%s8771_s1 + $0xa] sm:$0x3]  ;;  %v322_v5 = vld [vmem:[%s8771_s1] sm:$0x3] }
   0xf   : > { %6400 = vmatpush3.bf16.msra.mxu0 %v2005_v2  ;;  %6248 = vmatpush3.bf16.msra.mxu1 %v625_v3  ;;  %s8929_s22 = smov (!%p262_p3, %s5418_s22), 1  ;;  %vm419_vm1 = vsmask.f32 7424  ;;  %vm568_vm2 = vcmask 31744   ;;  %v7113_v6 = vsel %vm623_vm0, %v5562_v4, 0  ;;  %v841_v12 = vsel %vm623_vm0, %v322_v5, 0 }
  0x10   : > { %6920 = vmatprep.subr.msk.bf16.mxu0 %vm623_vm0, %v5562_v4  ;;  %s6925_s7 = smul.u32 172, %s8929_s22  ;;  %6916 = vmatprep.subr.msk.bf16.mxu1 %vm623_vm0, %v322_v5  ;;  %vm1779_vm3 = vsmask.f32 6400  ;;  %v7161_v39 = vld [vmem:[%s8771_s1 + $0x4] sm:$0x3]  ;;  %vm2226_vm4 = vcmask 1045504  }
  0x11   : > { %v7195_v1 = vld [vmem:[%s8771_s1 + $0xc] sm:$0x3]  ;;  %vm1026_vm5 = vcmask 1046528   ;;  %vm2979_vm6 = vsmask.f32 5376  ;;  %vm3426_vm7 = vcmask 1044480  }
  0x12   : > { %s7110_s10 = scalar_lea.vmem %s8770_s0, %s6925_s7  ;;  %s6926_s25 = smul.u32 144, %s8929_s22 }
  0x13   : > { %v286_v7 = vld [vmem:[%s7110_s10] sm:$0xf]  ;;  %v7117_v8 = vld [vmem:[%s7110_s10 + $0x4] sm:$0xf]  ;;  %v7123_v10 = vld [vmem:[%s7110_s10 + $0x8] sm:$0xff]   ;;  %s5425_s8 = sshll.u32 %s8929_s22, 1 }
  0x14   : > { %8802 = vst [vmem:[#allocation2_spill] sm:$0xff] %v7117_v8  ;;  %v7120_v9 = vcombine.low %v286_v7, %v7117_v8  ;;  %v1334_v11 = vld [vmem:[%s7110_s10 + $0x8] sm:$0xe]  ;;  %v7128_v13 = vld [vmem:[%s7110_s10 + $0xc] sm:$0xf]  ;;  %v428_v16 = vshll.u32 %v7123_v10, 16  ;;  %s8338_s28 = scalar_lea.vmem %s8775_s5, %s6926_s25  ;;  %s8388_s7 = scalar_lea.vmem %s8773_s3, %s6926_s25 }
  0x15   : > { %v432_v17 = vshrl.u32 %v7123_v10, 16  ;;  %v7135_v18 = vld [vmem:[%s7110_s10 + $0x10] sm:$0xff]   ;;  %v7141_v20 = vcombine.low %v1334_v11, %v7128_v13  ;;  %v7149_v28 = vld [vmem:[%s7110_s10 + $0x18] sm:$0xff]   ;;  %v7155_v34 = vld [vmem:[%s7110_s10 + $0x20] sm:$0xff]   ;;  %s284_s11 = scalar_lea.vmem %s8776_s6, %s5425_s8  ;;  %s275_s14 = scalar_lea.vmem %s8774_s4, %s5425_s8 }
  0x16   : > { %v421_v14 = vshrl.u32 %v7120_v9, 16  ;;  %v423_v15 = vshll.u32 %v7120_v9, 16  ;;  %v7138_v19 = vld [vmem:[%s7110_s10 + $0x10] sm:$0xff]   ;;  %v430_v22 = vrot.slane %v428_v16, 1  ;;  %v1789_v23 = vshrl.u32 %v7135_v18, 16  ;;  %v7152_v33 = vld [vmem:[%s7110_s10 + $0x18] sm:$0xff]  }
  0x17   : > { %8803 = vst [vmem:[#allocation3_spill] sm:$0xff] %v7141_v20  ;;  %v1792_v24 = vshll.u32 %v7135_v18, 16  ;;  %v1781_v25 = vshrl.u32 %v7141_v20, 16  ;;  %v1784_v26 = vshll.u32 %v7141_v20, 16  ;;  %v436_v27 = vshll.u32 %v7138_v19, 16  ;;  %v7170_v48 = vld [vmem:[%s7110_s10 + $0x20] sm:$0xff]  }
  0x18   : > { %v425_v21 = vrot.slane %v423_v15, 1  ;;  %v434_v30 = vor.u32 %v432_v17, %v430_v22  ;;  %v1791_v31 = vrot.slane %v1789_v23, 1  ;;  %v1798_v38 = vshrl.u32 %v7149_v28, 16  ;;  %v7173_v49 = vld [vmem:[%s7110_s10 + $0x28] sm:$0xff]   ;;  %v7185_v59 = vld [vmem:[%s7110_s10 + $0x30] sm:$0xff]  }
  0x19   : > { %v1794_v32 = vrot.slane %v1792_v24, 2  ;;  %v1783_v35 = vrot.slane %v1781_v25, 1  ;;  %v1786_v36 = vrot.slane %v1784_v26, 2  ;;  %v438_v37 = vrot.slane %v436_v27, 1  ;;  %v7179_v54 = vld [vmem:[%s7110_s10 + $0x28] sm:$0xff]   ;;  %v7190_v0 = vld [vmem:[%s7110_s10 + $0x30] sm:$0xff]  }
  0x1a   : > { %v426_v29 = vor.u32 %v425_v21, %v421_v14  ;;  %v1801_v42 = vshll.u32 %v7149_v28, 16  ;;  %v440_v43 = vshrl.u32 %v7138_v19, 16  ;;  %v1800_v46 = vrot.slane %v1798_v38, 1 }
  0x1b   : > { %v1795_v41 = vor.u32 %v1794_v32, %v1791_v31  ;;  %v1787_v44 = vor.u32 %v1786_v36, %v1783_v35  ;;  %v439_v45 = vsel %vm419_vm1, %v434_v30, %v438_v37  ;;  %v444_v47 = vshll.u32 %v7152_v33, 16  ;;  %v7218_v32 = vld [vmem:[%s7110_s10 + $0x38] sm:$0xff]  }
  0x1c   : > { %v431_v40 = vsel %vm419_vm1, %v426_v29, %v430_v22  ;;  %v1803_v50 = vrot.slane %v1801_v42, 2  ;;  %v442_v51 = vor.u32 %v440_v43, %v438_v37  ;;  %v1807_v52 = vshrl.u32 %v7155_v34, 16  ;;  %v7209_v22 = vld [vmem:[%s7110_s10 + $0x38] sm:$0xff]   ;;  %v7229_v43 = vld [vmem:[%s7110_s10 + $0x40] sm:$0xff]  }
  0x1d   : > { %6249 = vmatprep.mubr.msk.bf16.mxu1 %vm568_vm2, %v431_v40  ;;  %v1810_v53 = vshll.u32 %v7155_v34, 16  ;;  %v1796_v55 = vsel %vm1779_vm3, %v1787_v44, %v1795_v41  ;;  %v446_v56 = vrot.slane %v444_v47, 1  ;;  %v448_v57 = vshrl.u32 %v7152_v33, 16 }
  0x1e   : > { %6250 = vmatmul.mubr.msk.bf16.vlgmr.msra.gmra.mrb[0].mxu1 %vm568_vm2, %v439_v45  ;;  %v452_v58 = vshll.u32 %v7170_v48, 16  ;;  %6401 = vmatprep.mubr.msk.bf16.mxu0 %vm568_vm2, %v1796_v55  ;;  %v1804_v60 = vor.u32 %v1803_v50, %v1800_v46  ;;  %v1809_v61 = vrot.slane %v1807_v52, 1  ;;  %v1816_v63 = vshrl.u32 %v7173_v49, 16  ;;  %v7234_v50 = vld [vmem:[%s7110_s10 + $0x40] sm:$0xff]  }
  0x1f   : > { %6286 = vmatpush3.bf16.msra.mxu1 %v841_v12  ;;  %v1812_v62 = vrot.slane %v1810_v53, 2  ;;  %v447_v2 = vsel %vm419_vm1, %v442_v51, %v446_v56  ;;  %v450_v3 = vor.u32 %v448_v57, %v446_v56  ;;  %v1819_v5 = vshll.u32 %v7173_v49, 16 }
  0x20   : > { %6917 = vmatprep.subr.msk.bf16.mxu1 %vm623_vm0, %v7161_v39  ;;  %v454_v4 = vrot.slane %v452_v58, 1  ;;  %v1805_v7 = vsel %vm1779_vm3, %v1795_v41, %v1804_v60  ;;  %6253 = vmatprep.mubr.msk.bf16.mxu1 %vm568_vm2, %v447_v2  ;;  %v1818_v12 = vrot.slane %v1816_v63, 1  ;;  %v456_v14 = vshrl.u32 %v7170_v48, 16 }
  0x21   : > { %v1813_v11 = vor.u32 %v1812_v62, %v1809_v61  ;;  %6402 = vmatmul.mubr.msk.bf16.vlgmr.msra.gmra.mrb[0].mxu0 %vm568_vm2, %v1805_v7  ;;  %v1821_v16 = vrot.slane %v1819_v5, 2  ;;  %v460_v17 = vshll.u32 %v7179_v54, 16  ;;  %v1825_v21 = vshrl.u32 %v7185_v59, 16  ;;  %v7242_v61 = vld [vmem:[%s7110_s10 + $0x48] sm:$0xff]  }
  0x22   : > { %v455_v15 = vsel %vm419_vm1, %v450_v3, %v454_v4  ;;  %6438 = vmatpush3.bf16.msra.mxu0 %v7113_v6  ;;  %v458_v24 = vor.u32 %v456_v14, %v454_v4  ;;  %v1828_v25 = vshll.u32 %v7185_v59, 16  ;;  %v464_v26 = vshrl.u32 %v7179_v54, 16  ;;  %v7245_v62 = vld [vmem:[%s7110_s10 + $0x48] sm:$0xff]  }
  0x23   : > { %v1814_v23 = vsel %vm1779_vm3, %v1804_v60, %v1813_v11  ;;  %v1822_v27 = vor.u32 %v1821_v16, %v1818_v12  ;;  %v462_v29 = vrot.slane %v460_v17, 1  ;;  %v1827_v30 = vrot.slane %v1825_v21, 1  ;;  %6921 = vmatprep.subr.msk.bf16.mxu0 %vm623_vm0, %v7195_v1 }
  0x24   : > { %6405 = vmatprep.mubr.msk.bf16.mxu0 %vm568_vm2, %v1814_v23  ;;  %v468_v31 = vshll.u32 %v7190_v0, 16  ;;  %v1830_v6 = vrot.slane %v1828_v25, 2  ;;  %v1834_v35 = vshrl.u32 %v7209_v22, 16  ;;  %v1837_v36 = vshll.u32 %v7209_v22, 16  ;;  %v7262_v23 = vld [vmem:[%s7110_s10 + $0x50] sm:$0xff]  }
  0x25   : > { %v472_v37 = vshrl.u32 %v7190_v0, 16  ;;  %v1823_v38 = vsel %vm1779_vm3, %v1813_v11, %v1822_v27  ;;  %v463_v40 = vsel %vm419_vm1, %v458_v24, %v462_v29  ;;  %v466_v41 = vor.u32 %v464_v26, %v462_v29  ;;  %v7254_v11 = vld [vmem:[%s7110_s10 + $0x50] sm:$0xff]   ;;  %v7267_v26 = vld [vmem:[%s7110_s10 + $0x58] sm:$0xff]  }
  0x26   : > { %6254 = vmatmul.mubr.msk.bf16.gmra.mrb[4].mxu1 %vm568_vm2, %v455_v15  ;;  %v470_v42 = vrot.slane %v468_v31, 1  ;;  %v1831_v44 = vor.u32 %v1830_v6, %v1827_v30  ;;  %v1836_v45 = vrot.slane %v1834_v35, 1  ;;  %v1839_v46 = vrot.slane %v1837_v36, 2 }
  0x27   : > { %6257 = vmatprep.mubr.msk.bf16.mxu1 %vm568_vm2, %v463_v40  ;;  %v476_v47 = vshll.u32 %v7218_v32, 16  ;;  %v1843_v53 = vshrl.u32 %v7229_v43, 16  ;;  %v1846_v55 = vshll.u32 %v7229_v43, 16  ;;  %v480_v60 = vshrl.u32 %v7218_v32, 16 }
  0x28   : > { %v471_v51 = vsel %vm419_vm1, %v466_v41, %v470_v42  ;;  %v474_v52 = vor.u32 %v472_v37, %v470_v42  ;;  %v1832_v56 = vsel %vm1779_vm3, %v1822_v27, %v1831_v44  ;;  %v1840_v57 = vor.u32 %v1839_v46, %v1836_v45  ;;  %v7280_v45 = vld [vmem:[%s7110_s10 + $0x60] sm:$0xff]  }
  0x29   : > { %v478_v58 = vrot.slane %v476_v47, 1  ;;  %6406 = vmatmul.mubr.msk.bf16.gmra.mrb[4].mxu0 %vm568_vm2, %v1823_v38  ;;  %v1845_v63 = vrot.slane %v1843_v53, 1  ;;  %v1848_v2 = vrot.slane %v1846_v55, 2  ;;  %v484_v3 = vshll.u32 %v7234_v50, 16  ;;  %v7272_v38 = vld [vmem:[%s7110_s10 + $0x58] sm:$0xff]  }
  0x2a   : > { %v488_v4 = vshrl.u32 %v7234_v50, 16  ;;  %6409 = vmatprep.mubr.msk.bf16.mxu0 %vm568_vm2, %v1832_v56  ;;  %v1852_v7 = vshrl.u32 %v7242_v61, 16  ;;  %v1855_v14 = vshll.u32 %v7242_v61, 16  ;;  %v492_v15 = vshll.u32 %v7245_v62, 16 }
  0x2b   : > { %v479_v5 = vsel %vm419_vm1, %v474_v52, %v478_v58  ;;  %v1849_v12 = vor.u32 %v1848_v2, %v1845_v63  ;;  %v486_v16 = vrot.slane %v484_v3, 1  ;;  %v1861_v17 = vshrl.u32 %v7254_v11, 16 }
  0x2c   : > { %v1864_v21 = vshll.u32 %v7254_v11, 16  ;;  %v1841_v24 = vsel %vm1779_vm3, %v1831_v44, %v1840_v57  ;;  %v482_v25 = vor.u32 %v480_v60, %v478_v58  ;;  %v1854_v27 = vrot.slane %v1852_v7, 1  ;;  %v7290_v58 = vld [vmem:[%s7110_s10 + $0x60] sm:$0xff]   ;;  %v7293_v60 = vld [vmem:[%s7110_s10 + $0x68] sm:$0xff]  }
  0x2d   : > { %v1857_v29 = vrot.slane %v1855_v14, 2  ;;  %v490_v30 = vor.u32 %v488_v4, %v486_v16  ;;  %v494_v31 = vrot.slane %v492_v15, 1  ;;  %v1850_v6 = vsel %vm1779_vm3, %v1840_v57, %v1849_v12  ;;  %v7298_v14 = vld [vmem:[%s7110_s10 + $0x68] sm:$0xff]  }
  0x2e   : > { %6258 = vmatmul.mubr.msk.bf16.gmra.mrb[8].mxu1 %vm568_vm2, %v471_v51  ;;  %v1863_v35 = vrot.slane %v1861_v17, 1  ;;  %v1866_v36 = vrot.slane %v1864_v21, 2  ;;  %v500_v37 = vshll.u32 %v7262_v23, 16  ;;  %v487_v40 = vsel %vm419_vm1, %v482_v25, %v486_v16  ;;  %v7302_v21 = vld [vmem:[%s7110_s10 + $0x70] sm:$0xff]  }
  0x2f   : > { %6261 = vmatprep.mubr.msk.bf16.mxu1 %vm568_vm2, %v479_v5  ;;  %v496_v41 = vshrl.u32 %v7245_v62, 16  ;;  %v1870_v42 = vshrl.u32 %v7267_v26, 16  ;;  %v1873_v44 = vshll.u32 %v7267_v26, 16  ;;  %v1858_v46 = vor.u32 %v1857_v29, %v1854_v27 }
  0x30   : > { %v495_v47 = vsel %vm419_vm1, %v490_v30, %v494_v31  ;;  %v504_v51 = vshrl.u32 %v7262_v23, 16  ;;  %v508_v52 = vshll.u32 %v7272_v38, 16  ;;  %v1867_v53 = vor.u32 %v1866_v36, %v1863_v35 }
  0x31   : > { %6410 = vmatmul.mubr.msk.bf16.gmra.mrb[8].mxu0 %vm568_vm2, %v1841_v24  ;;  %v1879_v55 = vshrl.u32 %v7280_v45, 16  ;;  %v1882_v56 = vshll.u32 %v7280_v45, 16  ;;  %v502_v57 = vrot.slane %v500_v37, 1  ;;  %v498_v63 = vor.u32 %v496_v41, %v494_v31 }
  0x32   : > { %6413 = vmatprep.mubr.msk.bf16.mxu0 %vm568_vm2, %v1850_v6  ;;  %v1872_v2 = vrot.slane %v1870_v42, 1  ;;  %v1875_v3 = vrot.slane %v1873_v44, 2  ;;  %v1859_v4 = vsel %vm1779_vm3, %v1849_v12, %v1858_v46  ;;  %v510_v7 = vrot.slane %v508_v52, 1  ;;  %v7318_v44 = vld [vmem:[%s7110_s10 + $0x70] sm:$0xff]  }
  0x33   : > { %v506_v5 = vor.u32 %v504_v51, %v502_v57  ;;  %v1868_v15 = vsel %vm1779_vm3, %v1858_v46, %v1867_v53  ;;  %v1881_v16 = vrot.slane %v1879_v55, 1  ;;  %v1884_v17 = vrot.slane %v1882_v56, 2  ;;  %v7322_v51 = vld [vmem:[%s7110_s10 + $0x78] sm:$0xff]  }
  0x34   : > { %v516_v24 = vshll.u32 %v7290_v58, 16  ;;  %v1888_v25 = vshrl.u32 %v7293_v60, 16  ;;  %v503_v27 = vsel %vm419_vm1, %v498_v63, %v502_v57  ;;  %v512_v12 = vshrl.u32 %v7272_v38, 16  ;;  %v7326_v57 = vld [vmem:[%s7110_s10 + $0x78] sm:$0xff]  }
  0x35   : > { %v1891_v29 = vshll.u32 %v7293_v60, 16  ;;  %v1876_v30 = vor.u32 %v1875_v3, %v1872_v2  ;;  %v511_v31 = vsel %vm419_vm1, %v506_v5, %v510_v7  ;;  %v520_v6 = vshrl.u32 %v7290_v58, 16  ;;  %8804 = vst [vmem:[#allocation4_spill] sm:$0xff] %v7326_v57 }
  0x36   : > { %6262 = vmatmul.mubr.msk.bf16.gmra.mrb[12].mxu1 %vm568_vm2, %v487_v40  ;;  %v524_v35 = vshll.u32 %v7298_v14, 16  ;;  %v1885_v36 = vor.u32 %v1884_v17, %v1881_v16  ;;  %v1897_v37 = vshrl.u32 %v7302_v21, 16  ;;  %v1900_v40 = vshll.u32 %v7302_v21, 16 }
  0x37   : > { %6265 = vmatprep.mubr.msk.bf16.mxu1 %vm568_vm2, %v495_v47  ;;  %v518_v41 = vrot.slane %v516_v24, 1  ;;  %v1890_v42 = vrot.slane %v1888_v25, 1  ;;  %v514_v46 = vor.u32 %v512_v12, %v510_v7  ;;  %v1893_v47 = vrot.slane %v1891_v29, 2 }
  0x38   : > { %v1877_v52 = vsel %vm1779_vm3, %v1867_v53, %v1876_v30  ;;  %v526_v56 = vrot.slane %v524_v35, 1  ;;  %v1886_v63 = vsel %vm1779_vm3, %v1876_v30, %v1885_v36  ;;  %v1899_v2 = vrot.slane %v1897_v37, 1  ;;  %v7346_v35 = vld [vmem:[%s7110_s10 + $0x80] sm:$0xff]  }
  0x39   : > { %6414 = vmatmul.mubr.msk.bf16.gmra.mrb[12].mxu0 %vm568_vm2, %v1859_v4  ;;  %v522_v55 = vor.u32 %v520_v6, %v518_v41  ;;  %v1902_v3 = vrot.slane %v1900_v40, 2  ;;  %v7330_v4 = vld [vmem:[%s7110_s10 + $0x80] sm:$0xff]   ;;  %v528_v5 = vshrl.u32 %v7298_v14, 16  ;;  %v519_v7 = vsel %vm419_vm1, %v514_v46, %v518_v41  ;;  %8805 = vst [vmem:[#allocation5_spill] sm:$0xff] %v7346_v35  ;;  %v7351_v40 = vld [vmem:[%s7110_s10 + $0x88] sm:$0xff]  }
  0x3a   : > { %6417 = vmatprep.mubr.msk.bf16.mxu0 %vm568_vm2, %v1868_v15  ;;  %v532_v15 = vshll.u32 %v7318_v44, 16  ;;  %v1894_v53 = vor.u32 %v1893_v47, %v1890_v42  ;;  %v1906_v16 = vshrl.u32 %v7322_v51, 16  ;;  %v1909_v24 = vshll.u32 %v7322_v51, 16 }
  0x3b   : > { %v527_v17 = vsel %vm419_vm1, %v522_v55, %v526_v56  ;;  %v536_v25 = vshrl.u32 %v7318_v44, 16  ;;  %v1903_v12 = vor.u32 %v1902_v3, %v1899_v2  ;;  %v1915_v29 = vshrl.u32 %v7330_v4, 16  ;;  %v7357_v55 = vld [vmem:[%s7110_s10 + $0x90] sm:$0xff]  }
  0x3c   : > { %v1918_v30 = vshll.u32 %v7330_v4, 16  ;;  %v534_v6 = vrot.slane %v532_v15, 1  ;;  %v1895_v37 = vsel %vm1779_vm3, %v1885_v36, %v1894_v53  ;;  %v1908_v41 = vrot.slane %v1906_v16, 1 }
  0x3d   : > { %v1911_v42 = vrot.slane %v1909_v24, 2  ;;  %v548_v3 = vshll.u32 %v7346_v35, 16  ;;  %v1924_v15 = vshrl.u32 %v7351_v40, 16  ;;  %v552_v16 = vshrl.u32 %v7346_v35, 16 }
  0x3e   : > { %6266 = vmatmul.mubr.msk.bf16.gmra.mrb[16].mxu1 %vm568_vm2, %v503_v27  ;;  %v540_v27 = vshll.u32 %v7326_v57, 16  ;;  %v538_v46 = vor.u32 %v536_v25, %v534_v6  ;;  %v1920_v2 = vrot.slane %v1918_v30, 2  ;;  %v1933_v25 = vshrl.u32 %v7357_v55, 16 }
  0x3f   : > { %6269 = vmatprep.mubr.msk.bf16.mxu1 %vm568_vm2, %v511_v31  ;;  %v530_v31 = vor.u32 %v528_v5, %v526_v56  ;;  %v1904_v56 = vsel %vm1779_vm3, %v1894_v53, %v1903_v12  ;;  %v544_v5 = vshrl.u32 %v7326_v57, 16  ;;  %v1912_v53 = vor.u32 %v1911_v42, %v1908_v41 }
  0x40   : > { %v542_v47 = vrot.slane %v540_v27, 1  ;;  %v7372_v27 = vld [vmem:[%s7110_s10 + $0x90] ss:$0 sps:$4 sm:$0x11]   ;;  %v1936_v30 = vshll.u32 %v7357_v55, 16  ;;  %v1935_v57 = vrot.slane %v1933_v25, 1 }
  0x41   : > { %6418 = vmatmul.mubr.msk.bf16.gmra.mrb[16].mxu0 %vm568_vm2, %v1877_v52  ;;  %v7354_v52 = vld [vmem:[%s7110_s10 + $0x88] sm:$0xff]   ;;  %v535_v36 = vsel %vm419_vm1, %v530_v31, %v534_v6  ;;  %v6972_v31 = vld [vmem:[%s7110_s10 + $0x98] ss:$0 sps:$4 sm:$0x33]   ;;  %v550_v6 = vrot.slane %v548_v3, 1  ;;  %v1913_v41 = vsel %vm1779_vm3, %v1903_v12, %v1912_v53  ;;  %v564_v8 = vshll.u32 %v7372_v27, 16 }
  0x42   : > { %6421 = vmatprep.mubr.msk.bf16.mxu0 %vm568_vm2, %v1886_v63  ;;  %v1917_v63 = vrot.slane %v1915_v29, 1  ;;  %v556_v24 = vshll.u32 %v7354_v52, 16  ;;  %v2260_v3 = vrot.slane %v7357_v55, 2  ;;  %v7017_v55 = vld [vmem:[%s7110_s10 + $0x10] sm:$0xff]  }
  0x43   : > { %v566_v25 = vrot.slane %v564_v8, 1 }
  0x44   : > { %v1921_v29 = vor.u32 %v1920_v2, %v1917_v63  ;;  %v558_v20 = vrot.slane %v556_v24, 1  ;;  %v1938_v63 = vrot.slane %v1936_v30, 2  ;;  %v560_v2 = vshrl.u32 %v7354_v52, 16 }
  0x46   : > { %6270 = vmatmul.mubr.msk.bf16.gmra.mrb[20].mxu1 %vm568_vm2, %v519_v7  ;;  %v1927_v7 = vshll.u32 %v7351_v40, 16  ;;  %v1922_v35 = vsel %vm1779_vm3, %v1912_v53, %v1921_v29  ;;  %v2220_v53 = vld [vmem:[%s7110_s10 + $0x8] sm:$0xc]  ;;  %v562_v24 = vor.u32 %v560_v2, %v558_v20 }
  0x47   : > { %6273 = vmatprep.mubr.msk.bf16.mxu1 %vm568_vm2, %v527_v17  ;;  %v543_v17 = vsel %vm419_vm1, %v538_v46, %v542_v47  ;;  %v554_v46 = vor.u32 %v552_v16, %v550_v6  ;;  %v1939_v16 = vor.u32 %v1938_v63, %v1935_v57  ;;  %v5563_v57 = vcombine.low %v2220_v53, %v7128_v13 }
  0x48   : > { %v1929_v42 = vrot.slane %v1927_v7, 2  ;;  %v2262_v7 = vrot.slane %v6972_v31, 2  ;;  %v1119_v13 = vsel %vm623_vm0, %v7161_v39, 0 }
  0x49   : > { %6422 = vmatmul.mubr.msk.bf16.gmra.mrb[20].mxu0 %vm568_vm2, %v1895_v37  ;;  %v546_v37 = vor.u32 %v544_v5, %v542_v47  ;;  %v1942_v47 = vshrl.u32 %v6972_v31, 16  ;;  %v559_v5 = vsel %vm419_vm1, %v554_v46, %v558_v20  ;;  %v7416_v46 = vld [vmem:[%s8771_s1 + $0x6] sm:$0x3] }
  0x4a   : > { %6425 = vmatprep.mubr.msk.bf16.mxu0 %vm568_vm2, %v1904_v56  ;;  %v1926_v56 = vrot.slane %v1924_v15, 1  ;;  %v1945_v15 = vshll.u32 %v6972_v31, 16 }
  0x4b   : > { %v1944_v30 = vrot.slane %v1942_v47, 1  ;;  %v2242_v47 = vrot.slane %v7242_v61, 2  ;;  %v2248_v61 = vrot.slane %v7280_v45, 2 }
  0x4c   : > { %v1930_v12 = vor.u32 %v1929_v42, %v1926_v56  ;;  %v2228_v42 = vrot.slane %v7135_v18, 2  ;;  %v2232_v18 = vrot.slane %v7155_v34, 2 }
  0x4e   : > { %6274 = vmatmul.mubr.msk.bf16.gmra.mrb[24].mxu1 %vm568_vm2, %v535_v36  ;;  %v551_v36 = vsel %vm419_vm1, %v546_v37, %v550_v6  ;;  %v1947_v6 = vrot.slane %v1945_v15, 2  ;;  %v1940_v31 = vsel %vm1779_vm3, %v1930_v12, %v1939_v16  ;;  %v567_v37 = vsel %vm419_vm1, %v562_v24, %v566_v25  ;;  %v1020_v25 = vld [vmem:[%s7110_s10] sm:$0xe] }
  0x4f   : > { %6277 = vmatprep.mubr.msk.bf16.mxu1 %vm568_vm2, %v543_v17  ;;  %v7392_v17 = vsel %vm2226_vm4, %v2260_v3, %v2262_v7  ;;  %v2250_v7 = vrot.slane %v7293_v60, 2  ;;  %v2254_v60 = vrot.slane %v7322_v51, 2  ;;  %v2258_v51 = vrot.slane %v7351_v40, 2 }
  0x50   : > { %v1948_v56 = vor.u32 %v1947_v6, %v1944_v30  ;;  %v8807_v30 = vld [vmem:[#allocation4_spill] sm:$0xff] }
  0x51   : > { %6426 = vmatmul.mubr.msk.bf16.gmra.mrb[24].mxu0 %vm568_vm2, %v1913_v41  ;;  %v2227_v41 = vrot.slane %v5563_v57, 2  ;;  %v2251_v45 = vsel %vm2226_vm4, %v2248_v61, %v2250_v7  ;;  %v2534_v6 = vld [vmem:[%s7110_s10 + $0x10] sm:$0xc]  ;;  %v8808_v57 = vld [vmem:[#allocation5_spill] sm:$0xff]  ;;  %v2261_v40 = vsel %vm2226_vm4, %v2258_v51, %v2260_v3  ;;  %v1030_v3 = vrot.slane %v7017_v55, 1 }
  0x52   : > { %6429 = vmatprep.mubr.msk.bf16.mxu0 %vm568_vm2, %v1922_v35  ;;  %v1931_v35 = vsel %vm1779_vm3, %v1921_v29, %v1930_v12  ;;  %v1949_v8 = vsel %vm1779_vm3, %v1939_v16, %v1948_v56  ;;  %v2230_v29 = vrot.slane %v7149_v28, 2  ;;  %v7428_v28 = vld [vmem:[%s8771_s1 + $0xe] sm:$0x3] }
  0x53   : > { %v2229_v20 = vsel %vm2226_vm4, %v2227_v41, %v2228_v42  ;;  %v7016_v41 = vld [vmem:[%s7110_s10 + $0x8] sm:$0xff]  }
  0x54   : > { %v2231_v39 = vsel %vm2226_vm4, %v2228_v42, %v2230_v29  ;;  %v2233_v34 = vsel %vm2226_vm4, %v2230_v29, %v2232_v18  ;;  %v1028_v42 = vrot.slane %v7016_v41, 1  ;;  %v7620_v41 = vld [vmem:[%s7110_s10 + $0x60] sm:$0xff]  }
  0x56   : > { %6278 = vmatmul.mubr.msk.bf16.gmra.mrb[28].mxu1 %vm568_vm2, %v551_v36 }
  0x57   : > { %6281 = vmatprep.mubr.msk.bf16.mxu1 %vm568_vm2, %v559_v5  ;;  %v2246_v5 = vrot.slane %v7267_v26, 2  ;;  %v2252_v26 = vrot.slane %v7302_v21, 2  ;;  %v2256_v21 = vrot.slane %v7330_v4, 2  ;;  %v8806_v4 = vld [vmem:[#allocation2_spill] sm:$0xff] }
  0x59   : > { %6430 = vmatmul.mubr.msk.bf16.gmra.mrb[28].mxu0 %vm568_vm2, %v1931_v35  ;;  %v2249_v15 = vsel %vm2226_vm4, %v2246_v5, %v2248_v61  ;;  %v2253_v16 = vsel %vm2226_vm4, %v2250_v7, %v2252_v26  ;;  %v2255_v53 = vsel %vm2226_vm4, %v2252_v26, %v2254_v60  ;;  %v2257_v24 = vsel %vm2226_vm4, %v2254_v60, %v2256_v21 }
  0x5a   : > { %6433 = vmatprep.mubr.msk.bf16.mxu0 %vm568_vm2, %v1940_v31  ;;  %v5485_v35 = vcombine.low %v1020_v25, %v8806_v4  ;;  %v7504_v31 = vld [vmem:[%s7110_s10 + $0x14] sm:$0xf]  ;;  %v1038_v61 = vrot.slane %v7190_v0, 1  ;;  %v1040_v7 = vrot.slane %v7218_v32, 1  ;;  %v1044_v25 = vrot.slane %v7245_v62, 1  ;;  %v7607_v4 = vld [vmem:[%s7110_s10 + $0x58] sm:$0xff]  }
  0x5c   : > { %v1027_v56 = vrot.slane %v5485_v35, 1  ;;  %v1041_v60 = vsel %vm1026_vm5, %v1038_v61, %v1040_v7 }
  0x5e   : > { %6282 = vmatmul.mubr.msk.bf16.gmra.mrb[32].mxu1 %vm568_vm2, %v567_v37  ;;  %v2259_v37 = vsel %vm2226_vm4, %v2256_v21, %v2258_v51 }
  0x5f   : > { %6287 = vmatprep.mubr.msk.bf16.mxu1 %vm568_vm2, %v7120_v9  ;;  %v2758_v9 = vsel %vm623_vm0, %v7195_v1, 0 }
  0x61   : > { %6434 = vmatmul.mubr.msk.bf16.gmra.mrb[32].mxu0 %vm568_vm2, %v1949_v8  ;;  %v7514_v8 = vcombine.low %v2534_v6, %v7504_v31 }
  0x62   : > { %6439 = vmatprep.mubr.msk.bf16.mxu0 %vm568_vm2, %v2229_v20  ;;  %v7517_v20 = vld [vmem:[%s7110_s10 + $0x18] sm:$0xff]  }
  0x63   : > { %v2666_v29 = vrot.slane %v7514_v8, 2 }
  0x66   : > { %6288 = vmatmul.mubr.msk.bf16.vlgmr.msra.gmra.mrb[0].mxu1 %vm568_vm2, %v7123_v10  ;;  %v2234_v10 = vrot.slane %v7173_v49, 2  ;;  %v2238_v49 = vrot.slane %v7209_v22, 2  ;;  %v2244_v22 = vrot.slane %v7254_v11, 2 }
  0x67   : > { %6324 = vmatpush3.bf16.msra.mxu1 %v1119_v13  ;;  %6291 = vmatprep.mubr.msk.bf16.mxu1 %vm568_vm2, %v7138_v19  ;;  %v2236_v19 = vrot.slane %v7185_v59, 2  ;;  %v2240_v59 = vrot.slane %v7229_v43, 2  ;;  %v1029_v13 = vsel %vm1026_vm5, %v1027_v56, %v1028_v42 }
  0x68   : > { %6918 = vmatprep.subr.msk.bf16.mxu1 %vm623_vm0, %v7416_v46  ;;  %v2235_v1 = vsel %vm2226_vm4, %v2232_v18, %v2234_v10  ;;  %v2245_v12 = vsel %vm2226_vm4, %v2242_v47, %v2244_v22  ;;  %v2247_v11 = vsel %vm2226_vm4, %v2244_v22, %v2246_v5  ;;  %v2667_v18 = vrot.slane %v7517_v20, 2 }
  0x69   : > { %6440 = vmatmul.mubr.msk.bf16.vlgmr.msra.gmra.mrb[0].mxu0 %vm568_vm2, %v2231_v39  ;;  %v2237_v63 = vsel %vm2226_vm4, %v2234_v10, %v2236_v19  ;;  %v2239_v2 = vsel %vm2226_vm4, %v2236_v19, %v2238_v49  ;;  %v2241_v36 = vsel %vm2226_vm4, %v2238_v49, %v2240_v59  ;;  %v2243_v43 = vsel %vm2226_vm4, %v2240_v59, %v2242_v47  ;;  %v7534_v10 = vld [vmem:[%s7110_s10 + $0x28] sm:$0xff]   ;;  %v7548_v59 = vld [vmem:[%s8772_s2] sm:$0x3] }
  0x6a   : > { %6476 = vmatpush3.bf16.msra.mxu0 %v2758_v9  ;;  %6443 = vmatprep.mubr.msk.bf16.mxu0 %vm568_vm2, %v2233_v34  ;;  %v7529_v9 = vld [vmem:[%s7110_s10 + $0x20] sm:$0xff]   ;;  %v1032_v39 = vrot.slane %v7152_v33, 1  ;;  %v2668_v34 = vsel %vm2226_vm4, %v2666_v29, %v2667_v18  ;;  %v1031_v19 = vsel %vm1026_vm5, %v1028_v42, %v1030_v3  ;;  %v2671_v49 = vrot.slane %v7534_v10, 2 }
  0x6b   : > { %6922 = vmatprep.subr.msk.bf16.mxu0 %vm623_vm0, %v7428_v28  ;;  %v3205_v47 = vsel %vm623_vm0, %v7428_v28, 0  ;;  %v1048_v42 = vrot.slane %v7272_v38, 1 }
  0x6e   : > { %6292 = vmatmul.mubr.msk.bf16.gmra.mrb[4].mxu1 %vm568_vm2, %v7152_v33  ;;  %v1033_v33 = vsel %vm1026_vm5, %v1030_v3, %v1032_v39 }
  0x6f   : > { %6295 = vmatprep.mubr.msk.bf16.mxu1 %vm568_vm2, %v7170_v48 }
  0x71   : > { %6444 = vmatmul.mubr.msk.bf16.gmra.mrb[4].mxu0 %vm568_vm2, %v2235_v1  ;;  %v2669_v1 = vrot.slane %v7529_v9, 2 }
  0x72   : > { %6447 = vmatprep.mubr.msk.bf16.mxu0 %vm568_vm2, %v2237_v63  ;;  %v1558_v63 = vsel %vm623_vm0, %v7416_v46, 0  ;;  %v1036_v46 = vrot.slane %v7179_v54, 1 }
  0x73   : > { %v2672_v22 = vsel %vm2226_vm4, %v2669_v1, %v2671_v49 }
  0x76   : > { %6296 = vmatmul.mubr.msk.bf16.gmra.mrb[8].mxu1 %vm568_vm2, %v7179_v54 }
  0x77   : > { %6299 = vmatprep.mubr.msk.bf16.mxu1 %vm568_vm2, %v7190_v0 }
  0x79   : > { %6448 = vmatmul.mubr.msk.bf16.gmra.mrb[8].mxu0 %vm568_vm2, %v2239_v2  ;;  %v2670_v2 = vsel %vm2226_vm4, %v2667_v18, %v2669_v1  ;;  %v7643_v1 = vld [vmem:[%s7110_s10 + $0x78] sm:$0xff]  }
  0x7a   : > { %6451 = vmatprep.mubr.msk.bf16.mxu0 %vm568_vm2, %v2241_v36  ;;  %v7555_v36 = vld [vmem:[%s7110_s10 + $0x30] sm:$0xff]  }
  0x7b   : > { %v2673_v28 = vrot.slane %v7555_v36, 2 }
  0x7e   : > { %6300 = vmatmul.mubr.msk.bf16.gmra.mrb[12].mxu1 %vm568_vm2, %v7218_v32  ;;  %v1042_v32 = vrot.slane %v7234_v50, 1 }
  0x7f   : > { %6303 = vmatprep.mubr.msk.bf16.mxu1 %vm568_vm2, %v7234_v50 }
  0x80   : > { %v1043_v35 = vsel %vm1026_vm5, %v1040_v7, %v1042_v32  ;;  %v1045_v6 = vsel %vm1026_vm5, %v1042_v32, %v1044_v25  ;;  %v7678_v7 = vld [vmem:[%s7110_s10 + $0x98] sm:$0xff]   ;;  %v2989_v32 = vshrl.u32 %v7517_v20, 16 }
  0x81   : > { %6452 = vmatmul.mubr.msk.bf16.gmra.mrb[12].mxu0 %vm568_vm2, %v2243_v43  ;;  %v7564_v43 = vld [vmem:[%s7110_s10 + $0x38] sm:$0xff]  }
  0x82   : > { %6455 = vmatprep.mubr.msk.bf16.mxu0 %vm568_vm2, %v2245_v12  ;;  %v2675_v5 = vrot.slane %v7564_v43, 2 }
  0x84   : > { %v2676_v26 = vsel %vm2226_vm4, %v2673_v28, %v2675_v5 }
  0x86   : > { %6304 = vmatmul.mubr.msk.bf16.gmra.mrb[16].mxu1 %vm568_vm2, %v7245_v62  ;;  %v1046_v62 = vrot.slane %v7262_v23, 1 }
  0x87   : > { %6307 = vmatprep.mubr.msk.bf16.mxu1 %vm568_vm2, %v7262_v23  ;;  %v2685_v23 = vrot.slane %v7620_v41, 2 }
  0x88   : > { %v1047_v29 = vsel %vm1026_vm5, %v1044_v25, %v1046_v62  ;;  %v1049_v18 = vsel %vm1026_vm5, %v1046_v62, %v1048_v42  ;;  %v1062_v25 = vrot.slane %v7372_v27, 1  ;;  %v7018_v62 = vld [vmem:[%s7110_s10 + $0x10] sm:$0xff]   ;;  %v2998_v27 = vshrl.u32 %v7529_v9, 16 }
  0x89   : > { %6456 = vmatmul.mubr.msk.bf16.gmra.mrb[16].mxu0 %vm568_vm2, %v2247_v11  ;;  %v2674_v11 = vsel %vm2226_vm4, %v2671_v49, %v2673_v28  ;;  %v2691_v49 = vrot.slane %v7643_v1, 2 }
  0x8a   : > { %6459 = vmatprep.mubr.msk.bf16.mxu0 %vm568_vm2, %v2249_v15  ;;  %v7584_v15 = vld [vmem:[%s7110_s10 + $0x40] sm:$0xff]  }
  0x8b   : > { %v2677_v0 = vrot.slane %v7584_v15, 2 }
  0x8e   : > { %6308 = vmatmul.mubr.msk.bf16.gmra.mrb[20].mxu1 %vm568_vm2, %v7272_v38  ;;  %v1050_v38 = vrot.slane %v7290_v58, 1 }
  0x8f   : > { %6311 = vmatprep.mubr.msk.bf16.mxu1 %vm568_vm2, %v7290_v58 }
  0x91   : > { %6460 = vmatmul.mubr.msk.bf16.gmra.mrb[20].mxu0 %vm568_vm2, %v2251_v45  ;;  %v7589_v45 = vld [vmem:[%s7110_s10 + $0x48] sm:$0xff]  }
  0x92   : > { %6463 = vmatprep.mubr.msk.bf16.mxu0 %vm568_vm2, %v2253_v16  ;;  %v1039_v16 = vsel %vm1026_vm5, %v1036_v46, %v1038_v61  ;;  %v2679_v21 = vrot.slane %v7589_v45, 2  ;;  %v7674_v61 = vld [vmem:[%s7110_s10 + $0x90] sm:$0xff]  }
  0x94   : > { %v2680_v51 = vsel %vm2226_vm4, %v2677_v0, %v2679_v21 }
  0x96   : > { %6312 = vmatmul.mubr.msk.bf16.gmra.mrb[24].mxu1 %vm568_vm2, %v7298_v14 }
  0x97   : > { %6315 = vmatprep.mubr.msk.bf16.mxu1 %vm568_vm2, %v7318_v44 }
  0x99   : > { %6464 = vmatmul.mubr.msk.bf16.gmra.mrb[24].mxu0 %vm568_vm2, %v2255_v53  ;;  %v2678_v53 = vsel %vm2226_vm4, %v2675_v5, %v2677_v0 }
  0x9a   : > { %6467 = vmatprep.mubr.msk.bf16.mxu0 %vm568_vm2, %v2257_v24  ;;  %v7602_v24 = vld [vmem:[%s7110_s10 + $0x50] sm:$0xff]  }
  0x9b   : > { %v2681_v50 = vrot.slane %v7602_v24, 2 }
  0x9d   : > { %v2682_v56 = vsel %vm2226_vm4, %v2679_v21, %v2681_v50  ;;  %v2984_v21 = vshll.u32 %v7514_v8, 16 }
  0x9e   : > { %6316 = vmatmul.mubr.msk.bf16.gmra.mrb[28].mxu1 %vm568_vm2, %v8807_v30 }
  0x9f   : > { %6319 = vmatprep.mubr.msk.bf16.mxu1 %vm568_vm2, %v8808_v57 }
  0xa1   : > { %6468 = vmatmul.mubr.msk.bf16.gmra.mrb[28].mxu0 %vm568_vm2, %v2259_v37  ;;  %v2683_v37 = vrot.slane %v7607_v4, 2 }
  0xa2   : > { %6471 = vmatprep.mubr.msk.bf16.mxu0 %vm568_vm2, %v2261_v40 }
  0xa3   : > { %v2684_v40 = vsel %vm2226_vm4, %v2681_v50, %v2683_v37  ;;  %v2686_v3 = vsel %vm2226_vm4, %v2683_v37, %v2685_v23  ;;  %v6993_v50 = vld [vmem:[%s7110_s10 + $0xa0] ss:$0 sps:$4 sm:$0x33]  }
  0xa6   : > { %6320 = vmatmul.mubr.msk.bf16.gmra.mrb[32].mxu1 %vm568_vm2, %v7354_v52 }
  0xa7   : > { %6325 = vmatprep.mubr.msk.bf16.mxu1 %vm568_vm2, %v1029_v13  ;;  %v7625_v13 = vld [vmem:[%s7110_s10 + $0x68] sm:$0xff]  }
  0xa8   : > { %v2687_v55 = vrot.slane %v7625_v13, 2 }
  0xa9   : > { %6472 = vmatmul.mubr.msk.bf16.gmra.mrb[32].mxu0 %vm568_vm2, %v7392_v17  ;;  %v1034_v17 = vrot.slane %v7170_v48, 1  ;;  %v7569_v48 = vld [vmem:[%s8771_s1 + $0x10] sm:$0x3] }
  0xaa   : > { %6477 = vmatprep.mubr.msk.bf16.mxu0 %vm568_vm2, %v2668_v34  ;;  %v1052_v34 = vrot.slane %v7298_v14, 1  ;;  %v1054_v14 = vrot.slane %v7318_v44, 1 }
  0xab   : > { %v1035_v54 = vsel %vm1026_vm5, %v1032_v39, %v1034_v17  ;;  %v1037_v12 = vsel %vm1026_vm5, %v1034_v17, %v1036_v46  ;;  %v7638_v39 = vld [vmem:[%s7110_s10 + $0x70] sm:$0xff]   ;;  %v1056_v46 = vrot.slane %v8807_v30, 1  ;;  %v1058_v30 = vrot.slane %v8808_v57, 1 }
  0xac   : > { %v2689_v58 = vrot.slane %v7638_v39, 2  ;;  %v2697_v57 = vrot.slane %v7674_v61, 2 }
  0xad   : > { %v1057_v28 = vsel %vm1026_vm5, %v1054_v14, %v1056_v46 }
  0xae   : > { %6326 = vmatmul.mubr.msk.bf16.vlgmr.msra.gmra.mrb[0].mxu1 %vm568_vm2, %v1031_v19  ;;  %v2688_v19 = vsel %vm2226_vm4, %v2685_v23, %v2687_v55  ;;  %v2690_v17 = vsel %vm2226_vm4, %v2687_v55, %v2689_v58  ;;  %v2701_v55 = vrot.slane %v6993_v50, 2 }
  0xaf   : > { %6362 = vmatpush3.bf16.msra.mxu1 %v1558_v63  ;;  %6329 = vmatprep.mubr.msk.bf16.mxu1 %vm568_vm2, %v1033_v33  ;;  %v1051_v63 = vsel %vm1026_vm5, %v1048_v42, %v1050_v38  ;;  %v1053_v33 = vsel %vm1026_vm5, %v1050_v38, %v1052_v34  ;;  %v2986_v42 = vrot.slane %v2984_v21, 3 }
  0xb0   : > { %6924 = vmatprep.subr.msk.bf16.mxu1 %vm623_vm0, %v7548_v59 }
  0xb1   : > { %6478 = vmatmul.mubr.msk.bf16.vlgmr.msra.gmra.mrb[0].mxu0 %vm568_vm2, %v2670_v2  ;;  %v7656_v2 = vld [vmem:[%s7110_s10 + $0x80] sm:$0xff]  }
  0xb2   : > { %6514 = vmatpush3.bf16.msra.mxu0 %v3205_v47  ;;  %6481 = vmatprep.mubr.msk.bf16.mxu0 %vm568_vm2, %v2672_v22  ;;  %v2692_v47 = vsel %vm2226_vm4, %v2689_v58, %v2691_v49  ;;  %v7661_v22 = vld [vmem:[%s7110_s10 + $0x88] sm:$0xff]   ;;  %v2693_v44 = vrot.slane %v7656_v2, 2  ;;  %v7019_v58 = vld [vmem:[%s7110_s10 + $0x18] sm:$0xff]  }
  0xb3   : > { %6923 = vmatprep.subr.msk.bf16.mxu0 %vm623_vm0, %v7569_v48 }
  0xb4   : > { %v2694_v5 = vsel %vm2226_vm4, %v2691_v49, %v2693_v44  ;;  %v3000_v49 = vrot.slane %v2998_v27, 2  ;;  %v7023_v27 = vld [vmem:[%s7110_s10 + $0x38] sm:$0xff]  }
  0xb6   : > { %6330 = vmatmul.mubr.msk.bf16.gmra.mrb[4].mxu1 %vm568_vm2, %v1035_v54  ;;  %v1055_v54 = vsel %vm1026_vm5, %v1052_v34, %v1054_v14 }
  0xb7   : > { %6333 = vmatprep.mubr.msk.bf16.mxu1 %vm568_vm2, %v1037_v12  ;;  %v2695_v12 = vrot.slane %v7661_v22, 2 }
  0xb9   : > { %6482 = vmatmul.mubr.msk.bf16.gmra.mrb[4].mxu0 %vm568_vm2, %v2674_v11  ;;  %v1060_v11 = vrot.slane %v7354_v52, 1  ;;  %v2981_v52 = vshrl.u32 %v7514_v8, 16 }
  0xba   : > { %6485 = vmatprep.mubr.msk.bf16.mxu0 %vm568_vm2, %v2676_v26  ;;  %v2696_v26 = vsel %vm2226_vm4, %v2693_v44, %v2695_v12 }
  0xbb   : > { %v1061_v0 = vsel %vm1026_vm5, %v1058_v30, %v1060_v11  ;;  %v2983_v8 = vrot.slane %v2981_v52, 2  ;;  %v1063_v23 = vsel %vm1026_vm5, %v1060_v11, %v1062_v25  ;;  %v7021_v52 = vld [vmem:[%s7110_s10 + $0x28] sm:$0xff]   ;;  %v7022_v25 = vld [vmem:[%s7110_s10 + $0x30] sm:$0xff]  }
  0xbc   : > { %v1473_v21 = vrot.slane %v7021_v52, 1 }
  0xbe   : > { %6334 = vmatmul.mubr.msk.bf16.gmra.mrb[8].mxu1 %vm568_vm2, %v1039_v16  ;;  %v1059_v16 = vsel %vm1026_vm5, %v1056_v46, %v1058_v30  ;;  %v7020_v46 = vld [vmem:[%s7110_s10 + $0x20] sm:$0xff]  }
  0xbf   : > { %6337 = vmatprep.mubr.msk.bf16.mxu1 %vm568_vm2, %v1041_v60  ;;  %v2699_v60 = vrot.slane %v7678_v7, 2 }
  0xc1   : > { %6486 = vmatmul.mubr.msk.bf16.gmra.mrb[8].mxu0 %vm568_vm2, %v2678_v53  ;;  %v2992_v53 = vshll.u32 %v7517_v20, 16 }
  0xc2   : > { %6489 = vmatprep.mubr.msk.bf16.mxu0 %vm568_vm2, %v2680_v51  ;;  %v2698_v51 = vsel %vm2226_vm4, %v2695_v12, %v2697_v57 }
  0xc6   : > { %6338 = vmatmul.mubr.msk.bf16.gmra.mrb[12].mxu1 %vm568_vm2, %v1043_v35  ;;  %v2700_v35 = vsel %vm2226_vm4, %v2697_v57, %v2699_v60 }
  0xc7   : > { %6341 = vmatprep.mubr.msk.bf16.mxu1 %vm568_vm2, %v1045_v6  ;;  %v8809_v6 = vld [vmem:[#allocation3_spill] sm:$0xff] }
  0xc8   : > { %v1466_v37 = vrot.slane %v8809_v6, 1 }
  0xc9   : > { %6490 = vmatmul.mubr.msk.bf16.gmra.mrb[12].mxu0 %vm568_vm2, %v2682_v56  ;;  %v1467_v56 = vrot.slane %v7018_v62, 1 }
  0xca   : > { %6493 = vmatprep.mubr.msk.bf16.mxu0 %vm568_vm2, %v2684_v40  ;;  %v2991_v40 = vrot.slane %v2989_v32, 2 }
  0xcb   : > { %v1468_v38 = vsel %vm1026_vm5, %v1466_v37, %v1467_v56 }
  0xce   : > { %6342 = vmatmul.mubr.msk.bf16.gmra.mrb[16].mxu1 %vm568_vm2, %v1047_v29  ;;  %v2994_v29 = vrot.slane %v2992_v53, 3 }
  0xcf   : > { %6345 = vmatprep.mubr.msk.bf16.mxu1 %vm568_vm2, %v1049_v18  ;;  %v3001_v18 = vshll.u32 %v7529_v9, 16 }
  0xd0   : > { %v2995_v34 = vor.u32 %v2994_v29, %v2991_v40  ;;  %v3043_v29 = vshrl.u32 %v7589_v45, 16 }
  0xd1   : > { %6494 = vmatmul.mubr.msk.bf16.gmra.mrb[16].mxu0 %vm568_vm2, %v2686_v3  ;;  %v2987_v3 = vor.u32 %v2986_v42, %v2983_v8  ;;  %v3003_v14 = vrot.slane %v3001_v18, 3  ;;  %v3034_v42 = vshrl.u32 %v7584_v15, 16  ;;  %v1477_v18 = vrot.slane %v7023_v27, 1 }
  0xd2   : > { %6497 = vmatprep.mubr.msk.bf16.mxu0 %vm568_vm2, %v2688_v19  ;;  %v3007_v19 = vshrl.u32 %v7534_v10, 16 }
  0xd3   : > { %v3004_v30 = vor.u32 %v3003_v14, %v3000_v49 }
  0xd4   : > { %v3009_v44 = vrot.slane %v3007_v19, 2 }
  0xd6   : > { %6346 = vmatmul.mubr.msk.bf16.gmra.mrb[20].mxu1 %vm568_vm2, %v1051_v63  ;;  %v3010_v63 = vshll.u32 %v7534_v10, 16 }
  0xd7   : > { %6349 = vmatprep.mubr.msk.bf16.mxu1 %vm568_vm2, %v1053_v33  ;;  %v1469_v33 = vrot.slane %v7019_v58, 1  ;;  %v3045_v58 = vrot.slane %v3043_v29, 2 }
  0xd9   : > { %6498 = vmatmul.mubr.msk.bf16.gmra.mrb[20].mxu0 %vm568_vm2, %v2690_v17  ;;  %v2702_v17 = vsel %vm2226_vm4, %v2699_v60, %v2701_v55  ;;  %v1470_v12 = vsel %vm1026_vm5, %v1467_v56, %v1469_v33  ;;  %v3028_v60 = vshll.u32 %v7564_v43, 16 }
  0xda   : > { %6501 = vmatprep.mubr.msk.bf16.mxu0 %vm568_vm2, %v2692_v47  ;;  %v1471_v47 = vrot.slane %v7020_v46, 1  ;;  %v3052_v46 = vshrl.u32 %v7602_v24, 16 }
  0xdb   : > { %v3030_v37 = vrot.slane %v3028_v60, 3 }
  0xdc   : > { %v1472_v11 = vsel %vm1026_vm5, %v1469_v33, %v1471_v47  ;;  %v1474_v62 = vsel %vm1026_vm5, %v1471_v47, %v1473_v21  ;;  %v3055_v47 = vshll.u32 %v7602_v24, 16 }
  0xde   : > { %6350 = vmatmul.mubr.msk.bf16.gmra.mrb[24].mxu1 %vm568_vm2, %v1055_v54  ;;  %v2996_v54 = vsel %vm2979_vm6, %v2987_v3, %v2995_v34 }
  0xdf   : > { %6353 = vmatprep.mubr.msk.bf16.mxu1 %vm568_vm2, %v1057_v28  ;;  %v3012_v28 = vrot.slane %v3010_v63, 3 }
  0xe1   : > { %6502 = vmatmul.mubr.msk.bf16.gmra.mrb[24].mxu0 %vm568_vm2, %v2694_v5  ;;  %v4753_v5 = vsel %vm623_vm0, %v7548_v59, 0  ;;  %v3013_v57 = vor.u32 %v3012_v28, %v3009_v44  ;;  %v3005_v59 = vsel %vm2979_vm6, %v2995_v34, %v3004_v30  ;;  %v7024_v34 = vld [vmem:[%s7110_s10 + $0x40] sm:$0xff]   ;;  %v3061_v44 = vshrl.u32 %v7607_v4, 16 }
  0xe2   : > { %6505 = vmatprep.mubr.msk.bf16.mxu0 %vm568_vm2, %v2696_v26  ;;  %v3016_v26 = vshrl.u32 %v7555_v36, 16  ;;  %v1479_v19 = vrot.slane %v7024_v34, 1  ;;  %v3064_v28 = vshll.u32 %v7607_v4, 16 }
  0xe3   : > { %v3014_v50 = vsel %vm2979_vm6, %v3004_v30, %v3013_v57  ;;  %v3063_v60 = vrot.slane %v3061_v44, 2 }
  0xe4   : > { %v3018_v32 = vrot.slane %v3016_v26, 2  ;;  %v3057_v26 = vrot.slane %v3055_v47, 3  ;;  %v3066_v52 = vrot.slane %v3064_v28, 3 }
  0xe6   : > { %6354 = vmatmul.mubr.msk.bf16.gmra.mrb[28].mxu1 %vm568_vm2, %v1059_v16  ;;  %v3019_v16 = vshll.u32 %v7555_v36, 16 }
  0xe7   : > { %6357 = vmatprep.mubr.msk.bf16.mxu1 %vm568_vm2, %v1061_v0  ;;  %v3025_v0 = vshrl.u32 %v7564_v43, 16 }
  0xe8   : > { %v3021_v53 = vrot.slane %v3019_v16, 3  ;;  %v7026_v16 = vld [vmem:[%s7110_s10 + $0x50] sm:$0xff]  }
  0xe9   : > { %6506 = vmatmul.mubr.msk.bf16.gmra.mrb[28].mxu0 %vm568_vm2, %v2698_v51  ;;  %v1475_v51 = vrot.slane %v7022_v25, 1  ;;  %v3027_v6 = vrot.slane %v3025_v0, 2  ;;  %v3073_v25 = vshll.u32 %v7620_v41, 16 }
  0xea   : > { %6509 = vmatprep.mubr.msk.bf16.mxu0 %vm568_vm2, %v2700_v35  ;;  %v3519_v35 = vsel %vm623_vm0, %v7569_v48, 0  ;;  %v3022_v56 = vor.u32 %v3021_v53, %v3018_v32  ;;  %v3037_v48 = vshll.u32 %v7584_v15, 16  ;;  %v3070_v53 = vshrl.u32 %v7620_v41, 16 }
  0xeb   : > { %v1476_v8 = vsel %vm1026_vm5, %v1473_v21, %v1475_v51  ;;  %v3031_v40 = vor.u32 %v3030_v37, %v3027_v6  ;;  %v1478_v49 = vsel %vm1026_vm5, %v1475_v51, %v1477_v18  ;;  %v3067_v51 = vor.u32 %v3066_v52, %v3063_v60  ;;  %v7027_v6 = vld [vmem:[%s7110_s10 + $0x58] sm:$0xff]  }
  0xec   : > { %v3023_v55 = vsel %vm2979_vm6, %v3013_v57, %v3022_v56  ;;  %v3039_v3 = vrot.slane %v3037_v48, 3  ;;  %v1483_v57 = vrot.slane %v7026_v16, 1  ;;  %v1485_v37 = vrot.slane %v7027_v6, 1  ;;  %v7031_v60 = vld [vmem:[%s7110_s10 + $0x78] sm:$0xff]  }
  0xed   : > { %v3032_v63 = vsel %vm2979_vm6, %v3022_v56, %v3031_v40  ;;  %v3072_v56 = vrot.slane %v3070_v53, 2  ;;  %v1493_v52 = vrot.slane %v7031_v60, 1  ;;  %v7032_v53 = vld [vmem:[%s7110_s10 + $0x80] sm:$0xff]   ;;  %v3124_v6 = vshrl.u32 %v7674_v61, 16 }
  0xee   : > { %6358 = vmatmul.mubr.msk.bf16.gmra.mrb[32].mxu1 %vm568_vm2, %v1063_v23  ;;  %v3046_v23 = vshll.u32 %v7589_v45, 16  ;;  %v1486_v27 = vsel %vm1026_vm5, %v1483_v57, %v1485_v37  ;;  %v7000_v60 = vld [vmem:[%s7110_s10 + $0x20] sm:$0xff]  }
  0xef   : > { %6363 = vmatprep.mubr.msk.bf16.mxu1 %vm568_vm2, %v1468_v38  ;;  %v3036_v38 = vrot.slane %v3034_v42, 2  ;;  %v7028_v42 = vld [vmem:[%s7110_s10 + $0x60] sm:$0xff]  }
  0xf0   : > { %v3048_v33 = vrot.slane %v3046_v23, 3  ;;  %v1487_v48 = vrot.slane %v7028_v42, 1  ;;  %v6997_v42 = vld [vmem:[%s7110_s10 + $0x8] sm:$0xfe]  }
  0xf1   : > { %6510 = vmatmul.mubr.msk.bf16.gmra.mrb[32].mxu0 %vm568_vm2, %v2702_v17  ;;  %v3040_v14 = vor.u32 %v3039_v3, %v3036_v38  ;;  %v1480_v17 = vsel %vm1026_vm5, %v1477_v18, %v1479_v19  ;;  %v3088_v38 = vshrl.u32 %v7638_v39, 16  ;;  %v3091_v3 = vshll.u32 %v7638_v39, 16 }
  0xf2   : > { %6515 = vmatprep.mubr.msk.bf16.mxu0 %vm568_vm2, %v2996_v54  ;;  %v3049_v54 = vor.u32 %v3048_v33, %v3045_v58  ;;  %v7029_v58 = vld [vmem:[%s7110_s10 + $0x68] sm:$0xff]  }
  0xf3   : > { %v1489_v33 = vrot.slane %v7029_v58, 1  ;;  %v4529_v58 = vshrl.u32 %v6997_v42, 16 }
  0xf4   : > { %v3050_v0 = vsel %vm2979_vm6, %v3040_v14, %v3049_v54 }
  0xf6   : > { %6364 = vmatmul.mubr.msk.bf16.vlgmr.msra.gmra.mrb[0].mxu1 %vm568_vm2, %v1470_v12  ;;  %v7025_v12 = vld [vmem:[%s7110_s10 + $0x48] sm:$0xff]  }
  0xf7   : > { %6590 = vmatpush3.bf16.msra.mxu1 %v4753_v5  ;;  %6367 = vmatprep.mubr.msk.bf16.mxu1 %vm568_vm2, %v1472_v11  ;;  %v1481_v30 = vrot.slane %v7025_v12, 1  ;;  %v3041_v5 = vsel %vm2979_vm6, %v3031_v40, %v3040_v14  ;;  %v3054_v11 = vrot.slane %v3052_v46, 2  ;;  %v3090_v14 = vrot.slane %v3088_v38, 2  ;;  %v7030_v46 = vld [vmem:[%s7110_s10 + $0x70] sm:$0xff]   ;;  %v7033_v38 = vld [vmem:[%s7110_s10 + $0x88] sm:$0xff]  }
  0xf8   : > { %v1491_v47 = vrot.slane %v7030_v46, 1  ;;  %v1490_v12 = vsel %vm1026_vm5, %v1487_v48, %v1489_v33 }
  0xf9   : > { %6516 = vmatmul.mubr.msk.bf16.vlgmr.msra.gmra.mrb[0].mxu0 %vm568_vm2, %v3005_v59  ;;  %v1482_v21 = vsel %vm1026_vm5, %v1479_v19, %v1481_v30  ;;  %v3058_v59 = vor.u32 %v3057_v26, %v3054_v11  ;;  %v1484_v32 = vsel %vm1026_vm5, %v1481_v30, %v1483_v57  ;;  %v3097_v19 = vshrl.u32 %v7643_v1, 16 }
  0xfa   : > { %6552 = vmatpush3.bf16.msra.mxu0 %v3519_v35  ;;  %6519 = vmatprep.mubr.msk.bf16.mxu0 %vm568_vm2, %v3014_v50  ;;  %v3079_v35 = vshrl.u32 %v7625_v13, 16  ;;  %v3082_v50 = vshll.u32 %v7625_v13, 16  ;;  %v3106_v30 = vshrl.u32 %v7656_v2, 16  ;;  %v1492_v26 = vsel %vm1026_vm5, %v1489_v33, %v1491_v47 }
  0xfb   : > { %v3068_v40 = vsel %vm2979_vm6, %v3058_v59, %v3067_v51  ;;  %v3099_v44 = vrot.slane %v3097_v19, 2  ;;  %v3115_v57 = vshrl.u32 %v7661_v22, 16  ;;  %v4532_v33 = vshll.u32 %v6997_v42, 16 }
  0xfc   : > { %v3081_v29 = vrot.slane %v3079_v35, 2  ;;  %v3084_v23 = vrot.slane %v3082_v50, 3 }
  0xfd   : > { %v3117_v35 = vrot.slane %v3115_v57, 2 }
  0xfe   : > { %6368 = vmatmul.mubr.msk.bf16.gmra.mrb[4].mxu1 %vm568_vm2, %v1474_v62  ;;  %v3059_v62 = vsel %vm2979_vm6, %v3049_v54, %v3058_v59  ;;  %v3085_v34 = vor.u32 %v3084_v23, %v3081_v29  ;;  %v3133_v29 = vshrl.u32 %v7678_v7, 16  ;;  %v3136_v23 = vshll.u32 %v7678_v7, 16 }
  0xff   : > { %6371 = vmatprep.mubr.msk.bf16.mxu1 %vm568_vm2, %v1476_v8  ;;  %v3075_v8 = vrot.slane %v3073_v25, 3  ;;  %v1495_v25 = vrot.slane %v7032_v53, 1 }
 0x100   : > { %v3135_v46 = vrot.slane %v3133_v29, 2  ;;  %v7001_v29 = vld [vmem:[%s7110_s10 + $0x28] sm:$0xff]  }
 0x101   : > { %6520 = vmatmul.mubr.msk.bf16.gmra.mrb[4].mxu0 %vm568_vm2, %v3023_v55  ;;  %v3076_v18 = vor.u32 %v3075_v8, %v3072_v56  ;;  %v1488_v55 = vsel %vm1026_vm5, %v1485_v37, %v1487_v48  ;;  %v3127_v37 = vshll.u32 %v7674_v61, 16  ;;  %v1496_v8 = vsel %vm1026_vm5, %v1493_v52, %v1495_v25  ;;  %v6998_v48 = vld [vmem:[%s7110_s10 + $0x10] sm:$0xff]  }
 0x102   : > { %6523 = vmatprep.mubr.msk.bf16.mxu0 %vm568_vm2, %v3032_v63  ;;  %v3100_v63 = vshll.u32 %v7643_v1, 16 }
 0x103   : > { %v3086_v54 = vsel %vm2979_vm6, %v3076_v18, %v3085_v34 }
 0x104   : > { %v3102_v28 = vrot.slane %v3100_v63, 3  ;;  %v7817_v63 = vld [vmem:[%s7110_s10 + $0xa0] ss:$0 sps:$4 sm:$0x77]  }
 0x106   : > { %6372 = vmatmul.mubr.msk.bf16.gmra.mrb[8].mxu1 %vm568_vm2, %v1478_v49  ;;  %v3077_v49 = vsel %vm2979_vm6, %v3067_v51, %v3076_v18  ;;  %v3103_v16 = vor.u32 %v3102_v28, %v3099_v44  ;;  %v3129_v18 = vrot.slane %v3127_v37, 3  ;;  %v6994_v44 = vld [vmem:[%s7110_s10 + $0x98] ss:$0 sps:$4 sm:$0x11]   ;;  %v4555_v37 = vshrl.u32 %v7000_v60, 16 }
 0x107   : > { %6375 = vmatprep.mubr.msk.bf16.mxu1 %vm568_vm2, %v1480_v17  ;;  %v3093_v17 = vrot.slane %v3091_v3, 3  ;;  %v1497_v3 = vrot.slane %v7033_v38, 1  ;;  %v7002_v38 = vld [vmem:[%s7110_s10 + $0x30] sm:$0xff]  }
 0x109   : > { %6524 = vmatmul.mubr.msk.bf16.gmra.mrb[8].mxu0 %vm568_vm2, %v3041_v5  ;;  %v3109_v5 = vshll.u32 %v7656_v2, 16  ;;  %v3094_v11 = vor.u32 %v3093_v17, %v3090_v14  ;;  %v4540_v14 = vshll.u32 %v6998_v48, 16  ;;  %v1498_v28 = vsel %vm1026_vm5, %v1495_v25, %v1497_v3 }
 0x10a   : > { %6527 = vmatprep.mubr.msk.bf16.mxu0 %vm568_vm2, %v3050_v0  ;;  %v3118_v0 = vshll.u32 %v7661_v22, 16 }
 0x10b   : > { %v3111_v59 = vrot.slane %v3109_v5, 3  ;;  %v3104_v51 = vsel %vm2979_vm6, %v3094_v11, %v3103_v16  ;;  %v3145_v5 = vshll.u32 %v7817_v63, 16 }
 0x10c   : > { %v3120_v50 = vrot.slane %v3118_v0, 3  ;;  %v4542_v0 = vrot.slane %v4540_v14, 2  ;;  %v4573_v14 = vshrl.u32 %v7002_v38, 16 }
 0x10d   : > { %v3147_v25 = vrot.slane %v3145_v5, 3 }
 0x10e   : > { %6376 = vmatmul.mubr.msk.bf16.gmra.mrb[12].mxu1 %vm568_vm2, %v1482_v21  ;;  %v3108_v21 = vrot.slane %v3106_v30, 2  ;;  %v3142_v30 = vshrl.u32 %v7817_v63, 16 }
 0x10f   : > { %6379 = vmatprep.mubr.msk.bf16.mxu1 %vm568_vm2, %v1484_v32  ;;  %v3095_v32 = vsel %vm2979_vm6, %v3085_v34, %v3094_v11  ;;  %v7034_v34 = vld [vmem:[%s7110_s10 + $0x90] sm:$0xff]   ;;  %v6999_v11 = vld [vmem:[%s7110_s10 + $0x18] sm:$0xff]  }
 0x110   : > { %v3112_v56 = vor.u32 %v3111_v59, %v3108_v21  ;;  %v1499_v19 = vrot.slane %v7034_v34, 1  ;;  %v1501_v59 = vrot.slane %v6994_v44, 1  ;;  %v3144_v53 = vrot.slane %v3142_v30, 2  ;;  %v7003_v44 = vld [vmem:[%s7110_s10 + $0x38] sm:$0xff]  }
 0x111   : > { %6528 = vmatmul.mubr.msk.bf16.gmra.mrb[12].mxu0 %vm568_vm2, %v3059_v62  ;;  %v1494_v62 = vsel %vm1026_vm5, %v1491_v47, %v1493_v52  ;;  %v3138_v47 = vrot.slane %v3136_v23, 3  ;;  %v3428_v34 = vrot.slane %v7517_v20, 3  ;;  %v4575_v30 = vrot.slane %v4573_v14, 1 }
 0x112   : > { %6531 = vmatprep.mubr.msk.bf16.mxu0 %vm568_vm2, %v3068_v40  ;;  %v3121_v40 = vor.u32 %v3120_v50, %v3117_v35  ;;  %v4549_v35 = vshll.u32 %v6999_v11, 16  ;;  %v1502_v42 = vsel %vm1026_vm5, %v1499_v19, %v1501_v59  ;;  %v3148_v23 = vor.u32 %v3147_v25, %v3144_v53  ;;  %v7005_v25 = vld [vmem:[%s7110_s10 + $0x48] sm:$0xff]  }
 0x113   : > { %v3139_v52 = vor.u32 %v3138_v47, %v3135_v46 }
 0x114   : > { %v3122_v17 = vsel %vm2979_vm6, %v3112_v56, %v3121_v40 }
 0x116   : > { %6380 = vmatmul.mubr.msk.bf16.gmra.mrb[16].mxu1 %vm568_vm2, %v1486_v27  ;;  %v3126_v27 = vrot.slane %v3124_v6, 2 }
 0x117   : > { %6383 = vmatprep.mubr.msk.bf16.mxu1 %vm568_vm2, %v1488_v55  ;;  %v3113_v55 = vsel %vm2979_vm6, %v3103_v16, %v3112_v56  ;;  %v4534_v16 = vrot.slane %v4532_v33, 2  ;;  %v3149_v33 = vsel %vm2979_vm6, %v3139_v52, %v3148_v23 }
 0x119   : > { %6532 = vmatmul.mubr.msk.bf16.gmra.mrb[16].mxu0 %vm568_vm2, %v3077_v49  ;;  %v4537_v49 = vshrl.u32 %v6998_v48, 16 }
 0x11a   : > { %6535 = vmatprep.mubr.msk.bf16.mxu0 %vm568_vm2, %v3086_v54  ;;  %v3130_v54 = vor.u32 %v3129_v18, %v3126_v27  ;;  %v4557_v18 = vrot.slane %v4555_v37, 1  ;;  %v7006_v37 = vld [vmem:[%s7110_s10 + $0x50] sm:$0xff]  }
 0x11b   : > { %v4539_v57 = vrot.slane %v4537_v49, 1 }
 0x11c   : > { %v3131_v21 = vsel %vm2979_vm6, %v3121_v40, %v3130_v54  ;;  %v3140_v56 = vsel %vm2979_vm6, %v3130_v54, %v3139_v52  ;;  %v4551_v40 = vrot.slane %v4549_v35, 2 }
 0x11d   : > { %v4543_v6 = vor.u32 %v4542_v0, %v4539_v57  ;;  %v4582_v57 = vshrl.u32 %v7003_v44, 16  ;;  %v4585_v0 = vshll.u32 %v7003_v44, 16 }
 0x11e   : > { %6384 = vmatmul.mubr.msk.bf16.gmra.mrb[20].mxu1 %vm568_vm2, %v1490_v12  ;;  %v1500_v12 = vsel %vm1026_vm5, %v1497_v3, %v1499_v19  ;;  %v4564_v19 = vshrl.u32 %v7001_v29, 16 }
 0x11f   : > { %6387 = vmatprep.mubr.msk.bf16.mxu1 %vm568_vm2, %v1492_v26  ;;  %v4531_v26 = vrot.slane %v4529_v58, 1  ;;  %v4567_v58 = vshll.u32 %v7001_v29, 16  ;;  %v4587_v53 = vrot.slane %v4585_v0, 2  ;;  %v4612_v29 = vshll.u32 %v7006_v37, 16 }
 0x120   : > { %v4566_v47 = vrot.slane %v4564_v19, 1  ;;  %v7008_v19 = vld [vmem:[%s7110_s10 + $0x60] sm:$0xff]  }
 0x121   : > { %6536 = vmatmul.mubr.msk.bf16.gmra.mrb[20].mxu0 %vm568_vm2, %v3095_v32  ;;  %v3420_v32 = vld [vmem:[%s7110_s10 + $0x10] sm:$0x8]  ;;  %v4535_v50 = vor.u32 %v4534_v16, %v4531_v26  ;;  %v4569_v54 = vrot.slane %v4567_v58, 2  ;;  %v3432_v26 = vrot.slane %v7534_v10, 3  ;;  %v4584_v10 = vrot.slane %v4582_v57, 1 }
 0x122   : > { %6539 = vmatprep.mubr.msk.bf16.mxu0 %vm568_vm2, %v3104_v51  ;;  %v4546_v51 = vshrl.u32 %v6999_v11, 16  ;;  %v7004_v11 = vld [vmem:[%s7110_s10 + $0x40] sm:$0xff]   ;;  %v3440_v58 = vrot.slane %v7589_v45, 3 }
 0x123   : > { %v4544_v27 = vsel %vm1779_vm3, %v4535_v50, %v4543_v6  ;;  %v4570_v16 = vor.u32 %v4569_v54, %v4566_v47 }
 0x124   : > { %v4548_v48 = vrot.slane %v4546_v51, 1  ;;  %v3434_v51 = vrot.slane %v7555_v36, 3  ;;  %v4609_v36 = vshrl.u32 %v7006_v37, 16  ;;  %v3448_v37 = vrot.slane %v7625_v13, 3 }
 0x126   : > { %6388 = vmatmul.mubr.msk.bf16.gmra.mrb[24].mxu1 %vm568_vm2, %v1494_v62  ;;  %v4558_v62 = vshll.u32 %v7000_v60, 16 }
 0x127   : > { %6391 = vmatprep.mubr.msk.bf16.mxu1 %vm568_vm2, %v1496_v8  ;;  %v5641_v8 = vcombine.low %v3420_v32, %v7504_v31  ;;  %v4552_v31 = vor.u32 %v4551_v40, %v4548_v48  ;;  %v3435_v48 = vsel %vm3426_vm7, %v3432_v26, %v3434_v51 }
 0x129   : > { %6540 = vmatmul.mubr.msk.bf16.gmra.mrb[24].mxu0 %vm568_vm2, %v3113_v55  ;;  %v4560_v55 = vrot.slane %v4558_v62, 2  ;;  %v3427_v3 = vrot.slane %v5641_v8, 3  ;;  %v4553_v20 = vsel %vm1779_vm3, %v4543_v6, %v4552_v31  ;;  %v3436_v62 = vrot.slane %v7564_v43, 3 }
 0x12a   : > { %6543 = vmatprep.mubr.msk.bf16.mxu0 %vm568_vm2, %v3122_v17  ;;  %v4576_v17 = vshll.u32 %v7002_v38, 16  ;;  %v4600_v8 = vshrl.u32 %v7005_v25, 16  ;;  %v3438_v38 = vrot.slane %v7584_v15, 3  ;;  %v4627_v15 = vshrl.u32 %v7008_v19, 16 }
 0x12b   : > { %v4561_v49 = vor.u32 %v4560_v55, %v4557_v18  ;;  %v3429_v46 = vsel %vm3426_vm7, %v3427_v3, %v3428_v34  ;;  %v3437_v23 = vsel %vm3426_vm7, %v3434_v51, %v3436_v62  ;;  %v7007_v55 = vld [vmem:[%s7110_s10 + $0x58] sm:$0xff]  }
 0x12c   : > { %v4578_v5 = vrot.slane %v4576_v17, 2  ;;  %v4602_v43 = vrot.slane %v4600_v8, 1  ;;  %v4621_v14 = vshll.u32 %v7007_v55, 16  ;;  %v3439_v17 = vsel %vm3426_vm7, %v3436_v62, %v3438_v38 }
 0x12d   : > { %v4571_v32 = vsel %vm1779_vm3, %v4561_v49, %v4570_v16  ;;  %v3441_v47 = vsel %vm3426_vm7, %v3438_v38, %v3440_v58 }
 0x12e   : > { %6392 = vmatmul.mubr.msk.bf16.gmra.mrb[28].mxu1 %vm568_vm2, %v1498_v28  ;;  %v3430_v28 = vrot.slane %v7529_v9, 3  ;;  %v4579_v52 = vor.u32 %v4578_v5, %v4575_v30  ;;  %v4591_v9 = vshrl.u32 %v7004_v11, 16  ;;  %v4623_v44 = vrot.slane %v4621_v14, 2 }
 0x12f   : > { %6395 = vmatprep.mubr.msk.bf16.mxu1 %vm568_vm2, %v1500_v12  ;;  %v4562_v12 = vsel %vm1779_vm3, %v4552_v31, %v4561_v49  ;;  %v4614_v31 = vrot.slane %v4612_v29, 2  ;;  %v4618_v49 = vshrl.u32 %v7007_v55, 16  ;;  %v4629_v5 = vrot.slane %v4627_v15, 1 }
 0x130   : > { %v3431_v60 = vsel %vm3426_vm7, %v3428_v34, %v3430_v28  ;;  %v3433_v59 = vsel %vm3426_vm7, %v3430_v28, %v3432_v26  ;;  %v4580_v35 = vsel %vm1779_vm3, %v4570_v16, %v4579_v52  ;;  %v4593_v50 = vrot.slane %v4591_v9, 1  ;;  %v7009_v28 = vld [vmem:[%s7110_s10 + $0x68] sm:$0xff]   ;;  %v7010_v26 = vld [vmem:[%s7110_s10 + $0x70] sm:$0xff]  }
 0x131   : > { %6544 = vmatmul.mubr.msk.bf16.gmra.mrb[28].mxu0 %vm568_vm2, %v3131_v21  ;;  %v4594_v21 = vshll.u32 %v7004_v11, 16  ;;  %v4611_v34 = vrot.slane %v4609_v36, 1  ;;  %v4620_v45 = vrot.slane %v4618_v49, 1  ;;  %v3444_v16 = vrot.slane %v7607_v4, 3 }
 0x132   : > { %6547 = vmatprep.mubr.msk.bf16.mxu0 %vm568_vm2, %v3140_v56  ;;  %v4588_v56 = vor.u32 %v4587_v53, %v4584_v10  ;;  %v4636_v0 = vshrl.u32 %v7009_v28, 16  ;;  %v7011_v53 = vld [vmem:[%s7110_s10 + $0x78] sm:$0xff]  }
 0x133   : > { %v4596_v6 = vrot.slane %v4594_v21, 2  ;;  %v4624_v57 = vor.u32 %v4623_v44, %v4620_v45  ;;  %v4648_v21 = vshll.u32 %v7010_v26, 16  ;;  %v4657_v8 = vshll.u32 %v7011_v53, 16 }
 0x134   : > { %v4638_v4 = vrot.slane %v4636_v0, 1 }
 0x135   : > { %v4597_v40 = vor.u32 %v4596_v6, %v4593_v50  ;;  %v4650_v50 = vrot.slane %v4648_v21, 2  ;;  %v7012_v6 = vld [vmem:[%s7110_s10 + $0x80] sm:$0xff]  }
 0x136   : > { %6396 = vmatmul.mubr.msk.bf16.gmra.mrb[32].mxu1 %vm568_vm2, %v1502_v42  ;;  %v4603_v42 = vshll.u32 %v7005_v25, 16  ;;  %v3446_v25 = vrot.slane %v7620_v41, 3  ;;  %v4663_v41 = vshrl.u32 %v7012_v6, 16 }
 0x137   : > { %6591 = vmatprep.mubr.msk.bf16.mxu1 %vm568_vm2, %v4544_v27  ;;  %v4589_v27 = vsel %vm1779_vm3, %v4579_v52, %v4588_v56  ;;  %v4598_v3 = vsel %vm1779_vm3, %v4588_v56, %v4597_v40  ;;  %v4654_v56 = vshrl.u32 %v7011_v53, 16 }
 0x138   : > { %v4605_v18 = vrot.slane %v4603_v42, 2  ;;  %v3447_v42 = vsel %vm3426_vm7, %v3444_v16, %v3446_v25  ;;  %v3449_v36 = vsel %vm3426_vm7, %v3446_v25, %v3448_v37  ;;  %v4665_v55 = vrot.slane %v4663_v41, 1 }
 0x139   : > { %6548 = vmatmul.mubr.msk.bf16.gmra.mrb[32].mxu0 %vm568_vm2, %v3149_v33  ;;  %v4656_v13 = vrot.slane %v4654_v56, 1  ;;  %v3734_v25 = vlaneseq }
 0x13a   : > { %6553 = vmatprep.mubr.msk.bf16.mxu0 %vm568_vm2, %v3429_v46  ;;  %v4606_v33 = vor.u32 %v4605_v18, %v4602_v43  ;;  %v4615_v46 = vor.u32 %v4614_v31, %v4611_v34  ;;  %v3450_v43 = vrot.slane %v7638_v39, 3  ;;  %v3452_v34 = vrot.slane %v7643_v1, 3 }
 0x13c   : > { %v4607_v54 = vsel %vm1779_vm3, %v4597_v40, %v4606_v33  ;;  %v4616_v30 = vsel %vm1779_vm3, %v4606_v33, %v4615_v46  ;;  %v4666_v40 = vshll.u32 %v7012_v6, 16  ;;  %v3451_v33 = vsel %vm3426_vm7, %v3448_v37, %v3450_v43 }
 0x13e   : > { %6592 = vmatmul.mubr.msk.bf16.vlgmr.msra.gmra.mrb[36].mxu1 %vm568_vm2, %v4553_v20  ;;  %v4630_v20 = vshll.u32 %v7008_v19, 16  ;;  %v4668_v38 = vrot.slane %v4666_v40, 2 }
 0x13f   : > { %6595 = vmatprep.mubr.msk.bf16.mxu1 %vm568_vm2, %v4562_v12  ;;  %v3442_v12 = vrot.slane %v7602_v24, 3  ;;  %v4645_v24 = vshrl.u32 %v7010_v26, 16 }
 0x140   : > { %v4632_v11 = vrot.slane %v4630_v20, 2  ;;  %v4669_v49 = vor.u32 %v4668_v38, %v4665_v55  ;;  %v7015_v20 = vld [vmem:[%s7110_s10 + $0x98] ss:$0 sps:$4 sm:$0x33]  }
 0x141   : > { %6554 = vmatmul.mubr.msk.bf16.vlgmr.msra.gmra.mrb[0].mxu0 %vm568_vm2, %v3431_v60  ;;  %v4639_v60 = vshll.u32 %v7009_v28, 16  ;;  %v3443_v52 = vsel %vm3426_vm7, %v3440_v58, %v3442_v12  ;;  %v3456_v28 = vrot.slane %v7661_v22, 3  ;;  %v3458_v22 = vrot.slane %v7674_v61, 3 }
 0x142   : > { %6557 = vmatprep.mubr.msk.bf16.mxu0 %vm568_vm2, %v3433_v59  ;;  %v4633_v9 = vor.u32 %v4632_v11, %v4629_v5  ;;  %v3445_v59 = vsel %vm3426_vm7, %v3442_v12, %v3444_v16  ;;  %v4693_v5 = vshll.u32 %v7015_v20, 16  ;;  %v3462_v61 = vrot.slane %v7817_v63, 3 }
 0x143   : > { %v4641_v10 = vrot.slane %v4639_v60, 2  ;;  %v7958_v63 = vshrl.u32 %v3734_v25, 7 }
 0x144   : > { %v4634_v51 = vsel %vm1779_vm3, %v4624_v57, %v4633_v9  ;;  %v4695_v0 = vrot.slane %v4693_v5, 2 }
 0x145   : > { %v4642_v62 = vor.u32 %v4641_v10, %v4638_v4  ;;  %v3737_v37 = vadd.s32 16, %v7958_v63  ;;  %v3738_v56 = vadd.s32 24, %v7958_v63  ;;  %v8021_v5 = vadd.s32 112, %v7958_v63 }
 0x146   : > { %6596 = vmatmul.mubr.msk.bf16.gmra.mrb[40].mxu1 %vm568_vm2, %v4571_v32  ;;  %v4625_v32 = vsel %vm1779_vm3, %v4615_v46, %v4624_v57 }
 0x147   : > { %6599 = vmatprep.mubr.msk.bf16.mxu1 %vm568_vm2, %v4580_v35  ;;  %v4647_v35 = vrot.slane %v4645_v24, 1  ;;  %v4643_v29 = vsel %vm1779_vm3, %v4633_v9, %v4642_v62  ;;  %v3459_v24 = vsel %vm3426_vm7, %v3456_v28, %v3458_v22 }
 0x149   : > { %6558 = vmatmul.mubr.msk.bf16.gmra.mrb[4].mxu0 %vm568_vm2, %v3435_v48  ;;  %v4651_v48 = vor.u32 %v4650_v50, %v4647_v35 }
 0x14a   : > { %6561 = vmatprep.mubr.msk.bf16.mxu0 %vm568_vm2, %v3437_v23  ;;  %v4659_v23 = vrot.slane %v4657_v8, 2  ;;  %v7969_v8 = vadd.s32 8, %v7958_v63 }
 0x14b   : > { %v4652_v18 = vsel %vm1779_vm3, %v4642_v62, %v4651_v48 }
 0x14c   : > { %v4660_v31 = vor.u32 %v4659_v23, %v4656_v13  ;;  %v3772_v13 = vcvt.s32.f32 %v7969_v8 }
 0x14e   : > { %6600 = vmatmul.mubr.msk.bf16.gmra.mrb[44].mxu1 %vm568_vm2, %v4589_v27  ;;  %v7013_v27 = vld [vmem:[%s7110_s10 + $0x88] sm:$0xff]   ;;  %v4661_v46 = vsel %vm1779_vm3, %v4651_v48, %v4660_v31  ;;  %v3773_v48 = vcvt.s32.f32 %v3737_v37  ;;  %v3809_v55 = vmul.f32 0.055555556, %v3772_v13 }
 0x14f   : > { %6603 = vmatprep.mubr.msk.bf16.mxu1 %vm568_vm2, %v4598_v3  ;;  %v7014_v3 = vld [vmem:[%s7110_s10 + $0x90] sm:$0xff]   ;;  %v4672_v19 = vshrl.u32 %v7013_v27, 16  ;;  %v4675_v58 = vshll.u32 %v7013_v27, 16 }
 0x150   : > { %v4681_v14 = vshrl.u32 %v7014_v3, 16  ;;  %v4684_v39 = vshll.u32 %v7014_v3, 16  ;;  %v3810_v23 = vmul.f32 0.055555556, %v3773_v48 }
 0x151   : > { %6562 = vmatmul.mubr.msk.bf16.gmra.mrb[8].mxu0 %vm568_vm2, %v3439_v17  ;;  %v3453_v17 = vsel %vm3426_vm7, %v3450_v43, %v3452_v34  ;;  %v4674_v15 = vrot.slane %v4672_v19, 1  ;;  %v4677_v1 = vrot.slane %v4675_v58, 2  ;;  %v7991_v19 = vadd.s32 32, %v7958_v63 }
 0x152   : > { %6565 = vmatprep.mubr.msk.bf16.mxu0 %vm568_vm2, %v3441_v47  ;;  %v3454_v47 = vrot.slane %v7656_v2, 3  ;;  %v4683_v45 = vrot.slane %v4681_v14, 1  ;;  %v4686_v44 = vrot.slane %v4684_v39, 2  ;;  %v3846_v3 = vfloor.f32 %v3810_v23 }
 0x153   : > { %v4678_v12 = vor.u32 %v4677_v1, %v4674_v15  ;;  %v7999_v14 = vadd.s32 40, %v7958_v63  ;;  %v8005_v15 = vadd.s32 64, %v7958_v63  ;;  %v8791_v23 = vcvt.s32.f32 %v8021_v5 }
 0x154   : > { %v3455_v11 = vsel %vm3426_vm7, %v3452_v34, %v3454_v47  ;;  %v4687_v26 = vor.u32 %v4686_v44, %v4683_v45  ;;  %v3457_v16 = vsel %vm3426_vm7, %v3454_v47, %v3456_v28  ;;  %v3882_v1 = vmul.f32 18.0, %v3846_v3 }
 0x155   : > { %v4679_v2 = vsel %vm1779_vm3, %v4669_v49, %v4678_v12  ;;  %v8011_v47 = vadd.s32 72, %v7958_v63  ;;  %v8790_v45 = vcvt.s32.f32 %v7991_v19  ;;  %v8016_v44 = vadd.s32 96, %v7958_v63 }
 0x156   : > { %6604 = vmatmul.mubr.msk.bf16.gmra.mrb[48].mxu1 %vm568_vm2, %v4607_v54  ;;  %v4670_v54 = vsel %vm1779_vm3, %v4660_v31, %v4669_v49  ;;  %v4688_v60 = vsel %vm1779_vm3, %v4678_v12, %v4687_v26  ;;  %v7988_v31 = vadd.s32 48, %v7958_v63  ;;  %v7996_v49 = vadd.s32 56, %v7958_v63 }
 0x157   : > { %6607 = vmatprep.mubr.msk.bf16.mxu1 %vm568_vm2, %v4616_v30  ;;  %v4690_v30 = vshrl.u32 %v7015_v20, 16  ;;  %v8008_v20 = vadd.s32 88, %v7958_v63  ;;  %v8062_v3 = vadd.s32 128, %v7958_v63 }
 0x158   : > { %v8788_v12 = vcvt.s32.f32 %v7996_v49 }
 0x159   : > { %6566 = vmatmul.mubr.msk.bf16.gmra.mrb[12].mxu0 %vm568_vm2, %v3443_v52  ;;  %v4692_v57 = vrot.slane %v4690_v30, 1  ;;  %v3460_v52 = vrot.slane %v7678_v7, 3  ;;  %v8786_v30 = vcvt.s32.f32 %v7999_v14 }
 0x15a   : > { %6569 = vmatprep.mubr.msk.bf16.mxu0 %vm568_vm2, %v3445_v59 }
 0x15b   : > { %v4696_v9 = vor.u32 %v4695_v0, %v4692_v57  ;;  %v3461_v21 = vsel %vm3426_vm7, %v3458_v22, %v3460_v52  ;;  %v3463_v7 = vsel %vm3426_vm7, %v3460_v52, %v3462_v61  ;;  %v8783_v57 = vcvt.s32.f32 %v8005_v15 }
 0x15c   : > { %v8029_v22 = vsub.f32 %v3773_v48, %v3882_v1  ;;  %v8787_v52 = vcvt.s32.f32 %v8011_v47  ;;  %v8789_v61 = vcvt.s32.f32 %v8016_v44  ;;  %v3813_v48 = vmul.f32 0.055555556, %v8786_v30 }
 0x15d   : > { %v4697_v59 = vsel %vm1779_vm3, %v4687_v26, %v4696_v9  ;;  %v8034_v9 = vadd.s32 120, %v7958_v63  ;;  %v8078_v30 = vadd.s32 152, %v7958_v63 }
 0x15e   : > { %6608 = vmatmul.mubr.msk.bf16.gmra.mrb[52].mxu1 %vm568_vm2, %v4625_v32  ;;  %vm3954_vm9 = vcmp.lt.f32.partialorder %v8029_v22, 16.0 }
 0x15f   : > { %6611 = vmatprep.mubr.msk.bf16.mxu1 %vm568_vm2, %v4634_v51 }
 0x161   : > { %6570 = vmatmul.mubr.msk.bf16.gmra.mrb[16].mxu0 %vm568_vm2, %v3447_v42 }
 0x162   : > { %6573 = vmatprep.mubr.msk.bf16.mxu0 %vm568_vm2, %v3449_v36  ;;  %v3771_v36 = vcvt.s32.f32 %v7958_v63 }
 0x164   : > { %v3808_v27 = vmul.f32 0.055555556, %v3771_v36 }
 0x166   : > { %6612 = vmatmul.mubr.msk.bf16.gmra.mrb[56].mxu1 %vm568_vm2, %v4643_v29  ;;  %v3774_v29 = vcvt.s32.f32 %v3738_v56  ;;  %v3815_v56 = vmul.f32 0.055555556, %v8788_v12 }
 0x167   : > { %6615 = vmatprep.mubr.msk.bf16.mxu1 %vm568_vm2, %v4652_v18 }
 0x168   : > { %v3811_v18 = vmul.f32 0.055555556, %v3774_v29 }
 0x169   : > { %6574 = vmatmul.mubr.msk.bf16.gmra.mrb[20].mxu0 %vm568_vm2, %v3451_v33  ;;  %v3844_v33 = vfloor.f32 %v3808_v27 }
 0x16a   : > { %6577 = vmatprep.mubr.msk.bf16.mxu0 %vm568_vm2, %v3453_v17  ;;  %v3847_v39 = vfloor.f32 %v3811_v18  ;;  %v3845_v17 = vfloor.f32 %v3809_v55  ;;  %v3816_v55 = vmul.f32 0.055555556, %v8783_v57  ;;  %v3851_v57 = vfloor.f32 %v3815_v56 }
 0x16b   : > { %v3880_v28 = vmul.f32 18.0, %v3844_v33  ;;  %v3817_v33 = vmul.f32 0.055555556, %v8787_v52 }
 0x16c   : > { %v3883_v26 = vmul.f32 18.0, %v3847_v39  ;;  %v8793_v39 = vcvt.s32.f32 %v8034_v9 }
 0x16d   : > { %v8048_v37 = vsub.f32 %v3771_v36, %v3880_v28  ;;  %v3820_v28 = vmul.f32 0.055555556, %v8789_v61 }
 0x16e   : > { %6616 = vmatmul.mubr.msk.bf16.gmra.mrb[60].mxu1 %vm568_vm2, %v4661_v46  ;;  %v8002_v46 = vadd.s32 80, %v7958_v63  ;;  %v8055_v27 = vsub.f32 %v3774_v29, %v3883_v26  ;;  %v8070_v29 = vadd.s32 144, %v7958_v63 }
 0x16f   : > { %6619 = vmatprep.mubr.msk.bf16.mxu1 %vm568_vm2, %v4670_v54  ;;  %v8792_v54 = vcvt.s32.f32 %v7988_v31  ;;  %v3856_v8 = vfloor.f32 %v3820_v28  ;;  %vm3952_vm8 = vcmp.lt.f32.partialorder %v8048_v37, 16.0 }
 0x170   : > { %vm3955_vm11 = vcmp.lt.f32.partialorder %v8055_v27, 16.0 }
 0x171   : > { %6578 = vmatmul.mubr.msk.bf16.gmra.mrb[24].mxu0 %vm568_vm2, %v3455_v11 }
 0x172   : > { %6581 = vmatprep.mubr.msk.bf16.mxu0 %vm568_vm2, %v3457_v16  ;;  %v3881_v16 = vmul.f32 18.0, %v3845_v17 }
 0x174   : > { %v8084_v12 = vsub.f32 %v3772_v13, %v3881_v16 }
 0x176   : > { %6620 = vmatmul.mubr.msk.bf16.gmra.mrb[64].mxu1 %vm568_vm2, %v4679_v2  ;;  %v8784_v2 = vcvt.s32.f32 %v8002_v46  ;;  %vm3953_vm10 = vcmp.lt.f32.partialorder %v8084_v12, 16.0 }
 0x177   : > { %6623 = vmatprep.mubr.msk.bf16.mxu1 %vm568_vm2, %v4688_v60  ;;  %v8785_v60 = vcvt.s32.f32 %v8008_v20 }
 0x178   : > { %v3818_v18 = vmul.f32 0.055555556, %v8784_v2  ;;  %v3849_v2 = vfloor.f32 %v3813_v48  ;;  %v3853_v48 = vfloor.f32 %v3817_v33 }
 0x179   : > { %6582 = vmatmul.mubr.msk.bf16.gmra.mrb[28].mxu0 %vm568_vm2, %v3459_v24  ;;  %v3819_v36 = vmul.f32 0.055555556, %v8785_v60  ;;  %v3822_v60 = vmul.f32 0.055555556, %v8791_v23  ;;  %v3823_v23 = vmul.f32 0.055555556, %v8793_v39  ;;  %v8826_v39 = vcvt.s32.f32 %v8062_v3 }
 0x17a   : > { %6585 = vmatprep.mubr.msk.bf16.mxu0 %vm568_vm2, %v3461_v21  ;;  %v3814_v21 = vmul.f32 0.055555556, %v8792_v54  ;;  %v3885_v61 = vmul.f32 18.0, %v3849_v2 }
 0x17b   : > { %v3855_v56 = vfloor.f32 %v3819_v36  ;;  %v3824_v54 = vmul.f32 0.055555556, %v8826_v39  ;;  %v3859_v28 = vfloor.f32 %v3823_v23  ;;  %v8830_v39 = vcvt.s32.f32 %v7996_v49 }
 0x17c   : > { %v3850_v17 = vfloor.f32 %v3814_v21  ;;  %v3854_v21 = vfloor.f32 %v3818_v18 }
 0x17d   : > { %v3860_v49 = vfloor.f32 %v3824_v54 }
 0x17e   : > { %6624 = vmatmul.mubr.msk.bf16.gmra.mrb[68].mxu1 %vm568_vm2, %v4697_v59  ;;  %v3812_v59 = vmul.f32 0.055555556, %v8790_v45  ;;  %v3890_v33 = vmul.f32 18.0, %v3854_v21 }
 0x180   : > { %v3848_v1 = vfloor.f32 %v3812_v59  ;;  %v3852_v59 = vfloor.f32 %v3816_v55  ;;  %v3887_v55 = vmul.f32 18.0, %v3851_v57  ;;  %v8828_v57 = vcvt.s32.f32 %v7988_v31 }
 0x181   : > { %6586 = vmatmul.mubr.msk.bf16.gmra.mrb[32].mxu0 %vm568_vm2, %v3463_v7  ;;  %v8044_v7 = vadd.s32 104, %v7958_v63 }
 0x183   : > { %v8824_v13 = vcvt.s32.f32 %v8044_v7 }
 0x185   : > { %v3821_v16 = vmul.f32 0.055555556, %v8824_v13  ;;  %v8827_v13 = vcvt.s32.f32 %v8070_v29 }
 0x187   : > { %v3857_v36 = vfloor.f32 %v3821_v16 }
 0x189   : > { %v3893_v54 = vmul.f32 18.0, %v3857_v36  ;;  %v3896_v36 = vmul.f32 18.0, %v3860_v49  ;;  %v8846_v49 = vcvt.s32.f32 %v8044_v7  ;;  %v8849_v7 = vcvt.s32.f32 %v8062_v3 }
 0x1c9   : > { %v7946_v32 = vpop.f32.mrb[0].mxu1 }
 0x1ca   : > { %v7948_v4 = vpop.f32.mrb[1].mxu1 }
 0x1cb   : > { %v7950_v10 = vpop.f32.mrb[2].mxu1 }
 0x1cc   : > { %v7952_v53 = vpop.f32.mrb[3].mxu1 }
 0x1d1   : > { %v7954_v51 = vpop.f32.mrb[4].mxu1 }
 0x1d2   : > { %v7956_v35 = vpop.f32.mrb[5].mxu1 }
 0x1d3   : > { %v7960_v50 = vpop.f32.mrb[6].mxu1 }
 0x1d4   : > { %v7962_v6 = vpop.f32.mrb[7].mxu1 }
 0x1d9   : > { %v7965_v62 = vpop.f32.mrb[8].mxu1 }
 0x1da   : > { %v7971_v42 = vpop.f32.mrb[9].mxu1 }
 0x1db   : > { %8810 = vst [vmem:[#allocation2_spill] sm:$0xff] %v7971_v42  ;;  %v7973_v41 = vpop.f32.mrb[10].mxu1 }
 0x1dc   : > { %8811 = vst [vmem:[#allocation4_spill] sm:$0xff] %v7973_v41  ;;  %v7975_v40 = vpop.f32.mrb[11].mxu1 }
 0x1dd   : > { %8812 = vst [vmem:[#allocation5_spill] sm:$0xff] %v7975_v40 }
 0x1e1   : > { %v7979_v43 = vpop.f32.mrb[12].mxu1 }
 0x1e2   : > { %8813 = vst [vmem:[#allocation3_spill] sm:$0xff] %v7979_v43  ;;  %v7983_v38 = vpop.f32.mrb[13].mxu1 }
 0x1e3   : > { %8814 = vst [vmem:[#allocation6_spill] sm:$0xff] %v7983_v38  ;;  %v7985_v34 = vpop.f32.mrb[14].mxu1 }
 0x1e4   : > { %8815 = vst [vmem:[#allocation7_spill] sm:$0xff] %v7985_v34  ;;  %v7993_v58 = vpop.f32.mrb[15].mxu1  ;;  %v8260_v34 = vadd.s32 280, %v7958_v63 }
 0x1e5   : > { %8816 = vst [vmem:[#allocation8_spill] sm:$0xff] %v7993_v58 }
 0x1e9   : > { %v8023_v11 = vpop.f32.mrb[16].mxu1 }
 0x1ea   : > { %8817 = vst [vmem:[#allocation9_spill] sm:$0xff] %v8023_v11  ;;  %v8027_v0 = vpop.f32.mrb[17].mxu1 }
 0x1eb   : > { %8818 = vst [vmem:[#allocation10_spill] sm:$0xff] %v8027_v0  ;;  %v8036_v24 = vpop.f32.mrb[18].mxu1  ;;  %v3826_v0 = vmul.f32 0.055555556, %v8827_v13  ;;  %v8832_v13 = vcvt.s32.f32 %v8078_v30 }
 0x1ec   : > { %8819 = vst [vmem:[#allocation11_spill] sm:$0xff] %v8036_v24  ;;  %v8046_v25 = vpop.f32.mrb[19].mxu1  ;;  %v3888_v24 = vmul.f32 18.0, %v3852_v59  ;;  %v3892_v59 = vmul.f32 18.0, %v3856_v8  ;;  %v8835_v8 = vcvt.s32.f32 %v8005_v15  ;;  %v8840_v15 = vcvt.s32.f32 %v8016_v44 }
 0x1ed   : > { %8820 = vst [vmem:[#allocation12_spill] sm:$0xff] %v8046_v25  ;;  %v3884_v25 = vmul.f32 18.0, %v3848_v1  ;;  %v3889_v1 = vmul.f32 18.0, %v3853_v48  ;;  %v3827_v31 = vmul.f32 0.055555556, %v8832_v13  ;;  %v8167_v44 = vadd.s32 168, %v7958_v63 }
 0x1ee   : > { %v8132_v16 = vsub.f32 %v8835_v8, %v3888_v24  ;;  %v8149_v24 = vsub.f32 %v8840_v15, %v3892_v59  ;;  %v8172_v13 = vadd.s32 208, %v7958_v63  ;;  %v8182_v8 = vadd.s32 216, %v7958_v63 }
 0x1f0   : > { %vm3960_vm0 = vcmp.lt.f32.partialorder %v8132_v16, 16.0  ;;  %vm3964_vm4 = vcmp.lt.f32.partialorder %v8149_v24, 16.0 }
 0x1f1   : > { %v8080_v52 = vpop.f32.mrb[20].mxu1 }
 0x1f2   : > { %8821 = vst [vmem:[#allocation13_spill] sm:$0xff] %v8080_v52  ;;  %v8087_v45 = vpop.f32.mrb[21].mxu1  ;;  %v3886_v52 = vmul.f32 18.0, %v3850_v17  ;;  %v3891_v17 = vmul.f32 18.0, %v3855_v56  ;;  %v8831_v56 = vcvt.s32.f32 %v7999_v14 }
 0x1f3   : > { %8822 = vst [vmem:[#allocation14_spill] sm:$0xff] %v8087_v45  ;;  %v8092_v26 = vpop.f32.mrb[22].mxu1  ;;  %v3858_v45 = vfloor.f32 %v3822_v60  ;;  %v8829_v60 = vcvt.s32.f32 %v7991_v19  ;;  %v8834_v19 = vcvt.s32.f32 %v8002_v46  ;;  %v3895_v46 = vmul.f32 18.0, %v3859_v28 }
 0x1f4   : > { %8823 = vst [vmem:[#allocation15_spill] sm:$0xff] %v8092_v26  ;;  %v8096_v18 = vpop.f32.mrb[23].mxu1  ;;  %v8102_v26 = vadd.s32 136, %v7958_v63  ;;  %v8108_v2 = vsub.f32 %v8828_v57, %v3886_v52  ;;  %v8120_v23 = vsub.f32 %v8831_v56, %v3885_v61  ;;  %v8838_v57 = vcvt.s32.f32 %v8011_v47 }
 0x1f5   : > { %8825 = vst [vmem:[#allocation16_spill] sm:$0xff] %v8096_v18  ;;  %v8112_v21 = vsub.f32 %v8829_v60, %v3884_v25  ;;  %v8116_v18 = vsub.f32 %v8830_v39, %v3887_v55  ;;  %v3894_v48 = vmul.f32 18.0, %v3858_v45  ;;  %v8128_v25 = vsub.f32 %v8834_v19, %v3890_v33 }
 0x1f6   : > { %v8794_v55 = vcvt.s32.f32 %v8102_v26  ;;  %v8837_v45 = vcvt.s32.f32 %v8008_v20  ;;  %v8143_v60 = vsub.f32 %v8838_v57, %v3889_v1  ;;  %v3862_v33 = vfloor.f32 %v3826_v0 }
 0x1f7   : > { %v8152_v56 = vadd.s32 176, %v7958_v63  ;;  %v8155_v20 = vadd.s32 160, %v7958_v63  ;;  %v8842_v47 = vcvt.s32.f32 %v8021_v5  ;;  %v3863_v0 = vfloor.f32 %v3827_v31 }
 0x1f8   : > { %v8139_v61 = vsub.f32 %v8837_v45, %v3891_v17  ;;  %v8164_v28 = vadd.s32 184, %v7958_v63  ;;  %v3825_v59 = vmul.f32 0.055555556, %v8794_v55  ;;  %v8175_v19 = vadd.s32 192, %v7958_v63 }
 0x1f9   : > { %v8124_v52 = vpop.f32.mrb[24].mxu1  ;;  %v8161_v1 = vsub.f32 %v8842_v47, %v3894_v48  ;;  %v8844_v5 = vcvt.s32.f32 %v8034_v9  ;;  %v3898_v31 = vmul.f32 18.0, %v3862_v33  ;;  %v8185_v45 = vadd.s32 200, %v7958_v63 }
 0x1fa   : > { %8833 = vst [vmem:[#allocation17_spill] sm:$0xff] %v8124_v52  ;;  %v8135_v14 = vpop.f32.mrb[25].mxu1  ;;  %v8189_v57 = vsub.f32 %v8846_v49, %v3893_v54  ;;  %v8194_v55 = vadd.s32 224, %v7958_v63  ;;  %v3899_v9 = vmul.f32 18.0, %v3863_v0  ;;  %v8205_v54 = vsub.f32 %v8849_v7, %v3896_v36 }
 0x1fb   : > { %8836 = vst [vmem:[#allocation18_spill] sm:$0xff] %v8135_v14  ;;  %v8145_v39 = vpop.f32.mrb[26].mxu1  ;;  %8843 = vst [vmem:[#allocation21_spill] sm:$0xff] %v8161_v1  ;;  %v8179_v48 = vsub.f32 %v8844_v5, %v3895_v46  ;;  %v8199_v5 = vadd.s32 240, %v7958_v63  ;;  %v3861_v49 = vfloor.f32 %v3825_v59  ;;  %v8852_v0 = vcvt.s32.f32 %v8070_v29 }
 0x1fc   : > { %8839 = vst [vmem:[#allocation19_spill] sm:$0xff] %v8145_v39  ;;  %v8157_v17 = vpop.f32.mrb[27].mxu1  ;;  %8847 = vst [vmem:[#allocation23_spill] sm:$0xff] %v8189_v57  ;;  %v8855_v36 = vcvt.s32.f32 %v8152_v56  ;;  %v8856_v7 = vcvt.s32.f32 %v8155_v20  ;;  %v8228_v29 = vadd.s32 232, %v7958_v63  ;;  %v8860_v33 = vcvt.s32.f32 %v8164_v28 }
 0x1fd   : > { %8841 = vst [vmem:[#allocation20_spill] sm:$0xff] %v8157_v17  ;;  %8845 = vst [vmem:[#allocation22_spill] sm:$0xff] %v8179_v48  ;;  %v8213_v46 = vsub.f32 %v8852_v0, %v3898_v31  ;;  %v8858_v0 = vcvt.s32.f32 %v8078_v30  ;;  %v8862_v47 = vcvt.s32.f32 %v8172_v13  ;;  %v8863_v58 = vcvt.s32.f32 %v8175_v19 }
 0x1fe   : > { %8850 = vst [vmem:[#allocation25_spill] sm:$0xff] %v8205_v54  ;;  %v3830_v59 = vmul.f32 0.055555556, %v8855_v36  ;;  %v3828_v15 = vmul.f32 0.055555556, %v8856_v7  ;;  %v3897_v7 = vmul.f32 18.0, %v3861_v49  ;;  %v8864_v30 = vcvt.s32.f32 %v8182_v8 }
 0x1ff   : > { %8853 = vst [vmem:[#allocation27_spill] sm:$0xff] %v8213_v46  ;;  %v8234_v14 = vsub.f32 %v8858_v0, %v3899_v9  ;;  %v3834_v11 = vmul.f32 0.055555556, %v8862_v47  ;;  %v3832_v46 = vmul.f32 0.055555556, %v8863_v58  ;;  %v8254_v52 = vadd.s32 272, %v7958_v63 }
 0x200   : > { %v3835_v9 = vmul.f32 0.055555556, %v8864_v30  ;;  %v3864_v49 = vfloor.f32 %v3828_v15  ;;  %v8866_v47 = vcvt.s32.f32 %v8194_v55  ;;  %v3866_v30 = vfloor.f32 %v3830_v59 }
 0x201   : > { %v8201_v17 = vpop.f32.mrb[28].mxu1  ;;  %8859 = vst [vmem:[#allocation30_spill] sm:$0xff] %v8234_v14  ;;  %v8869_v15 = vcvt.s32.f32 %v8102_v26  ;;  %v3870_v58 = vfloor.f32 %v3834_v11  ;;  %v3868_v57 = vfloor.f32 %v3832_v46  ;;  %v8874_v11 = vcvt.s32.f32 %v8228_v29 }
 0x202   : > { %8848 = vst [vmem:[#allocation24_spill] sm:$0xff] %v8201_v17  ;;  %v8209_v39 = vpop.f32.mrb[29].mxu1  ;;  %v8218_v17 = vadd.s32 248, %v7958_v63  ;;  %v3836_v14 = vmul.f32 0.055555556, %v8866_v47  ;;  %v3900_v26 = vmul.f32 18.0, %v3864_v49 }
 0x203   : > { %8851 = vst [vmem:[#allocation26_spill] sm:$0xff] %v8209_v39  ;;  %v8220_v3 = vpop.f32.mrb[30].mxu1  ;;  %v8861_v39 = vcvt.s32.f32 %v8167_v44  ;;  %v8270_v47 = vsub.f32 %v8869_v15, %v3897_v7  ;;  %v3837_v46 = vmul.f32 0.055555556, %v8874_v11  ;;  %v8877_v15 = vcvt.s32.f32 %v8254_v52 }
 0x204   : > { %8854 = vst [vmem:[#allocation28_spill] sm:$0xff] %v8220_v3  ;;  %v8230_v31 = vpop.f32.mrb[31].mxu1  ;;  %v3831_v3 = vmul.f32 0.055555556, %v8860_v33  ;;  %v8865_v33 = vcvt.s32.f32 %v8185_v45  ;;  %v3872_v7 = vfloor.f32 %v3836_v14  ;;  %v8290_v14 = vadd.s32 264, %v7958_v63 }
 0x205   : > { %8857 = vst [vmem:[#allocation29_spill] sm:$0xff] %v8230_v31  ;;  %v3829_v36 = vmul.f32 0.055555556, %v8861_v39  ;;  %v8246_v31 = vadd.s32 256, %v7958_v63  ;;  %8870 = vst [vmem:[#allocation32_spill] sm:$0xff] %v8270_v47  ;;  %vm3956_vm12 = vcmp.lt.f32.partialorder %v8112_v21, 16.0 }
 0x206   : > { %v3833_v0 = vmul.f32 0.055555556, %v8865_v33  ;;  %v3867_v54 = vfloor.f32 %v3831_v3  ;;  %v8867_v33 = vcvt.s32.f32 %v8199_v5  ;;  %v3871_v3 = vfloor.f32 %v3835_v9 }
 0x207   : > { %v3865_v38 = vfloor.f32 %v3829_v36  ;;  %v8872_v36 = vcvt.s32.f32 %v8218_v17  ;;  %vm3958_vm13 = vcmp.lt.f32.partialorder %v8108_v2, 16.0  ;;  %vm3957_vm14 = vcmp.lt.f32.partialorder %v8120_v23, 16.0 }
 0x208   : > { %v3838_v39 = vmul.f32 0.055555556, %v8867_v33  ;;  %v3869_v59 = vfloor.f32 %v3833_v0  ;;  %v3903_v9 = vmul.f32 18.0, %v3867_v54  ;;  %v3907_v11 = vmul.f32 18.0, %v3871_v3 }
 0x209   : > { %v8265_v43 = vpop.f32.mrb[32].mxu1  ;;  %v3839_v33 = vmul.f32 0.055555556, %v8872_v36  ;;  %v3901_v0 = vmul.f32 18.0, %v3865_v38  ;;  %v3906_v36 = vmul.f32 18.0, %v3870_v58  ;;  %v8878_v38 = vcvt.s32.f32 %v8155_v20 }
 0x20a   : > { %8868 = vst [vmem:[#allocation31_spill] sm:$0xff] %v8265_v43  ;;  %v8273_v48 = vpop.f32.mrb[33].mxu1  ;;  %v3874_v47 = vfloor.f32 %v3838_v39  ;;  %v3904_v43 = vmul.f32 18.0, %v3868_v57  ;;  %v3905_v41 = vmul.f32 18.0, %v3869_v59  ;;  %v3908_v39 = vmul.f32 18.0, %v3872_v7 }
 0x20b   : > { %8871 = vst [vmem:[#allocation33_spill] sm:$0xff] %v8273_v48  ;;  %v8279_v1 = vpop.f32.mrb[34].mxu1  ;;  %v3902_v48 = vmul.f32 18.0, %v3866_v30  ;;  %v3875_v42 = vfloor.f32 %v3839_v33  ;;  %v8297_v54 = vsub.f32 %v8878_v38, %v3900_v26  ;;  %v3873_v58 = vfloor.f32 %v3837_v46 }
 0x20c   : > { %8873 = vst [vmem:[#allocation34_spill] sm:$0xff] %v8279_v1  ;;  %v8284_v40 = vpop.f32.mrb[35].mxu1  ;;  %v8876_v1 = vcvt.s32.f32 %v8246_v31  ;;  %v8879_v57 = vcvt.s32.f32 %v8260_v34  ;;  %v8881_v3 = vcvt.s32.f32 %v8164_v28  ;;  %v8882_v33 = vcvt.s32.f32 %v8167_v44 }
 0x20d   : > { %8875 = vst [vmem:[#allocation35_spill] sm:$0xff] %v8284_v40  ;;  %v3842_v40 = vmul.f32 0.055555556, %v8877_v15  ;;  %v3910_v20 = vmul.f32 18.0, %v3874_v47  ;;  %v8883_v7 = vcvt.s32.f32 %v8172_v13  ;;  %v8884_v38 = vcvt.s32.f32 %v8175_v19 }
 0x20e   : > { %v3840_v49 = vmul.f32 0.055555556, %v8876_v1  ;;  %v3843_v30 = vmul.f32 0.055555556, %v8879_v57  ;;  %v8880_v1 = vcvt.s32.f32 %v8152_v56  ;;  %v8307_v59 = vsub.f32 %v8881_v3, %v3903_v9 }
 0x20f   : > { %v8311_v15 = vsub.f32 %v8882_v33, %v3901_v0  ;;  %v8315_v46 = vsub.f32 %v8883_v7, %v3906_v36  ;;  %v8319_v56 = vsub.f32 %v8884_v38, %v3904_v43  ;;  %v3804_v28 = vcvt.s32.f32 %v8290_v14 }
 0x210   : > { %v8303_v63 = vsub.f32 %v8880_v1, %v3902_v48  ;;  %v3876_v48 = vfloor.f32 %v3840_v49  ;;  %v8885_v44 = vcvt.s32.f32 %v8182_v8  ;;  %v8886_v47 = vcvt.s32.f32 %v8185_v45 }
 0x211   : > { %v6593_v26 = vpop.f32.mrb[36].mxu1  ;;  %v3911_v13 = vmul.f32 18.0, %v3875_v42  ;;  %v3878_v36 = vfloor.f32 %v3842_v40  ;;  %v8887_v8 = vcvt.s32.f32 %v8194_v55  ;;  %v3879_v42 = vfloor.f32 %v3843_v30 }
 0x212   : > { %v4789_v57 = vpop.f32.mrb[37].mxu1  ;;  %v8325_v9 = vsub.f32 %v8885_v44, %v3907_v11  ;;  %v8329_v0 = vsub.f32 %v8886_v47, %v3905_v41  ;;  %v3909_v41 = vmul.f32 18.0, %v3873_v58  ;;  %v4934_v40 = vsel %vm3954_vm9, %v6593_v26, 0.0 }
 0x213   : > { %v4932_v43 = vsel %vm3952_vm8, %v4789_v57, 0.0  ;;  %v6594_v19 = vpop.f32.mrb[38].mxu1  ;;  %v8343_v45 = vsub.f32 %v8887_v8, %v3908_v39  ;;  %v8888_v3 = vcvt.s32.f32 %v8199_v5  ;;  %v3912_v55 = vmul.f32 18.0, %v3876_v48 }
 0x214   : > { %v5009_v49 = vmul.f32 %v4932_v43, %v4932_v43  ;;  %v5941_v11 = vpack.c.bf16 %v6594_v19, %v6593_v26  ;;  %v4792_v1 = vpop.f32.mrb[39].mxu1  ;;  %v8356_v39 = vmul.f32 0.055555556, %v3804_v28  ;;  %v6555_v58 = vpop.f32.mrb[0].mxu0  ;;  %v8889_v5 = vcvt.s32.f32 %v8218_v17 }
 0x215   : > { %v8349_v33 = vsub.f32 %v8888_v3, %v3910_v20  ;;  %v4933_v7 = vsel %vm3953_vm10, %v4792_v1, 0.0  ;;  %v5936_v38 = vpack.c.bf16 %v4792_v1, %v4789_v57  ;;  %v3914_v20 = vmul.f32 18.0, %v3878_v36  ;;  %v3555_v57 = vpop.f32.mrb[1].mxu0 }
 0x216   : > { %6040 = vst [vmem:[%s8338_s28 + $0x8] sm:$0xff] %v5941_v11   ;;  %v4968_v30 = vadd.f32 %v4933_v7, %v4932_v43  ;;  %v5010_v26 = vmul.f32 %v4933_v7, %v4933_v7  ;;  %v8361_v44 = vsub.f32 %v8889_v5, %v3911_v13  ;;  %v6627_v47 = vadd.f32 %v6555_v58, %v7946_v32  ;;  %v6556_v3 = vpop.f32.mrb[2].mxu0 }
 0x217   : > { %v5011_v8 = vmul.f32 %v4934_v40, %v4934_v40  ;;  %5937 = vst [vmem:[%s8338_s28] sm:$0xff] %v5936_v38   ;;  %vm3959_vm15 = vcmp.lt.f32.partialorder %v8116_v18, 16.0  ;;  %v8890_v48 = vcvt.s32.f32 %v8228_v29  ;;  %v3915_v11 = vmul.f32 18.0, %v3879_v42  ;;  %v3558_v38 = vpop.f32.mrb[3].mxu0 }
 0x218   : > { %v6628_v43 = vadd.f32 %v3555_v57, %v7948_v4  ;;  %v4935_v17 = vsel %vm3955_vm11, %v6594_v19, 0.0  ;;  %v4969_v13 = vadd.f32 %v4968_v30, %v4934_v40  ;;  %v5045_v36 = vadd.f32 %v5010_v26, %v5009_v49 }
 0x219   : > { %v8368_v1 = vsub.f32 %v8890_v48, %v3909_v41  ;;  %v4062_v32 = vsel %vm3954_vm9, %v6627_v47, 0.0  ;;  %v6629_v7 = vadd.f32 %v6556_v3, %v7950_v10  ;;  %v6597_v58 = vpop.f32.mrb[40].mxu1  ;;  %v8891_v29 = vcvt.s32.f32 %v8246_v31 }
 0x21a   : > { %v3877_v42 = vfloor.f32 %v8356_v39  ;;  %v4060_v4 = vsel %vm3952_vm8, %v6628_v43, 0.0  ;;  %v6630_v10 = vadd.f32 %v3558_v38, %v7952_v53  ;;  %v5046_v22 = vadd.f32 %v5045_v36, %v5011_v8  ;;  %v8391_v19 = vpop.f32.mrb[41].mxu1  ;;  %v8898_v39 = vld [vmem:[#allocation5_spill] sm:$0xff] }
 0x21b   : > { %v8378_v41 = vsub.f32 %v8891_v29, %v3912_v55  ;;  %v8892_v31 = vcvt.s32.f32 %v8254_v52  ;;  %v4139_v49 = vmul.f32 %v4062_v32, %v4062_v32  ;;  %v5851_v37 = vpack.c.bf16 %v6629_v7, %v6627_v47  ;;  %v6598_v30 = vpop.f32.mrb[42].mxu1 }
 0x21c   : > { %v5012_v55 = vmul.f32 %v4935_v17, %v4935_v17  ;;  %v8893_v26 = vcvt.s32.f32 %v8260_v34  ;;  %v4137_v57 = vmul.f32 %v4060_v4, %v4060_v4  ;;  %v4063_v53 = vsel %vm3955_vm11, %v6629_v7, 0.0  ;;  %v8405_v52 = vpop.f32.mrb[43].mxu1  ;;  %v6559_v27 = vpop.f32.mrb[4].mxu0 }
 0x21d   : > { %v8395_v40 = vsub.f32 %v8892_v31, %v3914_v20  ;;  %v4061_v8 = vsel %vm3953_vm10, %v6630_v10, 0.0  ;;  %v5846_v48 = vpack.c.bf16 %v6630_v10, %v6628_v43  ;;  %6023 = vst [vmem:[%s8388_s7 + $0x8] sm:$0xff] %v5851_v37   ;;  %v4936_v34 = vsel %vm3956_vm12, %v8391_v19, 0.0 }
 0x21e   : > { %v8399_v5 = vsub.f32 %v8893_v26, %v3915_v11  ;;  %v4096_v20 = vadd.f32 %v4061_v8, %v4060_v4  ;;  %v4138_v47 = vmul.f32 %v4061_v8, %v4061_v8  ;;  %v4970_v11 = vadd.f32 %v4969_v13, %v4935_v17  ;;  %v3571_v4 = vpop.f32.mrb[5].mxu0 }
 0x21f   : > { %5847 = vst [vmem:[%s8388_s7] sm:$0xff] %v5846_v48   ;;  %v4938_v12 = vsel %vm3958_vm13, %v6597_v58, 0.0  ;;  %v5013_v3 = vmul.f32 %v4936_v34, %v4936_v34  ;;  %v5047_v43 = vadd.f32 %v5046_v22, %v5012_v55  ;;  %v5951_v36 = vpack.c.bf16 %v6598_v30, %v6597_v58  ;;  %v6560_v37 = vpop.f32.mrb[6].mxu0 }
 0x220   : > { %vm3962_vm1 = vcmp.lt.f32.partialorder %v8128_v25, 16.0  ;;  %v4097_v7 = vadd.f32 %v4096_v20, %v4062_v32  ;;  %v4173_v38 = vadd.f32 %v4138_v47, %v4137_v57  ;;  %v6631_v29 = vadd.f32 %v6559_v27, %v7954_v51  ;;  %v3574_v57 = vpop.f32.mrb[7].mxu0 }
 0x221   : > { %v4971_v10 = vadd.f32 %v4970_v11, %v4936_v34  ;;  %v4140_v31 = vmul.f32 %v4063_v53, %v4063_v53  ;;  %v6632_v17 = vadd.f32 %v3571_v4, %v7956_v35  ;;  %v5048_v13 = vadd.f32 %v5047_v43, %v5013_v3  ;;  %6042 = vst [vmem:[%s8338_s28 + $0x18] sm:$0xff] %v5951_v36   ;;  %v8423_v8 = vpop.f32.mrb[44].mxu1 }
 0x222   : > { %v4937_v26 = vsel %vm3957_vm14, %v8405_v52, 0.0  ;;  %v4174_v22 = vadd.f32 %v4173_v38, %v4139_v49  ;;  %v5015_v58 = vmul.f32 %v4938_v12, %v4938_v12  ;;  %v4098_v55 = vadd.f32 %v4097_v7, %v4063_v53  ;;  %v8430_v47 = vpop.f32.mrb[45].mxu1 }
 0x223   : > { %v6633_v32 = vadd.f32 %v6560_v37, %v7960_v50  ;;  %v4064_v51 = vsel %vm3956_vm12, %v6632_v17, 0.0  ;;  %v4939_v35 = vsel %vm3959_vm15, %v6598_v30, 0.0  ;;  %v6634_v48 = vadd.f32 %v3574_v57, %v7962_v6  ;;  %v8435_v21 = vpop.f32.mrb[46].mxu1 }
 0x224   : > { %v4972_v20 = vadd.f32 %v4971_v10, %v4937_v26  ;;  %v4066_v49 = vsel %vm3958_vm13, %v6631_v29, 0.0  ;;  %v4099_v53 = vadd.f32 %v4098_v55, %v4064_v51  ;;  %v4141_v50 = vmul.f32 %v4064_v51, %v4064_v51  ;;  %v8442_v27 = vpop.f32.mrb[47].mxu1 }
 0x225   : > { %v4175_v34 = vadd.f32 %v4174_v22, %v4140_v31  ;;  %vm3963_vm2 = vcmp.lt.f32.partialorder %v8139_v61, 16.0  ;;  %vm3961_vm3 = vcmp.lt.f32.partialorder %v8143_v60, 16.0  ;;  %v4067_v6 = vsel %vm3959_vm15, %v6633_v32, 0.0 }
 0x226   : > { %v5861_v30 = vpack.c.bf16 %v6633_v32, %v6631_v29  ;;  %v4065_v11 = vsel %vm3957_vm14, %v6634_v48, 0.0  ;;  %v5856_v2 = vpack.c.bf16 %v6634_v48, %v6632_v17  ;;  %v4973_v7 = vadd.f32 %v4972_v20, %v4938_v12  ;;  %v6563_v29 = vpop.f32.mrb[8].mxu0  ;;  %v8894_v32 = vld [vmem:[#allocation2_spill] sm:$0xff]  ;;  %v8895_v20 = vld [vmem:[#allocation4_spill] sm:$0xff] }
 0x227   : > { %v4176_v3 = vadd.f32 %v4175_v34, %v4141_v50  ;;  %v4100_v43 = vadd.f32 %v4099_v53, %v4065_v11  ;;  %v4142_v36 = vmul.f32 %v4065_v11, %v4065_v11  ;;  %v4143_v38 = vmul.f32 %v4066_v49, %v4066_v49  ;;  %v3587_v37 = vpop.f32.mrb[9].mxu0 }
 0x228   : > { %6025 = vst [vmem:[%s8388_s7 + $0x18] sm:$0xff] %v5861_v30   ;;  %v5016_v4 = vmul.f32 %v4939_v35, %v4939_v35  ;;  %6024 = vst [vmem:[%s8388_s7 + $0x10] sm:$0xff] %v5856_v2   ;;  %v5014_v10 = vmul.f32 %v4937_v26, %v4937_v26  ;;  %v5946_v18 = vpack.c.bf16 %v8405_v52, %v8391_v19  ;;  %v4940_v12 = vsel %vm3960_vm0, %v8430_v47, 0.0  ;;  %v6564_v51 = vpop.f32.mrb[10].mxu0 }
 0x229   : > { %v4101_v23 = vadd.f32 %v4100_v43, %v4066_v49  ;;  %v4177_v31 = vadd.f32 %v4176_v3, %v4142_v36  ;;  %v6635_v17 = vadd.f32 %v6563_v29, %v7965_v62  ;;  %v4144_v22 = vmul.f32 %v4067_v6, %v4067_v6  ;;  %v3590_v49 = vpop.f32.mrb[11].mxu0  ;;  %v8459_v53 = vpop.f32.mrb[48].mxu1  ;;  %v8896_v43 = vld [vmem:[#allocation21_spill] sm:$0xff] }
 0x22a   : > { %v5049_v55 = vadd.f32 %v5048_v13, %v5014_v10  ;;  %6041 = vst [vmem:[%s8338_s28 + $0x10] sm:$0xff] %v5946_v18   ;;  %v6636_v26 = vadd.f32 %v3587_v37, %v8894_v32  ;;  %v4974_v57 = vadd.f32 %v4973_v7, %v4939_v35  ;;  %v4942_v52 = vsel %vm3962_vm1, %v8423_v8, 0.0  ;;  %v8463_v11 = vpop.f32.mrb[49].mxu1  ;;  %v8897_v10 = vld [vmem:[#allocation22_spill] sm:$0xff]  ;;  %v8899_v37 = vld [vmem:[#allocation23_spill] sm:$0xff] }
 0x22b   : > { %v4178_v19 = vadd.f32 %v4177_v31, %v4143_v38  ;;  %v4102_v48 = vadd.f32 %v4101_v23, %v4067_v6  ;;  %v6637_v62 = vadd.f32 %v6564_v51, %v8895_v20  ;;  %v5017_v30 = vmul.f32 %v4940_v12, %v4940_v12  ;;  %v8466_v6 = vpop.f32.mrb[50].mxu1 }
 0x22c   : > { %v5050_v50 = vadd.f32 %v5049_v55, %v5015_v58  ;;  %v4068_v13 = vsel %vm3960_vm0, %v6636_v26, 0.0  ;;  %v4975_v34 = vadd.f32 %v4974_v57, %v4940_v12  ;;  %vm3966_vm5 = vcmp.lt.f32.partialorder %v8896_v43, 16.0  ;;  %v8473_v18 = vpop.f32.mrb[51].mxu1 }
 0x22d   : > { %v4103_v35 = vadd.f32 %v4102_v48, %v4068_v13  ;;  %v4145_v2 = vmul.f32 %v4068_v13, %v4068_v13  ;;  %v4179_v3 = vadd.f32 %v4178_v19, %v4144_v22  ;;  %v3913_v36 = vmul.f32 18.0, %v3877_v42  ;;  %v8900_v48 = vld [vmem:[#allocation3_spill] sm:$0xff] }
 0x22e   : > { %v4070_v58 = vsel %vm3962_vm1, %v6635_v17, 0.0  ;;  %v5019_v16 = vmul.f32 %v4942_v52, %v4942_v52  ;;  %v5051_v7 = vadd.f32 %v5050_v50, %v5016_v4  ;;  %v5871_v38 = vpack.c.bf16 %v6637_v62, %v6635_v17 }
 0x22f   : > { %vm3967_vm6 = vcmp.lt.f32.partialorder %v8897_v10, 16.0  ;;  %v4180_v29 = vadd.f32 %v4179_v3, %v4145_v2  ;;  %v4071_v23 = vsel %vm3963_vm2, %v6637_v62, 0.0  ;;  %v5961_v31 = vpack.c.bf16 %v8435_v21, %v8423_v8  ;;  %v6567_v8 = vpop.f32.mrb[12].mxu0 }
 0x230   : > { %v6638_v42 = vadd.f32 %v3590_v49, %v8898_v39  ;;  %vm3965_vm7 = vcmp.lt.f32.partialorder %v8899_v37, 16.0  ;;  %v5052_v25 = vadd.f32 %v5051_v7, %v5017_v30  ;;  %6027 = vst [vmem:[%s8388_s7 + $0x28] sm:$0xff] %v5871_v38   ;;  %v4943_v4 = vsel %vm3963_vm2, %v8435_v21, 0.0  ;;  %v3603_v51 = vpop.f32.mrb[13].mxu0 }
 0x231   : > { %v4941_v17 = vsel %vm3961_vm3, %v8442_v27, 0.0  ;;  %v5956_v12 = vpack.c.bf16 %v8442_v27, %v8430_v47  ;;  %6044 = vst [vmem:[%s8338_s28 + $0x28] sm:$0xff] %v5961_v31   ;;  %v4147_v19 = vmul.f32 %v4070_v58, %v4070_v58  ;;  %v6639_v20 = vadd.f32 %v6567_v8, %v8900_v48  ;;  %v6568_v62 = vpop.f32.mrb[14].mxu0  ;;  %v8901_v47 = vld [vmem:[#allocation6_spill] sm:$0xff]  ;;  %v8500_v13 = vpop.f32.mrb[52].mxu1  ;;  %v8903_v8 = vld [vmem:[#allocation7_spill] sm:$0xff] }
 0x232   : > { %v4069_v22 = vsel %vm3961_vm3, %v6638_v42, 0.0  ;;  %v5866_v55 = vpack.c.bf16 %v6638_v42, %v6636_v26  ;;  %v4976_v32 = vadd.f32 %v4975_v34, %v4941_v17  ;;  %v5018_v57 = vmul.f32 %v4941_v17, %v4941_v17  ;;  %v3606_v26 = vpop.f32.mrb[15].mxu0  ;;  %v8902_v34 = vld [vmem:[#allocation25_spill] sm:$0xff]  ;;  %v8503_v7 = vpop.f32.mrb[53].mxu1 }
 0x233   : > { %v4104_v61 = vadd.f32 %v4103_v35, %v4069_v22  ;;  %v4146_v21 = vmul.f32 %v4069_v22, %v4069_v22  ;;  %6043 = vst [vmem:[%s8338_s28 + $0x20] sm:$0xff] %v5956_v12   ;;  %v6640_v27 = vadd.f32 %v3603_v51, %v8901_v47  ;;  %v4944_v60 = vsel %vm3964_vm4, %v8463_v11, 0.0  ;;  %v8507_v42 = vpop.f32.mrb[54].mxu1 }
 0x234   : > { %6026 = vst [vmem:[%s8388_s7 + $0x20] sm:$0xff] %v5866_v55   ;;  %v4977_v49 = vadd.f32 %v4976_v32, %v4942_v52  ;;  %v5053_v50 = vadd.f32 %v5052_v25, %v5018_v57  ;;  %vm3968_vm8 = vcmp.lt.f32.partialorder %v8902_v34, 16.0  ;;  %v4148_v30 = vmul.f32 %v4071_v23, %v4071_v23  ;;  %v8904_v55 = vld [vmem:[#allocation27_spill] sm:$0xff] }
 0x235   : > { %v5020_v35 = vmul.f32 %v4943_v4, %v4943_v4  ;;  %v4105_v2 = vadd.f32 %v4104_v61, %v4070_v58  ;;  %v4181_v3 = vadd.f32 %v4180_v29, %v4146_v21  ;;  %v4072_v52 = vsel %vm3964_vm4, %v6640_v27, 0.0  ;;  %v8511_v58 = vpop.f32.mrb[55].mxu1  ;;  %v8905_v61 = vld [vmem:[#allocation30_spill] sm:$0xff] }
 0x236   : > { %v5054_v38 = vadd.f32 %v5053_v50, %v5019_v16  ;;  %v4978_v31 = vadd.f32 %v4977_v49, %v4943_v4  ;;  %v5021_v39 = vmul.f32 %v4944_v60, %v4944_v60  ;;  %v4149_v12 = vmul.f32 %v4072_v52, %v4072_v52  ;;  %v8907_v49 = vld [vmem:[#allocation32_spill] sm:$0xff] }
 0x237   : > { %v4182_v25 = vadd.f32 %v4181_v3, %v4147_v19  ;;  %v4106_v17 = vadd.f32 %v4105_v2, %v4071_v23  ;;  %v6641_v22 = vadd.f32 %v6568_v62, %v8903_v8  ;;  %vm3970_vm9 = vcmp.lt.f32.partialorder %v8904_v55, 16.0  ;;  %v6571_v19 = vpop.f32.mrb[16].mxu0 }
 0x238   : > { %v4979_v29 = vadd.f32 %v4978_v31, %v4944_v60  ;;  %v5055_v32 = vadd.f32 %v5054_v38, %v5020_v35  ;;  %v5971_v24 = vpack.c.bf16 %v8466_v6, %v8459_v53  ;;  %v8517_v16 = vsub.f32 %v3804_v28, %v3913_v36  ;;  %v8906_v28 = vld [vmem:[#allocation8_spill] sm:$0xff]  ;;  %v3619_v62 = vpop.f32.mrb[17].mxu0 }
 0x239   : > { %v4946_v23 = vsel %vm3966_vm5, %v8459_v53, 0.0  ;;  %v4107_v4 = vadd.f32 %v4106_v17, %v4072_v52  ;;  %v4183_v57 = vadd.f32 %v4182_v25, %v4148_v30  ;;  %v5881_v51 = vpack.c.bf16 %v6641_v22, %v6639_v20  ;;  %v8540_v3 = vpop.f32.mrb[56].mxu1 }
 0x23a   : > { %vm3971_vm10 = vcmp.lt.f32.partialorder %v8905_v61, 16.0  ;;  %v4074_v21 = vsel %vm3966_vm5, %v6639_v20, 0.0  ;;  %v5056_v48 = vadd.f32 %v5055_v32, %v5021_v39  ;;  %v4947_v14 = vsel %vm3967_vm6, %v8466_v6, 0.0  ;;  %6046 = vst [vmem:[%s8338_s28 + $0x38] sm:$0xff] %v5971_v24   ;;  %v8908_v20 = vld [vmem:[#allocation9_spill] sm:$0xff]  ;;  %v6572_v6 = vpop.f32.mrb[18].mxu0 }
 0x23b   : > { %v6642_v36 = vadd.f32 %v3606_v26, %v8906_v28  ;;  %vm3969_vm11 = vcmp.lt.f32.partialorder %v8907_v49, 16.0  ;;  %v4184_v53 = vadd.f32 %v4183_v57, %v4149_v12  ;;  %6029 = vst [vmem:[%s8388_s7 + $0x38] sm:$0xff] %v5881_v51   ;;  %v4945_v50 = vsel %vm3965_vm7, %v8473_v18, 0.0  ;;  %v3622_v2 = vpop.f32.mrb[19].mxu0  ;;  %v8543_v25 = vpop.f32.mrb[57].mxu1  ;;  %v8910_v51 = vld [vmem:[#allocation11_spill] sm:$0xff] }
 0x23c   : > { %v5966_v43 = vpack.c.bf16 %v8473_v18, %v8463_v11  ;;  %v6643_v47 = vadd.f32 %v6571_v19, %v8908_v20  ;;  %v4980_v30 = vadd.f32 %v4979_v29, %v4945_v50  ;;  %v5022_v35 = vmul.f32 %v4945_v50, %v4945_v50  ;;  %v8909_v29 = vld [vmem:[#allocation10_spill] sm:$0xff]  ;;  %v8914_v61 = vld [vmem:[#allocation15_spill] sm:$0xff] }
 0x23d   : > { %v4073_v60 = vsel %vm3965_vm7, %v6642_v36, 0.0  ;;  %v5876_v26 = vpack.c.bf16 %v6642_v36, %v6640_v27  ;;  %v4151_v38 = vmul.f32 %v4074_v21, %v4074_v21  ;;  %v5023_v52 = vmul.f32 %v4946_v23, %v4946_v23  ;;  %v8549_v27 = vpop.f32.mrb[58].mxu1  ;;  %v6575_v36 = vpop.f32.mrb[20].mxu0 }
 0x23e   : > { %v4108_v31 = vadd.f32 %v4107_v4, %v4073_v60  ;;  %v4150_v39 = vmul.f32 %v4073_v60, %v4073_v60  ;;  %6045 = vst [vmem:[%s8338_s28 + $0x30] sm:$0xff] %v5966_v43   ;;  %v4075_v11 = vsel %vm3967_vm6, %v6641_v22, 0.0  ;;  %v5024_v18 = vmul.f32 %v4947_v14, %v4947_v14  ;;  %v8555_v4 = vpop.f32.mrb[59].mxu1 }
 0x23f   : > { %6028 = vst [vmem:[%s8388_s7 + $0x30] sm:$0xff] %v5876_v26   ;;  %v4981_v37 = vadd.f32 %v4980_v30, %v4946_v23  ;;  %v5057_v17 = vadd.f32 %v5056_v48, %v5022_v35  ;;  %vm3972_vm12 = vcmp.lt.f32.partialorder %v8297_v54, 16.0  ;;  %v6644_v32 = vadd.f32 %v3619_v62, %v8909_v29 }
 0x240   : > { %v4109_v12 = vadd.f32 %v4108_v31, %v4074_v21  ;;  %v4185_v8 = vadd.f32 %v4184_v53, %v4150_v39  ;;  %v4948_v24 = vsel %vm3968_vm8, %v8503_v7, 0.0  ;;  %v6645_v23 = vadd.f32 %v6572_v6, %v8910_v51 }
 0x241   : > { %v5058_v10 = vadd.f32 %v5057_v17, %v5023_v52  ;;  %v4982_v22 = vadd.f32 %v4981_v37, %v4947_v14  ;;  %v5025_v57 = vmul.f32 %v4948_v24, %v4948_v24  ;;  %v4152_v19 = vmul.f32 %v4075_v11, %v4075_v11  ;;  %v3635_v14 = vpop.f32.mrb[21].mxu0  ;;  %v8911_v52 = vld [vmem:[#allocation12_spill] sm:$0xff]  ;;  %v8574_v55 = vpop.f32.mrb[60].mxu1  ;;  %v8912_v37 = vld [vmem:[#allocation13_spill] sm:$0xff] }
 0x242   : > { %v4186_v48 = vadd.f32 %v4185_v8, %v4151_v38  ;;  %v4076_v28 = vsel %vm3968_vm8, %v6644_v32, 0.0  ;;  %v4110_v21 = vadd.f32 %v4109_v12, %v4075_v11  ;;  %vm3974_vm13 = vcmp.lt.f32.partialorder %v8303_v63, 16.0  ;;  %v6576_v26 = vpop.f32.mrb[22].mxu0 }
 0x243   : > { %v4078_v62 = vsel %vm3970_vm9, %v6643_v47, 0.0  ;;  %v4153_v53 = vmul.f32 %v4076_v28, %v4076_v28  ;;  %v4983_v50 = vadd.f32 %v4982_v22, %v4948_v24  ;;  %v5059_v43 = vadd.f32 %v5058_v10, %v5024_v18  ;;  %v3638_v39 = vpop.f32.mrb[23].mxu0 }
 0x244   : > { %v4950_v20 = vsel %vm3970_vm9, %v8500_v13, 0.0  ;;  %v4111_v6 = vadd.f32 %v4110_v21, %v4076_v28  ;;  %v4187_v60 = vadd.f32 %v4186_v48, %v4152_v19  ;;  %v5891_v34 = vpack.c.bf16 %v6645_v23, %v6643_v47  ;;  %v8913_v28 = vld [vmem:[#allocation14_spill] sm:$0xff] }
 0x245   : > { %vm3975_vm14 = vcmp.lt.f32.partialorder %v8307_v59, 16.0  ;;  %v5060_v30 = vadd.f32 %v5059_v43, %v5025_v57  ;;  %v4951_v35 = vsel %vm3971_vm10, %v8507_v42, 0.0  ;;  %v5981_v38 = vpack.c.bf16 %v8507_v42, %v8500_v13  ;;  %v8583_v13 = vpop.f32.mrb[61].mxu1 }
 0x246   : > { %v6646_v31 = vadd.f32 %v3622_v2, %v8911_v52  ;;  %vm3973_vm15 = vcmp.lt.f32.partialorder %v8311_v15, 16.0  ;;  %v4188_v47 = vadd.f32 %v4187_v60, %v4153_v53  ;;  %6031 = vst [vmem:[%s8388_s7 + $0x48] sm:$0xff] %v5891_v34   ;;  %v4949_v11 = vsel %vm3969_vm11, %v8511_v58, 0.0  ;;  %v8588_v29 = vpop.f32.mrb[62].mxu1  ;;  %v6579_v53 = vpop.f32.mrb[24].mxu0 }
 0x247   : > { %v5976_v18 = vpack.c.bf16 %v8511_v58, %v8503_v7  ;;  %v6647_v17 = vadd.f32 %v6575_v36, %v8912_v37  ;;  %6048 = vst [vmem:[%s8338_s28 + $0x48] sm:$0xff] %v5981_v38   ;;  %v4984_v12 = vadd.f32 %v4983_v50, %v4949_v11  ;;  %v5026_v8 = vmul.f32 %v4949_v11, %v4949_v11  ;;  %v8591_v7 = vpop.f32.mrb[63].mxu1  ;;  %v3651_v60 = vpop.f32.mrb[25].mxu0 }
 0x248   : > { %v4077_v42 = vsel %vm3969_vm11, %v6646_v31, 0.0  ;;  %v5886_v2 = vpack.c.bf16 %v6646_v31, %v6644_v32  ;;  %v4155_v24 = vmul.f32 %v4078_v62, %v4078_v62  ;;  %v5027_v10 = vmul.f32 %v4950_v20, %v4950_v20 }
 0x249   : > { %v4112_v22 = vadd.f32 %v4111_v6, %v4077_v42  ;;  %v4154_v57 = vmul.f32 %v4077_v42, %v4077_v42  ;;  %6047 = vst [vmem:[%s8338_s28 + $0x40] sm:$0xff] %v5976_v18   ;;  %v4079_v58 = vsel %vm3971_vm10, %v6645_v23, 0.0  ;;  %v5028_v51 = vmul.f32 %v4951_v35, %v4951_v35 }
 0x24a   : > { %6030 = vst [vmem:[%s8388_s7 + $0x40] sm:$0xff] %v5886_v2   ;;  %v4985_v19 = vadd.f32 %v4984_v12, %v4950_v20  ;;  %v5061_v49 = vadd.f32 %v5060_v30, %v5026_v8  ;;  %vm3976_vm0 = vcmp.lt.f32.partialorder %v8319_v56, 16.0  ;;  %v6648_v21 = vadd.f32 %v3635_v14, %v8913_v28  ;;  %v6580_v14 = vpop.f32.mrb[26].mxu0 }
 0x24b   : > { %v4113_v32 = vadd.f32 %v4112_v22, %v4078_v62  ;;  %v4189_v48 = vadd.f32 %v4188_v47, %v4154_v57  ;;  %v4952_v36 = vsel %vm3972_vm12, %v8543_v25, 0.0  ;;  %v6649_v23 = vadd.f32 %v6576_v26, %v8914_v61  ;;  %v8609_v26 = vpop.f32.mrb[64].mxu1  ;;  %v8917_v61 = vld [vmem:[#allocation18_spill] sm:$0xff] }
 0x24c   : > { %v5062_v50 = vadd.f32 %v5061_v49, %v5027_v10  ;;  %v4986_v43 = vadd.f32 %v4985_v19, %v4951_v35  ;;  %v5029_v6 = vmul.f32 %v4952_v36, %v4952_v36  ;;  %v4156_v34 = vmul.f32 %v4079_v58, %v4079_v58  ;;  %v8607_v35 = vpop.f32.mrb[27].mxu0  ;;  %v8615_v42 = vpop.f32.mrb[65].mxu1 }
 0x24d   : > { %v4190_v20 = vadd.f32 %v4189_v48, %v4155_v24  ;;  %v4080_v30 = vsel %vm3972_vm12, %v6648_v21, 0.0  ;;  %v4114_v62 = vadd.f32 %v4113_v32, %v4079_v58  ;;  %vm3978_vm1 = vcmp.lt.f32.partialorder %v8315_v46, 16.0  ;;  %v8915_v24 = vld [vmem:[#allocation16_spill] sm:$0xff]  ;;  %v8624_v63 = vpop.f32.mrb[66].mxu1  ;;  %v8916_v58 = vld [vmem:[#allocation17_spill] sm:$0xff] }
 0x24e   : > { %v4082_v38 = vsel %vm3974_vm13, %v6647_v17, 0.0  ;;  %v4157_v52 = vmul.f32 %v4080_v30, %v4080_v30  ;;  %v4987_v31 = vadd.f32 %v4986_v43, %v4952_v36  ;;  %v5063_v47 = vadd.f32 %v5062_v50, %v5028_v51  ;;  %v6583_v50 = vpop.f32.mrb[28].mxu0 }
 0x24f   : > { %v4954_v54 = vsel %vm3974_vm13, %v8540_v3, 0.0  ;;  %v4115_v11 = vadd.f32 %v4114_v62, %v4080_v30  ;;  %v4191_v18 = vadd.f32 %v4190_v20, %v4156_v34  ;;  %v5901_v37 = vpack.c.bf16 %v6649_v23, %v6647_v17 }
 0x250   : > { %vm3979_vm2 = vcmp.lt.f32.partialorder %v8325_v9, 16.0  ;;  %v5064_v2 = vadd.f32 %v5063_v47, %v5029_v6  ;;  %v4955_v12 = vsel %vm3975_vm14, %v8549_v27, 0.0  ;;  %v5991_v8 = vpack.c.bf16 %v8549_v27, %v8540_v3  ;;  %v8633_v3 = vpop.f32.mrb[67].mxu1  ;;  %v3667_v6 = vpop.f32.mrb[29].mxu0 }
 0x251   : > { %v6650_v10 = vadd.f32 %v3638_v39, %v8915_v24  ;;  %vm3977_vm3 = vcmp.lt.f32.partialorder %v8329_v0, 16.0  ;;  %v4192_v17 = vadd.f32 %v4191_v18, %v4157_v52  ;;  %6033 = vst [vmem:[%s8388_s7 + $0x58] sm:$0xff] %v5901_v37   ;;  %v4953_v22 = vsel %vm3973_vm15, %v8555_v4, 0.0  ;;  %v6584_v30 = vpop.f32.mrb[30].mxu0 }
 0x252   : > { %v5986_v57 = vpack.c.bf16 %v8555_v4, %v8543_v25  ;;  %v6651_v51 = vadd.f32 %v6579_v53, %v8916_v58  ;;  %6050 = vst [vmem:[%s8338_s28 + $0x58] sm:$0xff] %v5991_v8   ;;  %v4988_v19 = vadd.f32 %v4987_v31, %v4953_v22  ;;  %v5030_v49 = vmul.f32 %v4953_v22, %v4953_v22  ;;  %v8648_v47 = vpop.f32.mrb[31].mxu0 }
 0x253   : > { %v4081_v27 = vsel %vm3973_vm15, %v6650_v10, 0.0  ;;  %v5896_v39 = vpack.c.bf16 %v6650_v10, %v6648_v21  ;;  %v4159_v32 = vmul.f32 %v4082_v38, %v4082_v38  ;;  %v5031_v48 = vmul.f32 %v4954_v54, %v4954_v54 }
 0x254   : > { %v4116_v28 = vadd.f32 %v4115_v11, %v4081_v27  ;;  %v4158_v36 = vmul.f32 %v4081_v27, %v4081_v27  ;;  %6049 = vst [vmem:[%s8338_s28 + $0x50] sm:$0xff] %v5986_v57   ;;  %v4083_v25 = vsel %vm3975_vm14, %v6649_v23, 0.0  ;;  %v5032_v4 = vmul.f32 %v4955_v12, %v4955_v12  ;;  %v8918_v23 = vld [vmem:[#allocation19_spill] sm:$0xff] }
 0x255   : > { %6032 = vst [vmem:[%s8388_s7 + $0x50] sm:$0xff] %v5896_v39   ;;  %v4989_v53 = vadd.f32 %v4988_v19, %v4954_v54  ;;  %v5065_v43 = vadd.f32 %v5064_v2, %v5030_v49  ;;  %vm3980_vm4 = vcmp.lt.f32.partialorder %v8343_v45, 16.0  ;;  %v6652_v34 = vadd.f32 %v3651_v60, %v8917_v61  ;;  %v8650_v54 = vpop.f32.mrb[68].mxu1  ;;  %v8919_v19 = vld [vmem:[#allocation20_spill] sm:$0xff] }
 0x256   : > { %v4117_v15 = vadd.f32 %v4116_v28, %v4082_v38  ;;  %v4193_v21 = vadd.f32 %v4192_v17, %v4158_v36  ;;  %v4956_v20 = vsel %vm3976_vm0, %v8583_v13, 0.0  ;;  %v6653_v31 = vadd.f32 %v6580_v14, %v8918_v23  ;;  %v8655_v37 = vpop.f32.mrb[69].mxu1  ;;  %v6587_v36 = vpop.f32.mrb[32].mxu0 }
 0x257   : > { %v5066_v62 = vadd.f32 %v5065_v43, %v5031_v48  ;;  %v4990_v52 = vadd.f32 %v4989_v53, %v4955_v12  ;;  %v5033_v59 = vmul.f32 %v4956_v20, %v4956_v20  ;;  %v4160_v11 = vmul.f32 %v4083_v25, %v4083_v25  ;;  %v8659_v24 = vpop.f32.mrb[70].mxu1  ;;  %v8920_v48 = vld [vmem:[#allocation24_spill] sm:$0xff] }
 0x258   : > { %v4194_v18 = vadd.f32 %v4193_v21, %v4159_v32  ;;  %v4084_v38 = vsel %vm3976_vm0, %v6652_v34, 0.0  ;;  %v4118_v60 = vadd.f32 %v4117_v15, %v4083_v25  ;;  %vm3982_vm5 = vcmp.lt.f32.partialorder %v8349_v33, 16.0  ;;  %v8665_v57 = vpop.f32.mrb[71].mxu1 }
 0x259   : > { %v4086_v2 = vsel %vm3978_vm1, %v6651_v51, 0.0  ;;  %v4161_v12 = vmul.f32 %v4084_v38, %v4084_v38  ;;  %v4991_v14 = vadd.f32 %v4990_v52, %v4956_v20  ;;  %v5067_v8 = vadd.f32 %v5066_v62, %v5032_v4  ;;  %v3683_v4 = vpop.f32.mrb[33].mxu0  ;;  %v8921_v52 = vld [vmem:[#allocation26_spill] sm:$0xff] }
 0x25a   : > { %v4958_v10 = vsel %vm3978_vm1, %v8574_v55, 0.0  ;;  %v4119_v56 = vadd.f32 %v4118_v60, %v4084_v38  ;;  %v4195_v17 = vadd.f32 %v4194_v18, %v4160_v11  ;;  %v5911_v22 = vpack.c.bf16 %v6653_v31, %v6651_v51  ;;  %v6588_v61 = vpop.f32.mrb[34].mxu0 }
 0x25b   : > { %vm3983_vm6 = vcmp.lt.f32.partialorder %v8361_v44, 16.0  ;;  %v5068_v58 = vadd.f32 %v5067_v8, %v5033_v59  ;;  %v4959_v27 = vsel %vm3979_vm2, %v8588_v29, 0.0  ;;  %v6001_v39 = vpack.c.bf16 %v8588_v29, %v8574_v55  ;;  %v8690_v0 = vpop.f32.mrb[35].mxu0 }
 0x25c   : > { %v6654_v46 = vadd.f32 %v8607_v35, %v8919_v19  ;;  %vm3981_vm7 = vcmp.lt.f32.partialorder %v8368_v1, 16.0  ;;  %v4196_v49 = vadd.f32 %v4195_v17, %v4161_v12  ;;  %6035 = vst [vmem:[%s8388_s7 + $0x68] sm:$0xff] %v5911_v22   ;;  %v4957_v51 = vsel %vm3977_vm3, %v8591_v7, 0.0  ;;  %v8923_v19 = vld [vmem:[#allocation29_spill] sm:$0xff] }
 0x25d   : > { %v5996_v32 = vpack.c.bf16 %v8591_v7, %v8583_v13  ;;  %v6655_v28 = vadd.f32 %v6583_v50, %v8920_v48  ;;  %6052 = vst [vmem:[%s8338_s28 + $0x68] sm:$0xff] %v6001_v39   ;;  %v4992_v35 = vadd.f32 %v4991_v14, %v4957_v51  ;;  %v5034_v25 = vmul.f32 %v4957_v51, %v4957_v51 }
 0x25e   : > { %v4085_v55 = vsel %vm3977_vm3, %v6654_v46, 0.0  ;;  %v5906_v29 = vpack.c.bf16 %v6654_v46, %v6652_v34  ;;  %v4163_v53 = vmul.f32 %v4086_v2, %v4086_v2  ;;  %v5035_v43 = vmul.f32 %v4958_v10, %v4958_v10 }
 0x25f   : > { %v4120_v15 = vadd.f32 %v4119_v56, %v4085_v55  ;;  %v4162_v21 = vmul.f32 %v4085_v55, %v4085_v55  ;;  %6051 = vst [vmem:[%s8338_s28 + $0x60] sm:$0xff] %v5996_v32   ;;  %v4087_v13 = vsel %vm3979_vm2, %v6653_v31, 0.0  ;;  %v5036_v7 = vmul.f32 %v4959_v27, %v4959_v27  ;;  %v8922_v31 = vld [vmem:[#allocation28_spill] sm:$0xff]  ;;  %v8924_v32 = vld [vmem:[#allocation31_spill] sm:$0xff] }
 0x260   : > { %6034 = vst [vmem:[%s8388_s7 + $0x60] sm:$0xff] %v5906_v29   ;;  %v4993_v50 = vadd.f32 %v4992_v35, %v4958_v10  ;;  %v5069_v20 = vadd.f32 %v5068_v58, %v5034_v25  ;;  %vm3984_vm8 = vcmp.lt.f32.partialorder %v8378_v41, 16.0  ;;  %v6656_v59 = vadd.f32 %v3667_v6, %v8921_v52 }
 0x261   : > { %v4121_v34 = vadd.f32 %v4120_v15, %v4086_v2  ;;  %v4197_v62 = vadd.f32 %v4196_v49, %v4162_v21  ;;  %v4960_v23 = vsel %vm3980_vm4, %v8615_v42, 0.0  ;;  %v6657_v38 = vadd.f32 %v6584_v30, %v8922_v31  ;;  %v8925_v21 = vld [vmem:[#allocation33_spill] sm:$0xff] }
 0x262   : > { %v5070_v11 = vadd.f32 %v5069_v20, %v5035_v43  ;;  %v4994_v18 = vadd.f32 %v4993_v50, %v4959_v27  ;;  %v5037_v9 = vmul.f32 %v4960_v23, %v4960_v23  ;;  %v4164_v60 = vmul.f32 %v4087_v13, %v4087_v13 }
 0x263   : > { %v4198_v12 = vadd.f32 %v4197_v62, %v4163_v53  ;;  %v4088_v14 = vsel %vm3980_vm4, %v6656_v59, 0.0  ;;  %v4122_v8 = vadd.f32 %v4121_v34, %v4087_v13  ;;  %v4090_v2 = vsel %vm3982_vm5, %v6655_v28, 0.0  ;;  %v8926_v34 = vld [vmem:[#allocation34_spill] sm:$0xff] }
 0x264   : > { %v4165_v6 = vmul.f32 %v4088_v14, %v4088_v14  ;;  %v4995_v10 = vadd.f32 %v4994_v18, %v4960_v23  ;;  %v5071_v56 = vadd.f32 %v5070_v11, %v5036_v7  ;;  %v4962_v17 = vsel %vm3982_vm5, %v8609_v26, 0.0 }
 0x265   : > { %v4123_v22 = vadd.f32 %v4122_v8, %v4088_v14  ;;  %v4199_v30 = vadd.f32 %v4198_v12, %v4164_v60  ;;  %v5921_v58 = vpack.c.bf16 %v6657_v38, %v6655_v28  ;;  %vm3986_vm9 = vcmp.lt.f32.partialorder %v8395_v40, 16.0  ;;  %v8927_v12 = vld [vmem:[#allocation35_spill] sm:$0xff] }
 0x266   : > { %v5072_v45 = vadd.f32 %v5071_v56, %v5037_v9  ;;  %v4963_v27 = vsel %vm3983_vm6, %v8624_v63, 0.0  ;;  %v6011_v39 = vpack.c.bf16 %v8624_v63, %v8609_v26  ;;  %v6658_v46 = vadd.f32 %v8648_v47, %v8923_v19 }
 0x267   : > { %v4200_v49 = vadd.f32 %v4199_v30, %v4165_v6  ;;  %6037 = vst [vmem:[%s8388_s7 + $0x78] sm:$0xff] %v5921_v58   ;;  %v4961_v33 = vsel %vm3981_vm7, %v8633_v3, 0.0  ;;  %v6006_v51 = vpack.c.bf16 %v8633_v3, %v8615_v42  ;;  %v6659_v48 = vadd.f32 %v6587_v36, %v8924_v32 }
 0x268   : > { %6054 = vst [vmem:[%s8338_s28 + $0x78] sm:$0xff] %v6011_v39   ;;  %v4089_v26 = vsel %vm3981_vm7, %v6658_v46, 0.0  ;;  %v5916_v63 = vpack.c.bf16 %v6658_v46, %v6656_v59  ;;  %v4996_v28 = vadd.f32 %v4995_v10, %v4961_v33  ;;  %v5038_v55 = vmul.f32 %v4961_v33, %v4961_v33 }
 0x269   : > { %v4167_v47 = vmul.f32 %v4090_v2, %v4090_v2  ;;  %v5039_v29 = vmul.f32 %v4962_v17, %v4962_v17  ;;  %v4124_v35 = vadd.f32 %v4123_v22, %v4089_v26  ;;  %v4166_v25 = vmul.f32 %v4089_v26, %v4089_v26  ;;  %6053 = vst [vmem:[%s8338_s28 + $0x70] sm:$0xff] %v6006_v51  }
 0x26a   : > { %v4091_v53 = vsel %vm3983_vm6, %v6657_v38, 0.0  ;;  %v5040_v43 = vmul.f32 %v4963_v27, %v4963_v27  ;;  %6036 = vst [vmem:[%s8388_s7 + $0x70] sm:$0xff] %v5916_v63   ;;  %v4997_v42 = vadd.f32 %v4996_v28, %v4962_v17  ;;  %v5073_v3 = vadd.f32 %v5072_v45, %v5038_v55 }
 0x26b   : > { %v4125_v36 = vadd.f32 %v4124_v35, %v4090_v2  ;;  %v4201_v15 = vadd.f32 %v4200_v49, %v4166_v25  ;;  %v6660_v1 = vadd.f32 %v3683_v4, %v8925_v21  ;;  %v4964_v13 = vsel %vm3984_vm8, %v8655_v37, 0.0 }
 0x26c   : > { %v5074_v7 = vadd.f32 %v5073_v3, %v5039_v29  ;;  %v4998_v50 = vadd.f32 %v4997_v42, %v4963_v27  ;;  %v5041_v20 = vmul.f32 %v4964_v13, %v4964_v13  ;;  %v6661_v62 = vadd.f32 %v6588_v61, %v8926_v34 }
 0x26d   : > { %v4168_v52 = vmul.f32 %v4091_v53, %v4091_v53  ;;  %v4202_v44 = vadd.f32 %v4201_v15, %v4167_v47  ;;  %v4092_v59 = vsel %vm3984_vm8, %v6660_v1, 0.0  ;;  %v4126_v23 = vadd.f32 %v4125_v36, %v4091_v53 }
 0x26e   : > { %v4169_v11 = vmul.f32 %v4092_v59, %v4092_v59  ;;  %v4999_v18 = vadd.f32 %v4998_v50, %v4964_v13  ;;  %v5075_v4 = vadd.f32 %v5074_v7, %v5040_v43  ;;  %vm3985_vm10 = vcmp.lt.f32.partialorder %v8517_v16, 16.0 }
 0x26f   : > { %v4127_v9 = vadd.f32 %v4126_v23, %v4092_v59  ;;  %v4203_v31 = vadd.f32 %v4202_v44, %v4168_v52  ;;  %vm3987_vm11 = vcmp.lt.f32.partialorder %v8399_v5, 16.0  ;;  %v5931_v38 = vpack.c.bf16 %v6661_v62, %v6659_v48 }
 0x270   : > { %v4094_v61 = vsel %vm3986_vm9, %v6659_v48, 0.0  ;;  %v5076_v60 = vadd.f32 %v5075_v4, %v5041_v20  ;;  %v6021_v41 = vpack.c.bf16 %v8659_v24, %v8650_v54  ;;  %v6662_v14 = vadd.f32 %v8690_v0, %v8927_v12 }
 0x271   : > { %v4966_v8 = vsel %vm3986_vm9, %v8650_v54, 0.0  ;;  %v4204_v2 = vadd.f32 %v4203_v31, %v4169_v11  ;;  %6039 = vst [vmem:[%s8388_s7 + $0x88] sm:$0xff] %v5931_v38   ;;  %v4965_v6 = vsel %vm3985_vm10, %v8665_v57, 0.0  ;;  %v6016_v10 = vpack.c.bf16 %v8665_v57, %v8655_v37 }
 0x272   : > { %6056 = vst [vmem:[%s8338_s28 + $0x88] sm:$0xff] %v6021_v41   ;;  %v5926_v56 = vpack.c.bf16 %v6662_v14, %v6660_v1  ;;  %v4093_v17 = vsel %vm3985_vm10, %v6662_v14, 0.0  ;;  %v5000_v0 = vadd.f32 %v4999_v18, %v4965_v6  ;;  %v5042_v22 = vmul.f32 %v4965_v6, %v4965_v6 }
 0x273   : > { %v4967_v40 = vsel %vm3987_vm11, %v8659_v24, 0.0  ;;  %v4128_v54 = vadd.f32 %v4127_v9, %v4093_v17  ;;  %v4170_v30 = vmul.f32 %v4093_v17, %v4093_v17  ;;  %6055 = vst [vmem:[%s8338_s28 + $0x80] sm:$0xff] %v6016_v10   ;;  %v5043_v58 = vmul.f32 %v4966_v8, %v4966_v8 }
 0x274   : > { %v4095_v45 = vsel %vm3987_vm11, %v6661_v62, 0.0  ;;  %6038 = vst [vmem:[%s8388_s7 + $0x80] sm:$0xff] %v5926_v56   ;;  %v5001_v37 = vadd.f32 %v5000_v0, %v4966_v8  ;;  %v5077_v57 = vadd.f32 %v5076_v60, %v5042_v22  ;;  %v4171_v27 = vmul.f32 %v4094_v61, %v4094_v61 }
 0x275   : > { %v4129_v39 = vadd.f32 %v4128_v54, %v4094_v61  ;;  %v4205_v16 = vadd.f32 %v4204_v2, %v4170_v30  ;;  %v5044_v19 = vmul.f32 %v4967_v40, %v4967_v40  ;;  %v4172_v33 = vmul.f32 %v4095_v45, %v4095_v45 }
 0x276   : > { %v5002_v46 = vadd.f32 %v5001_v37, %v4967_v40  ;;  %v5078_v49 = vadd.f32 %v5077_v57, %v5043_v58  ;;  %vm4214_vm12 = vcmask 1040384  }
 0x277   : > { %v4130_v51 = vadd.f32 %v4129_v39, %v4095_v45  ;;  %v4206_v32 = vadd.f32 %v4205_v16, %v4171_v27 }
 0x278   : > { %v5003_v24 = vrot.slane %v5002_v46, 4  ;;  %v5079_v48 = vadd.f32 %v5078_v49, %v5044_v19 }
 0x279   : > { %v4131_v26 = vrot.slane %v4130_v51, 4  ;;  %v4207_v63 = vadd.f32 %v4206_v32, %v4172_v33 }
 0x27a   : > { %v5004_v28 = vadd.f32 %v5003_v24, %v5002_v46  ;;  %v5080_v5 = vrot.slane %v5079_v48, 4 }
 0x27b   : > { %v4132_v55 = vadd.f32 %v4131_v26, %v4130_v51  ;;  %v4208_v47 = vrot.slane %v4207_v63, 4 }
 0x27c   : > { %v5005_v29 = vrot.slane %v5004_v28, 2  ;;  %v5081_v35 = vadd.f32 %v5080_v5, %v5079_v48 }
 0x27d   : > { %v4133_v25 = vrot.slane %v4132_v55, 2  ;;  %v4209_v53 = vadd.f32 %v4208_v47, %v4207_v63 }
 0x27e   : > { %v5006_v43 = vadd.f32 %v5005_v29, %v5004_v28  ;;  %v5082_v42 = vrot.slane %v5081_v35, 2 }
 0x27f   : > { %v4134_v3 = vadd.f32 %v4133_v25, %v4132_v55  ;;  %v4210_v36 = vrot.slane %v4209_v53, 2 }
 0x280   : > { %v5007_v15 = vrot.slane %v5006_v43, 1  ;;  %v5083_v21 = vadd.f32 %v5082_v42, %v5081_v35 }
 0x281   : > { %v4135_v1 = vrot.slane %v4134_v3, 1  ;;  %v4211_v13 = vadd.f32 %v4210_v36, %v4209_v53 }
 0x282   : > { %v5084_v7 = vrot.slane %v5083_v21, 1  ;;  %v5008_v20 = vadd.f32 %v5007_v15, %v5006_v43 }
 0x283   : > { %v4212_v50 = vrot.slane %v4211_v13, 1  ;;  %v4136_v62 = vadd.f32 %v4135_v1, %v4134_v3 }
 0x284   : > { %v5085_v34 = vadd.f32 %v5084_v7, %v5083_v21 }
 0x285   : > { %v4213_v52 = vadd.f32 %v4212_v50, %v4211_v13 }
 0x286   : > { %v5086_v44 = vsel %vm4214_vm12, %v5008_v20, %v5085_v34 }
 0x287   : > { %v4215_v59 = vsel %vm4214_vm12, %v4136_v62, %v4213_v52  ;;  %5087 = vst [vmem:[%s284_s11] sm:$0x3] %v5086_v44 }
 0x288   : > { %4216 = vst [vmem:[%s275_s14] sm:$0x3] %v4215_v59 }
 0x289 PF: > { %s17_s21 = sadd.s32 1, %s7041_s21  }
 0x28a   : > { %p14_p4 = scmp.ge.s32.totalorder %s17_s21, 4  }
 0x28c   :  { %16 = sbr.rel (!%p14_p4) target bundleno = 1 (0x1), region = 106 }

</bundles_post_ra>
